<compile_context>
chip_gen: v6e
topology: v6e:2x2x1
jax: 0.10.0
libtpu: 0.0.40
codegen_flags: <defaults>
</compile_context>

<pallas_src>
import functools

import jax
import jax.numpy as jnp
from jax import lax
from jax.experimental import pallas as pl
from jax.experimental.pallas import tpu as pltpu


def _round_up(v, m):
    return (v + m - 1) // m * m


# ---------------------------------------------------------------------------
# Fused kernel: pooling phase (tiled over proposals) + head on the last step.
#   x_ref : (tn_x, C, HW)  current x tile        (garbage rows if ragged)
#   g_ref : (tn_g, C, HW)  current gt_x tile
#   w_ref : (C, Kpad+D)    fused [fc_cls|fc_reg|0pad | id_feature] weights
#   b_ref : (1, Kpad+D)    fused bias (reid columns are ZERO on purpose)
#   bid_ref:(1, D)         id_feature bias (added after mean-centering)
# Outputs (written once, on the last grid step):
#   clsreg_ref : (Nxp, Kpad)   raw cls|reg slab for x rows
#   idx_ref    : (Nxp, D)      normalized reid features for x rows
#   idg_ref    : (Ngp, D)      normalized reid features for gt rows
# Scratch (resident across the grid):
#   px_scr : (Nxp, C) f32 pooled x rows (ragged rows zeroed)
#   pg_scr : (Ngp, C) f32 pooled gt rows (ragged rows zeroed)
# ---------------------------------------------------------------------------
def _fused_kernel(x_ref, g_ref, w_ref, b_ref, bid_ref,
                  clsreg_ref, idx_ref, idg_ref,
                  px_scr, pg_scr, *,
                  N, Ng, tn_x, tn_g, Tx, Tg, Kpad, inv_hw):
    i = pl.program_id(0)

    # ---- phase 1: pool one tile of x -------------------------------------
    @pl.when(i < Tx)
    def _():
        pooled = jnp.sum(x_ref[...].astype(jnp.float32), axis=-1) * inv_hw
        rows = lax.broadcasted_iota(jnp.int32, (tn_x, 1), 0)
        valid = N - i * tn_x
        pooled = jnp.where(rows < valid, pooled, 0.0)   # zero ragged rows
        start = pl.multiple_of(i * tn_x, tn_x)
        px_scr[pl.ds(start, tn_x), :] = pooled

    # ---- phase 2: pool one tile of gt_x -----------------------------------
    @pl.when(i >= Tx)
    def _():
        j = i - Tx
        pooled = jnp.sum(g_ref[...].astype(jnp.float32), axis=-1) * inv_hw
        rows = lax.broadcasted_iota(jnp.int32, (tn_g, 1), 0)
        valid = Ng - j * tn_g
        pooled = jnp.where(rows < valid, pooled, 0.0)
        start = pl.multiple_of(j * tn_g, tn_g)
        pg_scr[pl.ds(start, tn_g), :] = pooled

    # ---- final step: fused head ------------------------------------------
    @pl.when(i == Tx + Tg - 1)
    def _():
        w = w_ref[...]
        b = b_ref[...]
        # One wide lane-dense MXU call per pooled block: cls|reg|reid at once.
        fx = jnp.dot(px_scr[...], w, preferred_element_type=jnp.float32) + b
        fg = jnp.dot(pg_scr[...], w, preferred_element_type=jnp.float32) + b

        clsreg_ref[...] = fx[:, :Kpad]          # raw cls|reg slab (x rows)

        # reid columns: bias is zero in b, and zeroed pooled rows give exact
        # zeros, so summing over ALL rows / (N+Ng) is the true batch mean.
        rx = fx[:, Kpad:]
        rg = fg[:, Kpad:]
        m = (jnp.sum(rx, axis=0, keepdims=True)
             + jnp.sum(rg, axis=0, keepdims=True)) * (1.0 / (N + Ng))
        bid = bid_ref[...]
        vx = rx - m + bid
        vg = rg - m + bid
        # F.normalize: v / max(||v||, 1e-12) == v * rsqrt(max(||v||^2, 1e-24))
        vx = vx * lax.rsqrt(jnp.maximum(
            jnp.sum(vx * vx, axis=-1, keepdims=True), 1e-24))
        vg = vg * lax.rsqrt(jnp.maximum(
            jnp.sum(vg * vg, axis=-1, keepdims=True), 1e-24))
        idx_ref[...] = vx
        idg_ref[...] = vg


def prepare_cgps_head_params(wc, bc, wr, br, wid, bid):
    """Build the fused, lane-dense weight/bias slabs.  Do this ONCE at module
    init (it is per-call overhead otherwise)."""
    C, Kc = wc.shape
    Kr = wr.shape[1]
    D = wid.shape[1]
    Kpad = _round_up(max(Kc + Kr, 128), 128)
    w_all = jnp.zeros((C, Kpad + D), jnp.float32)
    w_all = w_all.at[:, :Kc].set(wc.astype(jnp.float32))
    w_all = w_all.at[:, Kc:Kc + Kr].set(wr.astype(jnp.float32))
    w_all = w_all.at[:, Kpad:].set(wid.astype(jnp.float32))
    b_all = jnp.zeros((1, Kpad + D), jnp.float32)
    b_all = b_all.at[:, :Kc].set(bc.astype(jnp.float32))
    b_all = b_all.at[:, Kc:Kc + Kr].set(br.astype(jnp.float32))
    # NOTE: the reid bias is deliberately NOT in b_all; it is added after the
    # mean-centering inside the kernel.
    return {
        "w_all": w_all, "b_all": b_all,
        "bid": bid.reshape(1, D).astype(jnp.float32),
        "Kc": Kc, "Kr": Kr, "Kpad": Kpad, "D": D,
    }


def cgps_head_forward(x, gt_x, params, *, tile_rows=64):
    """x, gt_x: NCHW RoI features (f32 or bf16).  params from
    prepare_cgps_head_params.  Returns (cls_score, bbox_pred, id_pred,
    gt_id_pred)."""
    # TODO(synk): gt_x=None and flag_reid_fc=True branches of forward() are
    # not implemented (this covers the gt_x-provided, avg-pool reid path).
    N, C, H, W = x.shape
    Ng = gt_x.shape[0]
    assert Ng >= 1, "empty gt_x not supported; use the gt_x=None path"
    HW = H * W
    Kc, Kr, Kpad, D = params["Kc"], params["Kr"], params["Kpad"], params["D"]
    Kall = Kpad + D

    # NCHW -> (n, C, HW): zero-cost reshape; no transpose, no extra HBM pass.
    x_l = x.reshape(N, C, HW)
    g_l = gt_x.reshape(Ng, C, HW)

    tn_x = min(tile_rows, _round_up(N, 8))
    tn_g = min(tile_rows, _round_up(Ng, 8))
    Tx = pl.cdiv(N, tn_x)
    Tg = pl.cdiv(Ng, tn_g)
    Nxp = Tx * tn_x
    Ngp = Tg * tn_g

    kernel = functools.partial(
        _fused_kernel, N=N, Ng=Ng, tn_x=tn_x, tn_g=tn_g, Tx=Tx, Tg=Tg,
        Kpad=Kpad, inv_hw=1.0 / HW)

    clsreg, reid_x, reid_g = pl.pallas_call(
        kernel,
        out_shape=(
            jax.ShapeDtypeStruct((Nxp, Kpad), jnp.float32),
            jax.ShapeDtypeStruct((Nxp, D), jnp.float32),
            jax.ShapeDtypeStruct((Ngp, D), jnp.float32),
        ),
        grid_spec=pltpu.PrefetchScalarGridSpec(
            num_scalar_prefetch=0,
            grid=(Tx + Tg,),
            in_specs=[
                # Clamped index maps: x only advances during the x phase,
                # gt_x only during the gt phase (unchanged index => no re-DMA).
                pl.BlockSpec((tn_x, C, HW),
                             lambda i: (jnp.minimum(i, Tx - 1), 0, 0)),
                pl.BlockSpec((tn_g, C, HW),
                             lambda i: (jnp.maximum(i - Tx, 0), 0, 0)),
                pl.BlockSpec((C, Kall), lambda i: (0, 0)),
                pl.BlockSpec((1, Kall), lambda i: (0, 0)),
                pl.BlockSpec((1, D), lambda i: (0, 0)),
            ],
            out_specs=[
                pl.BlockSpec((Nxp, Kpad), lambda i: (0, 0)),
                pl.BlockSpec((Nxp, D), lambda i: (0, 0)),
                pl.BlockSpec((Ngp, D), lambda i: (0, 0)),
            ],
            scratch_shapes=[
                pltpu.VMEM((Nxp, C), jnp.float32),
                pltpu.VMEM((Ngp, C), jnp.float32),
            ],
        ),
        compiler_params=pltpu.CompilerParams(
            # Sequential accumulation into scratch + head on the last step.
            dimension_semantics=("arbitrary",),
            # tn=64 f32 double-buffered inputs ~34 MB; 48 MB fits every gen
            # (v7x has 64 MiB/TC).  With bf16 inputs tile_rows can be doubled.
            vmem_limit_bytes=48 * 1024 * 1024,
        ),
    )(x_l, g_l, params["w_all"], params["b_all"], params["bid"])

    cls_score = clsreg[:N, :Kc]
    bbox_pred = clsreg[:N, Kc:Kc + Kr]
    id_pred = reid_x[:N]
    gt_id_pred = reid_g[:Ng]
    return cls_score, bbox_pred, id_pred, gt_id_pred


def _reference_forward(x, gt_x, wc, bc, wr, br, wid, bid):
    """Plain-JAX transcription of CGPSHead.forward (torch op order)."""
    mean_value = jnp.mean(jnp.concatenate([x, gt_x], axis=0), axis=0,
                          keepdims=True)
    x_reid = x - mean_value
    xp = jnp.mean(x, axis=(2, 3))                    # with_avg_pool
    cls_score = xp @ wc + bc
    bbox_pred = xp @ wr + br
    xr = jnp.mean(x_reid, axis=(2, 3))
    idp = xr @ wid + bid
    idp = idp / jnp.maximum(jnp.linalg.norm(idp, axis=1, keepdims=True), 1e-12)
    gr = jnp.mean(gt_x - mean_value, axis=(2, 3))
    gidp = gr @ wid + bid
    gidp = gidp / jnp.maximum(jnp.linalg.norm(gidp, axis=1, keepdims=True),
                              1e-12)
    return cls_score, bbox_pred, idp, gidp


if __name__ == "__main__":
    # Small, module-consistent shapes (in_channels default = 256, roi 7x7).
    N, Ng = 16, 8              # proposals, gt boxes
    C = 256                    # in_channels
    H = W = 7                  # roi_feat_size -> HW = 49
    num_classes = 4
    Kc = num_classes + 1       # fc_cls out
    Kr = 4 * num_classes       # fc_reg out (reg_class_agnostic=False)
    D = 256                    # reid feature dim (id_feature)

    key = jax.random.PRNGKey(0)
    kx, kg, kwc, kwr, kwid = jax.random.split(key, 5)

    x = jax.random.normal(kx, (N, C, H, W), dtype=jnp.float32)
    gt_x = jax.random.normal(kg, (Ng, C, H, W), dtype=jnp.float32)

    # init_weights(): normal(0, 0.01) / normal(0, 0.001), biases zero.
    wc = 0.01 * jax.random.normal(kwc, (C, Kc), dtype=jnp.float32)
    bc = jnp.zeros((Kc,), dtype=jnp.float32)
    wr = 0.001 * jax.random.normal(kwr, (C, Kr), dtype=jnp.float32)
    br = jnp.zeros((Kr,), dtype=jnp.float32)
    wid = 0.001 * jax.random.normal(kwid, (C, D), dtype=jnp.float32)
    bid = jnp.zeros((D,), dtype=jnp.float32)

    # Built once (module init), not per forward call.
    params = prepare_cgps_head_params(wc, bc, wr, br, wid, bid)

    outs = cgps_head_forward(x, gt_x, params)
    outs = jax.block_until_ready(outs)

    refs = _reference_forward(x, gt_x, wc, bc, wr, br, wid, bid)
    for o, r in zip(outs, refs):
        assert o.shape == r.shape and o.dtype == r.dtype
        assert jnp.allclose(o, r, atol=1e-4, rtol=1e-4), "mismatch vs reference"

    print("KERNEL_OK")
</pallas_src>

<mosaic_0001>
module attributes {stable_mosaic.version = 11 : i64} {
  func.func @_fused_kernel(%arg0: i32, %arg1: memref<16x256x49xf32, #tpu.memory_space<vmem>>, %arg2: memref<8x256x49xf32, #tpu.memory_space<vmem>>, %arg3: memref<256x384xf32, #tpu.memory_space<vmem>>, %arg4: memref<1x384xf32, #tpu.memory_space<vmem>>, %arg5: memref<1x256xf32, #tpu.memory_space<vmem>>, %arg6: memref<16x128xf32, #tpu.memory_space<vmem>>, %arg7: memref<16x256xf32, #tpu.memory_space<vmem>>, %arg8: memref<8x256xf32, #tpu.memory_space<vmem>>, %arg9: memref<16x256xf32, #tpu.memory_space<vmem>>, %arg10: memref<8x256xf32, #tpu.memory_space<vmem>>) attributes {dimension_semantics = [#tpu.dimension_semantics<arbitrary>], iteration_bounds = array<i64: 2>, scalar_prefetch = 0 : i64, scratch_operands = 2 : i64, tpu.core_type = #tpu.core_type<tc>, window_params = [{transform_indices = @transform_0, window_bounds = array<i64: 16, 256, 49>}, {transform_indices = @transform_1, window_bounds = array<i64: 8, 256, 49>}, {pipeline_mode = #tpu.pipeline_mode<synchronous>, transform_indices = @transform_2, window_bounds = array<i64: 256, 384>}, {pipeline_mode = #tpu.pipeline_mode<synchronous>, transform_indices = @transform_3, window_bounds = array<i64: 1, 384>}, {pipeline_mode = #tpu.pipeline_mode<synchronous>, transform_indices = @transform_4, window_bounds = array<i64: 1, 256>}, {pipeline_mode = #tpu.pipeline_mode<synchronous>, transform_indices = @transform_5, window_bounds = array<i64: 16, 128>}, {pipeline_mode = #tpu.pipeline_mode<synchronous>, transform_indices = @transform_6, window_bounds = array<i64: 16, 256>}, {pipeline_mode = #tpu.pipeline_mode<synchronous>, transform_indices = @transform_7, window_bounds = array<i64: 8, 256>}]} {
    %c1_i32 = arith.constant 1 : i32
    %0 = arith.cmpi slt, %arg0, %c1_i32 : i32
    %1 = arith.extui %0 : i1 to i32
    %c0_i32 = arith.constant 0 : i32
    %2 = arith.cmpi ne, %1, %c0_i32 : i32
    scf.if %2 {
      %c0 = arith.constant 0 : index
      %c0_4 = arith.constant 0 : index
      %c0_5 = arith.constant 0 : index
      %9 = vector.load %arg1[%c0, %c0_4, %c0_5] : memref<16x256x49xf32, #tpu.memory_space<vmem>>, vector<16x256x49xf32>
      %cst = arith.constant dense<0.000000e+00> : vector<16x256xf32>
      %10 = vector.multi_reduction <add>, %9, %cst [2] : vector<16x256x49xf32> to vector<16x256xf32>
      %cst_6 = arith.constant 0.0204081628 : f32
      %11 = vector.broadcast %cst_6 : f32 to vector<16x256xf32>
      %12 = arith.mulf %10, %11 : vector<16x256xf32>
      %13 = tpu.iota {dimensions = array<i32: 0>} : vector<16x1xi32>
      %c16_i32 = arith.constant 16 : i32
      %14 = arith.muli %arg0, %c16_i32 : i32
      %c16_i32_7 = arith.constant 16 : i32
      %15 = arith.subi %c16_i32_7, %14 : i32
      %16 = vector.broadcast %15 : i32 to vector<16x1xi32>
      %17 = arith.cmpi slt, %13, %16 : vector<16x1xi32>
      %cst_8 = arith.constant 0.000000e+00 : f32
      %18 = vector.shape_cast %17 : vector<16x1xi1> to vector<16x1xi1>
      %19 = vector.broadcast %18 : vector<16x1xi1> to vector<16x256xi1>
      %20 = vector.broadcast %cst_8 : f32 to vector<16x256xf32>
      %21 = arith.select %19, %12, %20 : vector<16x256xi1>, vector<16x256xf32>
      %c16_i32_9 = arith.constant 16 : i32
      %22 = arith.muli %arg0, %c16_i32_9 : i32
      %23 = tpu.assume_multiple %22, 16 : i32
      %24 = arith.index_cast %23 : i32 to index
      %c0_10 = arith.constant 0 : index
      %25 = vector.load %arg9[%24, %c0_10] : memref<16x256xf32, #tpu.memory_space<vmem>>, vector<16x256xf32>
      tpu.vector_store %arg9[%24, %c0_10], %21 {strides = array<i32>} : memref<16x256xf32, #tpu.memory_space<vmem>>, vector<16x256xf32>,
    } else {
    }
    %c1_i32_0 = arith.constant 1 : i32
    %3 = arith.cmpi sge, %arg0, %c1_i32_0 : i32
    %4 = arith.extui %3 : i1 to i32
    %c0_i32_1 = arith.constant 0 : i32
    %5 = arith.cmpi ne, %4, %c0_i32_1 : i32
    scf.if %5 {
      %c1_i32_4 = arith.constant 1 : i32
      %9 = arith.subi %arg0, %c1_i32_4 : i32
      %c0 = arith.constant 0 : index
      %c0_5 = arith.constant 0 : index
      %c0_6 = arith.constant 0 : index
      %10 = vector.load %arg2[%c0, %c0_5, %c0_6] : memref<8x256x49xf32, #tpu.memory_space<vmem>>, vector<8x256x49xf32>
      %cst = arith.constant dense<0.000000e+00> : vector<8x256xf32>
      %11 = vector.multi_reduction <add>, %10, %cst [2] : vector<8x256x49xf32> to vector<8x256xf32>
      %cst_7 = arith.constant 0.0204081628 : f32
      %12 = vector.broadcast %cst_7 : f32 to vector<8x256xf32>
      %13 = arith.mulf %11, %12 : vector<8x256xf32>
      %14 = tpu.iota {dimensions = array<i32: 0>} : vector<8x1xi32>
      %c8_i32 = arith.constant 8 : i32
      %15 = arith.muli %9, %c8_i32 : i32
      %c8_i32_8 = arith.constant 8 : i32
      %16 = arith.subi %c8_i32_8, %15 : i32
      %17 = vector.broadcast %16 : i32 to vector<8x1xi32>
      %18 = arith.cmpi slt, %14, %17 : vector<8x1xi32>
      %cst_9 = arith.constant 0.000000e+00 : f32
      %19 = vector.shape_cast %18 : vector<8x1xi1> to vector<8x1xi1>
      %20 = vector.broadcast %19 : vector<8x1xi1> to vector<8x256xi1>
      %21 = vector.broadcast %cst_9 : f32 to vector<8x256xf32>
      %22 = arith.select %20, %13, %21 : vector<8x256xi1>, vector<8x256xf32>
      %c8_i32_10 = arith.constant 8 : i32
      %23 = arith.muli %9, %c8_i32_10 : i32
      %24 = tpu.assume_multiple %23, 8 : i32
      %25 = arith.index_cast %24 : i32 to index
      %c0_11 = arith.constant 0 : index
      %26 = vector.load %arg10[%25, %c0_11] : memref<8x256xf32, #tpu.memory_space<vmem>>, vector<8x256xf32>
      tpu.vector_store %arg10[%25, %c0_11], %22 {strides = array<i32>} : memref<8x256xf32, #tpu.memory_space<vmem>>, vector<8x256xf32>,
    } else {
    }
    %c1_i32_2 = arith.constant 1 : i32
    %6 = arith.cmpi eq, %arg0, %c1_i32_2 : i32
    %7 = arith.extui %6 : i1 to i32
    %c0_i32_3 = arith.constant 0 : i32
    %8 = arith.cmpi ne, %7, %c0_i32_3 : i32
    scf.if %8 {
      %c0 = arith.constant 0 : index
      %c0_4 = arith.constant 0 : index
      %9 = vector.load %arg3[%c0, %c0_4] : memref<256x384xf32, #tpu.memory_space<vmem>>, vector<256x384xf32>
      %c0_5 = arith.constant 0 : index
      %c0_6 = arith.constant 0 : index
      %10 = vector.load %arg4[%c0_5, %c0_6] : memref<1x384xf32, #tpu.memory_space<vmem>>, vector<1x384xf32>
      %c0_7 = arith.constant 0 : index
      %c0_8 = arith.constant 0 : index
      %11 = vector.load %arg9[%c0_7, %c0_8] : memref<16x256xf32, #tpu.memory_space<vmem>>, vector<16x256xf32>
      %cst = arith.constant dense<0.000000e+00> : vector<16x384xf32>
      %12 = tpu.matmul %11, %9, %cst {dimension_numbers = #tpu.dot_dimension_numbers<[1], [0], [0], [1], [0, 0, 1, 1], [], []>} : vector<16x256xf32>, vector<256x384xf32>, vector<16x384xf32> -> vector<16x384xf32>
      %13 = vector.broadcast %10 : vector<1x384xf32> to vector<16x384xf32>
      %14 = arith.addf %12, %13 : vector<16x384xf32>
      %c0_9 = arith.constant 0 : index
      %c0_10 = arith.constant 0 : index
      %15 = vector.load %arg10[%c0_9, %c0_10] : memref<8x256xf32, #tpu.memory_space<vmem>>, vector<8x256xf32>
      %cst_11 = arith.constant dense<0.000000e+00> : vector<8x384xf32>
      %16 = tpu.matmul %15, %9, %cst_11 {dimension_numbers = #tpu.dot_dimension_numbers<[1], [0], [0], [1], [0, 0, 1, 1], [], []>} : vector<8x256xf32>, vector<256x384xf32>, vector<8x384xf32> -> vector<8x384xf32>
      %17 = vector.broadcast %10 : vector<1x384xf32> to vector<8x384xf32>
      %18 = arith.addf %16, %17 : vector<8x384xf32>
      %19 = vector.extract_strided_slice %14 {offsets = [0, 0], sizes = [16, 128], strides = [1, 1]} : vector<16x384xf32> to vector<16x128xf32>
      %c0_12 = arith.constant 0 : index
      %c0_13 = arith.constant 0 : index
      %20 = vector.load %arg6[%c0_12, %c0_13] : memref<16x128xf32, #tpu.memory_space<vmem>>, vector<16x128xf32>
      tpu.vector_store %arg6[%c0_12, %c0_13], %19 {strides = array<i32>} : memref<16x128xf32, #tpu.memory_space<vmem>>, vector<16x128xf32>,
      %21 = vector.extract_strided_slice %14 {offsets = [0, 128], sizes = [16, 256], strides = [1, 1]} : vector<16x384xf32> to vector<16x256xf32>
      %22 = vector.extract_strided_slice %18 {offsets = [0, 128], sizes = [8, 256], strides = [1, 1]} : vector<8x384xf32> to vector<8x256xf32>
      %cst_14 = arith.constant dense<0.000000e+00> : vector<256xf32>
      %23 = vector.multi_reduction <add>, %21, %cst_14 [0] : vector<16x256xf32> to vector<256xf32>
      %24 = vector.shape_cast %23 : vector<256xf32> to vector<1x256xf32>
      %cst_15 = arith.constant dense<0.000000e+00> : vector<256xf32>
      %25 = vector.multi_reduction <add>, %22, %cst_15 [0] : vector<8x256xf32> to vector<256xf32>
      %26 = vector.shape_cast %25 : vector<256xf32> to vector<1x256xf32>
      %27 = arith.addf %24, %26 : vector<1x256xf32>
      %cst_16 = arith.constant 0.0416666679 : f32
      %28 = vector.broadcast %cst_16 : f32 to vector<1x256xf32>
      %29 = arith.mulf %27, %28 : vector<1x256xf32>
      %c0_17 = arith.constant 0 : index
      %c0_18 = arith.constant 0 : index
      %30 = vector.load %arg5[%c0_17, %c0_18] : memref<1x256xf32, #tpu.memory_space<vmem>>, vector<1x256xf32>
      %31 = vector.broadcast %29 : vector<1x256xf32> to vector<16x256xf32>
      %32 = arith.subf %21, %31 : vector<16x256xf32>
      %33 = vector.broadcast %30 : vector<1x256xf32> to vector<16x256xf32>
      %34 = arith.addf %32, %33 : vector<16x256xf32>
      %35 = vector.broadcast %29 : vector<1x256xf32> to vector<8x256xf32>
      %36 = arith.subf %22, %35 : vector<8x256xf32>
      %37 = vector.broadcast %30 : vector<1x256xf32> to vector<8x256xf32>
      %38 = arith.addf %36, %37 : vector<8x256xf32>
      %39 = arith.mulf %34, %34 : vector<16x256xf32>
      %cst_19 = arith.constant dense<0.000000e+00> : vector<16xf32>
      %40 = vector.multi_reduction <add>, %39, %cst_19 [1] : vector<16x256xf32> to vector<16xf32>
      %41 = vector.shape_cast %40 : vector<16xf32> to vector<16x1xf32>
      %cst_20 = arith.constant 1.000000e-24 : f32
      %42 = vector.broadcast %cst_20 : f32 to vector<16x1xf32>
      %43 = arith.maximumf %41, %42 : vector<16x1xf32>
      %44 = math.rsqrt %43 : vector<16x1xf32>
      %45 = vector.broadcast %44 : vector<16x1xf32> to vector<16x256xf32>
      %46 = arith.mulf %34, %45 : vector<16x256xf32>
      %47 = arith.mulf %38, %38 : vector<8x256xf32>
      %cst_21 = arith.constant dense<0.000000e+00> : vector<8xf32>
      %48 = vector.multi_reduction <add>, %47, %cst_21 [1] : vector<8x256xf32> to vector<8xf32>
      %49 = vector.shape_cast %48 : vector<8xf32> to vector<8x1xf32>
      %cst_22 = arith.constant 1.000000e-24 : f32
      %50 = vector.broadcast %cst_22 : f32 to vector<8x1xf32>
      %51 = arith.maximumf %49, %50 : vector<8x1xf32>
      %52 = math.rsqrt %51 : vector<8x1xf32>
      %53 = vector.broadcast %52 : vector<8x1xf32> to vector<8x256xf32>
      %54 = arith.mulf %38, %53 : vector<8x256xf32>
      %c0_23 = arith.constant 0 : index
      %c0_24 = arith.constant 0 : index
      %55 = vector.load %arg7[%c0_23, %c0_24] : memref<16x256xf32, #tpu.memory_space<vmem>>, vector<16x256xf32>
      tpu.vector_store %arg7[%c0_23, %c0_24], %46 {strides = array<i32>} : memref<16x256xf32, #tpu.memory_space<vmem>>, vector<16x256xf32>,
      %c0_25 = arith.constant 0 : index
      %c0_26 = arith.constant 0 : index
      %56 = vector.load %arg8[%c0_25, %c0_26] : memref<8x256xf32, #tpu.memory_space<vmem>>, vector<8x256xf32>
      tpu.vector_store %arg8[%c0_25, %c0_26], %54 {strides = array<i32>} : memref<8x256xf32, #tpu.memory_space<vmem>>, vector<8x256xf32>,
    } else {
    }
    return
  }
  func.func @transform_0(%arg0: i32) -> (i32, i32, i32) {
    %c0_i32 = arith.constant 0 : i32
    %0 = arith.minsi %arg0, %c0_i32 : i32
    %c0_i32_0 = arith.constant 0 : i32
    %c0_i32_1 = arith.constant 0 : i32
    %c0_i32_2 = arith.constant 0 : i32
    return %0, %c0_i32_0, %c0_i32_1 : i32, i32, i32
  }
  func.func @transform_1(%arg0: i32) -> (i32, i32, i32) {
    %c1_i32 = arith.constant 1 : i32
    %0 = arith.subi %arg0, %c1_i32 : i32
    %c0_i32 = arith.constant 0 : i32
    %1 = arith.maxsi %0, %c0_i32 : i32
    %c0_i32_0 = arith.constant 0 : i32
    %c0_i32_1 = arith.constant 0 : i32
    %c0_i32_2 = arith.constant 0 : i32
    return %1, %c0_i32_0, %c0_i32_1 : i32, i32, i32
  }
  func.func @transform_2(%arg0: i32) -> (i32, i32) {
    %c0_i32 = arith.constant 0 : i32
    %c0_i32_0 = arith.constant 0 : i32
    %c0_i32_1 = arith.constant 0 : i32
    return %c0_i32, %c0_i32_0 : i32, i32
  }
  func.func @transform_3(%arg0: i32) -> (i32, i32) {
    %c0_i32 = arith.constant 0 : i32
    %c0_i32_0 = arith.constant 0 : i32
    %c0_i32_1 = arith.constant 0 : i32
    return %c0_i32, %c0_i32_0 : i32, i32
  }
  func.func @transform_4(%arg0: i32) -> (i32, i32) {
    %c0_i32 = arith.constant 0 : i32
    %c0_i32_0 = arith.constant 0 : i32
    %c0_i32_1 = arith.constant 0 : i32
    return %c0_i32, %c0_i32_0 : i32, i32
  }
  func.func @transform_5(%arg0: i32) -> (i32, i32) {
    %c0_i32 = arith.constant 0 : i32
    %c0_i32_0 = arith.constant 0 : i32
    %c0_i32_1 = arith.constant 0 : i32
    return %c0_i32, %c0_i32_0 : i32, i32
  }
  func.func @transform_6(%arg0: i32) -> (i32, i32) {
    %c0_i32 = arith.constant 0 : i32
    %c0_i32_0 = arith.constant 0 : i32
    %c0_i32_1 = arith.constant 0 : i32
    return %c0_i32, %c0_i32_0 : i32, i32
  }
  func.func @transform_7(%arg0: i32) -> (i32, i32) {
    %c0_i32 = arith.constant 0 : i32
    %c0_i32_0 = arith.constant 0 : i32
    %c0_i32_1 = arith.constant 0 : i32
    return %c0_i32, %c0_i32_0 : i32, i32
  }
}

</mosaic_0001>

<bundles_post_ra>
// kernel: tpu_custom_call.1
= control target key start
LH: loop header
LB: loop body
LE: loop exit
PB: predicated region body
PF: predicated region fallthrough
CT: control target
= control target key end

     0   :  { %13 = vsyncpa [#allocation5], 0  ;;  %s13959_s0 = inlined_call_operand.vmem [shape: f32[16,256,49], index: 0, kind: input, shape index: {}]   ;;  %s13960_s1 = inlined_call_operand.vmem [shape: f32[8,256,49], index: 1, kind: input, shape index: {}]   ;;  %s13961_s2 = inlined_call_operand.vmem [shape: f32[256,384], index: 2, kind: input, shape index: {}]   ;;  %s13962_s3 = inlined_call_operand.vmem [shape: f32[1,384], index: 3, kind: input, shape index: {}]   ;;  %s13963_s4 = inlined_call_operand.vmem [shape: f32[1,256], index: 4, kind: input, shape index: {}]   ;;  %s13964_s5 = inlined_call_operand.hbm [shape: f32[16,128], index: 5, kind: output, shape index: {0}]   ;;  %s13965_s6 = inlined_call_operand.hbm [shape: f32[16,256], index: 6, kind: output, shape index: {1}]   ;;  %s13966_s7 = inlined_call_operand.hbm [shape: f32[8,256], index: 7, kind: output, shape index: {2}]  }
   0x1   :  { %14 = vsyncpa [#allocation7], 0  ;;  %s9800_s24 = smov 0  }
   0x2 LB: > { %s9806_s25 = sadd.s32 4294967295, %s9751_s24   ;;  %p9523_p0 = scmp.ge.s32.totalorder %s9751_s24, 1  ;;  %s9751_s24 = sphi %s9800_s24, %s20_s24  }
   0x3   : > { %p263_p1 = scmp.lt.s32.totalorder %s9751_s24, 3 }
   0x5   : > { %p264_p2 = pnand %p9523_p0, %p263_p1 }
   0x6   : > { %p302_p3 = scmp.lt.s32.totalorder (!%p264_p2), %s9806_s25, 0  ;;  %s9812_s26 = sadd.s32 (!%p264_p2), 4294967295, %s9806_s25 }
   0x7   : > { %267 = sbr.rel (%p264_p2) target bundleno = 2390 (0x956), region = 40  ;;  %p314_p4 = scmp.gt.s32.totalorder (!%p264_p2), %s9812_s26, 0 }
   0x8   : > { %p9531_p7 = scmp.ge.s32.totalorder (!%p264_p2), %s9806_s25, 1 }
   0xc   : > { %s303_s27 = scalar_select %p302_p3, %s9806_s25, 0 }
   0xd   : > { %s315_s28 = scalar_select %p314_p4, %s9812_s26, 0 }
   0xe   : > { %s9524_s29 = sshll.u32 %s303_s27, 4  ;;  %s9532_s16 = sshll.u32 (!%p9531_p7), %s9806_s25, 4 }
   0xf   : > { %p305_p5 = scmp.lt.s32.totalorder %s9524_s29, 15  ;;  %s9528_s30 = sshll.u32 %s315_s28, 3 }
  0x10   : > { %p317_p6 = scmp.lt.s32.totalorder %s9528_s30, 7  ;;  %329 = sbr.rel (%p9531_p7) target bundleno = 1189 (0x4a5), region = 44 }
  0x11   : > { %s14114_s29 = smov (!%p305_p5, %s9524_s29), 15  ;;  %s11024_s17 = ssub.s32 (!%p9531_p7), 16, %s9532_s16 }
  0x12   : > { %s14116_s30 = smov (!%p317_p6, %s9528_s30), 7  ;;  %s9549_s8 = sshll.u32 %s14114_s29, 8 }
  0x13   : > { %s9820_s11 = scalar_lea.vmem %s13959_s0, %s9549_s8  ;;  %s9550_s12 = sshll.u32 %s14116_s30, 8 }
  0x14   : > { %s9825_s15 = scalar_lea.vmem %s13960_s1, %s9550_s12  ;;  %s11030_s18 = sshra.s32 (!%p9531_p7), %s9532_s16, 3 }
  0x15   : > { %v332_v0 = vld [vmem:[%s9820_s11 + $0x10] sm:$0xff]  ;;  %vm842_vm0 = vcmask 400384   ;;  %v330_v1 = vld [vmem:[%s9820_s11] sm:$0xff]  ;;  %v333_v2 = vld [vmem:[%s9820_s11 + $0x18] sm:$0xff]  ;;  %vm3426_vm1 = vcmask 130112   ;;  %vm3433_vm2 = vcmask 195712  }
  0x16   : > { %v849_v3 = vsel %vm842_vm0, %v332_v0, 0.0  ;;  %v843_v4 = vsel %vm842_vm0, %v330_v1, 0.0  ;;  %v331_v5 = vld [vmem:[%s9820_s11 + $0x8] sm:$0xff]  ;;  %v852_v6 = vsel %vm842_vm0, %v333_v2, 0.0  ;;  %v334_v9 = vld [vmem:[%s9820_s11 + $0x20] sm:$0xff]  ;;  %v337_v12 = vld [vmem:[%s9820_s11 + $0x38] sm:$0xff] }
  0x17   : > { %850 = vadd.xlane.f32.xlu1 %v849_v3  ;;  %844 = vadd.xlane.f32.xlu0 %v843_v4  ;;  %v846_v7 = vsel %vm842_vm0, %v331_v5, 0.0  ;;  %v335_v8 = vld [vmem:[%s9820_s11 + $0x28] sm:$0xff]  ;;  %v855_v11 = vsel %vm842_vm0, %v334_v9, 0.0  ;;  %v336_v13 = vld [vmem:[%s9820_s11 + $0x30] sm:$0xff]  ;;  %v864_v14 = vsel %vm842_vm0, %v337_v12, 0.0  ;;  %v338_v17 = vld [vmem:[%s9820_s11 + $0x40] sm:$0xff] }
  0x18   : > { %v858_v10 = vsel %vm842_vm0, %v335_v8, 0.0  ;;  %v861_v15 = vsel %vm842_vm0, %v336_v13, 0.0  ;;  %v339_v16 = vld [vmem:[%s9820_s11 + $0x48] sm:$0xff]  ;;  %v867_v19 = vsel %vm842_vm0, %v338_v17, 0.0  ;;  %v341_v20 = vld [vmem:[%s9820_s11 + $0x58] sm:$0xff]  ;;  %v340_v21 = vld [vmem:[%s9820_s11 + $0x50] sm:$0xff] }
  0x19   : > { %v870_v18 = vsel %vm842_vm0, %v339_v16, 0.0  ;;  %v876_v22 = vsel %vm842_vm0, %v341_v20, 0.0  ;;  %v873_v23 = vsel %vm842_vm0, %v340_v21, 0.0  ;;  %v343_v24 = vld [vmem:[%s9820_s11 + $0x68] sm:$0xff]  ;;  %v342_v25 = vld [vmem:[%s9820_s11 + $0x60] sm:$0xff]  ;;  %v345_v28 = vld [vmem:[%s9820_s11 + $0x78] sm:$0xff] }
  0x1a   : > { %v882_v26 = vsel %vm842_vm0, %v343_v24, 0.0  ;;  %v879_v27 = vsel %vm842_vm0, %v342_v25, 0.0  ;;  %v344_v29 = vld [vmem:[%s9820_s11 + $0x70] sm:$0xff]  ;;  %v888_v30 = vsel %vm842_vm0, %v345_v28, 0.0  ;;  %v347_v32 = vld [vmem:[%s9820_s11 + $0x88] sm:$0xff]  ;;  %v346_v33 = vld [vmem:[%s9820_s11 + $0x80] sm:$0xff] }
  0x1b   : > { %853 = vadd.xlane.f32.xlu1 %v852_v6  ;;  %847 = vadd.xlane.f32.xlu0 %v846_v7  ;;  %v885_v31 = vsel %vm842_vm0, %v344_v29, 0.0  ;;  %v894_v34 = vsel %vm842_vm0, %v347_v32, 0.0  ;;  %v891_v35 = vsel %vm842_vm0, %v346_v33, 0.0  ;;  %v349_v36 = vld [vmem:[%s9820_s11 + $0x98] sm:$0xff]  ;;  %v348_v37 = vld [vmem:[%s9820_s11 + $0x90] sm:$0xff]  ;;  %v351_v40 = vld [vmem:[%s9820_s11 + $0xa8] sm:$0xff] }
  0x1c   : > { %v900_v38 = vsel %vm842_vm0, %v349_v36, 0.0  ;;  %v897_v39 = vsel %vm842_vm0, %v348_v37, 0.0  ;;  %v350_v41 = vld [vmem:[%s9820_s11 + $0xa0] sm:$0xff]  ;;  %v906_v42 = vsel %vm842_vm0, %v351_v40, 0.0  ;;  %v353_v44 = vld [vmem:[%s9820_s11 + $0xb8] sm:$0xff]  ;;  %v352_v45 = vld [vmem:[%s9820_s11 + $0xb0] sm:$0xff] }
  0x1d   : > { %v903_v43 = vsel %vm842_vm0, %v350_v41, 0.0  ;;  %v912_v46 = vsel %vm842_vm0, %v353_v44, 0.0  ;;  %v909_v47 = vsel %vm842_vm0, %v352_v45, 0.0  ;;  %v355_v48 = vld [vmem:[%s9820_s11 + $0xc8] sm:$0xff]  ;;  %v354_v49 = vld [vmem:[%s9820_s11 + $0xc0] sm:$0xff]  ;;  %v357_v52 = vld [vmem:[%s9820_s11 + $0xd8] sm:$0xff] }
  0x1e   : > { %v918_v50 = vsel %vm842_vm0, %v355_v48, 0.0  ;;  %v915_v51 = vsel %vm842_vm0, %v354_v49, 0.0  ;;  %v356_v53 = vld [vmem:[%s9820_s11 + $0xd0] sm:$0xff]  ;;  %v924_v54 = vsel %vm842_vm0, %v357_v52, 0.0  ;;  %v359_v56 = vld [vmem:[%s9820_s11 + $0xe8] sm:$0xff]  ;;  %v358_v57 = vld [vmem:[%s9820_s11 + $0xe0] sm:$0xff] }
  0x1f   : > { %859 = vadd.xlane.f32.xlu1 %v858_v10  ;;  %856 = vadd.xlane.f32.xlu0 %v855_v11  ;;  %v921_v55 = vsel %vm842_vm0, %v356_v53, 0.0  ;;  %v930_v58 = vsel %vm842_vm0, %v359_v56, 0.0  ;;  %v927_v59 = vsel %vm842_vm0, %v358_v57, 0.0  ;;  %v361_v60 = vld [vmem:[%s9820_s11 + $0xf8] sm:$0xff]  ;;  %v360_v61 = vld [vmem:[%s9820_s11 + $0xf0] sm:$0xff]  ;;  %v363_v0 = vld [vmem:[%s9820_s11 + $0x108] sm:$0xff] }
  0x20   : > { %v936_v62 = vsel %vm842_vm0, %v361_v60, 0.0  ;;  %v933_v63 = vsel %vm842_vm0, %v360_v61, 0.0  ;;  %v362_v1 = vld [vmem:[%s9820_s11 + $0x100] sm:$0xff]  ;;  %v942_v2 = vsel %vm842_vm0, %v363_v0, 0.0  ;;  %v365_v4 = vld [vmem:[%s9820_s11 + $0x118] sm:$0xff]  ;;  %v364_v5 = vld [vmem:[%s9820_s11 + $0x110] sm:$0xff] }
  0x21   : > { %v939_v3 = vsel %vm842_vm0, %v362_v1, 0.0  ;;  %v948_v6 = vsel %vm842_vm0, %v365_v4, 0.0  ;;  %v945_v7 = vsel %vm842_vm0, %v364_v5, 0.0  ;;  %v367_v8 = vld [vmem:[%s9820_s11 + $0x128] sm:$0xff]  ;;  %v366_v9 = vld [vmem:[%s9820_s11 + $0x120] sm:$0xff]  ;;  %v369_v12 = vld [vmem:[%s9820_s11 + $0x138] sm:$0xff] }
  0x22   : > { %v954_v10 = vsel %vm842_vm0, %v367_v8, 0.0  ;;  %v951_v11 = vsel %vm842_vm0, %v366_v9, 0.0  ;;  %v368_v13 = vld [vmem:[%s9820_s11 + $0x130] sm:$0xff]  ;;  %v371_v16 = vld [vmem:[%s9820_s11 + $0x148] sm:$0xff]  ;;  %v370_v17 = vld [vmem:[%s9820_s11 + $0x140] sm:$0xff]  ;;  %v2891_v8 = vlaneseq  ;;  %vm3440_vm3 = vcmask 261312  }
  0x23   : > { %865 = vadd.xlane.f32.xlu1 %v864_v14  ;;  %862 = vadd.xlane.f32.xlu0 %v861_v15  ;;  %v960_v14 = vsel %vm842_vm0, %v369_v12, 0.0  ;;  %v957_v15 = vsel %vm842_vm0, %v368_v13, 0.0  ;;  %v373_v20 = vld [vmem:[%s9820_s11 + $0x158] sm:$0xff]  ;;  %v372_v21 = vld [vmem:[%s9820_s11 + $0x150] sm:$0xff]  ;;  %v375_v24 = vld [vmem:[%s9820_s11 + $0x168] sm:$0xff]  ;;  %vm3447_vm4 = vcmask 326912  }
  0x24   : > { %v374_v25 = vld [vmem:[%s9820_s11 + $0x160] sm:$0xff]  ;;  %v377_v28 = vld [vmem:[%s9820_s11 + $0x178] sm:$0xff]  ;;  %v376_v29 = vld [vmem:[%s9820_s11 + $0x170] sm:$0xff]  ;;  %v9968_v13 = vand.u32 127, %v2891_v8  ;;  %vm3454_vm5 = vcmask 392512   ;;  %vm3461_vm6 = vcmask 458112  }
  0x25   : > { %v379_v32 = vld [vmem:[%s9820_s11 + $0x188] sm:$0xff]  ;;  %v378_v33 = vld [vmem:[%s9820_s11 + $0x180] sm:$0xff]  ;;  %v381_v36 = vld [vmem:[%s9820_s11 + $0x198] sm:$0xff]  ;;  %vm13975_vm7 = vcmask 523712   ;;  %vm3475_vm8 = vcmask 589312   ;;  %vm13968_vm9 = vcmask 654912  }
  0x26   : > { %v380_v37 = vld [vmem:[%s9820_s11 + $0x190] sm:$0xff]  ;;  %v383_v40 = vld [vmem:[%s9820_s11 + $0x1a8] sm:$0xff]  ;;  %v382_v41 = vld [vmem:[%s9820_s11 + $0x1a0] sm:$0xff]  ;;  %vm3489_vm10 = vcmask 720512   ;;  %vm13967_vm11 = vcmask 786112   ;;  %vm3503_vm12 = vcmask 851712  }
  0x27   : > { %871 = vadd.xlane.f32.xlu1 %v870_v18  ;;  %868 = vadd.xlane.f32.xlu0 %v867_v19  ;;  %v966_v18 = vsel %vm842_vm0, %v371_v16, 0.0  ;;  %v963_v19 = vsel %vm842_vm0, %v370_v17, 0.0  ;;  %v385_v44 = vld [vmem:[%s9820_s11 + $0x1b8] sm:$0xff]  ;;  %v384_v45 = vld [vmem:[%s9820_s11 + $0x1b0] sm:$0xff]  ;;  %v387_v48 = vld [vmem:[%s9820_s11 + $0x1c8] sm:$0xff]  ;;  %v9972_v16 = vshrl.u32 %v2891_v8, 7 }
  0x28   : > { %v386_v49 = vld [vmem:[%s9820_s11 + $0x1c0] sm:$0xff]  ;;  %v389_v52 = vld [vmem:[%s9820_s11 + $0x1d8] sm:$0xff]  ;;  %v388_v53 = vld [vmem:[%s9820_s11 + $0x1d0] sm:$0xff]  ;;  %v3421_v17 = vadd.s32 4294967288, %v9968_v13  ;;  %vm3510_vm13 = vcmask 917312   ;;  %vm3517_vm14 = vcmask 982912  }
  0x29   : > { %v391_v56 = vld [vmem:[%s9820_s11 + $0x1e8] sm:$0xff]  ;;  %v390_v57 = vld [vmem:[%s9820_s11 + $0x1e0] sm:$0xff]  ;;  %v393_v60 = vld [vmem:[%s9820_s11 + $0x1f8] sm:$0xff]  ;;  %vm3524_vm15 = vcmask 1048512   ;;  %s9551_s19 = sshll.u32 %s11030_s18, 4 }
  0x2a   : > { %v392_v61 = vld [vmem:[%s9820_s11 + $0x1f0] sm:$0xff]  ;;  %v395_v0 = vld [vmem:[%s9820_s11 + $0x208] sm:$0xff]  ;;  %v394_v1 = vld [vmem:[%s9820_s11 + $0x200] sm:$0xff]  ;;  %s11063_s20 = scalar_lea.vmem [#allocation2], %s9551_s19 }
  0x2b   : > { %877 = vadd.xlane.f32.xlu1 %v876_v22  ;;  %874 = vadd.xlane.f32.xlu0 %v873_v23  ;;  %v972_v22 = vsel %vm842_vm0, %v373_v20, 0.0  ;;  %v969_v23 = vsel %vm842_vm0, %v372_v21, 0.0  ;;  %v397_v4 = vld [vmem:[%s9820_s11 + $0x218] sm:$0xff]  ;;  %v396_v5 = vld [vmem:[%s9820_s11 + $0x210] sm:$0xff]  ;;  %v399_v9 = vld [vmem:[%s9820_s11 + $0x228] sm:$0xff] }
  0x2f   : > { %883 = vadd.xlane.f32.xlu1 %v882_v26  ;;  %880 = vadd.xlane.f32.xlu0 %v879_v27  ;;  %v978_v26 = vsel %vm842_vm0, %v375_v24, 0.0  ;;  %v975_v27 = vsel %vm842_vm0, %v374_v25, 0.0  ;;  %v403_v24 = vld [vmem:[%s9820_s11 + $0x248] sm:$0xff]  ;;  %v402_v25 = vld [vmem:[%s9820_s11 + $0x240] sm:$0xff] }
  0x33   : > { %889 = vadd.xlane.f32.xlu1 %v888_v30  ;;  %886 = vadd.xlane.f32.xlu0 %v885_v31  ;;  %v984_v30 = vsel %vm842_vm0, %v377_v28, 0.0  ;;  %v981_v31 = vsel %vm842_vm0, %v376_v29, 0.0  ;;  %v9987_v29 = vsub.s32 %v3421_v17, %v9972_v16 }
  0x37   : > { %895 = vadd.xlane.f32.xlu1 %v894_v34  ;;  %892 = vadd.xlane.f32.xlu0 %v891_v35  ;;  %v990_v34 = vsel %vm842_vm0, %v379_v32, 0.0  ;;  %v987_v35 = vsel %vm842_vm0, %v378_v33, 0.0 }
  0x3b   : > { %901 = vadd.xlane.f32.xlu1 %v900_v38  ;;  %898 = vadd.xlane.f32.xlu0 %v897_v39  ;;  %v996_v38 = vsel %vm842_vm0, %v381_v36, 0.0  ;;  %v993_v39 = vsel %vm842_vm0, %v380_v37, 0.0  ;;  %v1059_v36 = vsel %vm842_vm0, %v402_v25, 0.0 }
  0x3f   : > { %907 = vadd.xlane.f32.xlu1 %v906_v42  ;;  %904 = vadd.xlane.f32.xlu0 %v903_v43  ;;  %v1002_v42 = vsel %vm842_vm0, %v383_v40, 0.0  ;;  %v999_v43 = vsel %vm842_vm0, %v382_v41, 0.0  ;;  %v405_v40 = vld [vmem:[%s9820_s11 + $0x258] sm:$0xff]  ;;  %v404_v41 = vld [vmem:[%s9820_s11 + $0x250] sm:$0xff] }
  0x43   : > { %913 = vadd.xlane.f32.xlu1 %v912_v46  ;;  %910 = vadd.xlane.f32.xlu0 %v909_v47  ;;  %v1008_v46 = vsel %vm842_vm0, %v385_v44, 0.0  ;;  %v1005_v47 = vsel %vm842_vm0, %v384_v45, 0.0  ;;  %v3456_v44 = vadd.s32 4294967248, %v9968_v13 }
  0x47   : > { %919 = vadd.xlane.f32.xlu1 %v918_v50  ;;  %916 = vadd.xlane.f32.xlu0 %v915_v51  ;;  %v1014_v50 = vsel %vm842_vm0, %v387_v48, 0.0  ;;  %v1011_v51 = vsel %vm842_vm0, %v386_v49, 0.0 }
  0x4b   : > { %925 = vadd.xlane.f32.xlu1 %v924_v54  ;;  %922 = vadd.xlane.f32.xlu0 %v921_v55  ;;  %v1020_v54 = vsel %vm842_vm0, %v389_v52, 0.0  ;;  %v1017_v55 = vsel %vm842_vm0, %v388_v53, 0.0  ;;  %v1065_v52 = vsel %vm842_vm0, %v404_v41, 0.0 }
  0x4f   : > { %931 = vadd.xlane.f32.xlu1 %v930_v58  ;;  %928 = vadd.xlane.f32.xlu0 %v927_v59  ;;  %v1026_v58 = vsel %vm842_vm0, %v391_v56, 0.0  ;;  %v1023_v59 = vsel %vm842_vm0, %v390_v57, 0.0  ;;  %v407_v57 = vld [vmem:[%s9820_s11 + $0x268] sm:$0xff] }
  0x53   : > { %937 = vadd.xlane.f32.xlu1 %v936_v62  ;;  %934 = vadd.xlane.f32.xlu0 %v933_v63  ;;  %v1032_v62 = vsel %vm842_vm0, %v393_v60, 0.0  ;;  %v1029_v63 = vsel %vm842_vm0, %v392_v61, 0.0  ;;  %v10022_v61 = vsub.s32 %v3456_v44, %v9972_v16 }
  0x57   : > { %943 = vadd.xlane.f32.xlu1 %v942_v2  ;;  %940 = vadd.xlane.f32.xlu0 %v939_v3  ;;  %v1038_v2 = vsel %vm842_vm0, %v395_v0, 0.0  ;;  %v1035_v3 = vsel %vm842_vm0, %v394_v1, 0.0 }
  0x5b   : > { %949 = vadd.xlane.f32.xlu1 %v948_v6  ;;  %946 = vadd.xlane.f32.xlu0 %v945_v7  ;;  %v1044_v6 = vsel %vm842_vm0, %v397_v4, 0.0  ;;  %v1041_v7 = vsel %vm842_vm0, %v396_v5, 0.0  ;;  %v1074_v5 = vsel %vm842_vm0, %v407_v57, 0.0 }
  0x5f   : > { %955 = vadd.xlane.f32.xlu1 %v954_v10  ;;  %952 = vadd.xlane.f32.xlu0 %v951_v11  ;;  %v398_v10 = vld [vmem:[%s9820_s11 + $0x220] sm:$0xff]  ;;  %v1050_v11 = vsel %vm842_vm0, %v399_v9, 0.0 }
  0x60   : > { %v1047_v12 = vsel %vm842_vm0, %v398_v10, 0.0 }
  0x63   : > { %961 = vadd.xlane.f32.xlu1 %v960_v14  ;;  %958 = vadd.xlane.f32.xlu0 %v957_v15  ;;  %v401_v14 = vld [vmem:[%s9820_s11 + $0x238] sm:$0xff]  ;;  %v400_v15 = vld [vmem:[%s9820_s11 + $0x230] sm:$0xff] }
  0x64   : > { %v1056_v21 = vsel %vm842_vm0, %v401_v14, 0.0 }
  0x67   : > { %967 = vadd.xlane.f32.xlu1 %v966_v18  ;;  %964 = vadd.xlane.f32.xlu0 %v963_v19  ;;  %v3428_v18 = vadd.s32 4294967280, %v9968_v13 }
  0x6b   : > { %973 = vadd.xlane.f32.xlu1 %v972_v22  ;;  %970 = vadd.xlane.f32.xlu0 %v969_v23  ;;  %v1053_v22 = vsel %vm842_vm0, %v400_v15, 0.0  ;;  %v3435_v23 = vadd.s32 4294967272, %v9968_v13  ;;  %v3491_v15 = vadd.s32 4294967208, %v9968_v13 }
  0x6d   : > { %v9996_v37 = vsub.s32 %v3435_v23, %v9972_v16 }
  0x6f   : > { %979 = vadd.xlane.f32.xlu1 %v978_v26  ;;  %976 = vadd.xlane.f32.xlu0 %v975_v27  ;;  %v3449_v26 = vadd.s32 4294967256, %v9968_v13  ;;  %v9984_v27 = vsub.s32 %v9968_v13, %v9972_v16 }
  0x73   : > { %985 = vadd.xlane.f32.xlu1 %v984_v30  ;;  %982 = vadd.xlane.f32.xlu0 %v981_v31  ;;  %v3442_v30 = vadd.s32 4294967264, %v9968_v13  ;;  %v9991_v31 = vsub.s32 %v3428_v18, %v9972_v16 }
  0x77   : > { %991 = vadd.xlane.f32.xlu1 %v990_v34  ;;  %988 = vadd.xlane.f32.xlu0 %v987_v35  ;;  %v1062_v35 = vsel %vm842_vm0, %v403_v24, 0.0 }
  0x7b   : > { %997 = vadd.xlane.f32.xlu1 %v996_v38  ;;  %994 = vadd.xlane.f32.xlu0 %v993_v39 }
  0x7f   : > { %1003 = vadd.xlane.f32.xlu1 %v1002_v42  ;;  %1000 = vadd.xlane.f32.xlu0 %v999_v43  ;;  %v10001_v42 = vsub.s32 %v3449_v26, %v9972_v16  ;;  %v3463_v43 = vadd.s32 4294967240, %v9968_v13 }
  0x81   : > { %v10019_v60 = vsub.s32 %v3463_v43, %v9972_v16 }
  0x83   : > { %1009 = vadd.xlane.f32.xlu1 %v1008_v46  ;;  %1006 = vadd.xlane.f32.xlu0 %v1005_v47  ;;  %v10008_v47 = vsub.s32 %v3442_v30, %v9972_v16  ;;  %v411_v30 = vld [vmem:[%s9820_s11 + $0x288] sm:$0xff] }
  0x84   : > { %v1086_v44 = vsel %vm842_vm0, %v411_v30, 0.0 }
  0x87   : > { %1015 = vadd.xlane.f32.xlu1 %v1014_v50  ;;  %1012 = vadd.xlane.f32.xlu0 %v1011_v51  ;;  %v1068_v51 = vsel %vm842_vm0, %v405_v40, 0.0  ;;  %v3498_v40 = vadd.s32 4294967200, %v9968_v13 }
  0x89   : > { %v10074_v57 = vsub.s32 %v3498_v40, %v9972_v16  ;;  %v418_v40 = vld [vmem:[%s9820_s11 + $0x2c0] sm:$0xff] }
  0x8b   : > { %1021 = vadd.xlane.f32.xlu1 %v1020_v54  ;;  %1018 = vadd.xlane.f32.xlu0 %v1017_v55 }
  0x8f   : > { %1027 = vadd.xlane.f32.xlu1 %v1026_v58  ;;  %1024 = vadd.xlane.f32.xlu0 %v1023_v59  ;;  %v406_v58 = vld [vmem:[%s9820_s11 + $0x260] sm:$0xff] }
  0x93   : > { %1033 = vadd.xlane.f32.xlu1 %v1032_v62  ;;  %1030 = vadd.xlane.f32.xlu0 %v1029_v63  ;;  %v3477_v62 = vadd.s32 4294967224, %v9968_v13 }
  0x95   : > { %v10036_v14 = vsub.s32 %v3477_v62, %v9972_v16 }
  0x97   : > { %1039 = vadd.xlane.f32.xlu1 %v1038_v2  ;;  %1036 = vadd.xlane.f32.xlu0 %v1035_v3  ;;  %v3470_v2 = vadd.s32 4294967232, %v9968_v13 }
  0x9b   : > { %1045 = vadd.xlane.f32.xlu1 %v1044_v6  ;;  %1042 = vadd.xlane.f32.xlu0 %v1041_v7  ;;  %v1071_v6 = vsel %vm842_vm0, %v406_v58, 0.0  ;;  %v409_v7 = vld [vmem:[%s9820_s11 + $0x278] sm:$0xff]  ;;  %v3512_v58 = vadd.s32 4294967184, %v9968_v13 }
  0x9c   : > { %v1080_v23 = vsel %vm842_vm0, %v409_v7, 0.0 }
  0x9f   : > { %1051 = vadd.xlane.f32.xlu1 %v1050_v11  ;;  %1048 = vadd.xlane.f32.xlu0 %v1047_v12  ;;  %v408_v11 = vld [vmem:[%s9820_s11 + $0x270] sm:$0xff] }
  0xa0   : > { %v851_v19 = vpop.xlane.xlu1 %850  ;;  %v845_v20 = vpop.xlane.xlu0 %844  ;;  %v1077_v24 = vsel %vm842_vm0, %v408_v11, 0.0 }
  0xa1   : > { %v2379_v28 = vmul.f32 0.020408163, %v845_v20  ;;  %v2381_v32 = vmul.f32 0.020408163, %v851_v19  ;;  %v10042_v19 = vsub.s32 %v3470_v2, %v9972_v16  ;;  %v3484_v20 = vadd.s32 4294967216, %v9968_v13 }
  0xa3   : > { %1057 = vadd.xlane.f32.xlu1 %v1056_v21  ;;  %1054 = vadd.xlane.f32.xlu0 %v1053_v22  ;;  %v3420_v45 = vrot.slane %v2379_v28, %v9984_v27  ;;  %v3432_v48 = vrot.slane %v2381_v32, %v9991_v31  ;;  %v410_v32 = vld [vmem:[%s9820_s11 + $0x280] sm:$0xff] }
  0xa4   : > { %v854_v33 = vpop.xlane.xlu1 %853  ;;  %v848_v34 = vpop.xlane.xlu0 %847 }
  0xa5   : > { %v2382_v38 = vmul.f32 0.020408163, %v854_v33  ;;  %v2380_v39 = vmul.f32 0.020408163, %v848_v34  ;;  %v10052_v34 = vsub.s32 %v3491_v15, %v9972_v16 }
  0xa7   : > { %v3425_v46 = vrot.slane %v2380_v39, %v9987_v29  ;;  %1063 = vadd.xlane.f32.xlu1 %v1062_v35  ;;  %1060 = vadd.xlane.f32.xlu0 %v1059_v36  ;;  %v3439_v53 = vrot.slane %v2382_v38, %v9996_v37  ;;  %v3505_v35 = vadd.s32 4294967192, %v9968_v13  ;;  %v10058_v39 = vsub.s32 %v3484_v20, %v9972_v16 }
  0xa8   : > { %v860_v49 = vpop.xlane.xlu1 %859  ;;  %v857_v50 = vpop.xlane.xlu0 %856 }
  0xa9   : > { %v3427_v54 = vsel %vm3426_vm1, %v3425_v46, %v3420_v45  ;;  %v2384_v55 = vmul.f32 0.020408163, %v860_v49  ;;  %v2383_v56 = vmul.f32 0.020408163, %v857_v50  ;;  %v1083_v45 = vsel %vm842_vm0, %v410_v32, 0.0  ;;  %v413_v50 = vld [vmem:[%s9820_s11 + $0x298] sm:$0xff] }
  0xaa   : > { %v3434_v59 = vsel %vm3433_vm2, %v3432_v48, %v3427_v54  ;;  %v3519_v54 = vadd.s32 4294967176, %v9968_v13 }
  0xab   : > { %v3453_v63 = vrot.slane %v2384_v55, %v10001_v42  ;;  %v3441_v0 = vsel %vm3440_vm3, %v3439_v53, %v3434_v59  ;;  %v3446_v1 = vrot.slane %v2383_v56, %v10008_v47  ;;  %1069 = vadd.xlane.f32.xlu1 %v1068_v51  ;;  %1066 = vadd.xlane.f32.xlu0 %v1065_v52  ;;  %v412_v51 = vld [vmem:[%s9820_s11 + $0x290] sm:$0xff] }
  0xac   : > { %v866_v3 = vpop.xlane.xlu1 %865  ;;  %v863_v4 = vpop.xlane.xlu0 %862  ;;  %v10068_v53 = vsub.s32 %v3505_v35, %v9972_v16  ;;  %v10084_v7 = vsub.s32 %v3519_v54, %v9972_v16  ;;  %v421_v54 = vld [vmem:[%s9820_s11 + $0x2d8] sm:$0xff] }
  0xad   : > { %v3448_v8 = vsel %vm3447_vm4, %v3446_v1, %v3441_v0  ;;  %v2386_v9 = vmul.f32 0.020408163, %v866_v3  ;;  %v2385_v10 = vmul.f32 0.020408163, %v863_v4  ;;  %v1089_v0 = vsel %vm842_vm0, %v412_v51, 0.0  ;;  %v415_v4 = vld [vmem:[%s9820_s11 + $0x2a8] sm:$0xff] }
  0xae   : > { %v3455_v12 = vsel %vm3454_vm5, %v3453_v63, %v3448_v8  ;;  %v1092_v63 = vsel %vm842_vm0, %v413_v50, 0.0 }
  0xaf   : > { %v3467_v17 = vrot.slane %v2386_v9, %v10019_v60  ;;  %v3460_v18 = vrot.slane %v2385_v10, %v10022_v61  ;;  %1075 = vadd.xlane.f32.xlu1 %v1074_v5  ;;  %1072 = vadd.xlane.f32.xlu0 %v1071_v6  ;;  %v414_v5 = vld [vmem:[%s9820_s11 + $0x2a0] sm:$0xff]  ;;  %v10089_v9 = vsub.s32 %v3512_v58, %v9972_v16 }
  0xb0   : > { %v872_v21 = vpop.xlane.xlu1 %871  ;;  %v869_v22 = vpop.xlane.xlu0 %868  ;;  %v1095_v15 = vsel %vm842_vm0, %v414_v5, 0.0  ;;  %v422_v5 = vld [vmem:[%s9820_s11 + $0x2e0] sm:$0xff] }
  0xb1   : > { %v3462_v25 = vsel %vm3461_vm6, %v3460_v18, %v3455_v12  ;;  %v2388_v26 = vmul.f32 0.020408163, %v872_v21  ;;  %v2387_v28 = vmul.f32 0.020408163, %v869_v22  ;;  %v1098_v12 = vsel %vm842_vm0, %v415_v4, 0.0  ;;  %v417_v21 = vld [vmem:[%s9820_s11 + $0x2b8] sm:$0xff] }
  0xb2   : > { %v3469_v33 = vsel %vm13975_vm7, %v3467_v17, %v3462_v25  ;;  %v416_v22 = vld [vmem:[%s9820_s11 + $0x2b0] sm:$0xff]  ;;  %v1104_v30 = vsel %vm842_vm0, %v417_v21, 0.0  ;;  %v423_v4 = vld [vmem:[%s9820_s11 + $0x2e8] sm:$0xff]  ;;  %v425_v21 = vld [vmem:[%s9820_s11 + $0x2f8] sm:$0xff] }
  0xb3   : > { %v3481_v36 = vrot.slane %v2388_v26, %v10036_v14  ;;  %v3474_v38 = vrot.slane %v2387_v28, %v10042_v19  ;;  %1081 = vadd.xlane.f32.xlu1 %v1080_v23  ;;  %1078 = vadd.xlane.f32.xlu0 %v1077_v24  ;;  %v1101_v32 = vsel %vm842_vm0, %v416_v22, 0.0  ;;  %v424_v22 = vld [vmem:[%s9820_s11 + $0x2f0] sm:$0xff] }
  0xb4   : > { %v878_v41 = vpop.xlane.xlu1 %877  ;;  %v875_v43 = vpop.xlane.xlu0 %874 }
  0xb5   : > { %v3476_v46 = vsel %vm3475_vm8, %v3474_v38, %v3469_v33  ;;  %v2390_v48 = vmul.f32 0.020408163, %v878_v41  ;;  %v2389_v49 = vmul.f32 0.020408163, %v875_v43  ;;  %v419_v38 = vld [vmem:[%s9820_s11 + $0x2c8] sm:$0xff] }
  0xb6   : > { %v3483_v52 = vsel %vm13968_vm9, %v3481_v36, %v3476_v46 }
  0xb7   : > { %v3495_v55 = vrot.slane %v2390_v48, %v10052_v34  ;;  %v3488_v56 = vrot.slane %v2389_v49, %v10058_v39  ;;  %1087 = vadd.xlane.f32.xlu1 %v1086_v44  ;;  %1084 = vadd.xlane.f32.xlu0 %v1083_v45  ;;  %v1110_v48 = vsel %vm842_vm0, %v419_v38, 0.0  ;;  %v1107_v49 = vsel %vm842_vm0, %v418_v40, 0.0  ;;  %v427_v38 = vld [vmem:[%s9820_s11 + $0x308] sm:$0xff]  ;;  %v426_v40 = vld [vmem:[%s9820_s11 + $0x300] sm:$0xff] }
  0xb8   : > { %v884_v59 = vpop.xlane.xlu1 %883  ;;  %v881_v62 = vpop.xlane.xlu0 %880 }
  0xb9   : > { %v3490_v1 = vsel %vm3489_vm10, %v3488_v56, %v3483_v52  ;;  %v2392_v2 = vmul.f32 0.020408163, %v884_v59  ;;  %v2391_v3 = vmul.f32 0.020408163, %v881_v62 }
  0xba   : > { %v3497_v6 = vsel %vm13967_vm11, %v3495_v55, %v3490_v1  ;;  %v420_v55 = vld [vmem:[%s9820_s11 + $0x2d0] sm:$0xff] }
  0xbb   : > { %v3509_v13 = vrot.slane %v2392_v2, %v10068_v53  ;;  %v3502_v8 = vrot.slane %v2391_v3, %v10074_v57  ;;  %1093 = vadd.xlane.f32.xlu1 %v1092_v63  ;;  %1090 = vadd.xlane.f32.xlu0 %v1089_v0  ;;  %v1116_v63 = vsel %vm842_vm0, %v421_v54, 0.0  ;;  %v1113_v0 = vsel %vm842_vm0, %v420_v55, 0.0  ;;  %v429_v55 = vld [vmem:[%s9820_s11 + $0x318] sm:$0xff] }
  0xbc   : > { %v890_v10 = vpop.xlane.xlu1 %889  ;;  %v887_v11 = vpop.xlane.xlu0 %886 }
  0xbd   : > { %v3504_v17 = vsel %vm3503_vm12, %v3502_v8, %v3497_v6  ;;  %v2394_v18 = vmul.f32 0.020408163, %v890_v10  ;;  %v2393_v20 = vmul.f32 0.020408163, %v887_v11 }
  0xbe   : > { %v3511_v23 = vsel %vm3510_vm13, %v3509_v13, %v3504_v17 }
  0xbf   : > { %v3523_v24 = vrot.slane %v2394_v18, %v10084_v7  ;;  %v3516_v25 = vrot.slane %v2393_v20, %v10089_v9  ;;  %1099 = vadd.xlane.f32.xlu1 %v1098_v12  ;;  %1096 = vadd.xlane.f32.xlu0 %v1095_v15  ;;  %v1122_v12 = vsel %vm842_vm0, %v423_v4, 0.0  ;;  %v1119_v15 = vsel %vm842_vm0, %v422_v5, 0.0 }
  0xc0   : > { %v896_v26 = vpop.xlane.xlu1 %895  ;;  %v893_v28 = vpop.xlane.xlu0 %892 }
  0xc1   : > { %v3518_v33 = vsel %vm3517_vm14, %v3516_v25, %v3511_v23  ;;  %v2396_v35 = vmul.f32 0.020408163, %v896_v26  ;;  %v2395_v36 = vmul.f32 0.020408163, %v893_v28 }
  0xc2   : > { %v10105_v41 = vsel %vm3524_vm15, %v3523_v24, %v3518_v33 }
  0xc3   : > { %v3533_v43 = vrot.slane %v2396_v35, %v9987_v29  ;;  %v3529_v44 = vrot.slane %v2395_v36, %v9984_v27  ;;  %1105 = vadd.xlane.f32.xlu1 %v1104_v30  ;;  %1102 = vadd.xlane.f32.xlu0 %v1101_v32  ;;  %v1128_v30 = vsel %vm842_vm0, %v425_v21, 0.0  ;;  %v1125_v32 = vsel %vm842_vm0, %v424_v22, 0.0 }
  0xc4   : > { %v902_v45 = vpop.xlane.xlu1 %901  ;;  %v899_v46 = vpop.xlane.xlu0 %898 }
  0xc5   : > { %v3534_v50 = vsel %vm3426_vm1, %v3533_v43, %v3529_v44  ;;  %v2398_v51 = vmul.f32 0.020408163, %v902_v45  ;;  %v2397_v52 = vmul.f32 0.020408163, %v899_v46 }
  0xc7   : > { %v3543_v56 = vrot.slane %v2398_v51, %v9996_v37  ;;  %v3538_v58 = vrot.slane %v2397_v52, %v9991_v31  ;;  %1111 = vadd.xlane.f32.xlu1 %v1110_v48  ;;  %1108 = vadd.xlane.f32.xlu0 %v1107_v49  ;;  %v1134_v49 = vsel %vm842_vm0, %v427_v38, 0.0 }
  0xc8   : > { %v908_v59 = vpop.xlane.xlu1 %907  ;;  %v905_v62 = vpop.xlane.xlu0 %904 }
  0xc9   : > { %v3539_v1 = vsel %vm3433_vm2, %v3538_v58, %v3534_v50  ;;  %v2400_v2 = vmul.f32 0.020408163, %v908_v59  ;;  %v2399_v3 = vmul.f32 0.020408163, %v905_v62  ;;  %v1131_v50 = vsel %vm842_vm0, %v426_v40, 0.0 }
  0xca   : > { %v3544_v6 = vsel %vm3440_vm3, %v3543_v56, %v3539_v1  ;;  %v428_v56 = vld [vmem:[%s9820_s11 + $0x310] sm:$0xff]  ;;  %v1140_v1 = vsel %vm842_vm0, %v429_v55, 0.0 }
  0xcb   : > { %v3553_v13 = vrot.slane %v2400_v2, %v10001_v42  ;;  %v3548_v8 = vrot.slane %v2399_v3, %v10008_v47  ;;  %1117 = vadd.xlane.f32.xlu1 %v1116_v63  ;;  %1114 = vadd.xlane.f32.xlu0 %v1113_v0  ;;  %v1137_v2 = vsel %vm842_vm0, %v428_v56, 0.0 }
  0xcc   : > { %v914_v10 = vpop.xlane.xlu1 %913  ;;  %v911_v11 = vpop.xlane.xlu0 %910 }
  0xcd   : > { %v3549_v17 = vsel %vm3447_vm4, %v3548_v8, %v3544_v6  ;;  %v2402_v18 = vmul.f32 0.020408163, %v914_v10  ;;  %v2401_v20 = vmul.f32 0.020408163, %v911_v11  ;;  %v431_v6 = vld [vmem:[%s9820_s11 + $0x328] sm:$0xff] }
  0xce   : > { %v3554_v23 = vsel %vm3454_vm5, %v3553_v13, %v3549_v17  ;;  %v430_v13 = vld [vmem:[%s9820_s11 + $0x320] sm:$0xff]  ;;  %v1146_v17 = vsel %vm842_vm0, %v431_v6, 0.0 }
  0xcf   : > { %v3563_v24 = vrot.slane %v2402_v18, %v10019_v60  ;;  %v3558_v25 = vrot.slane %v2401_v20, %v10022_v61  ;;  %1123 = vadd.xlane.f32.xlu1 %v1122_v12  ;;  %1120 = vadd.xlane.f32.xlu0 %v1119_v15  ;;  %v1143_v18 = vsel %vm842_vm0, %v430_v13, 0.0  ;;  %v439_v13 = vld [vmem:[%s9820_s11 + $0x368] sm:$0xff] }
  0xd0   : > { %v920_v26 = vpop.xlane.xlu1 %919  ;;  %v917_v28 = vpop.xlane.xlu0 %916 }
  0xd1   : > { %v3559_v33 = vsel %vm3461_vm6, %v3558_v25, %v3554_v23  ;;  %v2404_v35 = vmul.f32 0.020408163, %v920_v26  ;;  %v2403_v36 = vmul.f32 0.020408163, %v917_v28  ;;  %v433_v23 = vld [vmem:[%s9820_s11 + $0x338] sm:$0xff] }
  0xd2   : > { %v3564_v43 = vsel %vm13975_vm7, %v3563_v24, %v3559_v33  ;;  %v432_v24 = vld [vmem:[%s9820_s11 + $0x330] sm:$0xff]  ;;  %v1152_v33 = vsel %vm842_vm0, %v433_v23, 0.0 }
  0xd3   : > { %v3573_v44 = vrot.slane %v2404_v35, %v10036_v14  ;;  %v3568_v45 = vrot.slane %v2403_v36, %v10042_v19  ;;  %1129 = vadd.xlane.f32.xlu1 %v1128_v30  ;;  %1126 = vadd.xlane.f32.xlu0 %v1125_v32  ;;  %v1149_v35 = vsel %vm842_vm0, %v432_v24, 0.0  ;;  %v441_v24 = vld [vmem:[%s9820_s11 + $0x378] sm:$0xff] }
  0xd4   : > { %v926_v46 = vpop.xlane.xlu1 %925  ;;  %v923_v48 = vpop.xlane.xlu0 %922 }
  0xd5   : > { %v3569_v51 = vsel %vm3475_vm8, %v3568_v45, %v3564_v43  ;;  %v2406_v52 = vmul.f32 0.020408163, %v926_v46  ;;  %v2405_v54 = vmul.f32 0.020408163, %v923_v48  ;;  %v435_v43 = vld [vmem:[%s9820_s11 + $0x348] sm:$0xff] }
  0xd6   : > { %v3574_v58 = vsel %vm13968_vm9, %v3573_v44, %v3569_v51  ;;  %v434_v44 = vld [vmem:[%s9820_s11 + $0x340] sm:$0xff]  ;;  %v1158_v51 = vsel %vm842_vm0, %v435_v43, 0.0 }
  0xd7   : > { %v3583_v59 = vrot.slane %v2406_v52, %v10052_v34  ;;  %v3578_v62 = vrot.slane %v2405_v54, %v10058_v39  ;;  %1135 = vadd.xlane.f32.xlu1 %v1134_v49  ;;  %1132 = vadd.xlane.f32.xlu0 %v1131_v50  ;;  %v1155_v52 = vsel %vm842_vm0, %v434_v44, 0.0  ;;  %v443_v44 = vld [vmem:[%s9820_s11 + $0x388] sm:$0xff] }
  0xd8   : > { %v932_v63 = vpop.xlane.xlu1 %931  ;;  %v929_v0 = vpop.xlane.xlu0 %928 }
  0xd9   : > { %v3579_v3 = vsel %vm3489_vm10, %v3578_v62, %v3574_v58  ;;  %v2408_v4 = vmul.f32 0.020408163, %v932_v63  ;;  %v2407_v5 = vmul.f32 0.020408163, %v929_v0  ;;  %v437_v58 = vld [vmem:[%s9820_s11 + $0x358] sm:$0xff] }
  0xda   : > { %v3584_v8 = vsel %vm13967_vm11, %v3583_v59, %v3579_v3  ;;  %v436_v59 = vld [vmem:[%s9820_s11 + $0x350] sm:$0xff] }
  0xdb   : > { %v3593_v10 = vrot.slane %v2408_v4, %v10068_v53  ;;  %v3588_v11 = vrot.slane %v2407_v5, %v10074_v57  ;;  %1141 = vadd.xlane.f32.xlu1 %v1140_v1  ;;  %1138 = vadd.xlane.f32.xlu0 %v1137_v2  ;;  %v1164_v2 = vsel %vm842_vm0, %v437_v58, 0.0  ;;  %v1161_v3 = vsel %vm842_vm0, %v436_v59, 0.0 }
  0xdc   : > { %v938_v12 = vpop.xlane.xlu1 %937  ;;  %v935_v15 = vpop.xlane.xlu0 %934 }
  0xdd   : > { %v3589_v20 = vsel %vm3503_vm12, %v3588_v11, %v3584_v8  ;;  %v2410_v21 = vmul.f32 0.020408163, %v938_v12  ;;  %v2409_v22 = vmul.f32 0.020408163, %v935_v15  ;;  %v438_v8 = vld [vmem:[%s9820_s11 + $0x360] sm:$0xff] }
  0xde   : > { %v3594_v25 = vsel %vm3510_vm13, %v3593_v10, %v3589_v20  ;;  %v1167_v20 = vsel %vm842_vm0, %v438_v8, 0.0 }
  0xdf   : > { %v3603_v26 = vrot.slane %v2410_v21, %v10084_v7  ;;  %v3598_v28 = vrot.slane %v2409_v22, %v10089_v9  ;;  %1147 = vadd.xlane.f32.xlu1 %v1146_v17  ;;  %1144 = vadd.xlane.f32.xlu0 %v1143_v18  ;;  %v1170_v18 = vsel %vm842_vm0, %v439_v13, 0.0 }
  0xe0   : > { %v944_v30 = vpop.xlane.xlu1 %943  ;;  %v941_v32 = vpop.xlane.xlu0 %940 }
  0xe1   : > { %v3599_v36 = vsel %vm3517_vm14, %v3598_v28, %v3594_v25  ;;  %v2412_v38 = vmul.f32 0.020408163, %v944_v30  ;;  %v2411_v40 = vmul.f32 0.020408163, %v941_v32  ;;  %v440_v25 = vld [vmem:[%s9820_s11 + $0x370] sm:$0xff] }
  0xe2   : > { %v10170_v45 = vsel %vm3524_vm15, %v3603_v26, %v3599_v36  ;;  %v1173_v36 = vsel %vm842_vm0, %v440_v25, 0.0 }
  0xe3   : > { %v3612_v46 = vrot.slane %v2412_v38, %v9987_v29  ;;  %v3608_v48 = vrot.slane %v2411_v40, %v9984_v27  ;;  %1153 = vadd.xlane.f32.xlu1 %v1152_v33  ;;  %1150 = vadd.xlane.f32.xlu0 %v1149_v35  ;;  %v1176_v35 = vsel %vm842_vm0, %v441_v24, 0.0 }
  0xe4   : > { %v950_v49 = vpop.xlane.xlu1 %949  ;;  %v947_v50 = vpop.xlane.xlu0 %946 }
  0xe5   : > { %v3613_v54 = vsel %vm3426_vm1, %v3612_v46, %v3608_v48  ;;  %v2414_v55 = vmul.f32 0.020408163, %v950_v49  ;;  %v2413_v56 = vmul.f32 0.020408163, %v947_v50  ;;  %v442_v46 = vld [vmem:[%s9820_s11 + $0x380] sm:$0xff] }
  0xe7   : > { %v3622_v62 = vrot.slane %v2414_v55, %v9996_v37  ;;  %v3617_v63 = vrot.slane %v2413_v56, %v9991_v31  ;;  %1159 = vadd.xlane.f32.xlu1 %v1158_v51  ;;  %1156 = vadd.xlane.f32.xlu0 %v1155_v52  ;;  %v1179_v55 = vsel %vm842_vm0, %v442_v46, 0.0 }
  0xe8   : > { %v956_v0 = vpop.xlane.xlu1 %955  ;;  %v953_v1 = vpop.xlane.xlu0 %952 }
  0xe9   : > { %v3618_v4 = vsel %vm3433_vm2, %v3617_v63, %v3613_v54  ;;  %v2416_v5 = vmul.f32 0.020408163, %v956_v0  ;;  %v2415_v6 = vmul.f32 0.020408163, %v953_v1  ;;  %v1182_v54 = vsel %vm842_vm0, %v443_v44, 0.0  ;;  %v444_v63 = vld [vmem:[%s9820_s11 + $0x390] sm:$0xff] }
  0xea   : > { %v3623_v10 = vsel %vm3440_vm3, %v3622_v62, %v3618_v4  ;;  %v445_v62 = vld [vmem:[%s9820_s11 + $0x398] sm:$0xff] }
  0xeb   : > { %v3632_v11 = vrot.slane %v2416_v5, %v10001_v42  ;;  %v3627_v12 = vrot.slane %v2415_v6, %v10008_v47  ;;  %1165 = vadd.xlane.f32.xlu1 %v1164_v2  ;;  %1162 = vadd.xlane.f32.xlu0 %v1161_v3  ;;  %v1188_v5 = vsel %vm842_vm0, %v445_v62, 0.0  ;;  %v1185_v6 = vsel %vm842_vm0, %v444_v63, 0.0 }
  0xec   : > { %v962_v15 = vpop.xlane.xlu1 %961  ;;  %v959_v17 = vpop.xlane.xlu0 %958 }
  0xed   : > { %v3628_v21 = vsel %vm3447_vm4, %v3627_v12, %v3623_v10  ;;  %v2418_v22 = vmul.f32 0.020408163, %v962_v15  ;;  %v2417_v23 = vmul.f32 0.020408163, %v959_v17  ;;  %v446_v12 = vld [vmem:[%s9820_s11 + $0x3a0] sm:$0xff] }
  0xee   : > { %v3633_v26 = vsel %vm3454_vm5, %v3632_v11, %v3628_v21  ;;  %v447_v11 = vld [vmem:[%s9820_s11 + $0x3a8] sm:$0xff] }
  0xef   : > { %v3642_v28 = vrot.slane %v2418_v22, %v10019_v60  ;;  %v3637_v30 = vrot.slane %v2417_v23, %v10022_v61  ;;  %1171 = vadd.xlane.f32.xlu1 %v1170_v18  ;;  %1168 = vadd.xlane.f32.xlu0 %v1167_v20  ;;  %v1194_v22 = vsel %vm842_vm0, %v447_v11, 0.0  ;;  %v1191_v23 = vsel %vm842_vm0, %v446_v12, 0.0 }
  0xf0   : > { %v968_v32 = vpop.xlane.xlu1 %967  ;;  %v965_v33 = vpop.xlane.xlu0 %964 }
  0xf1   : > { %v3638_v38 = vsel %vm3461_vm6, %v3637_v30, %v3633_v26  ;;  %v2420_v40 = vmul.f32 0.020408163, %v968_v32  ;;  %v2419_v43 = vmul.f32 0.020408163, %v965_v33  ;;  %v448_v30 = vld [vmem:[%s9820_s11 + $0x3b0] sm:$0xff] }
  0xf2   : > { %v3643_v48 = vsel %vm13975_vm7, %v3642_v28, %v3638_v38  ;;  %v449_v28 = vld [vmem:[%s9820_s11 + $0x3b8] sm:$0xff] }
  0xf3   : > { %v3652_v49 = vrot.slane %v2420_v40, %v10036_v14  ;;  %v3647_v50 = vrot.slane %v2419_v43, %v10042_v19  ;;  %1177 = vadd.xlane.f32.xlu1 %v1176_v35  ;;  %1174 = vadd.xlane.f32.xlu0 %v1173_v36  ;;  %v1200_v40 = vsel %vm842_vm0, %v449_v28, 0.0  ;;  %v1197_v43 = vsel %vm842_vm0, %v448_v30, 0.0 }
  0xf4   : > { %v974_v51 = vpop.xlane.xlu1 %973  ;;  %v971_v52 = vpop.xlane.xlu0 %970 }
  0xf5   : > { %v3648_v56 = vsel %vm3475_vm8, %v3647_v50, %v3643_v48  ;;  %v2422_v58 = vmul.f32 0.020408163, %v974_v51  ;;  %v2421_v59 = vmul.f32 0.020408163, %v971_v52  ;;  %v450_v50 = vld [vmem:[%s9820_s11 + $0x3c0] sm:$0xff] }
  0xf6   : > { %v3653_v0 = vsel %vm13968_vm9, %v3652_v49, %v3648_v56  ;;  %v451_v49 = vld [vmem:[%s9820_s11 + $0x3c8] sm:$0xff]  ;;  %v1203_v62 = vsel %vm842_vm0, %v450_v50, 0.0 }
  0xf7   : > { %v3662_v1 = vrot.slane %v2422_v58, %v10052_v34  ;;  %v3657_v2 = vrot.slane %v2421_v59, %v10058_v39  ;;  %1183 = vadd.xlane.f32.xlu1 %v1182_v54  ;;  %1180 = vadd.xlane.f32.xlu0 %v1179_v55  ;;  %v1206_v59 = vsel %vm842_vm0, %v451_v49, 0.0 }
  0xf8   : > { %v980_v3 = vpop.xlane.xlu1 %979  ;;  %v977_v4 = vpop.xlane.xlu0 %976 }
  0xf9   : > { %v3658_v13 = vsel %vm3489_vm10, %v3657_v2, %v3653_v0  ;;  %v2424_v8 = vmul.f32 0.020408163, %v980_v3  ;;  %v2423_v10 = vmul.f32 0.020408163, %v977_v4  ;;  %v452_v2 = vld [vmem:[%s9820_s11 + $0x3d0] sm:$0xff] }
  0xfa   : > { %v3663_v15 = vsel %vm13967_vm11, %v3662_v1, %v3658_v13  ;;  %vm13969_vm11 = vcmask 1041409  }
  0xfb   : > { %v3672_v17 = vrot.slane %v2424_v8, %v10068_v53  ;;  %v3667_v18 = vrot.slane %v2423_v10, %v10074_v57  ;;  %1189 = vadd.xlane.f32.xlu1 %v1188_v5  ;;  %1186 = vadd.xlane.f32.xlu0 %v1185_v6  ;;  %v1209_v8 = vsel %vm842_vm0, %v452_v2, 0.0 }
  0xfc   : > { %v986_v20 = vpop.xlane.xlu1 %985  ;;  %v983_v21 = vpop.xlane.xlu0 %982 }
  0xfd   : > { %v3668_v24 = vsel %vm3503_vm12, %v3667_v18, %v3663_v15  ;;  %v2426_v25 = vmul.f32 0.020408163, %v986_v20  ;;  %v2425_v26 = vmul.f32 0.020408163, %v983_v21  ;;  %v455_v15 = vld [vmem:[%s9820_s11 + $0x3e8] sm:$0xff] }
  0xfe   : > { %v3673_v32 = vsel %vm3510_vm13, %v3672_v17, %v3668_v24  ;;  %v454_v17 = vld [vmem:[%s9820_s11 + $0x3e0] sm:$0xff]  ;;  %v1218_v24 = vsel %vm842_vm0, %v455_v15, 0.0 }
  0xff   : > { %v3682_v33 = vrot.slane %v2426_v25, %v10084_v7  ;;  %v3677_v35 = vrot.slane %v2425_v26, %v10089_v9  ;;  %1195 = vadd.xlane.f32.xlu1 %v1194_v22  ;;  %1192 = vadd.xlane.f32.xlu0 %v1191_v23  ;;  %v1215_v25 = vsel %vm842_vm0, %v454_v17, 0.0 }
 0x100   : > { %v992_v36 = vpop.xlane.xlu1 %991  ;;  %v989_v38 = vpop.xlane.xlu0 %988 }
 0x101   : > { %v3678_v44 = vsel %vm3517_vm14, %v3677_v35, %v3673_v32  ;;  %v2428_v46 = vmul.f32 0.020408163, %v992_v36  ;;  %v2427_v48 = vmul.f32 0.020408163, %v989_v38  ;;  %v457_v32 = vld [vmem:[%s9820_s11 + $0x3f8] sm:$0xff] }
 0x102   : > { %v3683_v51 = vsel %vm3524_vm15, %v3682_v33, %v3678_v44  ;;  %v456_v33 = vld [vmem:[%s9820_s11 + $0x3f0] sm:$0xff]  ;;  %v1224_v44 = vsel %vm842_vm0, %v457_v32, 0.0 }
 0x103   : > { %v10237_v52 = vsel %vm13969_vm11, %v3683_v51, %v10105_v41  ;;  %v3691_v54 = vrot.slane %v2428_v46, %v9987_v29  ;;  %v3687_v55 = vrot.slane %v2427_v48, %v9984_v27  ;;  %1201 = vadd.xlane.f32.xlu1 %v1200_v40  ;;  %1198 = vadd.xlane.f32.xlu0 %v1197_v43  ;;  %v453_v41 = vld [vmem:[%s9820_s11 + $0x3d8] sm:$0xff]  ;;  %v1221_v46 = vsel %vm842_vm0, %v456_v33, 0.0  ;;  %v459_v51 = vld [vmem:[%s9820_s11 + $0x408] sm:$0xff] }
 0x104   : > { %v998_v56 = vpop.xlane.xlu1 %997  ;;  %v995_v58 = vpop.xlane.xlu0 %994  ;;  %v1212_v13 = vsel %vm842_vm0, %v453_v41, 0.0 }
 0x105   : > { %v3692_v63 = vsel %vm3426_vm1, %v3691_v54, %v3687_v55  ;;  %v2430_v0 = vmul.f32 0.020408163, %v998_v56  ;;  %v2429_v1 = vmul.f32 0.020408163, %v995_v58  ;;  %v458_v54 = vld [vmem:[%s9820_s11 + $0x400] sm:$0xff] }
 0x107   : > { %v3701_v3 = vrot.slane %v2430_v0, %v9996_v37  ;;  %v3696_v4 = vrot.slane %v2429_v1, %v9991_v31  ;;  %1207 = vadd.xlane.f32.xlu1 %v1206_v59  ;;  %1204 = vadd.xlane.f32.xlu0 %v1203_v62  ;;  %v1227_v0 = vsel %vm842_vm0, %v458_v54, 0.0 }
 0x108   : > { %v1004_v5 = vpop.xlane.xlu1 %1003  ;;  %v1001_v6 = vpop.xlane.xlu0 %1000 }
 0x109   : > { %v3697_v10 = vsel %vm3433_vm2, %v3696_v4, %v3692_v63  ;;  %v2432_v11 = vmul.f32 0.020408163, %v1004_v5  ;;  %v2431_v12 = vmul.f32 0.020408163, %v1001_v6  ;;  %v1230_v63 = vsel %vm842_vm0, %v459_v51, 0.0  ;;  %v460_v4 = vld [vmem:[%s9820_s11 + $0x410] sm:$0xff] }
 0x10a   : > { %v3702_v18 = vsel %vm3440_vm3, %v3701_v3, %v3697_v10  ;;  %v461_v3 = vld [vmem:[%s9820_s11 + $0x418] sm:$0xff] }
 0x10b   : > { %v3711_v20 = vrot.slane %v2432_v11, %v10001_v42  ;;  %v3706_v21 = vrot.slane %v2431_v12, %v10008_v47  ;;  %1213 = vadd.xlane.f32.xlu1 %v1212_v13  ;;  %1210 = vadd.xlane.f32.xlu0 %v1209_v8  ;;  %v1236_v11 = vsel %vm842_vm0, %v461_v3, 0.0  ;;  %v1233_v12 = vsel %vm842_vm0, %v460_v4, 0.0 }
 0x10c   : > { %v1010_v22 = vpop.xlane.xlu1 %1009  ;;  %v1007_v23 = vpop.xlane.xlu0 %1006 }
 0x10d   : > { %v3707_v26 = vsel %vm3447_vm4, %v3706_v21, %v3702_v18  ;;  %v2434_v28 = vmul.f32 0.020408163, %v1010_v22  ;;  %v2433_v30 = vmul.f32 0.020408163, %v1007_v23  ;;  %v462_v21 = vld [vmem:[%s9820_s11 + $0x420] sm:$0xff] }
 0x10e   : > { %v3712_v35 = vsel %vm3454_vm5, %v3711_v20, %v3707_v26  ;;  %v463_v20 = vld [vmem:[%s9820_s11 + $0x428] sm:$0xff] }
 0x10f   : > { %v3721_v36 = vrot.slane %v2434_v28, %v10019_v60  ;;  %v3716_v38 = vrot.slane %v2433_v30, %v10022_v61  ;;  %1219 = vadd.xlane.f32.xlu1 %v1218_v24  ;;  %1216 = vadd.xlane.f32.xlu0 %v1215_v25  ;;  %v1242_v28 = vsel %vm842_vm0, %v463_v20, 0.0  ;;  %v1239_v30 = vsel %vm842_vm0, %v462_v21, 0.0 }
 0x110   : > { %v1016_v40 = vpop.xlane.xlu1 %1015  ;;  %v1013_v43 = vpop.xlane.xlu0 %1012 }
 0x111   : > { %v3717_v48 = vsel %vm3461_vm6, %v3716_v38, %v3712_v35  ;;  %v2436_v49 = vmul.f32 0.020408163, %v1016_v40  ;;  %v2435_v50 = vmul.f32 0.020408163, %v1013_v43  ;;  %v464_v38 = vld [vmem:[%s9820_s11 + $0x430] sm:$0xff] }
 0x112   : > { %v3722_v55 = vsel %vm13975_vm7, %v3721_v36, %v3717_v48  ;;  %v465_v36 = vld [vmem:[%s9820_s11 + $0x438] sm:$0xff] }
 0x113   : > { %v3731_v56 = vrot.slane %v2436_v49, %v10036_v14  ;;  %v3726_v58 = vrot.slane %v2435_v50, %v10042_v19  ;;  %1225 = vadd.xlane.f32.xlu1 %v1224_v44  ;;  %1222 = vadd.xlane.f32.xlu0 %v1221_v46  ;;  %v1248_v49 = vsel %vm842_vm0, %v465_v36, 0.0  ;;  %v1245_v50 = vsel %vm842_vm0, %v464_v38, 0.0 }
 0x114   : > { %v1022_v59 = vpop.xlane.xlu1 %1021  ;;  %v1019_v62 = vpop.xlane.xlu0 %1018 }
 0x115   : > { %v3727_v1 = vsel %vm3475_vm8, %v3726_v58, %v3722_v55  ;;  %v2438_v41 = vmul.f32 0.020408163, %v1022_v59  ;;  %v2437_v2 = vmul.f32 0.020408163, %v1019_v62  ;;  %v466_v58 = vld [vmem:[%s9820_s11 + $0x440] sm:$0xff] }
 0x116   : > { %v3732_v5 = vsel %vm13968_vm9, %v3731_v56, %v3727_v1  ;;  %vm13987_vm9 = vcmask 786112   ;;  %v467_v56 = vld [vmem:[%s9820_s11 + $0x448] sm:$0xff]  ;;  %v1251_v3 = vsel %vm842_vm0, %v466_v58, 0.0 }
 0x117   : > { %v3741_v6 = vrot.slane %v2438_v41, %v10052_v34  ;;  %v3736_v13 = vrot.slane %v2437_v2, %v10058_v39  ;;  %1231 = vadd.xlane.f32.xlu1 %v1230_v63  ;;  %1228 = vadd.xlane.f32.xlu0 %v1227_v0  ;;  %v1254_v2 = vsel %vm842_vm0, %v467_v56, 0.0 }
 0x118   : > { %v1028_v8 = vpop.xlane.xlu1 %1027  ;;  %v1025_v10 = vpop.xlane.xlu0 %1024 }
 0x119   : > { %v3737_v15 = vsel %vm3489_vm10, %v3736_v13, %v3732_v5  ;;  %v2440_v17 = vmul.f32 0.020408163, %v1028_v8  ;;  %v2439_v18 = vmul.f32 0.020408163, %v1025_v10  ;;  %v468_v13 = vld [vmem:[%s9820_s11 + $0x450] sm:$0xff] }
 0x11a   : > { %v3742_v22 = vsel %vm13987_vm9, %v3741_v6, %v3737_v15  ;;  %vm13988_vm9 = vcmask 654912  }
 0x11b   : > { %v3751_v23 = vrot.slane %v2440_v17, %v10068_v53  ;;  %v3746_v24 = vrot.slane %v2439_v18, %v10074_v57  ;;  %1237 = vadd.xlane.f32.xlu1 %v1236_v11  ;;  %1234 = vadd.xlane.f32.xlu0 %v1233_v12  ;;  %v1257_v17 = vsel %vm842_vm0, %v468_v13, 0.0 }
 0x11c   : > { %v1034_v25 = vpop.xlane.xlu1 %1033  ;;  %v1031_v26 = vpop.xlane.xlu0 %1030 }
 0x11d   : > { %v3747_v32 = vsel %vm3503_vm12, %v3746_v24, %v3742_v22  ;;  %v2442_v33 = vmul.f32 0.020408163, %v1034_v25  ;;  %v2441_v35 = vmul.f32 0.020408163, %v1031_v26  ;;  %v471_v22 = vld [vmem:[%s9820_s11 + $0x468] sm:$0xff] }
 0x11e   : > { %v3752_v40 = vsel %vm3510_vm13, %v3751_v23, %v3747_v32  ;;  %v470_v23 = vld [vmem:[%s9820_s11 + $0x460] sm:$0xff]  ;;  %v1266_v32 = vsel %vm842_vm0, %v471_v22, 0.0 }
 0x11f   : > { %v3761_v43 = vrot.slane %v2442_v33, %v10084_v7  ;;  %v3756_v44 = vrot.slane %v2441_v35, %v10089_v9  ;;  %1243 = vadd.xlane.f32.xlu1 %v1242_v28  ;;  %1240 = vadd.xlane.f32.xlu0 %v1239_v30  ;;  %v1263_v33 = vsel %vm842_vm0, %v470_v23, 0.0 }
 0x120   : > { %v1040_v46 = vpop.xlane.xlu1 %1039  ;;  %v1037_v48 = vpop.xlane.xlu0 %1036 }
 0x121   : > { %v3757_v51 = vsel %vm3517_vm14, %v3756_v44, %v3752_v40  ;;  %v2444_v54 = vmul.f32 0.020408163, %v1040_v46  ;;  %v2443_v55 = vmul.f32 0.020408163, %v1037_v48  ;;  %v473_v40 = vld [vmem:[%s9820_s11 + $0x478] sm:$0xff] }
 0x122   : > { %v3762_v59 = vsel %vm3524_vm15, %v3761_v43, %v3757_v51  ;;  %v472_v43 = vld [vmem:[%s9820_s11 + $0x470] sm:$0xff]  ;;  %v1272_v51 = vsel %vm842_vm0, %v473_v40, 0.0 }
 0x123   : > { %v10304_v62 = vsel %vm13969_vm11, %v3762_v59, %v10170_v45  ;;  %v3770_v63 = vrot.slane %v2444_v54, %v9987_v29  ;;  %v3766_v0 = vrot.slane %v2443_v55, %v9984_v27  ;;  %1249 = vadd.xlane.f32.xlu1 %v1248_v49  ;;  %1246 = vadd.xlane.f32.xlu0 %v1245_v50  ;;  %v469_v45 = vld [vmem:[%s9820_s11 + $0x458] sm:$0xff]  ;;  %v1269_v54 = vsel %vm842_vm0, %v472_v43, 0.0  ;;  %v475_v59 = vld [vmem:[%s9820_s11 + $0x488] sm:$0xff] }
 0x124   : > { %v1046_v1 = vpop.xlane.xlu1 %1045  ;;  %v1043_v41 = vpop.xlane.xlu0 %1042  ;;  %v1260_v15 = vsel %vm842_vm0, %v469_v45, 0.0  ;;  %vm13990_vm11 = vcmask 654912  }
 0x125   : > { %v3771_v4 = vsel %vm3426_vm1, %v3770_v63, %v3766_v0  ;;  %v2446_v5 = vmul.f32 0.020408163, %v1046_v1  ;;  %v2445_v6 = vmul.f32 0.020408163, %v1043_v41  ;;  %v474_v63 = vld [vmem:[%s9820_s11 + $0x480] sm:$0xff] }
 0x127   : > { %v3780_v8 = vrot.slane %v2446_v5, %v9996_v37  ;;  %v3775_v10 = vrot.slane %v2445_v6, %v9991_v31  ;;  %1255 = vadd.xlane.f32.xlu1 %v1254_v2  ;;  %1252 = vadd.xlane.f32.xlu0 %v1251_v3  ;;  %v1275_v5 = vsel %vm842_vm0, %v474_v63, 0.0 }
 0x128   : > { %v1052_v11 = vpop.xlane.xlu1 %1051  ;;  %v1049_v12 = vpop.xlane.xlu0 %1048 }
 0x129   : > { %v3776_v18 = vsel %vm3433_vm2, %v3775_v10, %v3771_v4  ;;  %v2448_v20 = vmul.f32 0.020408163, %v1052_v11  ;;  %v2447_v21 = vmul.f32 0.020408163, %v1049_v12  ;;  %v1278_v4 = vsel %vm842_vm0, %v475_v59, 0.0  ;;  %v476_v10 = vld [vmem:[%s9820_s11 + $0x490] sm:$0xff] }
 0x12a   : > { %v3781_v24 = vsel %vm3440_vm3, %v3780_v8, %v3776_v18  ;;  %v477_v8 = vld [vmem:[%s9820_s11 + $0x498] sm:$0xff] }
 0x12b   : > { %v3790_v25 = vrot.slane %v2448_v20, %v10001_v42  ;;  %v3785_v26 = vrot.slane %v2447_v21, %v10008_v47  ;;  %1261 = vadd.xlane.f32.xlu1 %v1260_v15  ;;  %1258 = vadd.xlane.f32.xlu0 %v1257_v17  ;;  %v1284_v20 = vsel %vm842_vm0, %v477_v8, 0.0  ;;  %v1281_v21 = vsel %vm842_vm0, %v476_v10, 0.0 }
 0x12c   : > { %v1058_v28 = vpop.xlane.xlu1 %1057  ;;  %v1055_v30 = vpop.xlane.xlu0 %1054 }
 0x12d   : > { %v3786_v35 = vsel %vm3447_vm4, %v3785_v26, %v3781_v24  ;;  %v2450_v36 = vmul.f32 0.020408163, %v1058_v28  ;;  %v2449_v38 = vmul.f32 0.020408163, %v1055_v30  ;;  %v478_v26 = vld [vmem:[%s9820_s11 + $0x4a0] sm:$0xff] }
 0x12e   : > { %v3791_v44 = vsel %vm3454_vm5, %v3790_v25, %v3786_v35  ;;  %v479_v25 = vld [vmem:[%s9820_s11 + $0x4a8] sm:$0xff] }
 0x12f   : > { %v3800_v46 = vrot.slane %v2450_v36, %v10019_v60  ;;  %v3795_v48 = vrot.slane %v2449_v38, %v10022_v61  ;;  %1267 = vadd.xlane.f32.xlu1 %v1266_v32  ;;  %1264 = vadd.xlane.f32.xlu0 %v1263_v33  ;;  %v1290_v36 = vsel %vm842_vm0, %v479_v25, 0.0  ;;  %v1287_v38 = vsel %vm842_vm0, %v478_v26, 0.0 }
 0x130   : > { %v1064_v49 = vpop.xlane.xlu1 %1063  ;;  %v1061_v50 = vpop.xlane.xlu0 %1060 }
 0x131   : > { %v3796_v55 = vsel %vm3461_vm6, %v3795_v48, %v3791_v44  ;;  %v2452_v56 = vmul.f32 0.020408163, %v1064_v49  ;;  %v2451_v58 = vmul.f32 0.020408163, %v1061_v50  ;;  %v480_v48 = vld [vmem:[%s9820_s11 + $0x4b0] sm:$0xff] }
 0x132   : > { %v3801_v0 = vsel %vm13975_vm7, %v3800_v46, %v3796_v55  ;;  %v481_v46 = vld [vmem:[%s9820_s11 + $0x4b8] sm:$0xff] }
 0x133   : > { %v3810_v1 = vrot.slane %v2452_v56, %v10036_v14  ;;  %v3805_v41 = vrot.slane %v2451_v58, %v10042_v19  ;;  %1273 = vadd.xlane.f32.xlu1 %v1272_v51  ;;  %1270 = vadd.xlane.f32.xlu0 %v1269_v54  ;;  %v1296_v56 = vsel %vm842_vm0, %v481_v46, 0.0  ;;  %v1293_v58 = vsel %vm842_vm0, %v480_v48, 0.0 }
 0x134   : > { %v1070_v2 = vpop.xlane.xlu1 %1069  ;;  %v1067_v3 = vpop.xlane.xlu0 %1066 }
 0x135   : > { %v3806_v6 = vsel %vm3475_vm8, %v3805_v41, %v3801_v0  ;;  %v2454_v45 = vmul.f32 0.020408163, %v1070_v2  ;;  %v2453_v13 = vmul.f32 0.020408163, %v1067_v3  ;;  %v482_v41 = vld [vmem:[%s9820_s11 + $0x4c0] sm:$0xff] }
 0x136   : > { %v3811_v11 = vsel %vm13988_vm9, %v3810_v1, %v3806_v6  ;;  %vm13989_vm9 = vcmask 786112   ;;  %v483_v1 = vld [vmem:[%s9820_s11 + $0x4c8] sm:$0xff]  ;;  %v1299_v8 = vsel %vm842_vm0, %v482_v41, 0.0 }
 0x137   : > { %v3820_v12 = vrot.slane %v2454_v45, %v10052_v34  ;;  %v3815_v15 = vrot.slane %v2453_v13, %v10058_v39  ;;  %1279 = vadd.xlane.f32.xlu1 %v1278_v4  ;;  %1276 = vadd.xlane.f32.xlu0 %v1275_v5  ;;  %v1302_v13 = vsel %vm842_vm0, %v483_v1, 0.0 }
 0x138   : > { %v1076_v17 = vpop.xlane.xlu1 %1075  ;;  %v1073_v18 = vpop.xlane.xlu0 %1072 }
 0x139   : > { %v3816_v22 = vsel %vm3489_vm10, %v3815_v15, %v3811_v11  ;;  %v2456_v23 = vmul.f32 0.020408163, %v1076_v17  ;;  %v2455_v24 = vmul.f32 0.020408163, %v1073_v18  ;;  %v484_v15 = vld [vmem:[%s9820_s11 + $0x4d0] sm:$0xff] }
 0x13a   : > { %v3821_v28 = vsel %vm13989_vm9, %v3820_v12, %v3816_v22  ;;  %vm13970_vm9 = vcmask 1042434  }
 0x13b   : > { %v3830_v30 = vrot.slane %v2456_v23, %v10068_v53  ;;  %v3825_v32 = vrot.slane %v2455_v24, %v10074_v57  ;;  %1285 = vadd.xlane.f32.xlu1 %v1284_v20  ;;  %1282 = vadd.xlane.f32.xlu0 %v1281_v21  ;;  %v1305_v23 = vsel %vm842_vm0, %v484_v15, 0.0 }
 0x13c   : > { %v1082_v33 = vpop.xlane.xlu1 %1081  ;;  %v1079_v35 = vpop.xlane.xlu0 %1078 }
 0x13d   : > { %v3826_v40 = vsel %vm3503_vm12, %v3825_v32, %v3821_v28  ;;  %v2458_v43 = vmul.f32 0.020408163, %v1082_v33  ;;  %v2457_v44 = vmul.f32 0.020408163, %v1079_v35  ;;  %v487_v28 = vld [vmem:[%s9820_s11 + $0x4e8] sm:$0xff] }
 0x13e   : > { %v3831_v49 = vsel %vm3510_vm13, %v3830_v30, %v3826_v40  ;;  %v486_v30 = vld [vmem:[%s9820_s11 + $0x4e0] sm:$0xff]  ;;  %v1314_v40 = vsel %vm842_vm0, %v487_v28, 0.0 }
 0x13f   : > { %v3840_v50 = vrot.slane %v2458_v43, %v10084_v7  ;;  %v3835_v51 = vrot.slane %v2457_v44, %v10089_v9  ;;  %1291 = vadd.xlane.f32.xlu1 %v1290_v36  ;;  %1288 = vadd.xlane.f32.xlu0 %v1287_v38  ;;  %v1311_v43 = vsel %vm842_vm0, %v486_v30, 0.0 }
 0x140   : > { %v1088_v54 = vpop.xlane.xlu1 %1087  ;;  %v1085_v55 = vpop.xlane.xlu0 %1084 }
 0x141   : > { %v3836_v59 = vsel %vm3517_vm14, %v3835_v51, %v3831_v49  ;;  %v2460_v63 = vmul.f32 0.020408163, %v1088_v54  ;;  %v2459_v0 = vmul.f32 0.020408163, %v1085_v55  ;;  %v489_v49 = vld [vmem:[%s9820_s11 + $0x4f8] sm:$0xff] }
 0x142   : > { %v3841_v2 = vsel %vm3524_vm15, %v3840_v50, %v3836_v59  ;;  %v488_v50 = vld [vmem:[%s9820_s11 + $0x4f0] sm:$0xff]  ;;  %v1320_v59 = vsel %vm842_vm0, %v489_v49, 0.0 }
 0x143   : > { %v10371_v3 = vsel %vm13970_vm9, %v3841_v2, %v10237_v52  ;;  %v3849_v4 = vrot.slane %v2460_v63, %v9987_v29  ;;  %v3845_v5 = vrot.slane %v2459_v0, %v9984_v27  ;;  %1297 = vadd.xlane.f32.xlu1 %v1296_v56  ;;  %1294 = vadd.xlane.f32.xlu0 %v1293_v58  ;;  %v485_v52 = vld [vmem:[%s9820_s11 + $0x4d8] sm:$0xff]  ;;  %v1317_v63 = vsel %vm842_vm0, %v488_v50, 0.0  ;;  %v491_v2 = vld [vmem:[%s9820_s11 + $0x508] sm:$0xff] }
 0x144   : > { %v1094_v6 = vpop.xlane.xlu1 %1093  ;;  %v1091_v45 = vpop.xlane.xlu0 %1090  ;;  %v1308_v22 = vsel %vm842_vm0, %v485_v52, 0.0 }
 0x145   : > { %v3850_v10 = vsel %vm3426_vm1, %v3849_v4, %v3845_v5  ;;  %v2462_v11 = vmul.f32 0.020408163, %v1094_v6  ;;  %v2461_v12 = vmul.f32 0.020408163, %v1091_v45  ;;  %v490_v4 = vld [vmem:[%s9820_s11 + $0x500] sm:$0xff] }
 0x147   : > { %v3859_v17 = vrot.slane %v2462_v11, %v9996_v37  ;;  %v3854_v18 = vrot.slane %v2461_v12, %v9991_v31  ;;  %1303 = vadd.xlane.f32.xlu1 %v1302_v13  ;;  %1300 = vadd.xlane.f32.xlu0 %v1299_v8  ;;  %v1323_v11 = vsel %vm842_vm0, %v490_v4, 0.0 }
 0x148   : > { %v1100_v20 = vpop.xlane.xlu1 %1099  ;;  %v1097_v21 = vpop.xlane.xlu0 %1096 }
 0x149   : > { %v3855_v24 = vsel %vm3433_vm2, %v3854_v18, %v3850_v10  ;;  %v2464_v25 = vmul.f32 0.020408163, %v1100_v20  ;;  %v2463_v26 = vmul.f32 0.020408163, %v1097_v21  ;;  %v1326_v10 = vsel %vm842_vm0, %v491_v2, 0.0  ;;  %v492_v18 = vld [vmem:[%s9820_s11 + $0x510] sm:$0xff] }
 0x14a   : > { %v3860_v32 = vsel %vm3440_vm3, %v3859_v17, %v3855_v24  ;;  %v493_v17 = vld [vmem:[%s9820_s11 + $0x518] sm:$0xff] }
 0x14b   : > { %v3869_v33 = vrot.slane %v2464_v25, %v10001_v42  ;;  %v3864_v35 = vrot.slane %v2463_v26, %v10008_v47  ;;  %1309 = vadd.xlane.f32.xlu1 %v1308_v22  ;;  %1306 = vadd.xlane.f32.xlu0 %v1305_v23  ;;  %v1332_v25 = vsel %vm842_vm0, %v493_v17, 0.0  ;;  %v1329_v26 = vsel %vm842_vm0, %v492_v18, 0.0 }
 0x14c   : > { %v1106_v36 = vpop.xlane.xlu1 %1105  ;;  %v1103_v38 = vpop.xlane.xlu0 %1102 }
 0x14d   : > { %v3865_v44 = vsel %vm3447_vm4, %v3864_v35, %v3860_v32  ;;  %v2466_v46 = vmul.f32 0.020408163, %v1106_v36  ;;  %v2465_v48 = vmul.f32 0.020408163, %v1103_v38  ;;  %v494_v35 = vld [vmem:[%s9820_s11 + $0x520] sm:$0xff] }
 0x14e   : > { %v3870_v51 = vsel %vm3454_vm5, %v3869_v33, %v3865_v44  ;;  %v495_v33 = vld [vmem:[%s9820_s11 + $0x528] sm:$0xff] }
 0x14f   : > { %v3879_v54 = vrot.slane %v2466_v46, %v10019_v60  ;;  %v3874_v55 = vrot.slane %v2465_v48, %v10022_v61  ;;  %1315 = vadd.xlane.f32.xlu1 %v1314_v40  ;;  %1312 = vadd.xlane.f32.xlu0 %v1311_v43  ;;  %v1338_v46 = vsel %vm842_vm0, %v495_v33, 0.0  ;;  %v1335_v48 = vsel %vm842_vm0, %v494_v35, 0.0 }
 0x150   : > { %v1112_v56 = vpop.xlane.xlu1 %1111  ;;  %v1109_v58 = vpop.xlane.xlu0 %1108 }
 0x151   : > { %v3875_v0 = vsel %vm3461_vm6, %v3874_v55, %v3870_v51  ;;  %v2468_v1 = vmul.f32 0.020408163, %v1112_v56  ;;  %v2467_v41 = vmul.f32 0.020408163, %v1109_v58  ;;  %v496_v55 = vld [vmem:[%s9820_s11 + $0x530] sm:$0xff] }
 0x152   : > { %v3880_v5 = vsel %vm13975_vm7, %v3879_v54, %v3875_v0  ;;  %v497_v54 = vld [vmem:[%s9820_s11 + $0x538] sm:$0xff] }
 0x153   : > { %v3889_v6 = vrot.slane %v2468_v1, %v10036_v14  ;;  %v3884_v45 = vrot.slane %v2467_v41, %v10042_v19  ;;  %1321 = vadd.xlane.f32.xlu1 %v1320_v59  ;;  %1318 = vadd.xlane.f32.xlu0 %v1317_v63  ;;  %v1344_v1 = vsel %vm842_vm0, %v497_v54, 0.0  ;;  %v1341_v41 = vsel %vm842_vm0, %v496_v55, 0.0 }
 0x154   : > { %v1118_v13 = vpop.xlane.xlu1 %1117  ;;  %v1115_v8 = vpop.xlane.xlu0 %1114 }
 0x155   : > { %v3885_v12 = vsel %vm3475_vm8, %v3884_v45, %v3880_v5  ;;  %v2470_v52 = vmul.f32 0.020408163, %v1118_v13  ;;  %v2469_v15 = vmul.f32 0.020408163, %v1115_v8  ;;  %v498_v45 = vld [vmem:[%s9820_s11 + $0x540] sm:$0xff] }
 0x156   : > { %v3890_v20 = vsel %vm13990_vm11, %v3889_v6, %v3885_v12  ;;  %vm13991_vm11 = vcmask 786112   ;;  %v499_v6 = vld [vmem:[%s9820_s11 + $0x548] sm:$0xff]  ;;  %v1347_v17 = vsel %vm842_vm0, %v498_v45, 0.0 }
 0x157   : > { %v3899_v21 = vrot.slane %v2470_v52, %v10052_v34  ;;  %v3894_v22 = vrot.slane %v2469_v15, %v10058_v39  ;;  %1327 = vadd.xlane.f32.xlu1 %v1326_v10  ;;  %1324 = vadd.xlane.f32.xlu0 %v1323_v11  ;;  %v1350_v15 = vsel %vm842_vm0, %v499_v6, 0.0 }
 0x158   : > { %v1124_v23 = vpop.xlane.xlu1 %1123  ;;  %v1121_v24 = vpop.xlane.xlu0 %1120 }
 0x159   : > { %v3895_v28 = vsel %vm3489_vm10, %v3894_v22, %v3890_v20  ;;  %v2472_v30 = vmul.f32 0.020408163, %v1124_v23  ;;  %v2471_v32 = vmul.f32 0.020408163, %v1121_v24  ;;  %v500_v22 = vld [vmem:[%s9820_s11 + $0x550] sm:$0xff] }
 0x15a   : > { %v3900_v36 = vsel %vm13991_vm11, %v3899_v21, %v3895_v28  ;;  %vm13992_vm11 = vcmask 654912  }
 0x15b   : > { %v3909_v38 = vrot.slane %v2472_v30, %v10068_v53  ;;  %v3904_v40 = vrot.slane %v2471_v32, %v10074_v57  ;;  %1333 = vadd.xlane.f32.xlu1 %v1332_v25  ;;  %1330 = vadd.xlane.f32.xlu0 %v1329_v26  ;;  %v1353_v30 = vsel %vm842_vm0, %v500_v22, 0.0 }
 0x15c   : > { %v1130_v43 = vpop.xlane.xlu1 %1129  ;;  %v1127_v44 = vpop.xlane.xlu0 %1126 }
 0x15d   : > { %v3905_v49 = vsel %vm3503_vm12, %v3904_v40, %v3900_v36  ;;  %v2474_v50 = vmul.f32 0.020408163, %v1130_v43  ;;  %v2473_v51 = vmul.f32 0.020408163, %v1127_v44  ;;  %v503_v36 = vld [vmem:[%s9820_s11 + $0x568] sm:$0xff] }
 0x15e   : > { %v3910_v56 = vsel %vm3510_vm13, %v3909_v38, %v3905_v49  ;;  %v502_v38 = vld [vmem:[%s9820_s11 + $0x560] sm:$0xff]  ;;  %v1362_v49 = vsel %vm842_vm0, %v503_v36, 0.0 }
 0x15f   : > { %v3919_v58 = vrot.slane %v2474_v50, %v10084_v7  ;;  %v3914_v59 = vrot.slane %v2473_v51, %v10089_v9  ;;  %1339 = vadd.xlane.f32.xlu1 %v1338_v46  ;;  %1336 = vadd.xlane.f32.xlu0 %v1335_v48  ;;  %v1359_v50 = vsel %vm842_vm0, %v502_v38, 0.0 }
 0x160   : > { %v1136_v63 = vpop.xlane.xlu1 %1135  ;;  %v1133_v0 = vpop.xlane.xlu0 %1132 }
 0x161   : > { %v3915_v2 = vsel %vm3517_vm14, %v3914_v59, %v3910_v56  ;;  %v2476_v4 = vmul.f32 0.020408163, %v1136_v63  ;;  %v2475_v5 = vmul.f32 0.020408163, %v1133_v0  ;;  %v505_v56 = vld [vmem:[%s9820_s11 + $0x578] sm:$0xff] }
 0x162   : > { %v3920_v13 = vsel %vm3524_vm15, %v3919_v58, %v3915_v2  ;;  %v504_v58 = vld [vmem:[%s9820_s11 + $0x570] sm:$0xff]  ;;  %v1368_v2 = vsel %vm842_vm0, %v505_v56, 0.0 }
 0x163   : > { %v10438_v8 = vsel %vm13970_vm9, %v3920_v13, %v10304_v62  ;;  %v3928_v10 = vrot.slane %v2476_v4, %v9987_v29  ;;  %v3924_v11 = vrot.slane %v2475_v5, %v9984_v27  ;;  %1345 = vadd.xlane.f32.xlu1 %v1344_v1  ;;  %1342 = vadd.xlane.f32.xlu0 %v1341_v41  ;;  %v501_v62 = vld [vmem:[%s9820_s11 + $0x558] sm:$0xff]  ;;  %v1365_v4 = vsel %vm842_vm0, %v504_v58, 0.0  ;;  %v507_v13 = vld [vmem:[%s9820_s11 + $0x588] sm:$0xff] }
 0x164   : > { %v1142_v12 = vpop.xlane.xlu1 %1141  ;;  %v1139_v52 = vpop.xlane.xlu0 %1138  ;;  %v1356_v28 = vsel %vm842_vm0, %v501_v62, 0.0  ;;  %vm13994_vm9 = vcmask 654912  }
 0x165   : > { %v3929_v18 = vsel %vm3426_vm1, %v3928_v10, %v3924_v11  ;;  %v2478_v20 = vmul.f32 0.020408163, %v1142_v12  ;;  %v2477_v21 = vmul.f32 0.020408163, %v1139_v52  ;;  %v506_v10 = vld [vmem:[%s9820_s11 + $0x580] sm:$0xff] }
 0x167   : > { %v3938_v23 = vrot.slane %v2478_v20, %v9996_v37  ;;  %v3933_v24 = vrot.slane %v2477_v21, %v9991_v31  ;;  %1351 = vadd.xlane.f32.xlu1 %v1350_v15  ;;  %1348 = vadd.xlane.f32.xlu0 %v1347_v17  ;;  %v1371_v20 = vsel %vm842_vm0, %v506_v10, 0.0 }
 0x168   : > { %v1148_v25 = vpop.xlane.xlu1 %1147  ;;  %v1145_v26 = vpop.xlane.xlu0 %1144 }
 0x169   : > { %v3934_v32 = vsel %vm3433_vm2, %v3933_v24, %v3929_v18  ;;  %v2480_v33 = vmul.f32 0.020408163, %v1148_v25  ;;  %v2479_v35 = vmul.f32 0.020408163, %v1145_v26  ;;  %v1374_v18 = vsel %vm842_vm0, %v507_v13, 0.0  ;;  %v508_v24 = vld [vmem:[%s9820_s11 + $0x590] sm:$0xff] }
 0x16a   : > { %v3939_v40 = vsel %vm3440_vm3, %v3938_v23, %v3934_v32  ;;  %v509_v23 = vld [vmem:[%s9820_s11 + $0x598] sm:$0xff] }
 0x16b   : > { %v3948_v43 = vrot.slane %v2480_v33, %v10001_v42  ;;  %v3943_v44 = vrot.slane %v2479_v35, %v10008_v47  ;;  %1357 = vadd.xlane.f32.xlu1 %v1356_v28  ;;  %1354 = vadd.xlane.f32.xlu0 %v1353_v30  ;;  %v1380_v33 = vsel %vm842_vm0, %v509_v23, 0.0  ;;  %v1377_v35 = vsel %vm842_vm0, %v508_v24, 0.0 }
 0x16c   : > { %v1154_v46 = vpop.xlane.xlu1 %1153  ;;  %v1151_v48 = vpop.xlane.xlu0 %1150 }
 0x16d   : > { %v3944_v51 = vsel %vm3447_vm4, %v3943_v44, %v3939_v40  ;;  %v2482_v54 = vmul.f32 0.020408163, %v1154_v46  ;;  %v2481_v55 = vmul.f32 0.020408163, %v1151_v48  ;;  %v510_v44 = vld [vmem:[%s9820_s11 + $0x5a0] sm:$0xff] }
 0x16e   : > { %v3949_v59 = vsel %vm3454_vm5, %v3948_v43, %v3944_v51  ;;  %v511_v43 = vld [vmem:[%s9820_s11 + $0x5a8] sm:$0xff] }
 0x16f   : > { %v3958_v63 = vrot.slane %v2482_v54, %v10019_v60  ;;  %v3953_v0 = vrot.slane %v2481_v55, %v10022_v61  ;;  %1363 = vadd.xlane.f32.xlu1 %v1362_v49  ;;  %1360 = vadd.xlane.f32.xlu0 %v1359_v50  ;;  %v1386_v54 = vsel %vm842_vm0, %v511_v43, 0.0  ;;  %v1383_v55 = vsel %vm842_vm0, %v510_v44, 0.0 }
 0x170   : > { %v1160_v1 = vpop.xlane.xlu1 %1159  ;;  %v1157_v41 = vpop.xlane.xlu0 %1156 }
 0x171   : > { %v3954_v5 = vsel %vm3461_vm6, %v3953_v0, %v3949_v59  ;;  %v2484_v6 = vmul.f32 0.020408163, %v1160_v1  ;;  %v2483_v45 = vmul.f32 0.020408163, %v1157_v41  ;;  %v512_v0 = vld [vmem:[%s9820_s11 + $0x5b0] sm:$0xff] }
 0x172   : > { %v3959_v11 = vsel %vm13975_vm7, %v3958_v63, %v3954_v5  ;;  %v513_v63 = vld [vmem:[%s9820_s11 + $0x5b8] sm:$0xff] }
 0x173   : > { %v3968_v12 = vrot.slane %v2484_v6, %v10036_v14  ;;  %v3963_v52 = vrot.slane %v2483_v45, %v10042_v19  ;;  %1369 = vadd.xlane.f32.xlu1 %v1368_v2  ;;  %1366 = vadd.xlane.f32.xlu0 %v1365_v4  ;;  %v1392_v6 = vsel %vm842_vm0, %v513_v63, 0.0  ;;  %v1389_v45 = vsel %vm842_vm0, %v512_v0, 0.0 }
 0x174   : > { %v1166_v15 = vpop.xlane.xlu1 %1165  ;;  %v1163_v17 = vpop.xlane.xlu0 %1162 }
 0x175   : > { %v3964_v21 = vsel %vm3475_vm8, %v3963_v52, %v3959_v11  ;;  %v2486_v62 = vmul.f32 0.020408163, %v1166_v15  ;;  %v2485_v22 = vmul.f32 0.020408163, %v1163_v17  ;;  %v514_v52 = vld [vmem:[%s9820_s11 + $0x5c0] sm:$0xff] }
 0x176   : > { %v3969_v25 = vsel %vm13992_vm11, %v3968_v12, %v3964_v21  ;;  %vm13993_vm11 = vcmask 786112   ;;  %v515_v12 = vld [vmem:[%s9820_s11 + $0x5c8] sm:$0xff]  ;;  %v1395_v23 = vsel %vm842_vm0, %v514_v52, 0.0 }
 0x177   : > { %v3978_v26 = vrot.slane %v2486_v62, %v10052_v34  ;;  %v3973_v28 = vrot.slane %v2485_v22, %v10058_v39  ;;  %1375 = vadd.xlane.f32.xlu1 %v1374_v18  ;;  %1372 = vadd.xlane.f32.xlu0 %v1371_v20  ;;  %v1398_v22 = vsel %vm842_vm0, %v515_v12, 0.0 }
 0x178   : > { %v1172_v30 = vpop.xlane.xlu1 %1171  ;;  %v1169_v32 = vpop.xlane.xlu0 %1168 }
 0x179   : > { %v3974_v36 = vsel %vm3489_vm10, %v3973_v28, %v3969_v25  ;;  %v2488_v38 = vmul.f32 0.020408163, %v1172_v30  ;;  %v2487_v40 = vmul.f32 0.020408163, %v1169_v32  ;;  %v516_v28 = vld [vmem:[%s9820_s11 + $0x5d0] sm:$0xff] }
 0x17a   : > { %v3979_v46 = vsel %vm13993_vm11, %v3978_v26, %v3974_v36  ;;  %vm13971_vm11 = vcmask 1043459  }
 0x17b   : > { %v3988_v48 = vrot.slane %v2488_v38, %v10068_v53  ;;  %v3983_v49 = vrot.slane %v2487_v40, %v10074_v57  ;;  %1381 = vadd.xlane.f32.xlu1 %v1380_v33  ;;  %1378 = vadd.xlane.f32.xlu0 %v1377_v35  ;;  %v1401_v38 = vsel %vm842_vm0, %v516_v28, 0.0 }
 0x17c   : > { %v1178_v50 = vpop.xlane.xlu1 %1177  ;;  %v1175_v51 = vpop.xlane.xlu0 %1174 }
 0x17d   : > { %v3984_v56 = vsel %vm3503_vm12, %v3983_v49, %v3979_v46  ;;  %v2490_v58 = vmul.f32 0.020408163, %v1178_v50  ;;  %v2489_v59 = vmul.f32 0.020408163, %v1175_v51  ;;  %v519_v46 = vld [vmem:[%s9820_s11 + $0x5e8] sm:$0xff] }
 0x17e   : > { %v3989_v1 = vsel %vm3510_vm13, %v3988_v48, %v3984_v56  ;;  %v518_v48 = vld [vmem:[%s9820_s11 + $0x5e0] sm:$0xff]  ;;  %v1410_v56 = vsel %vm842_vm0, %v519_v46, 0.0 }
 0x17f   : > { %v3998_v41 = vrot.slane %v2490_v58, %v10084_v7  ;;  %v3993_v2 = vrot.slane %v2489_v59, %v10089_v9  ;;  %1387 = vadd.xlane.f32.xlu1 %v1386_v54  ;;  %1384 = vadd.xlane.f32.xlu0 %v1383_v55  ;;  %v1407_v58 = vsel %vm842_vm0, %v518_v48, 0.0 }
 0x180   : > { %v1184_v4 = vpop.xlane.xlu1 %1183  ;;  %v1181_v5 = vpop.xlane.xlu0 %1180 }
 0x181   : > { %v3994_v13 = vsel %vm3517_vm14, %v3993_v2, %v3989_v1  ;;  %v2492_v10 = vmul.f32 0.020408163, %v1184_v4  ;;  %v2491_v11 = vmul.f32 0.020408163, %v1181_v5  ;;  %v521_v1 = vld [vmem:[%s9820_s11 + $0x5f8] sm:$0xff] }
 0x182   : > { %v3999_v15 = vsel %vm3524_vm15, %v3998_v41, %v3994_v13  ;;  %v520_v41 = vld [vmem:[%s9820_s11 + $0x5f0] sm:$0xff]  ;;  %v1416_v13 = vsel %vm842_vm0, %v521_v1, 0.0 }
 0x183   : > { %v10505_v17 = vsel %vm13971_vm11, %v3999_v15, %v10371_v3  ;;  %v4007_v18 = vrot.slane %v2492_v10, %v9987_v29  ;;  %v4003_v20 = vrot.slane %v2491_v11, %v9984_v27  ;;  %1393 = vadd.xlane.f32.xlu1 %v1392_v6  ;;  %1390 = vadd.xlane.f32.xlu0 %v1389_v45  ;;  %v517_v3 = vld [vmem:[%s9820_s11 + $0x5d8] sm:$0xff]  ;;  %v1413_v10 = vsel %vm842_vm0, %v520_v41, 0.0  ;;  %v523_v15 = vld [vmem:[%s9820_s11 + $0x608] sm:$0xff] }
 0x184   : > { %v1190_v21 = vpop.xlane.xlu1 %1189  ;;  %v1187_v62 = vpop.xlane.xlu0 %1186  ;;  %v1404_v36 = vsel %vm842_vm0, %v517_v3, 0.0 }
 0x185   : > { %v4008_v24 = vsel %vm3426_vm1, %v4007_v18, %v4003_v20  ;;  %v2494_v25 = vmul.f32 0.020408163, %v1190_v21  ;;  %v2493_v26 = vmul.f32 0.020408163, %v1187_v62  ;;  %v522_v18 = vld [vmem:[%s9820_s11 + $0x600] sm:$0xff] }
 0x187   : > { %v4017_v30 = vrot.slane %v2494_v25, %v9996_v37  ;;  %v4012_v32 = vrot.slane %v2493_v26, %v9991_v31  ;;  %1399 = vadd.xlane.f32.xlu1 %v1398_v22  ;;  %1396 = vadd.xlane.f32.xlu0 %v1395_v23  ;;  %v1419_v25 = vsel %vm842_vm0, %v522_v18, 0.0 }
 0x188   : > { %v1196_v33 = vpop.xlane.xlu1 %1195  ;;  %v1193_v35 = vpop.xlane.xlu0 %1192 }
 0x189   : > { %v4013_v40 = vsel %vm3433_vm2, %v4012_v32, %v4008_v24  ;;  %v2496_v43 = vmul.f32 0.020408163, %v1196_v33  ;;  %v2495_v44 = vmul.f32 0.020408163, %v1193_v35  ;;  %v1422_v24 = vsel %vm842_vm0, %v523_v15, 0.0  ;;  %v524_v32 = vld [vmem:[%s9820_s11 + $0x610] sm:$0xff] }
 0x18a   : > { %v4018_v49 = vsel %vm3440_vm3, %v4017_v30, %v4013_v40  ;;  %v525_v30 = vld [vmem:[%s9820_s11 + $0x618] sm:$0xff] }
 0x18b   : > { %v4027_v50 = vrot.slane %v2496_v43, %v10001_v42  ;;  %v4022_v51 = vrot.slane %v2495_v44, %v10008_v47  ;;  %1405 = vadd.xlane.f32.xlu1 %v1404_v36  ;;  %1402 = vadd.xlane.f32.xlu0 %v1401_v38  ;;  %v1428_v43 = vsel %vm842_vm0, %v525_v30, 0.0  ;;  %v1425_v44 = vsel %vm842_vm0, %v524_v32, 0.0 }
 0x18c   : > { %v1202_v54 = vpop.xlane.xlu1 %1201  ;;  %v1199_v55 = vpop.xlane.xlu0 %1198 }
 0x18d   : > { %v4023_v59 = vsel %vm3447_vm4, %v4022_v51, %v4018_v49  ;;  %v2498_v63 = vmul.f32 0.020408163, %v1202_v54  ;;  %v2497_v0 = vmul.f32 0.020408163, %v1199_v55  ;;  %v526_v51 = vld [vmem:[%s9820_s11 + $0x620] sm:$0xff] }
 0x18e   : > { %v4028_v2 = vsel %vm3454_vm5, %v4027_v50, %v4023_v59  ;;  %v527_v50 = vld [vmem:[%s9820_s11 + $0x628] sm:$0xff] }
 0x18f   : > { %v4037_v4 = vrot.slane %v2498_v63, %v10019_v60  ;;  %v4032_v5 = vrot.slane %v2497_v0, %v10022_v61  ;;  %1411 = vadd.xlane.f32.xlu1 %v1410_v56  ;;  %1408 = vadd.xlane.f32.xlu0 %v1407_v58  ;;  %v1434_v63 = vsel %vm842_vm0, %v527_v50, 0.0  ;;  %v1431_v0 = vsel %vm842_vm0, %v526_v51, 0.0 }
 0x190   : > { %v1208_v6 = vpop.xlane.xlu1 %1207  ;;  %v1205_v45 = vpop.xlane.xlu0 %1204 }
 0x191   : > { %v4033_v11 = vsel %vm3461_vm6, %v4032_v5, %v4028_v2  ;;  %v2500_v12 = vmul.f32 0.020408163, %v1208_v6  ;;  %v2499_v52 = vmul.f32 0.020408163, %v1205_v45  ;;  %v528_v5 = vld [vmem:[%s9820_s11 + $0x630] sm:$0xff] }
 0x192   : > { %v4038_v20 = vsel %vm13975_vm7, %v4037_v4, %v4033_v11  ;;  %v529_v4 = vld [vmem:[%s9820_s11 + $0x638] sm:$0xff] }
 0x193   : > { %v4047_v21 = vrot.slane %v2500_v12, %v10036_v14  ;;  %v4042_v62 = vrot.slane %v2499_v52, %v10042_v19  ;;  %1417 = vadd.xlane.f32.xlu1 %v1416_v13  ;;  %1414 = vadd.xlane.f32.xlu0 %v1413_v10  ;;  %v1440_v12 = vsel %vm842_vm0, %v529_v4, 0.0  ;;  %v1437_v52 = vsel %vm842_vm0, %v528_v5, 0.0 }
 0x194   : > { %v1214_v22 = vpop.xlane.xlu1 %1213  ;;  %v1211_v23 = vpop.xlane.xlu0 %1210 }
 0x195   : > { %v4043_v26 = vsel %vm3475_vm8, %v4042_v62, %v4038_v20  ;;  %v2502_v3 = vmul.f32 0.020408163, %v1214_v22  ;;  %v2501_v28 = vmul.f32 0.020408163, %v1211_v23  ;;  %v530_v62 = vld [vmem:[%s9820_s11 + $0x640] sm:$0xff] }
 0x196   : > { %v4048_v33 = vsel %vm13994_vm9, %v4047_v21, %v4043_v26  ;;  %vm13995_vm9 = vcmask 786112   ;;  %v531_v21 = vld [vmem:[%s9820_s11 + $0x648] sm:$0xff]  ;;  %v1443_v30 = vsel %vm842_vm0, %v530_v62, 0.0 }
 0x197   : > { %v4057_v35 = vrot.slane %v2502_v3, %v10052_v34  ;;  %v4052_v36 = vrot.slane %v2501_v28, %v10058_v39  ;;  %1423 = vadd.xlane.f32.xlu1 %v1422_v24  ;;  %1420 = vadd.xlane.f32.xlu0 %v1419_v25  ;;  %v1446_v28 = vsel %vm842_vm0, %v531_v21, 0.0 }
 0x198   : > { %v1220_v38 = vpop.xlane.xlu1 %1219  ;;  %v1217_v40 = vpop.xlane.xlu0 %1216 }
 0x199   : > { %v4053_v46 = vsel %vm3489_vm10, %v4052_v36, %v4048_v33  ;;  %v2504_v48 = vmul.f32 0.020408163, %v1220_v38  ;;  %v2503_v49 = vmul.f32 0.020408163, %v1217_v40  ;;  %v532_v36 = vld [vmem:[%s9820_s11 + $0x650] sm:$0xff] }
 0x19a   : > { %v4058_v54 = vsel %vm13995_vm9, %v4057_v35, %v4053_v46  ;;  %vm13996_vm9 = vcmask 654912  }
 0x19b   : > { %v4067_v55 = vrot.slane %v2504_v48, %v10068_v53  ;;  %v4062_v56 = vrot.slane %v2503_v49, %v10074_v57  ;;  %1429 = vadd.xlane.f32.xlu1 %v1428_v43  ;;  %1426 = vadd.xlane.f32.xlu0 %v1425_v44  ;;  %v1449_v48 = vsel %vm842_vm0, %v532_v36, 0.0 }
 0x19c   : > { %v1226_v58 = vpop.xlane.xlu1 %1225  ;;  %v1223_v59 = vpop.xlane.xlu0 %1222 }
 0x19d   : > { %v4063_v1 = vsel %vm3503_vm12, %v4062_v56, %v4058_v54  ;;  %v2506_v41 = vmul.f32 0.020408163, %v1226_v58  ;;  %v2505_v2 = vmul.f32 0.020408163, %v1223_v59  ;;  %v535_v54 = vld [vmem:[%s9820_s11 + $0x668] sm:$0xff] }
 0x19e   : > { %v4068_v6 = vsel %vm3510_vm13, %v4067_v55, %v4063_v1  ;;  %v534_v55 = vld [vmem:[%s9820_s11 + $0x660] sm:$0xff]  ;;  %v1458_v1 = vsel %vm842_vm0, %v535_v54, 0.0 }
 0x19f   : > { %v4077_v45 = vrot.slane %v2506_v41, %v10084_v7  ;;  %v4072_v13 = vrot.slane %v2505_v2, %v10089_v9  ;;  %1435 = vadd.xlane.f32.xlu1 %v1434_v63  ;;  %1432 = vadd.xlane.f32.xlu0 %v1431_v0  ;;  %v1455_v41 = vsel %vm842_vm0, %v534_v55, 0.0 }
 0x1a0   : > { %v1232_v10 = vpop.xlane.xlu1 %1231  ;;  %v1229_v11 = vpop.xlane.xlu0 %1228 }
 0x1a1   : > { %v4073_v15 = vsel %vm3517_vm14, %v4072_v13, %v4068_v6  ;;  %v2508_v18 = vmul.f32 0.020408163, %v1232_v10  ;;  %v2507_v20 = vmul.f32 0.020408163, %v1229_v11  ;;  %v537_v6 = vld [vmem:[%s9820_s11 + $0x678] sm:$0xff] }
 0x1a2   : > { %v4078_v22 = vsel %vm3524_vm15, %v4077_v45, %v4073_v15  ;;  %v536_v45 = vld [vmem:[%s9820_s11 + $0x670] sm:$0xff]  ;;  %v1464_v15 = vsel %vm842_vm0, %v537_v6, 0.0 }
 0x1a3   : > { %v10572_v23 = vsel %vm13971_vm11, %v4078_v22, %v10438_v8  ;;  %v4086_v24 = vrot.slane %v2508_v18, %v9987_v29  ;;  %v4082_v25 = vrot.slane %v2507_v20, %v9984_v27  ;;  %1441 = vadd.xlane.f32.xlu1 %v1440_v12  ;;  %1438 = vadd.xlane.f32.xlu0 %v1437_v52  ;;  %v533_v8 = vld [vmem:[%s9820_s11 + $0x658] sm:$0xff]  ;;  %v1461_v18 = vsel %vm842_vm0, %v536_v45, 0.0  ;;  %v539_v22 = vld [vmem:[%s9820_s11 + $0x688] sm:$0xff] }
 0x1a4   : > { %v1238_v26 = vpop.xlane.xlu1 %1237  ;;  %v1235_v3 = vpop.xlane.xlu0 %1234  ;;  %v1452_v46 = vsel %vm842_vm0, %v533_v8, 0.0  ;;  %vm13998_vm11 = vcmask 654912  }
 0x1a5   : > { %v4087_v32 = vsel %vm3426_vm1, %v4086_v24, %v4082_v25  ;;  %v2510_v33 = vmul.f32 0.020408163, %v1238_v26  ;;  %v2509_v35 = vmul.f32 0.020408163, %v1235_v3  ;;  %v538_v24 = vld [vmem:[%s9820_s11 + $0x680] sm:$0xff] }
 0x1a7   : > { %v4096_v38 = vrot.slane %v2510_v33, %v9996_v37  ;;  %v4091_v40 = vrot.slane %v2509_v35, %v9991_v31  ;;  %1447 = vadd.xlane.f32.xlu1 %v1446_v28  ;;  %1444 = vadd.xlane.f32.xlu0 %v1443_v30  ;;  %v1467_v33 = vsel %vm842_vm0, %v538_v24, 0.0 }
 0x1a8   : > { %v1244_v43 = vpop.xlane.xlu1 %1243  ;;  %v1241_v44 = vpop.xlane.xlu0 %1240 }
 0x1a9   : > { %v4092_v49 = vsel %vm3433_vm2, %v4091_v40, %v4087_v32  ;;  %v2512_v50 = vmul.f32 0.020408163, %v1244_v43  ;;  %v2511_v51 = vmul.f32 0.020408163, %v1241_v44  ;;  %v1470_v32 = vsel %vm842_vm0, %v539_v22, 0.0  ;;  %v540_v40 = vld [vmem:[%s9820_s11 + $0x690] sm:$0xff] }
 0x1aa   : > { %v4097_v56 = vsel %vm3440_vm3, %v4096_v38, %v4092_v49  ;;  %v541_v38 = vld [vmem:[%s9820_s11 + $0x698] sm:$0xff] }
 0x1ab   : > { %v4106_v58 = vrot.slane %v2512_v50, %v10001_v42  ;;  %v4101_v59 = vrot.slane %v2511_v51, %v10008_v47  ;;  %1453 = vadd.xlane.f32.xlu1 %v1452_v46  ;;  %1450 = vadd.xlane.f32.xlu0 %v1449_v48  ;;  %v1476_v50 = vsel %vm842_vm0, %v541_v38, 0.0  ;;  %v1473_v51 = vsel %vm842_vm0, %v540_v40, 0.0 }
 0x1ac   : > { %v1250_v63 = vpop.xlane.xlu1 %1249  ;;  %v1247_v0 = vpop.xlane.xlu0 %1246 }
 0x1ad   : > { %v4102_v2 = vsel %vm3447_vm4, %v4101_v59, %v4097_v56  ;;  %v2514_v4 = vmul.f32 0.020408163, %v1250_v63  ;;  %v2513_v5 = vmul.f32 0.020408163, %v1247_v0  ;;  %v542_v59 = vld [vmem:[%s9820_s11 + $0x6a0] sm:$0xff] }
 0x1ae   : > { %v4107_v13 = vsel %vm3454_vm5, %v4106_v58, %v4102_v2  ;;  %v543_v58 = vld [vmem:[%s9820_s11 + $0x6a8] sm:$0xff] }
 0x1af   : > { %v4116_v10 = vrot.slane %v2514_v4, %v10019_v60  ;;  %v4111_v11 = vrot.slane %v2513_v5, %v10022_v61  ;;  %1459 = vadd.xlane.f32.xlu1 %v1458_v1  ;;  %1456 = vadd.xlane.f32.xlu0 %v1455_v41  ;;  %v1482_v4 = vsel %vm842_vm0, %v543_v58, 0.0  ;;  %v1479_v5 = vsel %vm842_vm0, %v542_v59, 0.0 }
 0x1b0   : > { %v1256_v12 = vpop.xlane.xlu1 %1255  ;;  %v1253_v52 = vpop.xlane.xlu0 %1252 }
 0x1b1   : > { %v4112_v20 = vsel %vm3461_vm6, %v4111_v11, %v4107_v13  ;;  %v2516_v21 = vmul.f32 0.020408163, %v1256_v12  ;;  %v2515_v62 = vmul.f32 0.020408163, %v1253_v52  ;;  %v544_v11 = vld [vmem:[%s9820_s11 + $0x6b0] sm:$0xff] }
 0x1b2   : > { %v4117_v25 = vsel %vm13975_vm7, %v4116_v10, %v4112_v20  ;;  %v545_v10 = vld [vmem:[%s9820_s11 + $0x6b8] sm:$0xff] }
 0x1b3   : > { %v4126_v26 = vrot.slane %v2516_v21, %v10036_v14  ;;  %v4121_v3 = vrot.slane %v2515_v62, %v10042_v19  ;;  %1465 = vadd.xlane.f32.xlu1 %v1464_v15  ;;  %1462 = vadd.xlane.f32.xlu0 %v1461_v18  ;;  %v1488_v21 = vsel %vm842_vm0, %v545_v10, 0.0  ;;  %v1485_v62 = vsel %vm842_vm0, %v544_v11, 0.0 }
 0x1b4   : > { %v1262_v28 = vpop.xlane.xlu1 %1261  ;;  %v1259_v30 = vpop.xlane.xlu0 %1258 }
 0x1b5   : > { %v4122_v35 = vsel %vm3475_vm8, %v4121_v3, %v4117_v25  ;;  %v2518_v8 = vmul.f32 0.020408163, %v1262_v28  ;;  %v2517_v36 = vmul.f32 0.020408163, %v1259_v30  ;;  %v546_v3 = vld [vmem:[%s9820_s11 + $0x6c0] sm:$0xff] }
 0x1b6   : > { %v4127_v43 = vsel %vm13996_vm9, %v4126_v26, %v4122_v35  ;;  %vm13997_vm9 = vcmask 786112   ;;  %v547_v26 = vld [vmem:[%s9820_s11 + $0x6c8] sm:$0xff]  ;;  %v1491_v38 = vsel %vm842_vm0, %v546_v3, 0.0 }
 0x1b7   : > { %v4136_v44 = vrot.slane %v2518_v8, %v10052_v34  ;;  %v4131_v46 = vrot.slane %v2517_v36, %v10058_v39  ;;  %1471 = vadd.xlane.f32.xlu1 %v1470_v32  ;;  %1468 = vadd.xlane.f32.xlu0 %v1467_v33  ;;  %v1494_v36 = vsel %vm842_vm0, %v547_v26, 0.0 }
 0x1b8   : > { %v1268_v48 = vpop.xlane.xlu1 %1267  ;;  %v1265_v49 = vpop.xlane.xlu0 %1264 }
 0x1b9   : > { %v4132_v54 = vsel %vm3489_vm10, %v4131_v46, %v4127_v43  ;;  %v2520_v55 = vmul.f32 0.020408163, %v1268_v48  ;;  %v2519_v56 = vmul.f32 0.020408163, %v1265_v49  ;;  %v548_v46 = vld [vmem:[%s9820_s11 + $0x6d0] sm:$0xff] }
 0x1ba   : > { %v4137_v63 = vsel %vm13997_vm9, %v4136_v44, %v4132_v54  ;;  %vm13972_vm9 = vcmask 1044484  }
 0x1bb   : > { %v4146_v0 = vrot.slane %v2520_v55, %v10068_v53  ;;  %v4141_v1 = vrot.slane %v2519_v56, %v10074_v57  ;;  %1477 = vadd.xlane.f32.xlu1 %v1476_v50  ;;  %1474 = vadd.xlane.f32.xlu0 %v1473_v51  ;;  %v1497_v55 = vsel %vm842_vm0, %v548_v46, 0.0 }
 0x1bc   : > { %v1274_v41 = vpop.xlane.xlu1 %1273  ;;  %v1271_v2 = vpop.xlane.xlu0 %1270 }
 0x1bd   : > { %v4142_v6 = vsel %vm3503_vm12, %v4141_v1, %v4137_v63  ;;  %v2522_v45 = vmul.f32 0.020408163, %v1274_v41  ;;  %v2521_v13 = vmul.f32 0.020408163, %v1271_v2  ;;  %v551_v63 = vld [vmem:[%s9820_s11 + $0x6e8] sm:$0xff] }
 0x1be   : > { %v4147_v12 = vsel %vm3510_vm13, %v4146_v0, %v4142_v6  ;;  %v550_v0 = vld [vmem:[%s9820_s11 + $0x6e0] sm:$0xff]  ;;  %v1506_v6 = vsel %vm842_vm0, %v551_v63, 0.0 }
 0x1bf   : > { %v4156_v52 = vrot.slane %v2522_v45, %v10084_v7  ;;  %v4151_v15 = vrot.slane %v2521_v13, %v10089_v9  ;;  %1483 = vadd.xlane.f32.xlu1 %v1482_v4  ;;  %1480 = vadd.xlane.f32.xlu0 %v1479_v5  ;;  %v1503_v45 = vsel %vm842_vm0, %v550_v0, 0.0 }
 0x1c0   : > { %v1280_v18 = vpop.xlane.xlu1 %1279  ;;  %v1277_v20 = vpop.xlane.xlu0 %1276 }
 0x1c1   : > { %v4152_v22 = vsel %vm3517_vm14, %v4151_v15, %v4147_v12  ;;  %v2524_v24 = vmul.f32 0.020408163, %v1280_v18  ;;  %v2523_v25 = vmul.f32 0.020408163, %v1277_v20  ;;  %v553_v12 = vld [vmem:[%s9820_s11 + $0x6f8] sm:$0xff] }
 0x1c2   : > { %v4157_v28 = vsel %vm3524_vm15, %v4156_v52, %v4152_v22  ;;  %v552_v52 = vld [vmem:[%s9820_s11 + $0x6f0] sm:$0xff]  ;;  %v1512_v22 = vsel %vm842_vm0, %v553_v12, 0.0 }
 0x1c3   : > { %v10639_v30 = vsel %vm13972_vm9, %v4157_v28, %v10505_v17  ;;  %v4165_v32 = vrot.slane %v2524_v24, %v9987_v29  ;;  %v4161_v33 = vrot.slane %v2523_v25, %v9984_v27  ;;  %1489 = vadd.xlane.f32.xlu1 %v1488_v21  ;;  %1486 = vadd.xlane.f32.xlu0 %v1485_v62  ;;  %v549_v17 = vld [vmem:[%s9820_s11 + $0x6d8] sm:$0xff]  ;;  %v1509_v24 = vsel %vm842_vm0, %v552_v52, 0.0  ;;  %v555_v28 = vld [vmem:[%s9820_s11 + $0x708] sm:$0xff] }
 0x1c4   : > { %v1286_v35 = vpop.xlane.xlu1 %1285  ;;  %v1283_v8 = vpop.xlane.xlu0 %1282  ;;  %v1500_v54 = vsel %vm842_vm0, %v549_v17, 0.0 }
 0x1c5   : > { %v4166_v40 = vsel %vm3426_vm1, %v4165_v32, %v4161_v33  ;;  %v2526_v43 = vmul.f32 0.020408163, %v1286_v35  ;;  %v2525_v44 = vmul.f32 0.020408163, %v1283_v8  ;;  %v554_v32 = vld [vmem:[%s9820_s11 + $0x700] sm:$0xff] }
 0x1c7   : > { %v4175_v48 = vrot.slane %v2526_v43, %v9996_v37  ;;  %v4170_v49 = vrot.slane %v2525_v44, %v9991_v31  ;;  %1495 = vadd.xlane.f32.xlu1 %v1494_v36  ;;  %1492 = vadd.xlane.f32.xlu0 %v1491_v38  ;;  %v1515_v43 = vsel %vm842_vm0, %v554_v32, 0.0 }
 0x1c8   : > { %v1292_v50 = vpop.xlane.xlu1 %1291  ;;  %v1289_v51 = vpop.xlane.xlu0 %1288 }
 0x1c9   : > { %v4171_v56 = vsel %vm3433_vm2, %v4170_v49, %v4166_v40  ;;  %v2528_v58 = vmul.f32 0.020408163, %v1292_v50  ;;  %v2527_v59 = vmul.f32 0.020408163, %v1289_v51  ;;  %v1518_v40 = vsel %vm842_vm0, %v555_v28, 0.0  ;;  %v556_v49 = vld [vmem:[%s9820_s11 + $0x710] sm:$0xff] }
 0x1ca   : > { %v4176_v1 = vsel %vm3440_vm3, %v4175_v48, %v4171_v56  ;;  %v557_v48 = vld [vmem:[%s9820_s11 + $0x718] sm:$0xff] }
 0x1cb   : > { %v4185_v41 = vrot.slane %v2528_v58, %v10001_v42  ;;  %v4180_v2 = vrot.slane %v2527_v59, %v10008_v47  ;;  %1501 = vadd.xlane.f32.xlu1 %v1500_v54  ;;  %1498 = vadd.xlane.f32.xlu0 %v1497_v55  ;;  %v1524_v58 = vsel %vm842_vm0, %v557_v48, 0.0  ;;  %v1521_v59 = vsel %vm842_vm0, %v556_v49, 0.0 }
 0x1cc   : > { %v1298_v4 = vpop.xlane.xlu1 %1297  ;;  %v1295_v5 = vpop.xlane.xlu0 %1294 }
 0x1cd   : > { %v4181_v13 = vsel %vm3447_vm4, %v4180_v2, %v4176_v1  ;;  %v2530_v10 = vmul.f32 0.020408163, %v1298_v4  ;;  %v2529_v11 = vmul.f32 0.020408163, %v1295_v5  ;;  %v558_v2 = vld [vmem:[%s9820_s11 + $0x720] sm:$0xff] }
 0x1ce   : > { %v4186_v15 = vsel %vm3454_vm5, %v4185_v41, %v4181_v13  ;;  %v559_v41 = vld [vmem:[%s9820_s11 + $0x728] sm:$0xff] }
 0x1cf   : > { %v4195_v18 = vrot.slane %v2530_v10, %v10019_v60  ;;  %v4190_v20 = vrot.slane %v2529_v11, %v10022_v61  ;;  %1507 = vadd.xlane.f32.xlu1 %v1506_v6  ;;  %1504 = vadd.xlane.f32.xlu0 %v1503_v45  ;;  %v1530_v10 = vsel %vm842_vm0, %v559_v41, 0.0  ;;  %v1527_v11 = vsel %vm842_vm0, %v558_v2, 0.0 }
 0x1d0   : > { %v1304_v21 = vpop.xlane.xlu1 %1303  ;;  %v1301_v62 = vpop.xlane.xlu0 %1300 }
 0x1d1   : > { %v4191_v25 = vsel %vm3461_vm6, %v4190_v20, %v4186_v15  ;;  %v2532_v26 = vmul.f32 0.020408163, %v1304_v21  ;;  %v2531_v3 = vmul.f32 0.020408163, %v1301_v62  ;;  %v560_v20 = vld [vmem:[%s9820_s11 + $0x730] sm:$0xff] }
 0x1d2   : > { %v4196_v33 = vsel %vm13975_vm7, %v4195_v18, %v4191_v25  ;;  %v561_v18 = vld [vmem:[%s9820_s11 + $0x738] sm:$0xff] }
 0x1d3   : > { %v4205_v35 = vrot.slane %v2532_v26, %v10036_v14  ;;  %v4200_v8 = vrot.slane %v2531_v3, %v10042_v19  ;;  %1513 = vadd.xlane.f32.xlu1 %v1512_v22  ;;  %1510 = vadd.xlane.f32.xlu0 %v1509_v24  ;;  %v1536_v26 = vsel %vm842_vm0, %v561_v18, 0.0  ;;  %v1533_v3 = vsel %vm842_vm0, %v560_v20, 0.0 }
 0x1d4   : > { %v1310_v36 = vpop.xlane.xlu1 %1309  ;;  %v1307_v38 = vpop.xlane.xlu0 %1306 }
 0x1d5   : > { %v4201_v44 = vsel %vm3475_vm8, %v4200_v8, %v4196_v33  ;;  %v2534_v17 = vmul.f32 0.020408163, %v1310_v36  ;;  %v2533_v46 = vmul.f32 0.020408163, %v1307_v38  ;;  %v562_v8 = vld [vmem:[%s9820_s11 + $0x740] sm:$0xff] }
 0x1d6   : > { %v4206_v50 = vsel %vm13998_vm11, %v4205_v35, %v4201_v44  ;;  %vm13999_vm11 = vcmask 786112   ;;  %v563_v35 = vld [vmem:[%s9820_s11 + $0x748] sm:$0xff]  ;;  %v1539_v48 = vsel %vm842_vm0, %v562_v8, 0.0 }
 0x1d7   : > { %v4215_v51 = vrot.slane %v2534_v17, %v10052_v34  ;;  %v4210_v54 = vrot.slane %v2533_v46, %v10058_v39  ;;  %1519 = vadd.xlane.f32.xlu1 %v1518_v40  ;;  %1516 = vadd.xlane.f32.xlu0 %v1515_v43  ;;  %v1542_v46 = vsel %vm842_vm0, %v563_v35, 0.0 }
 0x1d8   : > { %v1316_v55 = vpop.xlane.xlu1 %1315  ;;  %v1313_v56 = vpop.xlane.xlu0 %1312 }
 0x1d9   : > { %v4211_v63 = vsel %vm3489_vm10, %v4210_v54, %v4206_v50  ;;  %v2536_v0 = vmul.f32 0.020408163, %v1316_v55  ;;  %v2535_v1 = vmul.f32 0.020408163, %v1313_v56  ;;  %v564_v54 = vld [vmem:[%s9820_s11 + $0x750] sm:$0xff] }
 0x1da   : > { %v4216_v4 = vsel %vm13999_vm11, %v4215_v51, %v4211_v63  ;;  %vm14000_vm11 = vcmask 654912  }
 0x1db   : > { %v4225_v5 = vrot.slane %v2536_v0, %v10068_v53  ;;  %v4220_v6 = vrot.slane %v2535_v1, %v10074_v57  ;;  %1525 = vadd.xlane.f32.xlu1 %v1524_v58  ;;  %1522 = vadd.xlane.f32.xlu0 %v1521_v59  ;;  %v1545_v0 = vsel %vm842_vm0, %v564_v54, 0.0 }
 0x1dc   : > { %v1322_v45 = vpop.xlane.xlu1 %1321  ;;  %v1319_v13 = vpop.xlane.xlu0 %1318 }
 0x1dd   : > { %v4221_v12 = vsel %vm3503_vm12, %v4220_v6, %v4216_v4  ;;  %v2538_v52 = vmul.f32 0.020408163, %v1322_v45  ;;  %v2537_v15 = vmul.f32 0.020408163, %v1319_v13  ;;  %v567_v4 = vld [vmem:[%s9820_s11 + $0x768] sm:$0xff] }
 0x1de   : > { %v4226_v21 = vsel %vm3510_vm13, %v4225_v5, %v4221_v12  ;;  %v566_v5 = vld [vmem:[%s9820_s11 + $0x760] sm:$0xff]  ;;  %v1554_v12 = vsel %vm842_vm0, %v567_v4, 0.0 }
 0x1df   : > { %v4235_v62 = vrot.slane %v2538_v52, %v10084_v7  ;;  %v4230_v22 = vrot.slane %v2537_v15, %v10089_v9  ;;  %1531 = vadd.xlane.f32.xlu1 %v1530_v10  ;;  %1528 = vadd.xlane.f32.xlu0 %v1527_v11  ;;  %v1551_v52 = vsel %vm842_vm0, %v566_v5, 0.0 }
 0x1e0   : > { %v1328_v24 = vpop.xlane.xlu1 %1327  ;;  %v1325_v25 = vpop.xlane.xlu0 %1324 }
 0x1e1   : > { %v4231_v28 = vsel %vm3517_vm14, %v4230_v22, %v4226_v21  ;;  %v2540_v32 = vmul.f32 0.020408163, %v1328_v24  ;;  %v2539_v33 = vmul.f32 0.020408163, %v1325_v25  ;;  %v569_v21 = vld [vmem:[%s9820_s11 + $0x778] sm:$0xff] }
 0x1e2   : > { %v4236_v36 = vsel %vm3524_vm15, %v4235_v62, %v4231_v28  ;;  %v568_v62 = vld [vmem:[%s9820_s11 + $0x770] sm:$0xff]  ;;  %v1560_v28 = vsel %vm842_vm0, %v569_v21, 0.0 }
 0x1e3   : > { %v10706_v38 = vsel %vm13972_vm9, %v4236_v36, %v10572_v23  ;;  %v4244_v40 = vrot.slane %v2540_v32, %v9987_v29  ;;  %v4240_v43 = vrot.slane %v2539_v33, %v9984_v27  ;;  %1537 = vadd.xlane.f32.xlu1 %v1536_v26  ;;  %1534 = vadd.xlane.f32.xlu0 %v1533_v3  ;;  %v565_v23 = vld [vmem:[%s9820_s11 + $0x758] sm:$0xff]  ;;  %v1557_v32 = vsel %vm842_vm0, %v568_v62, 0.0  ;;  %v571_v36 = vld [vmem:[%s9820_s11 + $0x788] sm:$0xff] }
 0x1e4   : > { %v1334_v44 = vpop.xlane.xlu1 %1333  ;;  %v1331_v17 = vpop.xlane.xlu0 %1330  ;;  %v1548_v63 = vsel %vm842_vm0, %v565_v23, 0.0  ;;  %vm14002_vm9 = vcmask 654912  }
 0x1e5   : > { %v4245_v49 = vsel %vm3426_vm1, %v4244_v40, %v4240_v43  ;;  %v2542_v50 = vmul.f32 0.020408163, %v1334_v44  ;;  %v2541_v51 = vmul.f32 0.020408163, %v1331_v17  ;;  %v570_v40 = vld [vmem:[%s9820_s11 + $0x780] sm:$0xff] }
 0x1e7   : > { %v4254_v55 = vrot.slane %v2542_v50, %v9996_v37  ;;  %v4249_v56 = vrot.slane %v2541_v51, %v9991_v31  ;;  %1543 = vadd.xlane.f32.xlu1 %v1542_v46  ;;  %1540 = vadd.xlane.f32.xlu0 %v1539_v48  ;;  %v1563_v50 = vsel %vm842_vm0, %v570_v40, 0.0 }
 0x1e8   : > { %v1340_v58 = vpop.xlane.xlu1 %1339  ;;  %v1337_v59 = vpop.xlane.xlu0 %1336 }
 0x1e9   : > { %v4250_v1 = vsel %vm3433_vm2, %v4249_v56, %v4245_v49  ;;  %v2544_v41 = vmul.f32 0.020408163, %v1340_v58  ;;  %v2543_v2 = vmul.f32 0.020408163, %v1337_v59  ;;  %v1566_v49 = vsel %vm842_vm0, %v571_v36, 0.0  ;;  %v572_v56 = vld [vmem:[%s9820_s11 + $0x790] sm:$0xff] }
 0x1ea   : > { %v4255_v6 = vsel %vm3440_vm3, %v4254_v55, %v4250_v1  ;;  %v573_v55 = vld [vmem:[%s9820_s11 + $0x798] sm:$0xff] }
 0x1eb   : > { %v4264_v45 = vrot.slane %v2544_v41, %v10001_v42  ;;  %v4259_v13 = vrot.slane %v2543_v2, %v10008_v47  ;;  %1549 = vadd.xlane.f32.xlu1 %v1548_v63  ;;  %1546 = vadd.xlane.f32.xlu0 %v1545_v0  ;;  %v1572_v41 = vsel %vm842_vm0, %v573_v55, 0.0  ;;  %v1569_v2 = vsel %vm842_vm0, %v572_v56, 0.0 }
 0x1ec   : > { %v1346_v10 = vpop.xlane.xlu1 %1345  ;;  %v1343_v11 = vpop.xlane.xlu0 %1342 }
 0x1ed   : > { %v4260_v15 = vsel %vm3447_vm4, %v4259_v13, %v4255_v6  ;;  %v2546_v18 = vmul.f32 0.020408163, %v1346_v10  ;;  %v2545_v20 = vmul.f32 0.020408163, %v1343_v11  ;;  %v574_v13 = vld [vmem:[%s9820_s11 + $0x7a0] sm:$0xff] }
 0x1ee   : > { %v4265_v22 = vsel %vm3454_vm5, %v4264_v45, %v4260_v15  ;;  %v575_v45 = vld [vmem:[%s9820_s11 + $0x7a8] sm:$0xff] }
 0x1ef   : > { %v4274_v24 = vrot.slane %v2546_v18, %v10019_v60  ;;  %v4269_v25 = vrot.slane %v2545_v20, %v10022_v61  ;;  %1555 = vadd.xlane.f32.xlu1 %v1554_v12  ;;  %1552 = vadd.xlane.f32.xlu0 %v1551_v52  ;;  %v1578_v18 = vsel %vm842_vm0, %v575_v45, 0.0  ;;  %v1575_v20 = vsel %vm842_vm0, %v574_v13, 0.0 }
 0x1f0   : > { %v1352_v26 = vpop.xlane.xlu1 %1351  ;;  %v1349_v3 = vpop.xlane.xlu0 %1348 }
 0x1f1   : > { %v4270_v33 = vsel %vm3461_vm6, %v4269_v25, %v4265_v22  ;;  %v2548_v35 = vmul.f32 0.020408163, %v1352_v26  ;;  %v2547_v8 = vmul.f32 0.020408163, %v1349_v3  ;;  %v576_v25 = vld [vmem:[%s9820_s11 + $0x7b0] sm:$0xff] }
 0x1f2   : > { %v4275_v43 = vsel %vm13975_vm7, %v4274_v24, %v4270_v33  ;;  %v577_v24 = vld [vmem:[%s9820_s11 + $0x7b8] sm:$0xff] }
 0x1f3   : > { %v4284_v44 = vrot.slane %v2548_v35, %v10036_v14  ;;  %v4279_v17 = vrot.slane %v2547_v8, %v10042_v19  ;;  %1561 = vadd.xlane.f32.xlu1 %v1560_v28  ;;  %1558 = vadd.xlane.f32.xlu0 %v1557_v32  ;;  %v1584_v35 = vsel %vm842_vm0, %v577_v24, 0.0  ;;  %v1581_v8 = vsel %vm842_vm0, %v576_v25, 0.0 }
 0x1f4   : > { %v1358_v46 = vpop.xlane.xlu1 %1357  ;;  %v1355_v48 = vpop.xlane.xlu0 %1354 }
 0x1f5   : > { %v4280_v51 = vsel %vm3475_vm8, %v4279_v17, %v4275_v43  ;;  %v2550_v23 = vmul.f32 0.020408163, %v1358_v46  ;;  %v2549_v54 = vmul.f32 0.020408163, %v1355_v48  ;;  %v578_v17 = vld [vmem:[%s9820_s11 + $0x7c0] sm:$0xff] }
 0x1f6   : > { %v4285_v58 = vsel %vm14000_vm11, %v4284_v44, %v4280_v51  ;;  %vm14001_vm11 = vcmask 786112   ;;  %v579_v44 = vld [vmem:[%s9820_s11 + $0x7c8] sm:$0xff]  ;;  %v1587_v55 = vsel %vm842_vm0, %v578_v17, 0.0 }
 0x1f7   : > { %v4294_v59 = vrot.slane %v2550_v23, %v10052_v34  ;;  %v4289_v63 = vrot.slane %v2549_v54, %v10058_v39  ;;  %1567 = vadd.xlane.f32.xlu1 %v1566_v49  ;;  %1564 = vadd.xlane.f32.xlu0 %v1563_v50  ;;  %v1590_v54 = vsel %vm842_vm0, %v579_v44, 0.0 }
 0x1f8   : > { %v1364_v0 = vpop.xlane.xlu1 %1363  ;;  %v1361_v1 = vpop.xlane.xlu0 %1360 }
 0x1f9   : > { %v4290_v4 = vsel %vm3489_vm10, %v4289_v63, %v4285_v58  ;;  %v2552_v5 = vmul.f32 0.020408163, %v1364_v0  ;;  %v2551_v6 = vmul.f32 0.020408163, %v1361_v1  ;;  %v580_v63 = vld [vmem:[%s9820_s11 + $0x7d0] sm:$0xff] }
 0x1fa   : > { %v4295_v10 = vsel %vm14001_vm11, %v4294_v59, %v4290_v4  ;;  %vm13973_vm11 = vcmask 1045509  }
 0x1fb   : > { %v4304_v11 = vrot.slane %v2552_v5, %v10068_v53  ;;  %v4299_v12 = vrot.slane %v2551_v6, %v10074_v57  ;;  %1573 = vadd.xlane.f32.xlu1 %v1572_v41  ;;  %1570 = vadd.xlane.f32.xlu0 %v1569_v2  ;;  %v1593_v5 = vsel %vm842_vm0, %v580_v63, 0.0 }
 0x1fc   : > { %v1370_v52 = vpop.xlane.xlu1 %1369  ;;  %v1367_v15 = vpop.xlane.xlu0 %1366 }
 0x1fd   : > { %v4300_v21 = vsel %vm3503_vm12, %v4299_v12, %v4295_v10  ;;  %v2554_v62 = vmul.f32 0.020408163, %v1370_v52  ;;  %v2553_v22 = vmul.f32 0.020408163, %v1367_v15  ;;  %v583_v10 = vld [vmem:[%s9820_s11 + $0x7e8] sm:$0xff] }
 0x1fe   : > { %v4305_v26 = vsel %vm3510_vm13, %v4304_v11, %v4300_v21  ;;  %v582_v11 = vld [vmem:[%s9820_s11 + $0x7e0] sm:$0xff]  ;;  %v1602_v21 = vsel %vm842_vm0, %v583_v10, 0.0 }
 0x1ff   : > { %v4314_v3 = vrot.slane %v2554_v62, %v10084_v7  ;;  %v4309_v28 = vrot.slane %v2553_v22, %v10089_v9  ;;  %1579 = vadd.xlane.f32.xlu1 %v1578_v18  ;;  %1576 = vadd.xlane.f32.xlu0 %v1575_v20  ;;  %v1599_v62 = vsel %vm842_vm0, %v582_v11, 0.0 }
 0x200   : > { %v1376_v32 = vpop.xlane.xlu1 %1375  ;;  %v1373_v33 = vpop.xlane.xlu0 %1372 }
 0x201   : > { %v4310_v36 = vsel %vm3517_vm14, %v4309_v28, %v4305_v26  ;;  %v2556_v40 = vmul.f32 0.020408163, %v1376_v32  ;;  %v2555_v43 = vmul.f32 0.020408163, %v1373_v33  ;;  %v585_v26 = vld [vmem:[%s9820_s11 + $0x7f8] sm:$0xff] }
 0x202   : > { %v4315_v46 = vsel %vm3524_vm15, %v4314_v3, %v4310_v36  ;;  %v584_v3 = vld [vmem:[%s9820_s11 + $0x7f0] sm:$0xff]  ;;  %v1608_v36 = vsel %vm842_vm0, %v585_v26, 0.0 }
 0x203   : > { %v10773_v48 = vsel %vm13973_vm11, %v4315_v46, %v10639_v30  ;;  %v4323_v49 = vrot.slane %v2556_v40, %v9987_v29  ;;  %v4319_v50 = vrot.slane %v2555_v43, %v9984_v27  ;;  %1585 = vadd.xlane.f32.xlu1 %v1584_v35  ;;  %1582 = vadd.xlane.f32.xlu0 %v1581_v8  ;;  %v581_v30 = vld [vmem:[%s9820_s11 + $0x7d8] sm:$0xff]  ;;  %v1605_v40 = vsel %vm842_vm0, %v584_v3, 0.0  ;;  %v587_v46 = vld [vmem:[%s9820_s11 + $0x808] sm:$0xff] }
 0x204   : > { %v1382_v51 = vpop.xlane.xlu1 %1381  ;;  %v1379_v23 = vpop.xlane.xlu0 %1378  ;;  %v1596_v4 = vsel %vm842_vm0, %v581_v30, 0.0 }
 0x205   : > { %v4324_v56 = vsel %vm3426_vm1, %v4323_v49, %v4319_v50  ;;  %v2558_v58 = vmul.f32 0.020408163, %v1382_v51  ;;  %v2557_v59 = vmul.f32 0.020408163, %v1379_v23  ;;  %v586_v49 = vld [vmem:[%s9820_s11 + $0x800] sm:$0xff] }
 0x207   : > { %v4333_v0 = vrot.slane %v2558_v58, %v9996_v37  ;;  %v4328_v1 = vrot.slane %v2557_v59, %v9991_v31  ;;  %1591 = vadd.xlane.f32.xlu1 %v1590_v54  ;;  %1588 = vadd.xlane.f32.xlu0 %v1587_v55  ;;  %v1611_v58 = vsel %vm842_vm0, %v586_v49, 0.0 }
 0x208   : > { %v1388_v41 = vpop.xlane.xlu1 %1387  ;;  %v1385_v2 = vpop.xlane.xlu0 %1384 }
 0x209   : > { %v4329_v6 = vsel %vm3433_vm2, %v4328_v1, %v4324_v56  ;;  %v2560_v45 = vmul.f32 0.020408163, %v1388_v41  ;;  %v2559_v13 = vmul.f32 0.020408163, %v1385_v2  ;;  %v1614_v56 = vsel %vm842_vm0, %v587_v46, 0.0  ;;  %v588_v1 = vld [vmem:[%s9820_s11 + $0x810] sm:$0xff] }
 0x20a   : > { %v4334_v12 = vsel %vm3440_vm3, %v4333_v0, %v4329_v6  ;;  %v589_v0 = vld [vmem:[%s9820_s11 + $0x818] sm:$0xff] }
 0x20b   : > { %v4343_v52 = vrot.slane %v2560_v45, %v10001_v42  ;;  %v4338_v15 = vrot.slane %v2559_v13, %v10008_v47  ;;  %1597 = vadd.xlane.f32.xlu1 %v1596_v4  ;;  %1594 = vadd.xlane.f32.xlu0 %v1593_v5  ;;  %v1620_v45 = vsel %vm842_vm0, %v589_v0, 0.0  ;;  %v1617_v13 = vsel %vm842_vm0, %v588_v1, 0.0 }
 0x20c   : > { %v1394_v18 = vpop.xlane.xlu1 %1393  ;;  %v1391_v20 = vpop.xlane.xlu0 %1390 }
 0x20d   : > { %v4339_v22 = vsel %vm3447_vm4, %v4338_v15, %v4334_v12  ;;  %v2562_v24 = vmul.f32 0.020408163, %v1394_v18  ;;  %v2561_v25 = vmul.f32 0.020408163, %v1391_v20  ;;  %v590_v15 = vld [vmem:[%s9820_s11 + $0x820] sm:$0xff] }
 0x20e   : > { %v4344_v28 = vsel %vm3454_vm5, %v4343_v52, %v4339_v22  ;;  %v591_v52 = vld [vmem:[%s9820_s11 + $0x828] sm:$0xff] }
 0x20f   : > { %v4353_v32 = vrot.slane %v2562_v24, %v10019_v60  ;;  %v4348_v33 = vrot.slane %v2561_v25, %v10022_v61  ;;  %1603 = vadd.xlane.f32.xlu1 %v1602_v21  ;;  %1600 = vadd.xlane.f32.xlu0 %v1599_v62  ;;  %v1626_v24 = vsel %vm842_vm0, %v591_v52, 0.0  ;;  %v1623_v25 = vsel %vm842_vm0, %v590_v15, 0.0 }
 0x210   : > { %v1400_v35 = vpop.xlane.xlu1 %1399  ;;  %v1397_v8 = vpop.xlane.xlu0 %1396 }
 0x211   : > { %v4349_v43 = vsel %vm3461_vm6, %v4348_v33, %v4344_v28  ;;  %v2564_v44 = vmul.f32 0.020408163, %v1400_v35  ;;  %v2563_v17 = vmul.f32 0.020408163, %v1397_v8  ;;  %v592_v33 = vld [vmem:[%s9820_s11 + $0x830] sm:$0xff] }
 0x212   : > { %v4354_v50 = vsel %vm13975_vm7, %v4353_v32, %v4349_v43  ;;  %v593_v32 = vld [vmem:[%s9820_s11 + $0x838] sm:$0xff] }
 0x213   : > { %v4363_v51 = vrot.slane %v2564_v44, %v10036_v14  ;;  %v4358_v23 = vrot.slane %v2563_v17, %v10042_v19  ;;  %1609 = vadd.xlane.f32.xlu1 %v1608_v36  ;;  %1606 = vadd.xlane.f32.xlu0 %v1605_v40  ;;  %v1632_v44 = vsel %vm842_vm0, %v593_v32, 0.0  ;;  %v1629_v17 = vsel %vm842_vm0, %v592_v33, 0.0 }
 0x214   : > { %v1406_v54 = vpop.xlane.xlu1 %1405  ;;  %v1403_v55 = vpop.xlane.xlu0 %1402 }
 0x215   : > { %v4359_v59 = vsel %vm3475_vm8, %v4358_v23, %v4354_v50  ;;  %v2566_v30 = vmul.f32 0.020408163, %v1406_v54  ;;  %v2565_v63 = vmul.f32 0.020408163, %v1403_v55  ;;  %v594_v23 = vld [vmem:[%s9820_s11 + $0x840] sm:$0xff] }
 0x216   : > { %v4364_v41 = vsel %vm14002_vm9, %v4363_v51, %v4359_v59  ;;  %vm14003_vm9 = vcmask 786112   ;;  %v595_v51 = vld [vmem:[%s9820_s11 + $0x848] sm:$0xff]  ;;  %v1635_v0 = vsel %vm842_vm0, %v594_v23, 0.0 }
 0x217   : > { %v4373_v2 = vrot.slane %v2566_v30, %v10052_v34  ;;  %v4368_v4 = vrot.slane %v2565_v63, %v10058_v39  ;;  %1615 = vadd.xlane.f32.xlu1 %v1614_v56  ;;  %1612 = vadd.xlane.f32.xlu0 %v1611_v58  ;;  %v1638_v63 = vsel %vm842_vm0, %v595_v51, 0.0 }
 0x218   : > { %v1412_v5 = vpop.xlane.xlu1 %1411  ;;  %v1409_v6 = vpop.xlane.xlu0 %1408 }
 0x219   : > { %v4369_v10 = vsel %vm3489_vm10, %v4368_v4, %v4364_v41  ;;  %v2568_v11 = vmul.f32 0.020408163, %v1412_v5  ;;  %v2567_v12 = vmul.f32 0.020408163, %v1409_v6  ;;  %v596_v4 = vld [vmem:[%s9820_s11 + $0x850] sm:$0xff] }
 0x21a   : > { %v4374_v18 = vsel %vm14003_vm9, %v4373_v2, %v4369_v10  ;;  %vm14004_vm9 = vcmask 654912  }
 0x21b   : > { %v4383_v20 = vrot.slane %v2568_v11, %v10068_v53  ;;  %v4378_v21 = vrot.slane %v2567_v12, %v10074_v57  ;;  %1621 = vadd.xlane.f32.xlu1 %v1620_v45  ;;  %1618 = vadd.xlane.f32.xlu0 %v1617_v13  ;;  %v1641_v11 = vsel %vm842_vm0, %v596_v4, 0.0 }
 0x21c   : > { %v1418_v62 = vpop.xlane.xlu1 %1417  ;;  %v1415_v22 = vpop.xlane.xlu0 %1414 }
 0x21d   : > { %v4379_v26 = vsel %vm3503_vm12, %v4378_v21, %v4374_v18  ;;  %v2570_v3 = vmul.f32 0.020408163, %v1418_v62  ;;  %v2569_v28 = vmul.f32 0.020408163, %v1415_v22  ;;  %v599_v18 = vld [vmem:[%s9820_s11 + $0x868] sm:$0xff] }
 0x21e   : > { %v4384_v35 = vsel %vm3510_vm13, %v4383_v20, %v4379_v26  ;;  %v598_v20 = vld [vmem:[%s9820_s11 + $0x860] sm:$0xff]  ;;  %v1650_v26 = vsel %vm842_vm0, %v599_v18, 0.0 }
 0x21f   : > { %v4393_v8 = vrot.slane %v2570_v3, %v10084_v7  ;;  %v4388_v36 = vrot.slane %v2569_v28, %v10089_v9  ;;  %1627 = vadd.xlane.f32.xlu1 %v1626_v24  ;;  %1624 = vadd.xlane.f32.xlu0 %v1623_v25  ;;  %v1647_v3 = vsel %vm842_vm0, %v598_v20, 0.0 }
 0x220   : > { %v1424_v40 = vpop.xlane.xlu1 %1423  ;;  %v1421_v43 = vpop.xlane.xlu0 %1420 }
 0x221   : > { %v4389_v46 = vsel %vm3517_vm14, %v4388_v36, %v4384_v35  ;;  %v2572_v49 = vmul.f32 0.020408163, %v1424_v40  ;;  %v2571_v50 = vmul.f32 0.020408163, %v1421_v43  ;;  %v601_v35 = vld [vmem:[%s9820_s11 + $0x878] sm:$0xff] }
 0x222   : > { %v4394_v54 = vsel %vm3524_vm15, %v4393_v8, %v4389_v46  ;;  %v600_v8 = vld [vmem:[%s9820_s11 + $0x870] sm:$0xff]  ;;  %v1656_v46 = vsel %vm842_vm0, %v601_v35, 0.0 }
 0x223   : > { %v10840_v55 = vsel %vm13973_vm11, %v4394_v54, %v10706_v38  ;;  %v4402_v56 = vrot.slane %v2572_v49, %v9987_v29  ;;  %v4398_v58 = vrot.slane %v2571_v50, %v9984_v27  ;;  %1633 = vadd.xlane.f32.xlu1 %v1632_v44  ;;  %1630 = vadd.xlane.f32.xlu0 %v1629_v17  ;;  %v597_v38 = vld [vmem:[%s9820_s11 + $0x858] sm:$0xff]  ;;  %v1653_v49 = vsel %vm842_vm0, %v600_v8, 0.0  ;;  %v603_v54 = vld [vmem:[%s9820_s11 + $0x888] sm:$0xff] }
 0x224   : > { %v1430_v59 = vpop.xlane.xlu1 %1429  ;;  %v1427_v30 = vpop.xlane.xlu0 %1426  ;;  %v1644_v10 = vsel %vm842_vm0, %v597_v38, 0.0  ;;  %vm14006_vm11 = vcmask 654912  }
 0x225   : > { %v4403_v1 = vsel %vm3426_vm1, %v4402_v56, %v4398_v58  ;;  %v2574_v41 = vmul.f32 0.020408163, %v1430_v59  ;;  %v2573_v2 = vmul.f32 0.020408163, %v1427_v30  ;;  %v602_v56 = vld [vmem:[%s9820_s11 + $0x880] sm:$0xff] }
 0x227   : > { %v4412_v5 = vrot.slane %v2574_v41, %v9996_v37  ;;  %v4407_v6 = vrot.slane %v2573_v2, %v9991_v31  ;;  %1639 = vadd.xlane.f32.xlu1 %v1638_v63  ;;  %1636 = vadd.xlane.f32.xlu0 %v1635_v0  ;;  %v1659_v41 = vsel %vm842_vm0, %v602_v56, 0.0 }
 0x228   : > { %v1436_v45 = vpop.xlane.xlu1 %1435  ;;  %v1433_v13 = vpop.xlane.xlu0 %1432 }
 0x229   : > { %v4408_v12 = vsel %vm3433_vm2, %v4407_v6, %v4403_v1  ;;  %v2576_v52 = vmul.f32 0.020408163, %v1436_v45  ;;  %v2575_v15 = vmul.f32 0.020408163, %v1433_v13  ;;  %v1662_v1 = vsel %vm842_vm0, %v603_v54, 0.0  ;;  %v604_v6 = vld [vmem:[%s9820_s11 + $0x890] sm:$0xff] }
 0x22a   : > { %v4413_v21 = vsel %vm3440_vm3, %v4412_v5, %v4408_v12  ;;  %v605_v5 = vld [vmem:[%s9820_s11 + $0x898] sm:$0xff] }
 0x22b   : > { %v4422_v62 = vrot.slane %v2576_v52, %v10001_v42  ;;  %v4417_v22 = vrot.slane %v2575_v15, %v10008_v47  ;;  %1645 = vadd.xlane.f32.xlu1 %v1644_v10  ;;  %1642 = vadd.xlane.f32.xlu0 %v1641_v11  ;;  %v1668_v52 = vsel %vm842_vm0, %v605_v5, 0.0  ;;  %v1665_v15 = vsel %vm842_vm0, %v604_v6, 0.0 }
 0x22c   : > { %v1442_v24 = vpop.xlane.xlu1 %1441  ;;  %v1439_v25 = vpop.xlane.xlu0 %1438 }
 0x22d   : > { %v4418_v28 = vsel %vm3447_vm4, %v4417_v22, %v4413_v21  ;;  %v2578_v32 = vmul.f32 0.020408163, %v1442_v24  ;;  %v2577_v33 = vmul.f32 0.020408163, %v1439_v25  ;;  %v606_v22 = vld [vmem:[%s9820_s11 + $0x8a0] sm:$0xff] }
 0x22e   : > { %v4423_v36 = vsel %vm3454_vm5, %v4422_v62, %v4418_v28  ;;  %v607_v62 = vld [vmem:[%s9820_s11 + $0x8a8] sm:$0xff] }
 0x22f   : > { %v4432_v40 = vrot.slane %v2578_v32, %v10019_v60  ;;  %v4427_v43 = vrot.slane %v2577_v33, %v10022_v61  ;;  %1651 = vadd.xlane.f32.xlu1 %v1650_v26  ;;  %1648 = vadd.xlane.f32.xlu0 %v1647_v3  ;;  %v1674_v32 = vsel %vm842_vm0, %v607_v62, 0.0  ;;  %v1671_v33 = vsel %vm842_vm0, %v606_v22, 0.0 }
 0x230   : > { %v1448_v44 = vpop.xlane.xlu1 %1447  ;;  %v1445_v17 = vpop.xlane.xlu0 %1444 }
 0x231   : > { %v4428_v50 = vsel %vm3461_vm6, %v4427_v43, %v4423_v36  ;;  %v2580_v51 = vmul.f32 0.020408163, %v1448_v44  ;;  %v2579_v23 = vmul.f32 0.020408163, %v1445_v17  ;;  %v608_v43 = vld [vmem:[%s9820_s11 + $0x8b0] sm:$0xff] }
 0x232   : > { %v4433_v58 = vsel %vm13975_vm7, %v4432_v40, %v4428_v50  ;;  %v609_v40 = vld [vmem:[%s9820_s11 + $0x8b8] sm:$0xff] }
 0x233   : > { %v4442_v59 = vrot.slane %v2580_v51, %v10036_v14  ;;  %v4437_v30 = vrot.slane %v2579_v23, %v10042_v19  ;;  %1657 = vadd.xlane.f32.xlu1 %v1656_v46  ;;  %1654 = vadd.xlane.f32.xlu0 %v1653_v49  ;;  %v1680_v51 = vsel %vm842_vm0, %v609_v40, 0.0  ;;  %v1677_v23 = vsel %vm842_vm0, %v608_v43, 0.0 }
 0x234   : > { %v1454_v63 = vpop.xlane.xlu1 %1453  ;;  %v1451_v0 = vpop.xlane.xlu0 %1450 }
 0x235   : > { %v4438_v2 = vsel %vm3475_vm8, %v4437_v30, %v4433_v58  ;;  %v2582_v38 = vmul.f32 0.020408163, %v1454_v63  ;;  %v2581_v4 = vmul.f32 0.020408163, %v1451_v0  ;;  %v610_v30 = vld [vmem:[%s9820_s11 + $0x8c0] sm:$0xff] }
 0x236   : > { %v4443_v45 = vsel %vm14004_vm9, %v4442_v59, %v4438_v2  ;;  %vm14005_vm9 = vcmask 786112   ;;  %v611_v59 = vld [vmem:[%s9820_s11 + $0x8c8] sm:$0xff]  ;;  %v1683_v5 = vsel %vm842_vm0, %v610_v30, 0.0 }
 0x237   : > { %v4452_v13 = vrot.slane %v2582_v38, %v10052_v34  ;;  %v4447_v10 = vrot.slane %v2581_v4, %v10058_v39  ;;  %1663 = vadd.xlane.f32.xlu1 %v1662_v1  ;;  %1660 = vadd.xlane.f32.xlu0 %v1659_v41  ;;  %v1686_v4 = vsel %vm842_vm0, %v611_v59, 0.0 }
 0x238   : > { %v1460_v11 = vpop.xlane.xlu1 %1459  ;;  %v1457_v12 = vpop.xlane.xlu0 %1456 }
 0x239   : > { %v4448_v18 = vsel %vm3489_vm10, %v4447_v10, %v4443_v45  ;;  %v2584_v20 = vmul.f32 0.020408163, %v1460_v11  ;;  %v2583_v21 = vmul.f32 0.020408163, %v1457_v12  ;;  %v612_v10 = vld [vmem:[%s9820_s11 + $0x8d0] sm:$0xff] }
 0x23a   : > { %v4453_v24 = vsel %vm14005_vm9, %v4452_v13, %v4448_v18  ;;  %vm13974_vm9 = vcmask 1046534  }
 0x23b   : > { %v4462_v25 = vrot.slane %v2584_v20, %v10068_v53  ;;  %v4457_v26 = vrot.slane %v2583_v21, %v10074_v57  ;;  %1669 = vadd.xlane.f32.xlu1 %v1668_v52  ;;  %1666 = vadd.xlane.f32.xlu0 %v1665_v15  ;;  %v1689_v20 = vsel %vm842_vm0, %v612_v10, 0.0 }
 0x23c   : > { %v1466_v3 = vpop.xlane.xlu1 %1465  ;;  %v1463_v28 = vpop.xlane.xlu0 %1462 }
 0x23d   : > { %v4458_v35 = vsel %vm3503_vm12, %v4457_v26, %v4453_v24  ;;  %v2586_v8 = vmul.f32 0.020408163, %v1466_v3  ;;  %v2585_v36 = vmul.f32 0.020408163, %v1463_v28  ;;  %v615_v24 = vld [vmem:[%s9820_s11 + $0x8e8] sm:$0xff] }
 0x23e   : > { %v4463_v44 = vsel %vm3510_vm13, %v4462_v25, %v4458_v35  ;;  %v614_v25 = vld [vmem:[%s9820_s11 + $0x8e0] sm:$0xff]  ;;  %v1698_v35 = vsel %vm842_vm0, %v615_v24, 0.0 }
 0x23f   : > { %v4472_v17 = vrot.slane %v2586_v8, %v10084_v7  ;;  %v4467_v46 = vrot.slane %v2585_v36, %v10089_v9  ;;  %1675 = vadd.xlane.f32.xlu1 %v1674_v32  ;;  %1672 = vadd.xlane.f32.xlu0 %v1671_v33  ;;  %v1695_v8 = vsel %vm842_vm0, %v614_v25, 0.0 }
 0x240   : > { %v1472_v49 = vpop.xlane.xlu1 %1471  ;;  %v1469_v50 = vpop.xlane.xlu0 %1468 }
 0x241   : > { %v4468_v54 = vsel %vm3517_vm14, %v4467_v46, %v4463_v44  ;;  %v2588_v56 = vmul.f32 0.020408163, %v1472_v49  ;;  %v2587_v58 = vmul.f32 0.020408163, %v1469_v50  ;;  %v617_v44 = vld [vmem:[%s9820_s11 + $0x8f8] sm:$0xff] }
 0x242   : > { %v4473_v63 = vsel %vm3524_vm15, %v4472_v17, %v4468_v54  ;;  %v616_v17 = vld [vmem:[%s9820_s11 + $0x8f0] sm:$0xff]  ;;  %v1704_v54 = vsel %vm842_vm0, %v617_v44, 0.0 }
 0x243   : > { %v10907_v0 = vsel %vm13974_vm9, %v4473_v63, %v10773_v48  ;;  %v4481_v1 = vrot.slane %v2588_v56, %v9987_v29  ;;  %v4477_v41 = vrot.slane %v2587_v58, %v9984_v27  ;;  %1681 = vadd.xlane.f32.xlu1 %v1680_v51  ;;  %1678 = vadd.xlane.f32.xlu0 %v1677_v23  ;;  %v613_v48 = vld [vmem:[%s9820_s11 + $0x8d8] sm:$0xff]  ;;  %v1701_v56 = vsel %vm842_vm0, %v616_v17, 0.0  ;;  %v619_v63 = vld [vmem:[%s9820_s11 + $0x908] sm:$0xff] }
 0x244   : > { %v1478_v2 = vpop.xlane.xlu1 %1477  ;;  %v1475_v38 = vpop.xlane.xlu0 %1474  ;;  %v1692_v18 = vsel %vm842_vm0, %v613_v48, 0.0 }
 0x245   : > { %v4482_v6 = vsel %vm3426_vm1, %v4481_v1, %v4477_v41  ;;  %v2590_v45 = vmul.f32 0.020408163, %v1478_v2  ;;  %v2589_v13 = vmul.f32 0.020408163, %v1475_v38  ;;  %v618_v1 = vld [vmem:[%s9820_s11 + $0x900] sm:$0xff] }
 0x247   : > { %v4491_v11 = vrot.slane %v2590_v45, %v9996_v37  ;;  %v4486_v12 = vrot.slane %v2589_v13, %v9991_v31  ;;  %1687 = vadd.xlane.f32.xlu1 %v1686_v4  ;;  %1684 = vadd.xlane.f32.xlu0 %v1683_v5  ;;  %v1707_v45 = vsel %vm842_vm0, %v618_v1, 0.0 }
 0x248   : > { %v1484_v52 = vpop.xlane.xlu1 %1483  ;;  %v1481_v15 = vpop.xlane.xlu0 %1480 }
 0x249   : > { %v4487_v21 = vsel %vm3433_vm2, %v4486_v12, %v4482_v6  ;;  %v2592_v62 = vmul.f32 0.020408163, %v1484_v52  ;;  %v2591_v22 = vmul.f32 0.020408163, %v1481_v15  ;;  %v1710_v6 = vsel %vm842_vm0, %v619_v63, 0.0  ;;  %v620_v12 = vld [vmem:[%s9820_s11 + $0x910] sm:$0xff] }
 0x24a   : > { %v4492_v26 = vsel %vm3440_vm3, %v4491_v11, %v4487_v21  ;;  %v621_v11 = vld [vmem:[%s9820_s11 + $0x918] sm:$0xff] }
 0x24b   : > { %v4501_v3 = vrot.slane %v2592_v62, %v10001_v42  ;;  %v4496_v28 = vrot.slane %v2591_v22, %v10008_v47  ;;  %1693 = vadd.xlane.f32.xlu1 %v1692_v18  ;;  %1690 = vadd.xlane.f32.xlu0 %v1689_v20  ;;  %v1716_v62 = vsel %vm842_vm0, %v621_v11, 0.0  ;;  %v1713_v22 = vsel %vm842_vm0, %v620_v12, 0.0 }
 0x24c   : > { %v1490_v32 = vpop.xlane.xlu1 %1489  ;;  %v1487_v33 = vpop.xlane.xlu0 %1486 }
 0x24d   : > { %v4497_v36 = vsel %vm3447_vm4, %v4496_v28, %v4492_v26  ;;  %v2594_v40 = vmul.f32 0.020408163, %v1490_v32  ;;  %v2593_v43 = vmul.f32 0.020408163, %v1487_v33  ;;  %v622_v28 = vld [vmem:[%s9820_s11 + $0x920] sm:$0xff] }
 0x24e   : > { %v4502_v46 = vsel %vm3454_vm5, %v4501_v3, %v4497_v36  ;;  %v623_v3 = vld [vmem:[%s9820_s11 + $0x928] sm:$0xff] }
 0x24f   : > { %v4511_v49 = vrot.slane %v2594_v40, %v10019_v60  ;;  %v4506_v50 = vrot.slane %v2593_v43, %v10022_v61  ;;  %1699 = vadd.xlane.f32.xlu1 %v1698_v35  ;;  %1696 = vadd.xlane.f32.xlu0 %v1695_v8  ;;  %v1722_v40 = vsel %vm842_vm0, %v623_v3, 0.0  ;;  %v1719_v43 = vsel %vm842_vm0, %v622_v28, 0.0 }
 0x250   : > { %v1496_v51 = vpop.xlane.xlu1 %1495  ;;  %v1493_v23 = vpop.xlane.xlu0 %1492 }
 0x251   : > { %v4507_v58 = vsel %vm3461_vm6, %v4506_v50, %v4502_v46  ;;  %v2596_v59 = vmul.f32 0.020408163, %v1496_v51  ;;  %v2595_v30 = vmul.f32 0.020408163, %v1493_v23  ;;  %v624_v50 = vld [vmem:[%s9820_s11 + $0x930] sm:$0xff] }
 0x252   : > { %v4512_v41 = vsel %vm13975_vm7, %v4511_v49, %v4507_v58  ;;  %v625_v49 = vld [vmem:[%s9820_s11 + $0x938] sm:$0xff] }
 0x253   : > { %v4521_v2 = vrot.slane %v2596_v59, %v10036_v14  ;;  %v4516_v38 = vrot.slane %v2595_v30, %v10042_v19  ;;  %1705 = vadd.xlane.f32.xlu1 %v1704_v54  ;;  %1702 = vadd.xlane.f32.xlu0 %v1701_v56  ;;  %v1728_v59 = vsel %vm842_vm0, %v625_v49, 0.0  ;;  %v1725_v30 = vsel %vm842_vm0, %v624_v50, 0.0 }
 0x254   : > { %v1502_v4 = vpop.xlane.xlu1 %1501  ;;  %v1499_v5 = vpop.xlane.xlu0 %1498 }
 0x255   : > { %v4517_v13 = vsel %vm3475_vm8, %v4516_v38, %v4512_v41  ;;  %v2598_v48 = vmul.f32 0.020408163, %v1502_v4  ;;  %v2597_v10 = vmul.f32 0.020408163, %v1499_v5  ;;  %v626_v38 = vld [vmem:[%s9820_s11 + $0x940] sm:$0xff] }
 0x256   : > { %v4522_v52 = vsel %vm14006_vm11, %v4521_v2, %v4517_v13  ;;  %vm14007_vm11 = vcmask 786112   ;;  %v627_v2 = vld [vmem:[%s9820_s11 + $0x948] sm:$0xff]  ;;  %v1731_v11 = vsel %vm842_vm0, %v626_v38, 0.0 }
 0x257   : > { %v4531_v15 = vrot.slane %v2598_v48, %v10052_v34  ;;  %v4526_v18 = vrot.slane %v2597_v10, %v10058_v39  ;;  %1711 = vadd.xlane.f32.xlu1 %v1710_v6  ;;  %1708 = vadd.xlane.f32.xlu0 %v1707_v45  ;;  %v1734_v10 = vsel %vm842_vm0, %v627_v2, 0.0 }
 0x258   : > { %v1508_v20 = vpop.xlane.xlu1 %1507  ;;  %v1505_v21 = vpop.xlane.xlu0 %1504 }
 0x259   : > { %v4527_v24 = vsel %vm3489_vm10, %v4526_v18, %v4522_v52  ;;  %v2600_v25 = vmul.f32 0.020408163, %v1508_v20  ;;  %v2599_v26 = vmul.f32 0.020408163, %v1505_v21  ;;  %v628_v18 = vld [vmem:[%s9820_s11 + $0x950] sm:$0xff] }
 0x25a   : > { %v4532_v32 = vsel %vm14007_vm11, %v4531_v15, %v4527_v24  ;;  %v629_v15 = vld [vmem:[%s9820_s11 + $0x958] sm:$0xff]  ;;  %vm14008_vm11 = vcmask 654912  }
 0x25b   : > { %v4541_v33 = vrot.slane %v2600_v25, %v10068_v53  ;;  %v4536_v35 = vrot.slane %v2599_v26, %v10074_v57  ;;  %1717 = vadd.xlane.f32.xlu1 %v1716_v62  ;;  %1714 = vadd.xlane.f32.xlu0 %v1713_v22  ;;  %v1740_v24 = vsel %vm842_vm0, %v629_v15, 0.0  ;;  %v1737_v25 = vsel %vm842_vm0, %v628_v18, 0.0 }
 0x25c   : > { %v1514_v8 = vpop.xlane.xlu1 %1513  ;;  %v1511_v36 = vpop.xlane.xlu0 %1510 }
 0x25d   : > { %v4537_v44 = vsel %vm3503_vm12, %v4536_v35, %v4532_v32  ;;  %v2602_v17 = vmul.f32 0.020408163, %v1514_v8  ;;  %v2601_v46 = vmul.f32 0.020408163, %v1511_v36  ;;  %v631_v32 = vld [vmem:[%s9820_s11 + $0x968] sm:$0xff] }
 0x25e   : > { %v4542_v51 = vsel %vm3510_vm13, %v4541_v33, %v4537_v44  ;;  %v630_v33 = vld [vmem:[%s9820_s11 + $0x960] sm:$0xff]  ;;  %v1746_v44 = vsel %vm842_vm0, %v631_v32, 0.0 }
 0x25f   : > { %v4551_v23 = vrot.slane %v2602_v17, %v10084_v7  ;;  %v4546_v54 = vrot.slane %v2601_v46, %v10089_v9  ;;  %1723 = vadd.xlane.f32.xlu1 %v1722_v40  ;;  %1720 = vadd.xlane.f32.xlu0 %v1719_v43  ;;  %v1743_v17 = vsel %vm842_vm0, %v630_v33, 0.0 }
 0x260   : > { %v1520_v56 = vpop.xlane.xlu1 %1519  ;;  %v1517_v58 = vpop.xlane.xlu0 %1516 }
 0x261   : > { %v4547_v63 = vsel %vm3517_vm14, %v4546_v54, %v4542_v51  ;;  %v2604_v1 = vmul.f32 0.020408163, %v1520_v56  ;;  %v2603_v41 = vmul.f32 0.020408163, %v1517_v58  ;;  %v633_v51 = vld [vmem:[%s9820_s11 + $0x978] sm:$0xff] }
 0x262   : > { %v4552_v4 = vsel %vm3524_vm15, %v4551_v23, %v4547_v63  ;;  %v632_v23 = vld [vmem:[%s9820_s11 + $0x970] sm:$0xff]  ;;  %v1752_v63 = vsel %vm842_vm0, %v633_v51, 0.0 }
 0x263   : > { %v10974_v5 = vsel %vm13974_vm9, %v4552_v4, %v10840_v55  ;;  %1729 = vadd.xlane.f32.xlu1 %v1728_v59  ;;  %1726 = vadd.xlane.f32.xlu0 %v1725_v30  ;;  %v4560_v6 = vrot.slane %v2604_v1, %v9987_v29  ;;  %v4556_v45 = vrot.slane %v2603_v41, %v9984_v27  ;;  %v1749_v1 = vsel %vm842_vm0, %v632_v23, 0.0  ;;  %v635_v4 = vld [vmem:[%s9820_s11 + $0x988] sm:$0xff] }
 0x264   : > { %v1526_v13 = vpop.xlane.xlu1 %1525  ;;  %v1523_v48 = vpop.xlane.xlu0 %1522 }
 0x265   : > { %v2606_v12 = vmul.f32 0.020408163, %v1526_v13  ;;  %v2605_v52 = vmul.f32 0.020408163, %v1523_v48  ;;  %v4561_v20 = vsel %vm3426_vm1, %v4560_v6, %v4556_v45  ;;  %v634_v6 = vld [vmem:[%s9820_s11 + $0x980] sm:$0xff] }
 0x267   : > { %v4565_v55 = vrot.slane %v2605_v52, %v9991_v31  ;;  %1735 = vadd.xlane.f32.xlu1 %v1734_v10  ;;  %1732 = vadd.xlane.f32.xlu0 %v1731_v11  ;;  %v4570_v21 = vrot.slane %v2606_v12, %v9996_v37  ;;  %v1758_v12 = vsel %vm842_vm0, %v635_v4, 0.0  ;;  %v1755_v52 = vsel %vm842_vm0, %v634_v6, 0.0  ;;  %v643_v6 = vld [vmem:[%s9820_s11 + $0x9c8] sm:$0xff] }
 0x268   : > { %v1532_v62 = vpop.xlane.xlu1 %1531  ;;  %v1529_v22 = vpop.xlane.xlu0 %1528 }
 0x269   : > { %v4566_v26 = vsel %vm3433_vm2, %v4565_v55, %v4561_v20  ;;  %v2608_v3 = vmul.f32 0.020408163, %v1532_v62  ;;  %v2607_v28 = vmul.f32 0.020408163, %v1529_v22  ;;  %v637_v20 = vld [vmem:[%s9820_s11 + $0x998] sm:$0xff] }
 0x26a   : > { %v4571_v36 = vsel %vm3440_vm3, %v4570_v21, %v4566_v26  ;;  %v636_v21 = vld [vmem:[%s9820_s11 + $0x990] sm:$0xff] }
 0x26b   : > { %v4575_v35 = vrot.slane %v2607_v28, %v10008_v47  ;;  %1741 = vadd.xlane.f32.xlu1 %v1740_v24  ;;  %1738 = vadd.xlane.f32.xlu0 %v1737_v25  ;;  %v4580_v8 = vrot.slane %v2608_v3, %v10001_v42  ;;  %v1764_v3 = vsel %vm842_vm0, %v637_v20, 0.0  ;;  %v1761_v28 = vsel %vm842_vm0, %v636_v21, 0.0 }
 0x26c   : > { %v1538_v40 = vpop.xlane.xlu1 %1537  ;;  %v1535_v43 = vpop.xlane.xlu0 %1534 }
 0x26d   : > { %v4576_v46 = vsel %vm3447_vm4, %v4575_v35, %v4571_v36  ;;  %v2610_v49 = vmul.f32 0.020408163, %v1538_v40  ;;  %v2609_v50 = vmul.f32 0.020408163, %v1535_v43  ;;  %v638_v36 = vld [vmem:[%s9820_s11 + $0x9a0] sm:$0xff] }
 0x26e   : > { %v4581_v58 = vsel %vm3454_vm5, %v4580_v8, %v4576_v46  ;;  %v639_v8 = vld [vmem:[%s9820_s11 + $0x9a8] sm:$0xff] }
 0x26f   : > { %v4585_v54 = vrot.slane %v2609_v50, %v10022_v61  ;;  %1747 = vadd.xlane.f32.xlu1 %v1746_v44  ;;  %1744 = vadd.xlane.f32.xlu0 %v1743_v17  ;;  %v4590_v56 = vrot.slane %v2610_v49, %v10019_v60  ;;  %v1770_v49 = vsel %vm842_vm0, %v639_v8, 0.0  ;;  %v1767_v50 = vsel %vm842_vm0, %v638_v36, 0.0 }
 0x270   : > { %v1544_v59 = vpop.xlane.xlu1 %1543  ;;  %v1541_v30 = vpop.xlane.xlu0 %1540 }
 0x271   : > { %v4586_v41 = vsel %vm3461_vm6, %v4585_v54, %v4581_v58  ;;  %v2612_v2 = vmul.f32 0.020408163, %v1544_v59  ;;  %v2611_v38 = vmul.f32 0.020408163, %v1541_v30  ;;  %v640_v58 = vld [vmem:[%s9820_s11 + $0x9b0] sm:$0xff]  ;;  %v2896_v59 = vstv %s11024_s17 }
 0x272   : > { %v4591_v48 = vsel %vm13975_vm7, %v4590_v56, %v4586_v41  ;;  %v641_v56 = vld [vmem:[%s9820_s11 + $0x9b8] sm:$0xff]  ;;  %v1773_v4 = vsel %vm842_vm0, %v640_v58, 0.0  ;;  %vm11048_vm9 = vcmp.lt.s32.totalorder %v9972_v16, %v2896_v59 }
 0x273   : > { %v4595_v45 = vrot.slane %v2611_v38, %v10042_v19  ;;  %1753 = vadd.xlane.f32.xlu1 %v1752_v63  ;;  %1750 = vadd.xlane.f32.xlu0 %v1749_v1  ;;  %v4600_v13 = vrot.slane %v2612_v2, %v10036_v14  ;;  %v1776_v38 = vsel %vm842_vm0, %v641_v56, 0.0 }
 0x274   : > { %v1550_v10 = vpop.xlane.xlu1 %1549  ;;  %v1547_v11 = vpop.xlane.xlu0 %1546 }
 0x275   : > { %v4596_v15 = vsel %vm3475_vm8, %v4595_v45, %v4591_v48  ;;  %v2614_v18 = vmul.f32 0.020408163, %v1550_v10  ;;  %v2613_v55 = vmul.f32 0.020408163, %v1547_v11  ;;  %v642_v10 = vld [vmem:[%s9820_s11 + $0x9c0] sm:$0xff] }
 0x276   : > { %v4601_v24 = vsel %vm14008_vm11, %v4600_v13, %v4596_v15  ;;  %vm14009_vm11 = vcmask 786112  }
 0x277   : > { %v4605_v62 = vrot.slane %v2613_v55, %v10058_v39  ;;  %1759 = vadd.xlane.f32.xlu1 %v1758_v12  ;;  %1756 = vadd.xlane.f32.xlu0 %v1755_v52  ;;  %v4610_v22 = vrot.slane %v2614_v18, %v10052_v34  ;;  %v1782_v52 = vsel %vm842_vm0, %v643_v6, 0.0 }
 0x278   : > { %v1556_v25 = vpop.xlane.xlu1 %1555  ;;  %v1553_v26 = vpop.xlane.xlu0 %1552 }
 0x279   : > { %v4606_v32 = vsel %vm3489_vm10, %v4605_v62, %v4601_v24  ;;  %v2616_v33 = vmul.f32 0.020408163, %v1556_v25  ;;  %v2615_v35 = vmul.f32 0.020408163, %v1553_v26  ;;  %v1779_v62 = vsel %vm842_vm0, %v642_v10, 0.0  ;;  %v645_v26 = vld [vmem:[%s9820_s11 + $0x9d8] sm:$0xff] }
 0x27a   : > { %v4611_v44 = vsel %vm14009_vm11, %v4610_v22, %v4606_v32  ;;  %vm5987_vm11 = vcmask 1047559   ;;  %v1788_v8 = vsel %vm842_vm0, %v645_v26, 0.0 }
 0x27b   : > { %v4615_v40 = vrot.slane %v2615_v35, %v10074_v57  ;;  %1765 = vadd.xlane.f32.xlu1 %v1764_v3  ;;  %1762 = vadd.xlane.f32.xlu0 %v1761_v28  ;;  %v4620_v43 = vrot.slane %v2616_v33, %v10068_v53  ;;  %v644_v3 = vld [vmem:[%s9820_s11 + $0x9d0] sm:$0xff] }
 0x27c   : > { %v1562_v17 = vpop.xlane.xlu1 %1561  ;;  %v1559_v46 = vpop.xlane.xlu0 %1558  ;;  %v1785_v36 = vsel %vm842_vm0, %v644_v3, 0.0 }
 0x27d   : > { %v4616_v51 = vsel %vm3503_vm12, %v4615_v40, %v4611_v44  ;;  %v2618_v23 = vmul.f32 0.020408163, %v1562_v17  ;;  %v2617_v54 = vmul.f32 0.020408163, %v1559_v46  ;;  %v647_v17 = vld [vmem:[%s9820_s11 + $0x9e8] sm:$0xff]  ;;  %v646_v46 = vld [vmem:[%s9820_s11 + $0x9e0] sm:$0xff] }
 0x27e   : > { %v4621_v1 = vsel %vm3510_vm13, %v4620_v43, %v4616_v51  ;;  %v1794_v56 = vsel %vm842_vm0, %v647_v17, 0.0  ;;  %v1791_v58 = vsel %vm842_vm0, %v646_v46, 0.0 }
 0x27f   : > { %v4630_v30 = vrot.slane %v2618_v23, %v10084_v7  ;;  %v4625_v63 = vrot.slane %v2617_v54, %v10089_v9  ;;  %1771 = vadd.xlane.f32.xlu1 %v1770_v49  ;;  %1768 = vadd.xlane.f32.xlu0 %v1767_v50 }
 0x280   : > { %v1568_v41 = vpop.xlane.xlu1 %1567  ;;  %v1565_v2 = vpop.xlane.xlu0 %1564 }
 0x281   : > { %v4626_v45 = vsel %vm3517_vm14, %v4625_v63, %v4621_v1  ;;  %v2620_v13 = vmul.f32 0.020408163, %v1568_v41  ;;  %v2619_v48 = vmul.f32 0.020408163, %v1565_v2  ;;  %v649_v41 = vld [vmem:[%s9820_s11 + $0x9f8] sm:$0xff]  ;;  %v648_v2 = vld [vmem:[%s9820_s11 + $0x9f0] sm:$0xff] }
 0x282   : > { %v4631_v12 = vsel %vm3524_vm15, %v4630_v30, %v4626_v45  ;;  %v1797_v10 = vsel %vm842_vm0, %v648_v2, 0.0 }
 0x283   : > { %1777 = vadd.xlane.f32.xlu1 %v1776_v38  ;;  %1774 = vadd.xlane.f32.xlu0 %v1773_v4  ;;  %v5988_v15 = vsel %vm5987_vm11, %v4631_v12, %v10907_v0  ;;  %v4639_v18 = vrot.slane %v2620_v13, %v9987_v29  ;;  %v4635_v55 = vrot.slane %v2619_v48, %v9984_v27  ;;  %v1800_v48 = vsel %vm842_vm0, %v649_v41, 0.0 }
 0x284   : > { %v1574_v20 = vpop.xlane.xlu1 %1573  ;;  %v1571_v21 = vpop.xlane.xlu0 %1570  ;;  %v6014_v22 = vsel %vm11048_vm9, %v5988_v15, 0.0 }
 0x285   : > { %v2622_v24 = vmul.f32 0.020408163, %v1574_v20  ;;  %v2621_v25 = vmul.f32 0.020408163, %v1571_v21  ;;  %6023 = vst [vmem:[%s11063_s20] sm:$0xff] %v6014_v22  ;;  %v4640_v28 = vsel %vm3426_vm1, %v4639_v18, %v4635_v55  ;;  %v651_v18 = vld [vmem:[%s9820_s11 + $0xa08] sm:$0xff]  ;;  %v650_v55 = vld [vmem:[%s9820_s11 + $0xa00] sm:$0xff] }
 0x286   : > { %v1803_v26 = vsel %vm842_vm0, %v650_v55, 0.0 }
 0x287   : > { %v4644_v0 = vrot.slane %v2621_v25, %v9991_v31  ;;  %1783 = vadd.xlane.f32.xlu1 %v1782_v52  ;;  %1780 = vadd.xlane.f32.xlu0 %v1779_v62  ;;  %v4649_v32 = vrot.slane %v2622_v24, %v9996_v37  ;;  %v1806_v25 = vsel %vm842_vm0, %v651_v18, 0.0 }
 0x288   : > { %v1580_v33 = vpop.xlane.xlu1 %1579  ;;  %v1577_v35 = vpop.xlane.xlu0 %1576 }
 0x289   : > { %v4645_v40 = vsel %vm3433_vm2, %v4644_v0, %v4640_v28  ;;  %v2624_v43 = vmul.f32 0.020408163, %v1580_v33  ;;  %v2623_v44 = vmul.f32 0.020408163, %v1577_v35  ;;  %v652_v33 = vld [vmem:[%s9820_s11 + $0xa10] sm:$0xff] }
 0x28a   : > { %v4650_v51 = vsel %vm3440_vm3, %v4649_v32, %v4645_v40  ;;  %v653_v32 = vld [vmem:[%s9820_s11 + $0xa18] sm:$0xff]  ;;  %v1809_v17 = vsel %vm842_vm0, %v652_v33, 0.0 }
 0x28b   : > { %v4654_v49 = vrot.slane %v2623_v44, %v10008_v47  ;;  %1789 = vadd.xlane.f32.xlu1 %v1788_v8  ;;  %1786 = vadd.xlane.f32.xlu0 %v1785_v36  ;;  %v4659_v50 = vrot.slane %v2624_v43, %v10001_v42  ;;  %v1812_v44 = vsel %vm842_vm0, %v653_v32, 0.0 }
 0x28c   : > { %v1586_v23 = vpop.xlane.xlu1 %1585  ;;  %v1583_v54 = vpop.xlane.xlu0 %1582 }
 0x28d   : > { %v4655_v30 = vsel %vm3447_vm4, %v4654_v49, %v4650_v51  ;;  %v2626_v63 = vmul.f32 0.020408163, %v1586_v23  ;;  %v2625_v1 = vmul.f32 0.020408163, %v1583_v54  ;;  %v655_v51 = vld [vmem:[%s9820_s11 + $0xa28] sm:$0xff]  ;;  %v654_v23 = vld [vmem:[%s9820_s11 + $0xa20] sm:$0xff] }
 0x28e   : > { %v4660_v6 = vsel %vm3454_vm5, %v4659_v50, %v4655_v30  ;;  %v1815_v41 = vsel %vm842_vm0, %v654_v23, 0.0 }
 0x28f   : > { %v4664_v38 = vrot.slane %v2625_v1, %v10022_v61  ;;  %1795 = vadd.xlane.f32.xlu1 %v1794_v56  ;;  %1792 = vadd.xlane.f32.xlu0 %v1791_v58  ;;  %v4669_v4 = vrot.slane %v2626_v63, %v10019_v60  ;;  %v1818_v1 = vsel %vm842_vm0, %v655_v51, 0.0 }
 0x290   : > { %v1592_v45 = vpop.xlane.xlu1 %1591  ;;  %v1589_v13 = vpop.xlane.xlu0 %1588 }
 0x291   : > { %v4665_v12 = vsel %vm3461_vm6, %v4664_v38, %v4660_v6  ;;  %v2628_v52 = vmul.f32 0.020408163, %v1592_v45  ;;  %v2627_v15 = vmul.f32 0.020408163, %v1589_v13  ;;  %v657_v6 = vld [vmem:[%s9820_s11 + $0xa38] sm:$0xff]  ;;  %v656_v45 = vld [vmem:[%s9820_s11 + $0xa30] sm:$0xff] }
 0x292   : > { %v4670_v62 = vsel %vm13975_vm7, %v4669_v4, %v4665_v12  ;;  %vm14012_vm7 = vcmask 654912   ;;  %v1821_v18 = vsel %vm842_vm0, %v656_v45, 0.0 }
 0x293   : > { %v4674_v20 = vrot.slane %v2627_v15, %v10042_v19  ;;  %1801 = vadd.xlane.f32.xlu1 %v1800_v48  ;;  %1798 = vadd.xlane.f32.xlu0 %v1797_v10  ;;  %v4679_v21 = vrot.slane %v2628_v52, %v10036_v14  ;;  %v1824_v15 = vsel %vm842_vm0, %v657_v6, 0.0 }
 0x294   : > { %v1598_v22 = vpop.xlane.xlu1 %1597  ;;  %v1595_v24 = vpop.xlane.xlu0 %1594 }
 0x295   : > { %v4675_v3 = vsel %vm3475_vm8, %v4674_v20, %v4670_v62  ;;  %v2630_v0 = vmul.f32 0.020408163, %v1598_v22  ;;  %v2629_v28 = vmul.f32 0.020408163, %v1595_v24  ;;  %v659_v62 = vld [vmem:[%s9820_s11 + $0xa48] sm:$0xff]  ;;  %v658_v22 = vld [vmem:[%s9820_s11 + $0xa40] sm:$0xff] }
 0x296   : > { %v4680_v36 = vsel %vm14012_vm7, %v4679_v21, %v4675_v3  ;;  %vm14013_vm7 = vcmask 786112   ;;  %v1830_v32 = vsel %vm842_vm0, %v659_v62, 0.0  ;;  %v1827_v33 = vsel %vm842_vm0, %v658_v22, 0.0 }
 0x297   : > { %v4684_v35 = vrot.slane %v2629_v28, %v10058_v39  ;;  %1807 = vadd.xlane.f32.xlu1 %v1806_v25  ;;  %1804 = vadd.xlane.f32.xlu0 %v1803_v26  ;;  %v4689_v8 = vrot.slane %v2630_v0, %v10052_v34 }
 0x298   : > { %v1604_v40 = vpop.xlane.xlu1 %1603  ;;  %v1601_v43 = vpop.xlane.xlu0 %1600 }
 0x299   : > { %v4685_v46 = vsel %vm3489_vm10, %v4684_v35, %v4680_v36  ;;  %v2632_v49 = vmul.f32 0.020408163, %v1604_v40  ;;  %v2631_v50 = vmul.f32 0.020408163, %v1601_v43  ;;  %v661_v43 = vld [vmem:[%s9820_s11 + $0xa58] sm:$0xff] }
 0x29a   : > { %v4690_v58 = vsel %vm14013_vm7, %v4689_v8, %v4685_v46  ;;  %v1836_v11 = vsel %vm842_vm0, %v661_v43, 0.0  ;;  %vm14015_vm7 = vcmask 654912  }
 0x29b   : > { %v4694_v54 = vrot.slane %v2631_v50, %v10074_v57  ;;  %1813 = vadd.xlane.f32.xlu1 %v1812_v44  ;;  %1810 = vadd.xlane.f32.xlu0 %v1809_v17  ;;  %v4699_v56 = vrot.slane %v2632_v49, %v10068_v53  ;;  %v660_v44 = vld [vmem:[%s9820_s11 + $0xa50] sm:$0xff] }
 0x29c   : > { %v1610_v30 = vpop.xlane.xlu1 %1609  ;;  %v1607_v63 = vpop.xlane.xlu0 %1606  ;;  %v1833_v50 = vsel %vm842_vm0, %v660_v44, 0.0  ;;  %v669_v44 = vld [vmem:[%s9820_s11 + $0xa98] sm:$0xff] }
 0x29d   : > { %v4695_v2 = vsel %vm3503_vm12, %v4694_v54, %v4690_v58  ;;  %v2634_v38 = vmul.f32 0.020408163, %v1610_v30  ;;  %v2633_v4 = vmul.f32 0.020408163, %v1607_v63  ;;  %v662_v58 = vld [vmem:[%s9820_s11 + $0xa60] sm:$0xff] }
 0x29e   : > { %v4700_v10 = vsel %vm3510_vm13, %v4699_v56, %v4695_v2  ;;  %v663_v56 = vld [vmem:[%s9820_s11 + $0xa68] sm:$0xff] }
 0x29f   : > { %v4709_v13 = vrot.slane %v2634_v38, %v10084_v7  ;;  %v4704_v48 = vrot.slane %v2633_v4, %v10089_v9  ;;  %1819 = vadd.xlane.f32.xlu1 %v1818_v1  ;;  %1816 = vadd.xlane.f32.xlu0 %v1815_v41  ;;  %v1842_v38 = vsel %vm842_vm0, %v663_v56, 0.0  ;;  %v1839_v4 = vsel %vm842_vm0, %v662_v58, 0.0 }
 0x2a0   : > { %v1616_v12 = vpop.xlane.xlu1 %1615  ;;  %v1613_v52 = vpop.xlane.xlu0 %1612 }
 0x2a1   : > { %v4705_v55 = vsel %vm3517_vm14, %v4704_v48, %v4700_v10  ;;  %v2636_v20 = vmul.f32 0.020408163, %v1616_v12  ;;  %v2635_v21 = vmul.f32 0.020408163, %v1613_v52  ;;  %v665_v48 = vld [vmem:[%s9820_s11 + $0xa78] sm:$0xff]  ;;  %v664_v10 = vld [vmem:[%s9820_s11 + $0xa70] sm:$0xff] }
 0x2a2   : > { %v4710_v24 = vsel %vm3524_vm15, %v4709_v13, %v4705_v55 }
 0x2a3   : > { %v4718_v25 = vrot.slane %v2636_v20, %v9987_v29  ;;  %v4714_v26 = vrot.slane %v2635_v21, %v9984_v27  ;;  %1825 = vadd.xlane.f32.xlu1 %v1824_v15  ;;  %1822 = vadd.xlane.f32.xlu0 %v1821_v18  ;;  %v5995_v3 = vsel %vm5987_vm11, %v4710_v24, %v10974_v5  ;;  %v1848_v20 = vsel %vm842_vm0, %v665_v48, 0.0 }
 0x2a4   : > { %v1622_v0 = vpop.xlane.xlu1 %1621  ;;  %v1619_v28 = vpop.xlane.xlu0 %1618  ;;  %v6015_v35 = vsel %vm11048_vm9, %v5995_v3, 0.0  ;;  %v1845_v21 = vsel %vm842_vm0, %v664_v10, 0.0  ;;  %vm14014_vm9 = vcmask 523712  }
 0x2a5   : > { %v4719_v8 = vsel %vm3426_vm1, %v4718_v25, %v4714_v26  ;;  %v2638_v36 = vmul.f32 0.020408163, %v1622_v0  ;;  %v2637_v40 = vmul.f32 0.020408163, %v1619_v28  ;;  %6024 = vst [vmem:[%s11063_s20 + $0x8] sm:$0xff] %v6015_v35  ;;  %v667_v25 = vld [vmem:[%s9820_s11 + $0xa88] sm:$0xff] }
 0x2a6   : > { %v666_v26 = vld [vmem:[%s9820_s11 + $0xa80] sm:$0xff]  ;;  %v1854_v35 = vsel %vm842_vm0, %v667_v25, 0.0 }
 0x2a7   : > { %v4728_v5 = vrot.slane %v2638_v36, %v9996_v37  ;;  %v4723_v17 = vrot.slane %v2637_v40, %v9991_v31  ;;  %1831 = vadd.xlane.f32.xlu1 %v1830_v32  ;;  %1828 = vadd.xlane.f32.xlu0 %v1827_v33 }
 0x2a8   : > { %v1628_v46 = vpop.xlane.xlu1 %1627  ;;  %v1625_v49 = vpop.xlane.xlu0 %1624 }
 0x2a9   : > { %v4724_v51 = vsel %vm3433_vm2, %v4723_v17, %v4719_v8  ;;  %v2640_v23 = vmul.f32 0.020408163, %v1628_v46  ;;  %v2639_v54 = vmul.f32 0.020408163, %v1625_v49  ;;  %v1851_v8 = vsel %vm842_vm0, %v666_v26, 0.0 }
 0x2aa   : > { %v4729_v30 = vsel %vm3440_vm3, %v4728_v5, %v4724_v51  ;;  %v668_v5 = vld [vmem:[%s9820_s11 + $0xa90] sm:$0xff]  ;;  %v1860_v51 = vsel %vm842_vm0, %v669_v44, 0.0 }
 0x2ab   : > { %v4738_v63 = vrot.slane %v2640_v23, %v10001_v42  ;;  %v4733_v1 = vrot.slane %v2639_v54, %v10008_v47  ;;  %1837 = vadd.xlane.f32.xlu1 %v1836_v11  ;;  %1834 = vadd.xlane.f32.xlu0 %v1833_v50  ;;  %v1857_v23 = vsel %vm842_vm0, %v668_v5, 0.0 }
 0x2ac   : > { %v1634_v41 = vpop.xlane.xlu1 %1633  ;;  %v1631_v2 = vpop.xlane.xlu0 %1630 }
 0x2ad   : > { %v4734_v6 = vsel %vm3447_vm4, %v4733_v1, %v4729_v30  ;;  %v2642_v45 = vmul.f32 0.020408163, %v1634_v41  ;;  %v2641_v13 = vmul.f32 0.020408163, %v1631_v2  ;;  %v671_v30 = vld [vmem:[%s9820_s11 + $0xaa8] sm:$0xff] }
 0x2ae   : > { %v4739_v12 = vsel %vm3454_vm5, %v4738_v63, %v4734_v6  ;;  %v670_v63 = vld [vmem:[%s9820_s11 + $0xaa0] sm:$0xff]  ;;  %v1866_v6 = vsel %vm842_vm0, %v671_v30, 0.0 }
 0x2af   : > { %v4748_v52 = vrot.slane %v2642_v45, %v10019_v60  ;;  %v4743_v15 = vrot.slane %v2641_v13, %v10022_v61  ;;  %1843 = vadd.xlane.f32.xlu1 %v1842_v38  ;;  %1840 = vadd.xlane.f32.xlu0 %v1839_v4  ;;  %v1863_v45 = vsel %vm842_vm0, %v670_v63, 0.0  ;;  %v679_v63 = vld [vmem:[%s9820_s11 + $0xae8] sm:$0xff] }
 0x2b0   : > { %v1640_v18 = vpop.xlane.xlu1 %1639  ;;  %v1637_v55 = vpop.xlane.xlu0 %1636 }
 0x2b1   : > { %v4744_v62 = vsel %vm3461_vm6, %v4743_v15, %v4739_v12  ;;  %v2644_v22 = vmul.f32 0.020408163, %v1640_v18  ;;  %v2643_v24 = vmul.f32 0.020408163, %v1637_v55  ;;  %v673_v12 = vld [vmem:[%s9820_s11 + $0xab8] sm:$0xff] }
 0x2b2   : > { %v4749_v3 = vsel %vm14014_vm9, %v4748_v52, %v4744_v62  ;;  %vm14016_vm9 = vcmask 786112   ;;  %v672_v52 = vld [vmem:[%s9820_s11 + $0xab0] sm:$0xff]  ;;  %v1872_v62 = vsel %vm842_vm0, %v673_v12, 0.0 }
 0x2b3   : > { %v4758_v0 = vrot.slane %v2644_v22, %v10036_v14  ;;  %v4753_v28 = vrot.slane %v2643_v24, %v10042_v19  ;;  %1849 = vadd.xlane.f32.xlu1 %v1848_v20  ;;  %1846 = vadd.xlane.f32.xlu0 %v1845_v21  ;;  %v1869_v22 = vsel %vm842_vm0, %v672_v52, 0.0  ;;  %v681_v52 = vld [vmem:[%s9820_s11 + $0xaf8] sm:$0xff] }
 0x2b4   : > { %v1646_v32 = vpop.xlane.xlu1 %1645  ;;  %v1643_v33 = vpop.xlane.xlu0 %1642 }
 0x2b5   : > { %v4754_v36 = vsel %vm3475_vm8, %v4753_v28, %v4749_v3  ;;  %v2646_v40 = vmul.f32 0.020408163, %v1646_v32  ;;  %v2645_v43 = vmul.f32 0.020408163, %v1643_v33  ;;  %v675_v3 = vld [vmem:[%s9820_s11 + $0xac8] sm:$0xff] }
 0x2b6   : > { %v4759_v17 = vsel %vm14015_vm7, %v4758_v0, %v4754_v36  ;;  %v674_v0 = vld [vmem:[%s9820_s11 + $0xac0] sm:$0xff]  ;;  %v1878_v36 = vsel %vm842_vm0, %v675_v3, 0.0  ;;  %vm14017_vm7 = vcmask 523712  }
 0x2b7   : > { %v4768_v46 = vrot.slane %v2646_v40, %v10052_v34  ;;  %v4763_v49 = vrot.slane %v2645_v43, %v10058_v39  ;;  %1855 = vadd.xlane.f32.xlu1 %v1854_v35  ;;  %1852 = vadd.xlane.f32.xlu0 %v1851_v8  ;;  %v1875_v40 = vsel %vm842_vm0, %v674_v0, 0.0  ;;  %v683_v0 = vld [vmem:[%s9820_s11 + $0xb08] sm:$0xff] }
 0x2b8   : > { %v1652_v11 = vpop.xlane.xlu1 %1651  ;;  %v1649_v50 = vpop.xlane.xlu0 %1648 }
 0x2b9   : > { %v4764_v54 = vsel %vm3489_vm10, %v4763_v49, %v4759_v17  ;;  %v2648_v56 = vmul.f32 0.020408163, %v1652_v11  ;;  %v2647_v58 = vmul.f32 0.020408163, %v1649_v50  ;;  %v677_v17 = vld [vmem:[%s9820_s11 + $0xad8] sm:$0xff] }
 0x2ba   : > { %v4769_v1 = vsel %vm14016_vm9, %v4768_v46, %v4764_v54  ;;  %v676_v46 = vld [vmem:[%s9820_s11 + $0xad0] sm:$0xff]  ;;  %vm14018_vm9 = vcmask 654912  }
 0x2bb   : > { %v4778_v41 = vrot.slane %v2648_v56, %v10068_v53  ;;  %v4773_v2 = vrot.slane %v2647_v58, %v10074_v57  ;;  %1861 = vadd.xlane.f32.xlu1 %v1860_v51  ;;  %1858 = vadd.xlane.f32.xlu0 %v1857_v23  ;;  %v1884_v23 = vsel %vm842_vm0, %v677_v17, 0.0  ;;  %v1881_v54 = vsel %vm842_vm0, %v676_v46, 0.0 }
 0x2bc   : > { %v1658_v38 = vpop.xlane.xlu1 %1657  ;;  %v1655_v4 = vpop.xlane.xlu0 %1654 }
 0x2bd   : > { %v4774_v13 = vsel %vm3503_vm12, %v4773_v2, %v4769_v1  ;;  %v2650_v48 = vmul.f32 0.020408163, %v1658_v38  ;;  %v2649_v10 = vmul.f32 0.020408163, %v1655_v4  ;;  %v678_v1 = vld [vmem:[%s9820_s11 + $0xae0] sm:$0xff] }
 0x2be   : > { %v4779_v15 = vsel %vm3510_vm13, %v4778_v41, %v4774_v13  ;;  %v1887_v13 = vsel %vm842_vm0, %v678_v1, 0.0 }
 0x2bf   : > { %v4788_v18 = vrot.slane %v2650_v48, %v10084_v7  ;;  %v4783_v55 = vrot.slane %v2649_v10, %v10089_v9  ;;  %1867 = vadd.xlane.f32.xlu1 %v1866_v6  ;;  %1864 = vadd.xlane.f32.xlu0 %v1863_v45  ;;  %v1890_v45 = vsel %vm842_vm0, %v679_v63, 0.0 }
 0x2c0   : > { %v1664_v20 = vpop.xlane.xlu1 %1663  ;;  %v1661_v21 = vpop.xlane.xlu0 %1660 }
 0x2c1   : > { %v4784_v24 = vsel %vm3517_vm14, %v4783_v55, %v4779_v15  ;;  %v2652_v25 = vmul.f32 0.020408163, %v1664_v20  ;;  %v2651_v26 = vmul.f32 0.020408163, %v1661_v21  ;;  %v680_v15 = vld [vmem:[%s9820_s11 + $0xaf0] sm:$0xff] }
 0x2c2   : > { %v11191_v28 = vsel %vm3524_vm15, %v4788_v18, %v4784_v24  ;;  %v1893_v24 = vsel %vm842_vm0, %v680_v15, 0.0 }
 0x2c3   : > { %v4797_v32 = vrot.slane %v2652_v25, %v9987_v29  ;;  %v4793_v33 = vrot.slane %v2651_v26, %v9984_v27  ;;  %1873 = vadd.xlane.f32.xlu1 %v1872_v62  ;;  %1870 = vadd.xlane.f32.xlu0 %v1869_v22  ;;  %v1896_v22 = vsel %vm842_vm0, %v681_v52, 0.0 }
 0x2c4   : > { %v1670_v35 = vpop.xlane.xlu1 %1669  ;;  %v1667_v8 = vpop.xlane.xlu0 %1666 }
 0x2c5   : > { %v4798_v43 = vsel %vm3426_vm1, %v4797_v32, %v4793_v33  ;;  %v2654_v44 = vmul.f32 0.020408163, %v1670_v35  ;;  %v2653_v5 = vmul.f32 0.020408163, %v1667_v8  ;;  %v682_v32 = vld [vmem:[%s9820_s11 + $0xb00] sm:$0xff] }
 0x2c7   : > { %v4807_v49 = vrot.slane %v2654_v44, %v9996_v37  ;;  %v4802_v11 = vrot.slane %v2653_v5, %v9991_v31  ;;  %1879 = vadd.xlane.f32.xlu1 %v1878_v36  ;;  %1876 = vadd.xlane.f32.xlu0 %v1875_v40  ;;  %v1899_v44 = vsel %vm842_vm0, %v682_v32, 0.0 }
 0x2c8   : > { %v1676_v50 = vpop.xlane.xlu1 %1675  ;;  %v1673_v51 = vpop.xlane.xlu0 %1672 }
 0x2c9   : > { %v4803_v56 = vsel %vm3433_vm2, %v4802_v11, %v4798_v43  ;;  %v2656_v58 = vmul.f32 0.020408163, %v1676_v50  ;;  %v2655_v30 = vmul.f32 0.020408163, %v1673_v51  ;;  %v1902_v43 = vsel %vm842_vm0, %v683_v0, 0.0  ;;  %v684_v11 = vld [vmem:[%s9820_s11 + $0xb10] sm:$0xff] }
 0x2ca   : > { %v4808_v41 = vsel %vm3440_vm3, %v4807_v49, %v4803_v56  ;;  %v685_v49 = vld [vmem:[%s9820_s11 + $0xb18] sm:$0xff] }
 0x2cb   : > { %v4817_v2 = vrot.slane %v2656_v58, %v10001_v42  ;;  %v4812_v38 = vrot.slane %v2655_v30, %v10008_v47  ;;  %1885 = vadd.xlane.f32.xlu1 %v1884_v23  ;;  %1882 = vadd.xlane.f32.xlu0 %v1881_v54  ;;  %v1908_v58 = vsel %vm842_vm0, %v685_v49, 0.0  ;;  %v1905_v30 = vsel %vm842_vm0, %v684_v11, 0.0 }
 0x2cc   : > { %v1682_v4 = vpop.xlane.xlu1 %1681  ;;  %v1679_v6 = vpop.xlane.xlu0 %1678 }
 0x2cd   : > { %v4813_v48 = vsel %vm3447_vm4, %v4812_v38, %v4808_v41  ;;  %v2658_v10 = vmul.f32 0.020408163, %v1682_v4  ;;  %v2657_v12 = vmul.f32 0.020408163, %v1679_v6  ;;  %v686_v38 = vld [vmem:[%s9820_s11 + $0xb20] sm:$0xff] }
 0x2ce   : > { %v4818_v18 = vsel %vm3454_vm5, %v4817_v2, %v4813_v48  ;;  %v687_v2 = vld [vmem:[%s9820_s11 + $0xb28] sm:$0xff] }
 0x2cf   : > { %v4827_v55 = vrot.slane %v2658_v10, %v10019_v60  ;;  %v4822_v20 = vrot.slane %v2657_v12, %v10022_v61  ;;  %1891 = vadd.xlane.f32.xlu1 %v1890_v45  ;;  %1888 = vadd.xlane.f32.xlu0 %v1887_v13  ;;  %v1914_v10 = vsel %vm842_vm0, %v687_v2, 0.0  ;;  %v1911_v12 = vsel %vm842_vm0, %v686_v38, 0.0 }
 0x2d0   : > { %v1688_v21 = vpop.xlane.xlu1 %1687  ;;  %v1685_v62 = vpop.xlane.xlu0 %1684 }
 0x2d1   : > { %v4823_v25 = vsel %vm3461_vm6, %v4822_v20, %v4818_v18  ;;  %v2660_v26 = vmul.f32 0.020408163, %v1688_v21  ;;  %v2659_v3 = vmul.f32 0.020408163, %v1685_v62  ;;  %v688_v20 = vld [vmem:[%s9820_s11 + $0xb30] sm:$0xff] }
 0x2d2   : > { %v4828_v33 = vsel %vm14017_vm7, %v4827_v55, %v4823_v25  ;;  %vm14019_vm7 = vcmask 786112   ;;  %v689_v55 = vld [vmem:[%s9820_s11 + $0xb38] sm:$0xff] }
 0x2d3   : > { %v4837_v35 = vrot.slane %v2660_v26, %v10036_v14  ;;  %v4832_v8 = vrot.slane %v2659_v3, %v10042_v19  ;;  %1897 = vadd.xlane.f32.xlu1 %v1896_v22  ;;  %1894 = vadd.xlane.f32.xlu0 %v1893_v24  ;;  %v1920_v26 = vsel %vm842_vm0, %v689_v55, 0.0  ;;  %v1917_v3 = vsel %vm842_vm0, %v688_v20, 0.0 }
 0x2d4   : > { %v1694_v36 = vpop.xlane.xlu1 %1693  ;;  %v1691_v40 = vpop.xlane.xlu0 %1690 }
 0x2d5   : > { %v4833_v5 = vsel %vm3475_vm8, %v4832_v8, %v4828_v33  ;;  %v2662_v17 = vmul.f32 0.020408163, %v1694_v36  ;;  %v2661_v46 = vmul.f32 0.020408163, %v1691_v40  ;;  %v690_v8 = vld [vmem:[%s9820_s11 + $0xb40] sm:$0xff] }
 0x2d6   : > { %v4838_v50 = vsel %vm14018_vm9, %v4837_v35, %v4833_v5  ;;  %v691_v35 = vld [vmem:[%s9820_s11 + $0xb48] sm:$0xff]  ;;  %vm14020_vm9 = vcmask 523712  }
 0x2d7   : > { %v4847_v51 = vrot.slane %v2662_v17, %v10052_v34  ;;  %v4842_v23 = vrot.slane %v2661_v46, %v10058_v39  ;;  %1903 = vadd.xlane.f32.xlu1 %v1902_v43  ;;  %1900 = vadd.xlane.f32.xlu0 %v1899_v44  ;;  %v1926_v17 = vsel %vm842_vm0, %v691_v35, 0.0  ;;  %v1923_v46 = vsel %vm842_vm0, %v690_v8, 0.0 }
 0x2d8   : > { %v1700_v54 = vpop.xlane.xlu1 %1699  ;;  %v1697_v56 = vpop.xlane.xlu0 %1696 }
 0x2d9   : > { %v4843_v63 = vsel %vm3489_vm10, %v4842_v23, %v4838_v50  ;;  %v2664_v1 = vmul.f32 0.020408163, %v1700_v54  ;;  %v2663_v41 = vmul.f32 0.020408163, %v1697_v56  ;;  %v692_v23 = vld [vmem:[%s9820_s11 + $0xb50] sm:$0xff] }
 0x2da   : > { %v4848_v4 = vsel %vm14019_vm7, %v4847_v51, %v4843_v63  ;;  %v693_v51 = vld [vmem:[%s9820_s11 + $0xb58] sm:$0xff]  ;;  %vm14021_vm7 = vcmask 654912  }
 0x2db   : > { %v4857_v6 = vrot.slane %v2664_v1, %v10068_v53  ;;  %v4852_v45 = vrot.slane %v2663_v41, %v10074_v57  ;;  %1909 = vadd.xlane.f32.xlu1 %v1908_v58  ;;  %1906 = vadd.xlane.f32.xlu0 %v1905_v30  ;;  %v1932_v63 = vsel %vm842_vm0, %v693_v51, 0.0  ;;  %v1929_v1 = vsel %vm842_vm0, %v692_v23, 0.0 }
 0x2dc   : > { %v1706_v13 = vpop.xlane.xlu1 %1705  ;;  %v1703_v48 = vpop.xlane.xlu0 %1702 }
 0x2dd   : > { %v4853_v52 = vsel %vm3503_vm12, %v4852_v45, %v4848_v4  ;;  %v2666_v15 = vmul.f32 0.020408163, %v1706_v13  ;;  %v2665_v18 = vmul.f32 0.020408163, %v1703_v48  ;;  %v695_v4 = vld [vmem:[%s9820_s11 + $0xb68] sm:$0xff] }
 0x2de   : > { %v4858_v21 = vsel %vm3510_vm13, %v4857_v6, %v4853_v52  ;;  %v694_v6 = vld [vmem:[%s9820_s11 + $0xb60] sm:$0xff]  ;;  %v1938_v52 = vsel %vm842_vm0, %v695_v4, 0.0 }
 0x2df   : > { %v4867_v62 = vrot.slane %v2666_v15, %v10084_v7  ;;  %v4862_v22 = vrot.slane %v2665_v18, %v10089_v9  ;;  %1915 = vadd.xlane.f32.xlu1 %v1914_v10  ;;  %1912 = vadd.xlane.f32.xlu0 %v1911_v12  ;;  %v1935_v15 = vsel %vm842_vm0, %v694_v6, 0.0 }
 0x2e0   : > { %v1712_v24 = vpop.xlane.xlu1 %1711  ;;  %v1709_v25 = vpop.xlane.xlu0 %1708 }
 0x2e1   : > { %v4863_v0 = vsel %vm3517_vm14, %v4862_v22, %v4858_v21  ;;  %v2668_v32 = vmul.f32 0.020408163, %v1712_v24  ;;  %v2667_v33 = vmul.f32 0.020408163, %v1709_v25  ;;  %v697_v21 = vld [vmem:[%s9820_s11 + $0xb78] sm:$0xff] }
 0x2e2   : > { %v11256_v36 = vsel %vm3524_vm15, %v4867_v62, %v4863_v0  ;;  %v696_v62 = vld [vmem:[%s9820_s11 + $0xb70] sm:$0xff]  ;;  %v1944_v0 = vsel %vm842_vm0, %v697_v21, 0.0 }
 0x2e3   : > { %v4876_v40 = vrot.slane %v2668_v32, %v9987_v29  ;;  %v4872_v43 = vrot.slane %v2667_v33, %v9984_v27  ;;  %1921 = vadd.xlane.f32.xlu1 %v1920_v26  ;;  %1918 = vadd.xlane.f32.xlu0 %v1917_v3  ;;  %v1941_v32 = vsel %vm842_vm0, %v696_v62, 0.0 }
 0x2e4   : > { %v1718_v44 = vpop.xlane.xlu1 %1717  ;;  %v1715_v5 = vpop.xlane.xlu0 %1714 }
 0x2e5   : > { %v4877_v49 = vsel %vm3426_vm1, %v4876_v40, %v4872_v43  ;;  %v2670_v11 = vmul.f32 0.020408163, %v1718_v44  ;;  %v2669_v50 = vmul.f32 0.020408163, %v1715_v5  ;;  %v699_v40 = vld [vmem:[%s9820_s11 + $0xb88] sm:$0xff]  ;;  %v698_v43 = vld [vmem:[%s9820_s11 + $0xb80] sm:$0xff] }
 0x2e7   : > { %v4886_v54 = vrot.slane %v2670_v11, %v9996_v37  ;;  %v4881_v56 = vrot.slane %v2669_v50, %v9991_v31  ;;  %1927 = vadd.xlane.f32.xlu1 %v1926_v17  ;;  %1924 = vadd.xlane.f32.xlu0 %v1923_v46  ;;  %v1950_v11 = vsel %vm842_vm0, %v699_v40, 0.0  ;;  %v1947_v50 = vsel %vm842_vm0, %v698_v43, 0.0 }
 0x2e8   : > { %v1724_v58 = vpop.xlane.xlu1 %1723  ;;  %v1721_v30 = vpop.xlane.xlu0 %1720 }
 0x2e9   : > { %v4882_v41 = vsel %vm3433_vm2, %v4881_v56, %v4877_v49  ;;  %v2672_v2 = vmul.f32 0.020408163, %v1724_v58  ;;  %v2671_v38 = vmul.f32 0.020408163, %v1721_v30  ;;  %v701_v56 = vld [vmem:[%s9820_s11 + $0xb98] sm:$0xff]  ;;  %v700_v58 = vld [vmem:[%s9820_s11 + $0xb90] sm:$0xff] }
 0x2ea   : > { %v4887_v45 = vsel %vm3440_vm3, %v4886_v54, %v4882_v41  ;;  %v1953_v4 = vsel %vm842_vm0, %v700_v58, 0.0 }
 0x2eb   : > { %v4896_v13 = vrot.slane %v2672_v2, %v10001_v42  ;;  %v4891_v48 = vrot.slane %v2671_v38, %v10008_v47  ;;  %1933 = vadd.xlane.f32.xlu1 %v1932_v63  ;;  %1930 = vadd.xlane.f32.xlu0 %v1929_v1  ;;  %v1956_v38 = vsel %vm842_vm0, %v701_v56, 0.0 }
 0x2ec   : > { %v1730_v10 = vpop.xlane.xlu1 %1729  ;;  %v1727_v12 = vpop.xlane.xlu0 %1726 }
 0x2ed   : > { %v4892_v18 = vsel %vm3447_vm4, %v4891_v48, %v4887_v45  ;;  %v2674_v55 = vmul.f32 0.020408163, %v1730_v10  ;;  %v2673_v20 = vmul.f32 0.020408163, %v1727_v12  ;;  %v703_v48 = vld [vmem:[%s9820_s11 + $0xba8] sm:$0xff]  ;;  %v702_v10 = vld [vmem:[%s9820_s11 + $0xba0] sm:$0xff] }
 0x2ee   : > { %v4897_v22 = vsel %vm3454_vm5, %v4896_v13, %v4892_v18  ;;  %v1959_v21 = vsel %vm842_vm0, %v702_v10, 0.0 }
 0x2ef   : > { %v4906_v24 = vrot.slane %v2674_v55, %v10019_v60  ;;  %v4901_v25 = vrot.slane %v2673_v20, %v10022_v61  ;;  %1939 = vadd.xlane.f32.xlu1 %v1938_v52  ;;  %1936 = vadd.xlane.f32.xlu0 %v1935_v15  ;;  %v1962_v20 = vsel %vm842_vm0, %v703_v48, 0.0 }
 0x2f0   : > { %v1736_v26 = vpop.xlane.xlu1 %1735  ;;  %v1733_v3 = vpop.xlane.xlu0 %1732 }
 0x2f1   : > { %v4902_v33 = vsel %vm3461_vm6, %v4901_v25, %v4897_v22  ;;  %v2676_v35 = vmul.f32 0.020408163, %v1736_v26  ;;  %v2675_v8 = vmul.f32 0.020408163, %v1733_v3  ;;  %v705_v25 = vld [vmem:[%s9820_s11 + $0xbb8] sm:$0xff]  ;;  %v704_v26 = vld [vmem:[%s9820_s11 + $0xbb0] sm:$0xff] }
 0x2f2   : > { %v4907_v44 = vsel %vm14020_vm9, %v4906_v24, %v4902_v33  ;;  %vm14022_vm9 = vcmask 786112   ;;  %v1965_v40 = vsel %vm842_vm0, %v704_v26, 0.0 }
 0x2f3   : > { %v4916_v5 = vrot.slane %v2676_v35, %v10036_v14  ;;  %v4911_v17 = vrot.slane %v2675_v8, %v10042_v19  ;;  %1945 = vadd.xlane.f32.xlu1 %v1944_v0  ;;  %1942 = vadd.xlane.f32.xlu0 %v1941_v32  ;;  %v1968_v8 = vsel %vm842_vm0, %v705_v25, 0.0 }
 0x2f4   : > { %v1742_v46 = vpop.xlane.xlu1 %1741  ;;  %v1739_v49 = vpop.xlane.xlu0 %1738 }
 0x2f5   : > { %v4912_v51 = vsel %vm3475_vm8, %v4911_v17, %v4907_v44  ;;  %v2678_v23 = vmul.f32 0.020408163, %v1742_v46  ;;  %v2677_v54 = vmul.f32 0.020408163, %v1739_v49  ;;  %v707_v17 = vld [vmem:[%s9820_s11 + $0xbc8] sm:$0xff]  ;;  %v706_v46 = vld [vmem:[%s9820_s11 + $0xbc0] sm:$0xff] }
 0x2f6   : > { %v4917_v30 = vsel %vm14021_vm7, %v4916_v5, %v4912_v51  ;;  %vm14023_vm7 = vcmask 1041409   ;;  %v1974_v56 = vsel %vm842_vm0, %v707_v17, 0.0  ;;  %v1971_v58 = vsel %vm842_vm0, %v706_v46, 0.0 }
 0x2f7   : > { %v4926_v63 = vrot.slane %v2678_v23, %v10052_v34  ;;  %v4921_v1 = vrot.slane %v2677_v54, %v10058_v39  ;;  %1951 = vadd.xlane.f32.xlu1 %v1950_v11  ;;  %1948 = vadd.xlane.f32.xlu0 %v1947_v50 }
 0x2f8   : > { %v1748_v41 = vpop.xlane.xlu1 %1747  ;;  %v1745_v2 = vpop.xlane.xlu0 %1744 }
 0x2f9   : > { %v4922_v6 = vsel %vm3489_vm10, %v4921_v1, %v4917_v30  ;;  %v2680_v45 = vmul.f32 0.020408163, %v1748_v41  ;;  %v2679_v13 = vmul.f32 0.020408163, %v1745_v2  ;;  %v708_v41 = vld [vmem:[%s9820_s11 + $0xbd0] sm:$0xff] }
 0x2fa   : > { %v4927_v12 = vsel %vm14022_vm9, %v4926_v63, %v4922_v6  ;;  %vm14024_vm9 = vcmask 523712  }
 0x2fb   : > { %v4936_v52 = vrot.slane %v2680_v45, %v10068_v53  ;;  %v4931_v15 = vrot.slane %v2679_v13, %v10074_v57  ;;  %1957 = vadd.xlane.f32.xlu1 %v1956_v38  ;;  %1954 = vadd.xlane.f32.xlu0 %v1953_v4  ;;  %v1977_v13 = vsel %vm842_vm0, %v708_v41, 0.0 }
 0x2fc   : > { %v1754_v18 = vpop.xlane.xlu1 %1753  ;;  %v1751_v55 = vpop.xlane.xlu0 %1750 }
 0x2fd   : > { %v4932_v62 = vsel %vm3503_vm12, %v4931_v15, %v4927_v12  ;;  %v2682_v22 = vmul.f32 0.020408163, %v1754_v18  ;;  %v2681_v24 = vmul.f32 0.020408163, %v1751_v55  ;;  %v710_v15 = vld [vmem:[%s9820_s11 + $0xbe0] sm:$0xff] }
 0x2fe   : > { %v4937_v3 = vsel %vm3510_vm13, %v4936_v52, %v4932_v62  ;;  %v711_v52 = vld [vmem:[%s9820_s11 + $0xbe8] sm:$0xff] }
 0x2ff   : > { %v4946_v0 = vrot.slane %v2682_v22, %v10084_v7  ;;  %v4941_v32 = vrot.slane %v2681_v24, %v10089_v9  ;;  %1963 = vadd.xlane.f32.xlu1 %v1962_v20  ;;  %1960 = vadd.xlane.f32.xlu0 %v1959_v21  ;;  %v1986_v22 = vsel %vm842_vm0, %v711_v52, 0.0  ;;  %v1983_v24 = vsel %vm842_vm0, %v710_v15, 0.0 }
 0x300   : > { %v1760_v33 = vpop.xlane.xlu1 %1759  ;;  %v1757_v35 = vpop.xlane.xlu0 %1756 }
 0x301   : > { %v4942_v43 = vsel %vm3517_vm14, %v4941_v32, %v4937_v3  ;;  %v2684_v44 = vmul.f32 0.020408163, %v1760_v33  ;;  %v2683_v5 = vmul.f32 0.020408163, %v1757_v35  ;;  %v712_v32 = vld [vmem:[%s9820_s11 + $0xbf0] sm:$0xff] }
 0x302   : > { %v4947_v49 = vsel %vm3524_vm15, %v4946_v0, %v4942_v43  ;;  %v713_v0 = vld [vmem:[%s9820_s11 + $0xbf8] sm:$0xff] }
 0x303   : > { %v11323_v11 = vsel %vm14023_vm7, %v4947_v49, %v11191_v28  ;;  %v4955_v50 = vrot.slane %v2684_v44, %v9987_v29  ;;  %v4951_v51 = vrot.slane %v2683_v5, %v9984_v27  ;;  %1969 = vadd.xlane.f32.xlu1 %v1968_v8  ;;  %1966 = vadd.xlane.f32.xlu0 %v1965_v40  ;;  %v709_v28 = vld [vmem:[%s9820_s11 + $0xbd8] sm:$0xff]  ;;  %v1992_v44 = vsel %vm842_vm0, %v713_v0, 0.0 }
 0x304   : > { %v1766_v23 = vpop.xlane.xlu1 %1765  ;;  %v1763_v54 = vpop.xlane.xlu0 %1762  ;;  %v1980_v45 = vsel %vm842_vm0, %v709_v28, 0.0  ;;  %v1989_v5 = vsel %vm842_vm0, %v712_v32, 0.0  ;;  %vm14025_vm7 = vcmask 654912  }
 0x305   : > { %v4956_v30 = vsel %vm3426_vm1, %v4955_v50, %v4951_v51  ;;  %v2686_v63 = vmul.f32 0.020408163, %v1766_v23  ;;  %v2685_v1 = vmul.f32 0.020408163, %v1763_v54  ;;  %v715_v50 = vld [vmem:[%s9820_s11 + $0xc08] sm:$0xff]  ;;  %v714_v51 = vld [vmem:[%s9820_s11 + $0xc00] sm:$0xff] }
 0x307   : > { %v4965_v2 = vrot.slane %v2686_v63, %v9996_v37  ;;  %v4960_v38 = vrot.slane %v2685_v1, %v9991_v31  ;;  %1975 = vadd.xlane.f32.xlu1 %v1974_v56  ;;  %1972 = vadd.xlane.f32.xlu0 %v1971_v58  ;;  %v1998_v63 = vsel %vm842_vm0, %v715_v50, 0.0  ;;  %v1995_v1 = vsel %vm842_vm0, %v714_v51, 0.0 }
 0x308   : > { %v1772_v4 = vpop.xlane.xlu1 %1771  ;;  %v1769_v6 = vpop.xlane.xlu0 %1768 }
 0x309   : > { %v4961_v48 = vsel %vm3433_vm2, %v4960_v38, %v4956_v30  ;;  %v2688_v10 = vmul.f32 0.020408163, %v1772_v4  ;;  %v2687_v12 = vmul.f32 0.020408163, %v1769_v6  ;;  %v717_v38 = vld [vmem:[%s9820_s11 + $0xc18] sm:$0xff]  ;;  %v716_v4 = vld [vmem:[%s9820_s11 + $0xc10] sm:$0xff] }
 0x30a   : > { %v4966_v18 = vsel %vm3440_vm3, %v4965_v2, %v4961_v48  ;;  %v2001_v52 = vsel %vm842_vm0, %v716_v4, 0.0 }
 0x30b   : > { %v4975_v55 = vrot.slane %v2688_v10, %v10001_v42  ;;  %v4970_v20 = vrot.slane %v2687_v12, %v10008_v47  ;;  %1981 = vadd.xlane.f32.xlu1 %v1980_v45  ;;  %1978 = vadd.xlane.f32.xlu0 %v1977_v13  ;;  %v2004_v12 = vsel %vm842_vm0, %v717_v38, 0.0 }
 0x30c   : > { %v1778_v21 = vpop.xlane.xlu1 %1777  ;;  %v1775_v62 = vpop.xlane.xlu0 %1774 }
 0x30d   : > { %v4971_v25 = vsel %vm3447_vm4, %v4970_v20, %v4966_v18  ;;  %v2690_v26 = vmul.f32 0.020408163, %v1778_v21  ;;  %v2689_v3 = vmul.f32 0.020408163, %v1775_v62  ;;  %v719_v20 = vld [vmem:[%s9820_s11 + $0xc28] sm:$0xff]  ;;  %v718_v21 = vld [vmem:[%s9820_s11 + $0xc20] sm:$0xff] }
 0x30e   : > { %v4976_v33 = vsel %vm3454_vm5, %v4975_v55, %v4971_v25  ;;  %v2007_v0 = vsel %vm842_vm0, %v718_v21, 0.0 }
 0x30f   : > { %v4985_v35 = vrot.slane %v2690_v26, %v10019_v60  ;;  %v4980_v8 = vrot.slane %v2689_v3, %v10022_v61  ;;  %1987 = vadd.xlane.f32.xlu1 %v1986_v22  ;;  %1984 = vadd.xlane.f32.xlu0 %v1983_v24  ;;  %v2010_v3 = vsel %vm842_vm0, %v719_v20, 0.0 }
 0x310   : > { %v1784_v40 = vpop.xlane.xlu1 %1783  ;;  %v1781_v43 = vpop.xlane.xlu0 %1780 }
 0x311   : > { %v4981_v17 = vsel %vm3461_vm6, %v4980_v8, %v4976_v33  ;;  %v2692_v46 = vmul.f32 0.020408163, %v1784_v40  ;;  %v2691_v49 = vmul.f32 0.020408163, %v1781_v43  ;;  %v721_v8 = vld [vmem:[%s9820_s11 + $0xc38] sm:$0xff]  ;;  %v720_v40 = vld [vmem:[%s9820_s11 + $0xc30] sm:$0xff] }
 0x312   : > { %v4986_v23 = vsel %vm14024_vm9, %v4985_v35, %v4981_v17  ;;  %vm14026_vm9 = vcmask 786112   ;;  %v2013_v50 = vsel %vm842_vm0, %v720_v40, 0.0 }
 0x313   : > { %v4995_v54 = vrot.slane %v2692_v46, %v10036_v14  ;;  %v4990_v56 = vrot.slane %v2691_v49, %v10042_v19  ;;  %1993 = vadd.xlane.f32.xlu1 %v1992_v44  ;;  %1990 = vadd.xlane.f32.xlu0 %v1989_v5  ;;  %v2016_v49 = vsel %vm842_vm0, %v721_v8, 0.0 }
 0x314   : > { %v1790_v58 = vpop.xlane.xlu1 %1789  ;;  %v1787_v30 = vpop.xlane.xlu0 %1786 }
 0x315   : > { %v4991_v28 = vsel %vm3475_vm8, %v4990_v56, %v4986_v23  ;;  %v2694_v41 = vmul.f32 0.020408163, %v1790_v58  ;;  %v2693_v2 = vmul.f32 0.020408163, %v1787_v30  ;;  %v723_v56 = vld [vmem:[%s9820_s11 + $0xc48] sm:$0xff]  ;;  %v722_v58 = vld [vmem:[%s9820_s11 + $0xc40] sm:$0xff] }
 0x316   : > { %v4996_v6 = vsel %vm14025_vm7, %v4995_v54, %v4991_v28  ;;  %vm14027_vm7 = vcmask 1041409   ;;  %v2022_v38 = vsel %vm842_vm0, %v723_v56, 0.0  ;;  %v2019_v4 = vsel %vm842_vm0, %v722_v58, 0.0 }
 0x317   : > { %v5005_v45 = vrot.slane %v2694_v41, %v10052_v34  ;;  %v5000_v13 = vrot.slane %v2693_v2, %v10058_v39  ;;  %1999 = vadd.xlane.f32.xlu1 %v1998_v63  ;;  %1996 = vadd.xlane.f32.xlu0 %v1995_v1 }
 0x318   : > { %v1796_v48 = vpop.xlane.xlu1 %1795  ;;  %v1793_v10 = vpop.xlane.xlu0 %1792 }
 0x319   : > { %v5001_v15 = vsel %vm3489_vm10, %v5000_v13, %v4996_v6  ;;  %v2696_v18 = vmul.f32 0.020408163, %v1796_v48  ;;  %v2695_v55 = vmul.f32 0.020408163, %v1793_v10  ;;  %v724_v48 = vld [vmem:[%s9820_s11 + $0xc50] sm:$0xff] }
 0x31a   : > { %v5006_v62 = vsel %vm14026_vm9, %v5005_v45, %v5001_v15  ;;  %vm14028_vm9 = vcmask 523712  }
 0x31b   : > { %v5015_v22 = vrot.slane %v2696_v18, %v10068_v53  ;;  %v5010_v24 = vrot.slane %v2695_v55, %v10074_v57  ;;  %2005 = vadd.xlane.f32.xlu1 %v2004_v12  ;;  %2002 = vadd.xlane.f32.xlu0 %v2001_v52  ;;  %v2025_v55 = vsel %vm842_vm0, %v724_v48, 0.0 }
 0x31c   : > { %v1802_v25 = vpop.xlane.xlu1 %1801  ;;  %v1799_v26 = vpop.xlane.xlu0 %1798 }
 0x31d   : > { %v5011_v32 = vsel %vm3503_vm12, %v5010_v24, %v5006_v62  ;;  %v2698_v33 = vmul.f32 0.020408163, %v1802_v25  ;;  %v2697_v35 = vmul.f32 0.020408163, %v1799_v26  ;;  %v726_v24 = vld [vmem:[%s9820_s11 + $0xc60] sm:$0xff] }
 0x31e   : > { %v5016_v43 = vsel %vm3510_vm13, %v5015_v22, %v5011_v32  ;;  %v727_v22 = vld [vmem:[%s9820_s11 + $0xc68] sm:$0xff] }
 0x31f   : > { %v5025_v44 = vrot.slane %v2698_v33, %v10084_v7  ;;  %v5020_v5 = vrot.slane %v2697_v35, %v10089_v9  ;;  %2011 = vadd.xlane.f32.xlu1 %v2010_v3  ;;  %2008 = vadd.xlane.f32.xlu0 %v2007_v0  ;;  %v2034_v33 = vsel %vm842_vm0, %v727_v22, 0.0  ;;  %v2031_v35 = vsel %vm842_vm0, %v726_v24, 0.0 }
 0x320   : > { %v1808_v17 = vpop.xlane.xlu1 %1807  ;;  %v1805_v46 = vpop.xlane.xlu0 %1804 }
 0x321   : > { %v5021_v51 = vsel %vm3517_vm14, %v5020_v5, %v5016_v43  ;;  %v2700_v23 = vmul.f32 0.020408163, %v1808_v17  ;;  %v2699_v54 = vmul.f32 0.020408163, %v1805_v46  ;;  %v728_v5 = vld [vmem:[%s9820_s11 + $0xc70] sm:$0xff] }
 0x322   : > { %v5026_v30 = vsel %vm3524_vm15, %v5025_v44, %v5021_v51  ;;  %v729_v44 = vld [vmem:[%s9820_s11 + $0xc78] sm:$0xff] }
 0x323   : > { %v11390_v63 = vsel %vm14027_vm7, %v5026_v30, %v11256_v36  ;;  %v5034_v1 = vrot.slane %v2700_v23, %v9987_v29  ;;  %v5030_v28 = vrot.slane %v2699_v54, %v9984_v27  ;;  %2017 = vadd.xlane.f32.xlu1 %v2016_v49  ;;  %2014 = vadd.xlane.f32.xlu0 %v2013_v50  ;;  %v725_v36 = vld [vmem:[%s9820_s11 + $0xc58] sm:$0xff]  ;;  %v2040_v23 = vsel %vm842_vm0, %v729_v44, 0.0 }
 0x324   : > { %v1814_v41 = vpop.xlane.xlu1 %1813  ;;  %v1811_v2 = vpop.xlane.xlu0 %1810  ;;  %v2028_v18 = vsel %vm842_vm0, %v725_v36, 0.0  ;;  %v2037_v54 = vsel %vm842_vm0, %v728_v5, 0.0  ;;  %vm14029_vm7 = vcmask 654912  }
 0x325   : > { %v5035_v6 = vsel %vm3426_vm1, %v5034_v1, %v5030_v28  ;;  %v2702_v45 = vmul.f32 0.020408163, %v1814_v41  ;;  %v2701_v13 = vmul.f32 0.020408163, %v1811_v2  ;;  %v731_v1 = vld [vmem:[%s9820_s11 + $0xc88] sm:$0xff]  ;;  %v730_v28 = vld [vmem:[%s9820_s11 + $0xc80] sm:$0xff] }
 0x327   : > { %v5044_v10 = vrot.slane %v2702_v45, %v9996_v37  ;;  %v5039_v12 = vrot.slane %v2701_v13, %v9991_v31  ;;  %2023 = vadd.xlane.f32.xlu1 %v2022_v38  ;;  %2020 = vadd.xlane.f32.xlu0 %v2019_v4  ;;  %v2046_v45 = vsel %vm842_vm0, %v731_v1, 0.0  ;;  %v2043_v13 = vsel %vm842_vm0, %v730_v28, 0.0 }
 0x328   : > { %v1820_v52 = vpop.xlane.xlu1 %1819  ;;  %v1817_v15 = vpop.xlane.xlu0 %1816 }
 0x329   : > { %v5040_v20 = vsel %vm3433_vm2, %v5039_v12, %v5035_v6  ;;  %v2704_v21 = vmul.f32 0.020408163, %v1820_v52  ;;  %v2703_v62 = vmul.f32 0.020408163, %v1817_v15  ;;  %v733_v12 = vld [vmem:[%s9820_s11 + $0xc98] sm:$0xff]  ;;  %v732_v52 = vld [vmem:[%s9820_s11 + $0xc90] sm:$0xff] }
 0x32a   : > { %v5045_v25 = vsel %vm3440_vm3, %v5044_v10, %v5040_v20  ;;  %v2049_v22 = vsel %vm842_vm0, %v732_v52, 0.0 }
 0x32b   : > { %v5054_v26 = vrot.slane %v2704_v21, %v10001_v42  ;;  %v5049_v3 = vrot.slane %v2703_v62, %v10008_v47  ;;  %2029 = vadd.xlane.f32.xlu1 %v2028_v18  ;;  %2026 = vadd.xlane.f32.xlu0 %v2025_v55  ;;  %v2052_v62 = vsel %vm842_vm0, %v733_v12, 0.0 }
 0x32c   : > { %v1826_v0 = vpop.xlane.xlu1 %1825  ;;  %v1823_v32 = vpop.xlane.xlu0 %1822 }
 0x32d   : > { %v5050_v8 = vsel %vm3447_vm4, %v5049_v3, %v5045_v25  ;;  %v2706_v40 = vmul.f32 0.020408163, %v1826_v0  ;;  %v2705_v43 = vmul.f32 0.020408163, %v1823_v32  ;;  %v735_v3 = vld [vmem:[%s9820_s11 + $0xca8] sm:$0xff]  ;;  %v734_v0 = vld [vmem:[%s9820_s11 + $0xca0] sm:$0xff] }
 0x32e   : > { %v5055_v17 = vsel %vm3454_vm5, %v5054_v26, %v5050_v8  ;;  %v2055_v44 = vsel %vm842_vm0, %v734_v0, 0.0 }
 0x32f   : > { %v5064_v46 = vrot.slane %v2706_v40, %v10019_v60  ;;  %v5059_v49 = vrot.slane %v2705_v43, %v10022_v61  ;;  %2035 = vadd.xlane.f32.xlu1 %v2034_v33  ;;  %2032 = vadd.xlane.f32.xlu0 %v2031_v35  ;;  %v2058_v43 = vsel %vm842_vm0, %v735_v3, 0.0 }
 0x330   : > { %v1832_v50 = vpop.xlane.xlu1 %1831  ;;  %v1829_v51 = vpop.xlane.xlu0 %1828 }
 0x331   : > { %v5060_v56 = vsel %vm3461_vm6, %v5059_v49, %v5055_v17  ;;  %v2708_v58 = vmul.f32 0.020408163, %v1832_v50  ;;  %v2707_v30 = vmul.f32 0.020408163, %v1829_v51  ;;  %v737_v49 = vld [vmem:[%s9820_s11 + $0xcb8] sm:$0xff]  ;;  %v736_v50 = vld [vmem:[%s9820_s11 + $0xcb0] sm:$0xff] }
 0x332   : > { %v5065_v41 = vsel %vm14028_vm9, %v5064_v46, %v5060_v56  ;;  %vm14030_vm9 = vcmask 786112   ;;  %v2061_v1 = vsel %vm842_vm0, %v736_v50, 0.0 }
 0x333   : > { %v5074_v2 = vrot.slane %v2708_v58, %v10036_v14  ;;  %v5069_v38 = vrot.slane %v2707_v30, %v10042_v19  ;;  %2041 = vadd.xlane.f32.xlu1 %v2040_v23  ;;  %2038 = vadd.xlane.f32.xlu0 %v2037_v54  ;;  %v2064_v30 = vsel %vm842_vm0, %v737_v49, 0.0 }
 0x334   : > { %v1838_v4 = vpop.xlane.xlu1 %1837  ;;  %v1835_v6 = vpop.xlane.xlu0 %1834 }
 0x335   : > { %v5070_v36 = vsel %vm3475_vm8, %v5069_v38, %v5065_v41  ;;  %v2710_v48 = vmul.f32 0.020408163, %v1838_v4  ;;  %v2709_v10 = vmul.f32 0.020408163, %v1835_v6  ;;  %v739_v38 = vld [vmem:[%s9820_s11 + $0xcc8] sm:$0xff]  ;;  %v738_v4 = vld [vmem:[%s9820_s11 + $0xcc0] sm:$0xff] }
 0x336   : > { %v5075_v15 = vsel %vm14029_vm7, %v5074_v2, %v5070_v36  ;;  %vm14031_vm7 = vcmask 1042434   ;;  %v2070_v12 = vsel %vm842_vm0, %v739_v38, 0.0  ;;  %v2067_v52 = vsel %vm842_vm0, %v738_v4, 0.0 }
 0x337   : > { %v5084_v18 = vrot.slane %v2710_v48, %v10052_v34  ;;  %v5079_v55 = vrot.slane %v2709_v10, %v10058_v39  ;;  %2047 = vadd.xlane.f32.xlu1 %v2046_v45  ;;  %2044 = vadd.xlane.f32.xlu0 %v2043_v13 }
 0x338   : > { %v1844_v20 = vpop.xlane.xlu1 %1843  ;;  %v1841_v21 = vpop.xlane.xlu0 %1840 }
 0x339   : > { %v5080_v24 = vsel %vm3489_vm10, %v5079_v55, %v5075_v15  ;;  %v2712_v25 = vmul.f32 0.020408163, %v1844_v20  ;;  %v2711_v26 = vmul.f32 0.020408163, %v1841_v21  ;;  %v740_v20 = vld [vmem:[%s9820_s11 + $0xcd0] sm:$0xff] }
 0x33a   : > { %v5085_v32 = vsel %vm14030_vm9, %v5084_v18, %v5080_v24  ;;  %vm14032_vm9 = vcmask 523712  }
 0x33b   : > { %v5094_v33 = vrot.slane %v2712_v25, %v10068_v53  ;;  %v5089_v35 = vrot.slane %v2711_v26, %v10074_v57  ;;  %2053 = vadd.xlane.f32.xlu1 %v2052_v62  ;;  %2050 = vadd.xlane.f32.xlu0 %v2049_v22  ;;  %v2073_v26 = vsel %vm842_vm0, %v740_v20, 0.0 }
 0x33c   : > { %v1850_v8 = vpop.xlane.xlu1 %1849  ;;  %v1847_v40 = vpop.xlane.xlu0 %1846 }
 0x33d   : > { %v5090_v5 = vsel %vm3503_vm12, %v5089_v35, %v5085_v32  ;;  %v2714_v17 = vmul.f32 0.020408163, %v1850_v8  ;;  %v2713_v46 = vmul.f32 0.020408163, %v1847_v40  ;;  %v742_v35 = vld [vmem:[%s9820_s11 + $0xce0] sm:$0xff] }
 0x33e   : > { %v5095_v51 = vsel %vm3510_vm13, %v5094_v33, %v5090_v5  ;;  %v743_v33 = vld [vmem:[%s9820_s11 + $0xce8] sm:$0xff] }
 0x33f   : > { %v5104_v23 = vrot.slane %v2714_v17, %v10084_v7  ;;  %v5099_v54 = vrot.slane %v2713_v46, %v10089_v9  ;;  %2059 = vadd.xlane.f32.xlu1 %v2058_v43  ;;  %2056 = vadd.xlane.f32.xlu0 %v2055_v44  ;;  %v2082_v17 = vsel %vm842_vm0, %v743_v33, 0.0  ;;  %v2079_v46 = vsel %vm842_vm0, %v742_v35, 0.0 }
 0x340   : > { %v1856_v56 = vpop.xlane.xlu1 %1855  ;;  %v1853_v58 = vpop.xlane.xlu0 %1852 }
 0x341   : > { %v5100_v28 = vsel %vm3517_vm14, %v5099_v54, %v5095_v51  ;;  %v2716_v41 = vmul.f32 0.020408163, %v1856_v56  ;;  %v2715_v2 = vmul.f32 0.020408163, %v1853_v58  ;;  %v744_v54 = vld [vmem:[%s9820_s11 + $0xcf0] sm:$0xff] }
 0x342   : > { %v5105_v6 = vsel %vm3524_vm15, %v5104_v23, %v5100_v28  ;;  %v745_v23 = vld [vmem:[%s9820_s11 + $0xcf8] sm:$0xff] }
 0x343   : > { %v11457_v45 = vsel %vm14031_vm7, %v5105_v6, %v11323_v11  ;;  %v5113_v13 = vrot.slane %v2716_v41, %v9987_v29  ;;  %v5109_v36 = vrot.slane %v2715_v2, %v9984_v27  ;;  %2065 = vadd.xlane.f32.xlu1 %v2064_v30  ;;  %2062 = vadd.xlane.f32.xlu0 %v2061_v1  ;;  %v741_v11 = vld [vmem:[%s9820_s11 + $0xcd8] sm:$0xff]  ;;  %v2088_v41 = vsel %vm842_vm0, %v745_v23, 0.0 }
 0x344   : > { %v1862_v48 = vpop.xlane.xlu1 %1861  ;;  %v1859_v10 = vpop.xlane.xlu0 %1858  ;;  %v2076_v25 = vsel %vm842_vm0, %v741_v11, 0.0  ;;  %v2085_v2 = vsel %vm842_vm0, %v744_v54, 0.0  ;;  %vm14033_vm7 = vcmask 654912  }
 0x345   : > { %v5114_v15 = vsel %vm3426_vm1, %v5113_v13, %v5109_v36  ;;  %v2718_v18 = vmul.f32 0.020408163, %v1862_v48  ;;  %v2717_v55 = vmul.f32 0.020408163, %v1859_v10  ;;  %v747_v13 = vld [vmem:[%s9820_s11 + $0xd08] sm:$0xff]  ;;  %v746_v36 = vld [vmem:[%s9820_s11 + $0xd00] sm:$0xff] }
 0x347   : > { %v5123_v21 = vrot.slane %v2718_v18, %v9996_v37  ;;  %v5118_v62 = vrot.slane %v2717_v55, %v9991_v31  ;;  %2071 = vadd.xlane.f32.xlu1 %v2070_v12  ;;  %2068 = vadd.xlane.f32.xlu0 %v2067_v52  ;;  %v2094_v18 = vsel %vm842_vm0, %v747_v13, 0.0  ;;  %v2091_v55 = vsel %vm842_vm0, %v746_v36, 0.0 }
 0x348   : > { %v1868_v22 = vpop.xlane.xlu1 %1867  ;;  %v1865_v24 = vpop.xlane.xlu0 %1864 }
 0x349   : > { %v5119_v3 = vsel %vm3433_vm2, %v5118_v62, %v5114_v15  ;;  %v2720_v0 = vmul.f32 0.020408163, %v1868_v22  ;;  %v2719_v32 = vmul.f32 0.020408163, %v1865_v24  ;;  %v749_v62 = vld [vmem:[%s9820_s11 + $0xd18] sm:$0xff]  ;;  %v748_v22 = vld [vmem:[%s9820_s11 + $0xd10] sm:$0xff] }
 0x34a   : > { %v5124_v8 = vsel %vm3440_vm3, %v5123_v21, %v5119_v3  ;;  %v2097_v33 = vsel %vm842_vm0, %v748_v22, 0.0 }
 0x34b   : > { %v5133_v40 = vrot.slane %v2720_v0, %v10001_v42  ;;  %v5128_v43 = vrot.slane %v2719_v32, %v10008_v47  ;;  %2077 = vadd.xlane.f32.xlu1 %v2076_v25  ;;  %2074 = vadd.xlane.f32.xlu0 %v2073_v26  ;;  %v2100_v32 = vsel %vm842_vm0, %v749_v62, 0.0 }
 0x34c   : > { %v1874_v44 = vpop.xlane.xlu1 %1873  ;;  %v1871_v5 = vpop.xlane.xlu0 %1870 }
 0x34d   : > { %v5129_v49 = vsel %vm3447_vm4, %v5128_v43, %v5124_v8  ;;  %v2722_v50 = vmul.f32 0.020408163, %v1874_v44  ;;  %v2721_v51 = vmul.f32 0.020408163, %v1871_v5  ;;  %v751_v43 = vld [vmem:[%s9820_s11 + $0xd28] sm:$0xff]  ;;  %v750_v44 = vld [vmem:[%s9820_s11 + $0xd20] sm:$0xff] }
 0x34e   : > { %v5134_v56 = vsel %vm3454_vm5, %v5133_v40, %v5129_v49  ;;  %v2103_v23 = vsel %vm842_vm0, %v750_v44, 0.0 }
 0x34f   : > { %v5143_v58 = vrot.slane %v2722_v50, %v10019_v60  ;;  %v5138_v30 = vrot.slane %v2721_v51, %v10022_v61  ;;  %2083 = vadd.xlane.f32.xlu1 %v2082_v17  ;;  %2080 = vadd.xlane.f32.xlu0 %v2079_v46  ;;  %v2106_v51 = vsel %vm842_vm0, %v751_v43, 0.0 }
 0x350   : > { %v1880_v1 = vpop.xlane.xlu1 %1879  ;;  %v1877_v28 = vpop.xlane.xlu0 %1876 }
 0x351   : > { %v5139_v38 = vsel %vm3461_vm6, %v5138_v30, %v5134_v56  ;;  %v2724_v4 = vmul.f32 0.020408163, %v1880_v1  ;;  %v2723_v6 = vmul.f32 0.020408163, %v1877_v28  ;;  %v753_v30 = vld [vmem:[%s9820_s11 + $0xd38] sm:$0xff]  ;;  %v752_v1 = vld [vmem:[%s9820_s11 + $0xd30] sm:$0xff] }
 0x352   : > { %v5144_v48 = vsel %vm14032_vm9, %v5143_v58, %v5139_v38  ;;  %vm14034_vm9 = vcmask 786112   ;;  %v2109_v13 = vsel %vm842_vm0, %v752_v1, 0.0 }
 0x353   : > { %v5153_v10 = vrot.slane %v2724_v4, %v10036_v14  ;;  %v5148_v12 = vrot.slane %v2723_v6, %v10042_v19  ;;  %2089 = vadd.xlane.f32.xlu1 %v2088_v41  ;;  %2086 = vadd.xlane.f32.xlu0 %v2085_v2  ;;  %v2112_v6 = vsel %vm842_vm0, %v753_v30, 0.0 }
 0x354   : > { %v1886_v52 = vpop.xlane.xlu1 %1885  ;;  %v1883_v15 = vpop.xlane.xlu0 %1882 }
 0x355   : > { %v5149_v11 = vsel %vm3475_vm8, %v5148_v12, %v5144_v48  ;;  %v2726_v20 = vmul.f32 0.020408163, %v1886_v52  ;;  %v2725_v21 = vmul.f32 0.020408163, %v1883_v15  ;;  %v755_v12 = vld [vmem:[%s9820_s11 + $0xd48] sm:$0xff]  ;;  %v754_v52 = vld [vmem:[%s9820_s11 + $0xd40] sm:$0xff] }
 0x356   : > { %v5154_v24 = vsel %vm14033_vm7, %v5153_v10, %v5149_v11  ;;  %vm14035_vm7 = vcmask 1042434   ;;  %v2118_v62 = vsel %vm842_vm0, %v755_v12, 0.0  ;;  %v2115_v22 = vsel %vm842_vm0, %v754_v52, 0.0 }
 0x357   : > { %v5163_v25 = vrot.slane %v2726_v20, %v10052_v34  ;;  %v5158_v26 = vrot.slane %v2725_v21, %v10058_v39  ;;  %2095 = vadd.xlane.f32.xlu1 %v2094_v18  ;;  %2092 = vadd.xlane.f32.xlu0 %v2091_v55 }
 0x358   : > { %v1892_v3 = vpop.xlane.xlu1 %1891  ;;  %v1889_v0 = vpop.xlane.xlu0 %1888 }
 0x359   : > { %v5159_v35 = vsel %vm3489_vm10, %v5158_v26, %v5154_v24  ;;  %v2728_v8 = vmul.f32 0.020408163, %v1892_v3  ;;  %v2727_v40 = vmul.f32 0.020408163, %v1889_v0  ;;  %v756_v3 = vld [vmem:[%s9820_s11 + $0xd50] sm:$0xff] }
 0x35a   : > { %v5164_v5 = vsel %vm14034_vm9, %v5163_v25, %v5159_v35  ;;  %vm14036_vm9 = vcmask 523712  }
 0x35b   : > { %v5173_v17 = vrot.slane %v2728_v8, %v10068_v53  ;;  %v5168_v46 = vrot.slane %v2727_v40, %v10074_v57  ;;  %2101 = vadd.xlane.f32.xlu1 %v2100_v32  ;;  %2098 = vadd.xlane.f32.xlu0 %v2097_v33  ;;  %v2121_v40 = vsel %vm842_vm0, %v756_v3, 0.0 }
 0x35c   : > { %v1898_v49 = vpop.xlane.xlu1 %1897  ;;  %v1895_v50 = vpop.xlane.xlu0 %1894 }
 0x35d   : > { %v5169_v54 = vsel %vm3503_vm12, %v5168_v46, %v5164_v5  ;;  %v2730_v56 = vmul.f32 0.020408163, %v1898_v49  ;;  %v2729_v58 = vmul.f32 0.020408163, %v1895_v50  ;;  %v758_v46 = vld [vmem:[%s9820_s11 + $0xd60] sm:$0xff] }
 0x35e   : > { %v5174_v28 = vsel %vm3510_vm13, %v5173_v17, %v5169_v54  ;;  %v759_v17 = vld [vmem:[%s9820_s11 + $0xd68] sm:$0xff] }
 0x35f   : > { %v5183_v41 = vrot.slane %v2730_v56, %v10084_v7  ;;  %v5178_v2 = vrot.slane %v2729_v58, %v10089_v9  ;;  %2107 = vadd.xlane.f32.xlu1 %v2106_v51  ;;  %2104 = vadd.xlane.f32.xlu0 %v2103_v23  ;;  %v2130_v56 = vsel %vm842_vm0, %v759_v17, 0.0  ;;  %v2127_v58 = vsel %vm842_vm0, %v758_v46, 0.0 }
 0x360   : > { %v1904_v38 = vpop.xlane.xlu1 %1903  ;;  %v1901_v4 = vpop.xlane.xlu0 %1900 }
 0x361   : > { %v5179_v36 = vsel %vm3517_vm14, %v5178_v2, %v5174_v28  ;;  %v2732_v48 = vmul.f32 0.020408163, %v1904_v38  ;;  %v2731_v10 = vmul.f32 0.020408163, %v1901_v4  ;;  %v760_v2 = vld [vmem:[%s9820_s11 + $0xd70] sm:$0xff] }
 0x362   : > { %v5184_v15 = vsel %vm3524_vm15, %v5183_v41, %v5179_v36  ;;  %v761_v41 = vld [vmem:[%s9820_s11 + $0xd78] sm:$0xff] }
 0x363   : > { %v11524_v18 = vsel %vm14035_vm7, %v5184_v15, %v11390_v63  ;;  %v5192_v55 = vrot.slane %v2732_v48, %v9987_v29  ;;  %v5188_v11 = vrot.slane %v2731_v10, %v9984_v27  ;;  %2113 = vadd.xlane.f32.xlu1 %v2112_v6  ;;  %2110 = vadd.xlane.f32.xlu0 %v2109_v13  ;;  %v757_v63 = vld [vmem:[%s9820_s11 + $0xd58] sm:$0xff]  ;;  %v2136_v48 = vsel %vm842_vm0, %v761_v41, 0.0 }
 0x364   : > { %v1910_v20 = vpop.xlane.xlu1 %1909  ;;  %v1907_v21 = vpop.xlane.xlu0 %1906  ;;  %v2124_v8 = vsel %vm842_vm0, %v757_v63, 0.0  ;;  %v2133_v10 = vsel %vm842_vm0, %v760_v2, 0.0  ;;  %vm14037_vm7 = vcmask 654912  }
 0x365   : > { %v5193_v24 = vsel %vm3426_vm1, %v5192_v55, %v5188_v11  ;;  %v2734_v25 = vmul.f32 0.020408163, %v1910_v20  ;;  %v2733_v26 = vmul.f32 0.020408163, %v1907_v21  ;;  %v763_v55 = vld [vmem:[%s9820_s11 + $0xd88] sm:$0xff]  ;;  %v762_v11 = vld [vmem:[%s9820_s11 + $0xd80] sm:$0xff] }
 0x367   : > { %v5202_v0 = vrot.slane %v2734_v25, %v9996_v37  ;;  %v5197_v32 = vrot.slane %v2733_v26, %v9991_v31  ;;  %2119 = vadd.xlane.f32.xlu1 %v2118_v62  ;;  %2116 = vadd.xlane.f32.xlu0 %v2115_v22  ;;  %v2142_v25 = vsel %vm842_vm0, %v763_v55, 0.0  ;;  %v2139_v26 = vsel %vm842_vm0, %v762_v11, 0.0 }
 0x368   : > { %v1916_v33 = vpop.xlane.xlu1 %1915  ;;  %v1913_v35 = vpop.xlane.xlu0 %1912 }
 0x369   : > { %v5198_v43 = vsel %vm3433_vm2, %v5197_v32, %v5193_v24  ;;  %v2736_v44 = vmul.f32 0.020408163, %v1916_v33  ;;  %v2735_v5 = vmul.f32 0.020408163, %v1913_v35  ;;  %v765_v32 = vld [vmem:[%s9820_s11 + $0xd98] sm:$0xff]  ;;  %v764_v33 = vld [vmem:[%s9820_s11 + $0xd90] sm:$0xff] }
 0x36a   : > { %v5203_v49 = vsel %vm3440_vm3, %v5202_v0, %v5198_v43  ;;  %v2145_v17 = vsel %vm842_vm0, %v764_v33, 0.0 }
 0x36b   : > { %v5212_v50 = vrot.slane %v2736_v44, %v10001_v42  ;;  %v5207_v51 = vrot.slane %v2735_v5, %v10008_v47  ;;  %2125 = vadd.xlane.f32.xlu1 %v2124_v8  ;;  %2122 = vadd.xlane.f32.xlu0 %v2121_v40  ;;  %v2148_v5 = vsel %vm842_vm0, %v765_v32, 0.0 }
 0x36c   : > { %v1922_v23 = vpop.xlane.xlu1 %1921  ;;  %v1919_v54 = vpop.xlane.xlu0 %1918 }
 0x36d   : > { %v5208_v30 = vsel %vm3447_vm4, %v5207_v51, %v5203_v49  ;;  %v2738_v1 = vmul.f32 0.020408163, %v1922_v23  ;;  %v2737_v28 = vmul.f32 0.020408163, %v1919_v54  ;;  %v767_v51 = vld [vmem:[%s9820_s11 + $0xda8] sm:$0xff]  ;;  %v766_v23 = vld [vmem:[%s9820_s11 + $0xda0] sm:$0xff] }
 0x36e   : > { %v5213_v38 = vsel %vm3454_vm5, %v5212_v50, %v5208_v30  ;;  %v2151_v41 = vsel %vm842_vm0, %v766_v23, 0.0 }
 0x36f   : > { %v5222_v4 = vrot.slane %v2738_v1, %v10019_v60  ;;  %v5217_v6 = vrot.slane %v2737_v28, %v10022_v61  ;;  %2131 = vadd.xlane.f32.xlu1 %v2130_v56  ;;  %2128 = vadd.xlane.f32.xlu0 %v2127_v58  ;;  %v2154_v28 = vsel %vm842_vm0, %v767_v51, 0.0 }
 0x370   : > { %v1928_v13 = vpop.xlane.xlu1 %1927  ;;  %v1925_v36 = vpop.xlane.xlu0 %1924 }
 0x371   : > { %v5218_v12 = vsel %vm3461_vm6, %v5217_v6, %v5213_v38  ;;  %v2740_v52 = vmul.f32 0.020408163, %v1928_v13  ;;  %v2739_v15 = vmul.f32 0.020408163, %v1925_v36  ;;  %v769_v6 = vld [vmem:[%s9820_s11 + $0xdb8] sm:$0xff]  ;;  %v768_v13 = vld [vmem:[%s9820_s11 + $0xdb0] sm:$0xff] }
 0x372   : > { %v5223_v20 = vsel %vm14036_vm9, %v5222_v4, %v5218_v12  ;;  %vm14038_vm9 = vcmask 786112   ;;  %v2157_v55 = vsel %vm842_vm0, %v768_v13, 0.0 }
 0x373   : > { %v5232_v21 = vrot.slane %v2740_v52, %v10036_v14  ;;  %v5227_v62 = vrot.slane %v2739_v15, %v10042_v19  ;;  %2137 = vadd.xlane.f32.xlu1 %v2136_v48  ;;  %2134 = vadd.xlane.f32.xlu0 %v2133_v10  ;;  %v2160_v15 = vsel %vm842_vm0, %v769_v6, 0.0 }
 0x374   : > { %v1934_v22 = vpop.xlane.xlu1 %1933  ;;  %v1931_v24 = vpop.xlane.xlu0 %1930 }
 0x375   : > { %v5228_v63 = vsel %vm3475_vm8, %v5227_v62, %v5223_v20  ;;  %v2742_v3 = vmul.f32 0.020408163, %v1934_v22  ;;  %v2741_v0 = vmul.f32 0.020408163, %v1931_v24  ;;  %v771_v62 = vld [vmem:[%s9820_s11 + $0xdc8] sm:$0xff]  ;;  %v770_v22 = vld [vmem:[%s9820_s11 + $0xdc0] sm:$0xff] }
 0x376   : > { %v5233_v35 = vsel %vm14037_vm7, %v5232_v21, %v5228_v63  ;;  %vm14039_vm7 = vcmask 1043459   ;;  %v2166_v32 = vsel %vm842_vm0, %v771_v62, 0.0  ;;  %v2163_v33 = vsel %vm842_vm0, %v770_v22, 0.0 }
 0x377   : > { %v5242_v8 = vrot.slane %v2742_v3, %v10052_v34  ;;  %v5237_v40 = vrot.slane %v2741_v0, %v10058_v39  ;;  %2143 = vadd.xlane.f32.xlu1 %v2142_v25  ;;  %2140 = vadd.xlane.f32.xlu0 %v2139_v26 }
 0x378   : > { %v1940_v43 = vpop.xlane.xlu1 %1939  ;;  %v1937_v44 = vpop.xlane.xlu0 %1936 }
 0x379   : > { %v5238_v46 = vsel %vm3489_vm10, %v5237_v40, %v5233_v35  ;;  %v2744_v49 = vmul.f32 0.020408163, %v1940_v43  ;;  %v2743_v50 = vmul.f32 0.020408163, %v1937_v44  ;;  %v772_v43 = vld [vmem:[%s9820_s11 + $0xdd0] sm:$0xff] }
 0x37a   : > { %v5243_v54 = vsel %vm14038_vm9, %v5242_v8, %v5238_v46  ;;  %vm14040_vm9 = vcmask 523712  }
 0x37b   : > { %v5252_v56 = vrot.slane %v2744_v49, %v10068_v53  ;;  %v5247_v58 = vrot.slane %v2743_v50, %v10074_v57  ;;  %2149 = vadd.xlane.f32.xlu1 %v2148_v5  ;;  %2146 = vadd.xlane.f32.xlu0 %v2145_v17  ;;  %v2169_v50 = vsel %vm842_vm0, %v772_v43, 0.0 }
 0x37c   : > { %v1946_v30 = vpop.xlane.xlu1 %1945  ;;  %v1943_v1 = vpop.xlane.xlu0 %1942 }
 0x37d   : > { %v5248_v2 = vsel %vm3503_vm12, %v5247_v58, %v5243_v54  ;;  %v2746_v38 = vmul.f32 0.020408163, %v1946_v30  ;;  %v2745_v4 = vmul.f32 0.020408163, %v1943_v1  ;;  %v774_v58 = vld [vmem:[%s9820_s11 + $0xde0] sm:$0xff] }
 0x37e   : > { %v5253_v36 = vsel %vm3510_vm13, %v5252_v56, %v5248_v2  ;;  %v775_v56 = vld [vmem:[%s9820_s11 + $0xde8] sm:$0xff] }
 0x37f   : > { %v5262_v48 = vrot.slane %v2746_v38, %v10084_v7  ;;  %v5257_v10 = vrot.slane %v2745_v4, %v10089_v9  ;;  %2155 = vadd.xlane.f32.xlu1 %v2154_v28  ;;  %2152 = vadd.xlane.f32.xlu0 %v2151_v41  ;;  %v2178_v38 = vsel %vm842_vm0, %v775_v56, 0.0  ;;  %v2175_v4 = vsel %vm842_vm0, %v774_v58, 0.0 }
 0x380   : > { %v1952_v12 = vpop.xlane.xlu1 %1951  ;;  %v1949_v52 = vpop.xlane.xlu0 %1948 }
 0x381   : > { %v5258_v11 = vsel %vm3517_vm14, %v5257_v10, %v5253_v36  ;;  %v2748_v20 = vmul.f32 0.020408163, %v1952_v12  ;;  %v2747_v21 = vmul.f32 0.020408163, %v1949_v52  ;;  %v776_v10 = vld [vmem:[%s9820_s11 + $0xdf0] sm:$0xff] }
 0x382   : > { %v5263_v24 = vsel %vm3524_vm15, %v5262_v48, %v5258_v11  ;;  %v777_v48 = vld [vmem:[%s9820_s11 + $0xdf8] sm:$0xff] }
 0x383   : > { %v11591_v25 = vsel %vm14039_vm7, %v5263_v24, %v11457_v45  ;;  %v5271_v26 = vrot.slane %v2748_v20, %v9987_v29  ;;  %v5267_v63 = vrot.slane %v2747_v21, %v9984_v27  ;;  %2161 = vadd.xlane.f32.xlu1 %v2160_v15  ;;  %2158 = vadd.xlane.f32.xlu0 %v2157_v55  ;;  %v773_v45 = vld [vmem:[%s9820_s11 + $0xdd8] sm:$0xff]  ;;  %v2184_v20 = vsel %vm842_vm0, %v777_v48, 0.0 }
 0x384   : > { %v1958_v3 = vpop.xlane.xlu1 %1957  ;;  %v1955_v0 = vpop.xlane.xlu0 %1954  ;;  %v2172_v49 = vsel %vm842_vm0, %v773_v45, 0.0  ;;  %v2181_v21 = vsel %vm842_vm0, %v776_v10, 0.0  ;;  %vm14041_vm7 = vcmask 654912  }
 0x385   : > { %v5272_v35 = vsel %vm3426_vm1, %v5271_v26, %v5267_v63  ;;  %v2750_v8 = vmul.f32 0.020408163, %v1958_v3  ;;  %v2749_v40 = vmul.f32 0.020408163, %v1955_v0  ;;  %v779_v26 = vld [vmem:[%s9820_s11 + $0xe08] sm:$0xff]  ;;  %v778_v63 = vld [vmem:[%s9820_s11 + $0xe00] sm:$0xff] }
 0x387   : > { %v5281_v44 = vrot.slane %v2750_v8, %v9996_v37  ;;  %v5276_v5 = vrot.slane %v2749_v40, %v9991_v31  ;;  %2167 = vadd.xlane.f32.xlu1 %v2166_v32  ;;  %2164 = vadd.xlane.f32.xlu0 %v2163_v33  ;;  %v2190_v8 = vsel %vm842_vm0, %v779_v26, 0.0  ;;  %v2187_v40 = vsel %vm842_vm0, %v778_v63, 0.0 }
 0x388   : > { %v1964_v17 = vpop.xlane.xlu1 %1963  ;;  %v1961_v46 = vpop.xlane.xlu0 %1960 }
 0x389   : > { %v5277_v51 = vsel %vm3433_vm2, %v5276_v5, %v5272_v35  ;;  %v2752_v23 = vmul.f32 0.020408163, %v1964_v17  ;;  %v2751_v54 = vmul.f32 0.020408163, %v1961_v46  ;;  %v781_v5 = vld [vmem:[%s9820_s11 + $0xe18] sm:$0xff]  ;;  %v780_v17 = vld [vmem:[%s9820_s11 + $0xe10] sm:$0xff] }
 0x38a   : > { %v5282_v30 = vsel %vm3440_vm3, %v5281_v44, %v5277_v51  ;;  %v2193_v56 = vsel %vm842_vm0, %v780_v17, 0.0 }
 0x38b   : > { %v5291_v1 = vrot.slane %v2752_v23, %v10001_v42  ;;  %v5286_v28 = vrot.slane %v2751_v54, %v10008_v47  ;;  %2173 = vadd.xlane.f32.xlu1 %v2172_v49  ;;  %2170 = vadd.xlane.f32.xlu0 %v2169_v50  ;;  %v2196_v54 = vsel %vm842_vm0, %v781_v5, 0.0 }
 0x38c   : > { %v1970_v41 = vpop.xlane.xlu1 %1969  ;;  %v1967_v2 = vpop.xlane.xlu0 %1966 }
 0x38d   : > { %v5287_v6 = vsel %vm3447_vm4, %v5286_v28, %v5282_v30  ;;  %v2754_v13 = vmul.f32 0.020408163, %v1970_v41  ;;  %v2753_v36 = vmul.f32 0.020408163, %v1967_v2  ;;  %v783_v28 = vld [vmem:[%s9820_s11 + $0xe28] sm:$0xff]  ;;  %v782_v41 = vld [vmem:[%s9820_s11 + $0xe20] sm:$0xff] }
 0x38e   : > { %v5292_v12 = vsel %vm3454_vm5, %v5291_v1, %v5287_v6  ;;  %v2199_v48 = vsel %vm842_vm0, %v782_v41, 0.0 }
 0x38f   : > { %v5301_v52 = vrot.slane %v2754_v13, %v10019_v60  ;;  %v5296_v15 = vrot.slane %v2753_v36, %v10022_v61  ;;  %2179 = vadd.xlane.f32.xlu1 %v2178_v38  ;;  %2176 = vadd.xlane.f32.xlu0 %v2175_v4  ;;  %v2202_v36 = vsel %vm842_vm0, %v783_v28, 0.0 }
 0x390   : > { %v1976_v55 = vpop.xlane.xlu1 %1975  ;;  %v1973_v11 = vpop.xlane.xlu0 %1972 }
 0x391   : > { %v5297_v62 = vsel %vm3461_vm6, %v5296_v15, %v5292_v12  ;;  %v2756_v22 = vmul.f32 0.020408163, %v1976_v55  ;;  %v2755_v24 = vmul.f32 0.020408163, %v1973_v11  ;;  %v785_v15 = vld [vmem:[%s9820_s11 + $0xe38] sm:$0xff]  ;;  %v784_v55 = vld [vmem:[%s9820_s11 + $0xe30] sm:$0xff] }
 0x392   : > { %v5302_v3 = vsel %vm14040_vm9, %v5301_v52, %v5297_v62  ;;  %vm14042_vm9 = vcmask 786112   ;;  %v2205_v26 = vsel %vm842_vm0, %v784_v55, 0.0 }
 0x393   : > { %v5311_v0 = vrot.slane %v2756_v22, %v10036_v14  ;;  %v5306_v32 = vrot.slane %v2755_v24, %v10042_v19  ;;  %2185 = vadd.xlane.f32.xlu1 %v2184_v20  ;;  %2182 = vadd.xlane.f32.xlu0 %v2181_v21  ;;  %v2208_v24 = vsel %vm842_vm0, %v785_v15, 0.0 }
 0x394   : > { %v1982_v33 = vpop.xlane.xlu1 %1981  ;;  %v1979_v35 = vpop.xlane.xlu0 %1978 }
 0x395   : > { %v5307_v45 = vsel %vm3475_vm8, %v5306_v32, %v5302_v3  ;;  %v2758_v43 = vmul.f32 0.020408163, %v1982_v33  ;;  %v2757_v44 = vmul.f32 0.020408163, %v1979_v35  ;;  %v787_v32 = vld [vmem:[%s9820_s11 + $0xe48] sm:$0xff]  ;;  %v786_v33 = vld [vmem:[%s9820_s11 + $0xe40] sm:$0xff] }
 0x396   : > { %v5312_v46 = vsel %vm14041_vm7, %v5311_v0, %v5307_v45  ;;  %vm14043_vm7 = vcmask 1043459   ;;  %v2214_v5 = vsel %vm842_vm0, %v787_v32, 0.0  ;;  %v2211_v17 = vsel %vm842_vm0, %v786_v33, 0.0 }
 0x397   : > { %v5321_v49 = vrot.slane %v2758_v43, %v10052_v34  ;;  %v5316_v50 = vrot.slane %v2757_v44, %v10058_v39  ;;  %2191 = vadd.xlane.f32.xlu1 %v2190_v8  ;;  %2188 = vadd.xlane.f32.xlu0 %v2187_v40 }
 0x398   : > { %v1988_v51 = vpop.xlane.xlu1 %1987  ;;  %v1985_v23 = vpop.xlane.xlu0 %1984 }
 0x399   : > { %v5317_v58 = vsel %vm3489_vm10, %v5316_v50, %v5312_v46  ;;  %v2760_v30 = vmul.f32 0.020408163, %v1988_v51  ;;  %v2759_v1 = vmul.f32 0.020408163, %v1985_v23  ;;  %v788_v51 = vld [vmem:[%s9820_s11 + $0xe50] sm:$0xff] }
 0x39a   : > { %v5322_v2 = vsel %vm14042_vm9, %v5321_v49, %v5317_v58  ;;  %vm14044_vm9 = vcmask 523712  }
 0x39b   : > { %v5331_v38 = vrot.slane %v2760_v30, %v10068_v53  ;;  %v5326_v4 = vrot.slane %v2759_v1, %v10074_v57  ;;  %2197 = vadd.xlane.f32.xlu1 %v2196_v54  ;;  %2194 = vadd.xlane.f32.xlu0 %v2193_v56  ;;  %v2217_v1 = vsel %vm842_vm0, %v788_v51, 0.0 }
 0x39c   : > { %v1994_v6 = vpop.xlane.xlu1 %1993  ;;  %v1991_v13 = vpop.xlane.xlu0 %1990 }
 0x39d   : > { %v5327_v10 = vsel %vm3503_vm12, %v5326_v4, %v5322_v2  ;;  %v2762_v12 = vmul.f32 0.020408163, %v1994_v6  ;;  %v2761_v52 = vmul.f32 0.020408163, %v1991_v13  ;;  %v790_v4 = vld [vmem:[%s9820_s11 + $0xe60] sm:$0xff] }
 0x39e   : > { %v5332_v11 = vsel %vm3510_vm13, %v5331_v38, %v5327_v10  ;;  %v791_v38 = vld [vmem:[%s9820_s11 + $0xe68] sm:$0xff] }
 0x39f   : > { %v5341_v20 = vrot.slane %v2762_v12, %v10084_v7  ;;  %v5336_v21 = vrot.slane %v2761_v52, %v10089_v9  ;;  %2203 = vadd.xlane.f32.xlu1 %v2202_v36  ;;  %2200 = vadd.xlane.f32.xlu0 %v2199_v48  ;;  %v2226_v12 = vsel %vm842_vm0, %v791_v38, 0.0  ;;  %v2223_v52 = vsel %vm842_vm0, %v790_v4, 0.0 }
 0x3a0   : > { %v2000_v62 = vpop.xlane.xlu1 %1999  ;;  %v1997_v22 = vpop.xlane.xlu0 %1996 }
 0x3a1   : > { %v5337_v63 = vsel %vm3517_vm14, %v5336_v21, %v5332_v11  ;;  %v2764_v3 = vmul.f32 0.020408163, %v2000_v62  ;;  %v2763_v0 = vmul.f32 0.020408163, %v1997_v22  ;;  %v792_v21 = vld [vmem:[%s9820_s11 + $0xe70] sm:$0xff] }
 0x3a2   : > { %v5342_v35 = vsel %vm3524_vm15, %v5341_v20, %v5337_v63  ;;  %v793_v20 = vld [vmem:[%s9820_s11 + $0xe78] sm:$0xff] }
 0x3a3   : > { %v11658_v8 = vsel %vm14043_vm7, %v5342_v35, %v11524_v18  ;;  %v5350_v40 = vrot.slane %v2764_v3, %v9987_v29  ;;  %v5346_v45 = vrot.slane %v2763_v0, %v9984_v27  ;;  %2209 = vadd.xlane.f32.xlu1 %v2208_v24  ;;  %2206 = vadd.xlane.f32.xlu0 %v2205_v26  ;;  %v789_v18 = vld [vmem:[%s9820_s11 + $0xe58] sm:$0xff]  ;;  %v2232_v3 = vsel %vm842_vm0, %v793_v20, 0.0 }
 0x3a4   : > { %v2006_v43 = vpop.xlane.xlu1 %2005  ;;  %v2003_v44 = vpop.xlane.xlu0 %2002  ;;  %v2220_v30 = vsel %vm842_vm0, %v789_v18, 0.0  ;;  %v2229_v0 = vsel %vm842_vm0, %v792_v21, 0.0  ;;  %vm14045_vm7 = vcmask 654912  }
 0x3a5   : > { %v5351_v46 = vsel %vm3426_vm1, %v5350_v40, %v5346_v45  ;;  %v2766_v49 = vmul.f32 0.020408163, %v2006_v43  ;;  %v2765_v50 = vmul.f32 0.020408163, %v2003_v44  ;;  %v795_v40 = vld [vmem:[%s9820_s11 + $0xe88] sm:$0xff]  ;;  %v794_v45 = vld [vmem:[%s9820_s11 + $0xe80] sm:$0xff] }
 0x3a7   : > { %v5360_v23 = vrot.slane %v2766_v49, %v9996_v37  ;;  %v5355_v54 = vrot.slane %v2765_v50, %v9991_v31  ;;  %2215 = vadd.xlane.f32.xlu1 %v2214_v5  ;;  %2212 = vadd.xlane.f32.xlu0 %v2211_v17  ;;  %v2238_v49 = vsel %vm842_vm0, %v795_v40, 0.0  ;;  %v2235_v50 = vsel %vm842_vm0, %v794_v45, 0.0 }
 0x3a8   : > { %v2012_v56 = vpop.xlane.xlu1 %2011  ;;  %v2009_v58 = vpop.xlane.xlu0 %2008 }
 0x3a9   : > { %v5356_v28 = vsel %vm3433_vm2, %v5355_v54, %v5351_v46  ;;  %v2768_v41 = vmul.f32 0.020408163, %v2012_v56  ;;  %v2767_v2 = vmul.f32 0.020408163, %v2009_v58  ;;  %v810_v54 = vld [vmem:[%s9820_s11 + $0xf00] sm:$0xff]  ;;  %v796_v56 = vld [vmem:[%s9820_s11 + $0xe90] sm:$0xff] }
 0x3aa   : > { %v5361_v6 = vsel %vm3440_vm3, %v5360_v23, %v5356_v28  ;;  %v2241_v38 = vsel %vm842_vm0, %v796_v56, 0.0 }
 0x3ab   : > { %v5370_v13 = vrot.slane %v2768_v41, %v10001_v42  ;;  %v5365_v36 = vrot.slane %v2767_v2, %v10008_v47  ;;  %2221 = vadd.xlane.f32.xlu1 %v2220_v30  ;;  %2218 = vadd.xlane.f32.xlu0 %v2217_v1  ;;  %v2283_v2 = vsel %vm842_vm0, %v810_v54, 0.0 }
 0x3ac   : > { %v2018_v48 = vpop.xlane.xlu1 %2017  ;;  %v2015_v10 = vpop.xlane.xlu0 %2014 }
 0x3ad   : > { %v5366_v15 = vsel %vm3447_vm4, %v5365_v36, %v5361_v6  ;;  %v2770_v55 = vmul.f32 0.020408163, %v2018_v48  ;;  %v2769_v11 = vmul.f32 0.020408163, %v2015_v10  ;;  %v826_v36 = vld [vmem:[%s9820_s11 + $0xf80] sm:$0xff]  ;;  %v811_v48 = vld [vmem:[%s9820_s11 + $0xf08] sm:$0xff] }
 0x3ae   : > { %v5371_v62 = vsel %vm3454_vm5, %v5370_v13, %v5366_v15  ;;  %v2286_v20 = vsel %vm842_vm0, %v811_v48, 0.0 }
 0x3af   : > { %v5380_v22 = vrot.slane %v2770_v55, %v10019_v60  ;;  %v5375_v24 = vrot.slane %v2769_v11, %v10022_v61  ;;  %2227 = vadd.xlane.f32.xlu1 %v2226_v12  ;;  %2224 = vadd.xlane.f32.xlu0 %v2223_v52  ;;  %v2331_v11 = vsel %vm842_vm0, %v826_v36, 0.0 }
 0x3b0   : > { %v2024_v26 = vpop.xlane.xlu1 %2023  ;;  %v2021_v63 = vpop.xlane.xlu0 %2020 }
 0x3b1   : > { %v5376_v32 = vsel %vm3461_vm6, %v5375_v24, %v5371_v62  ;;  %v2772_v33 = vmul.f32 0.020408163, %v2024_v26  ;;  %v2771_v35 = vmul.f32 0.020408163, %v2021_v63  ;;  %v797_v24 = vld [vmem:[%s9820_s11 + $0xe98] sm:$0xff]  ;;  %v827_v26 = vld [vmem:[%s9820_s11 + $0xf88] sm:$0xff] }
 0x3b2   : > { %v5381_v43 = vsel %vm14044_vm9, %v5380_v22, %v5376_v32  ;;  %vm14046_vm9 = vcmask 786112   ;;  %v2334_v40 = vsel %vm842_vm0, %v827_v26, 0.0 }
 0x3b3   : > { %v5390_v44 = vrot.slane %v2772_v33, %v10036_v14  ;;  %v5385_v5 = vrot.slane %v2771_v35, %v10042_v19  ;;  %2233 = vadd.xlane.f32.xlu1 %v2232_v3  ;;  %2230 = vadd.xlane.f32.xlu0 %v2229_v0  ;;  %v2244_v35 = vsel %vm842_vm0, %v797_v24, 0.0 }
 0x3b4   : > { %v2030_v17 = vpop.xlane.xlu1 %2029  ;;  %v2027_v46 = vpop.xlane.xlu0 %2026 }
 0x3b5   : > { %v5386_v18 = vsel %vm3475_vm8, %v5385_v5, %v5381_v43  ;;  %v2774_v51 = vmul.f32 0.020408163, %v2030_v17  ;;  %v2773_v23 = vmul.f32 0.020408163, %v2027_v46  ;;  %v828_v5 = vld [vmem:[%s9820_s11 + $0xf90] sm:$0xff] }
 0x3b6   : > { %v5391_v58 = vsel %vm14045_vm7, %v5390_v44, %v5386_v18  ;;  %v812_v17 = vld [vmem:[%s9820_s11 + $0xf10] sm:$0xff]  ;;  %vm14047_vm7 = vcmask 1044484   ;;  %v2337_v54 = vsel %vm842_vm0, %v828_v5, 0.0 }
 0x3b7   : > { %v5400_v30 = vrot.slane %v2774_v51, %v10052_v34  ;;  %v5395_v1 = vrot.slane %v2773_v23, %v10058_v39  ;;  %2239 = vadd.xlane.f32.xlu1 %v2238_v49  ;;  %2236 = vadd.xlane.f32.xlu0 %v2235_v50  ;;  %v2289_v56 = vsel %vm842_vm0, %v812_v17, 0.0 }
 0x3b8   : > { %v2036_v28 = vpop.xlane.xlu1 %2035  ;;  %v2033_v41 = vpop.xlane.xlu0 %2032 }
 0x3b9   : > { %v5396_v4 = vsel %vm3489_vm10, %v5395_v1, %v5391_v58  ;;  %v2776_v6 = vmul.f32 0.020408163, %v2036_v28  ;;  %v2775_v13 = vmul.f32 0.020408163, %v2033_v41  ;;  %v798_v28 = vld [vmem:[%s9820_s11 + $0xea0] sm:$0xff] }
 0x3ba   : > { %v5401_v10 = vsel %vm14046_vm9, %v5400_v30, %v5396_v4  ;;  %vm14048_vm9 = vcmask 523712  }
 0x3bb   : > { %v5410_v12 = vrot.slane %v2776_v6, %v10068_v53  ;;  %v5405_v52 = vrot.slane %v2775_v13, %v10074_v57  ;;  %2284 = vadd.xlane.f32.xlu1 %v2283_v2  ;;  %2242 = vadd.xlane.f32.xlu0 %v2241_v38  ;;  %v2247_v13 = vsel %vm842_vm0, %v798_v28, 0.0 }
 0x3bc   : > { %v2042_v15 = vpop.xlane.xlu1 %2041  ;;  %v2039_v55 = vpop.xlane.xlu0 %2038 }
 0x3bd   : > { %v5406_v21 = vsel %vm3503_vm12, %v5405_v52, %v5401_v10  ;;  %v2778_v62 = vmul.f32 0.020408163, %v2042_v15  ;;  %v2777_v22 = vmul.f32 0.020408163, %v2039_v55  ;;  %v829_v52 = vld [vmem:[%s9820_s11 + $0xf98] sm:$0xff] }
 0x3be   : > { %v5411_v63 = vsel %vm3510_vm13, %v5410_v12, %v5406_v21  ;;  %v799_v12 = vld [vmem:[%s9820_s11 + $0xea8] sm:$0xff] }
 0x3bf   : > { %v5420_v3 = vrot.slane %v2778_v62, %v10084_v7  ;;  %v5415_v0 = vrot.slane %v2777_v22, %v10089_v9  ;;  %2332 = vadd.xlane.f32.xlu1 %v2331_v11  ;;  %2287 = vadd.xlane.f32.xlu0 %v2286_v20  ;;  %v2250_v62 = vsel %vm842_vm0, %v799_v12, 0.0  ;;  %v2340_v22 = vsel %vm842_vm0, %v829_v52, 0.0 }
 0x3c0   : > { %v2048_v32 = vpop.xlane.xlu1 %2047  ;;  %v2045_v33 = vpop.xlane.xlu0 %2044 }
 0x3c1   : > { %v5416_v45 = vsel %vm3517_vm14, %v5415_v0, %v5411_v63  ;;  %v2780_v43 = vmul.f32 0.020408163, %v2048_v32  ;;  %v2779_v44 = vmul.f32 0.020408163, %v2045_v33  ;;  %v814_v0 = vld [vmem:[%s9820_s11 + $0xf20] sm:$0xff] }
 0x3c2   : > { %v5421_v46 = vsel %vm3524_vm15, %v5420_v3, %v5416_v45  ;;  %v830_v3 = vld [vmem:[%s9820_s11 + $0xfa0] sm:$0xff] }
 0x3c3   : > { %v11725_v49 = vsel %vm14047_vm7, %v5421_v46, %v11591_v25  ;;  %v5429_v50 = vrot.slane %v2780_v43, %v9987_v29  ;;  %v5425_v18 = vrot.slane %v2779_v44, %v9984_v27  ;;  %2245 = vadd.xlane.f32.xlu1 %v2244_v35  ;;  %2335 = vadd.xlane.f32.xlu0 %v2334_v40  ;;  %v813_v25 = vld [vmem:[%s9820_s11 + $0xf18] sm:$0xff]  ;;  %v2343_v43 = vsel %vm842_vm0, %v830_v3, 0.0 }
 0x3c4   : > { %v2054_v51 = vpop.xlane.xlu1 %2053  ;;  %v2051_v23 = vpop.xlane.xlu0 %2050  ;;  %v2292_v6 = vsel %vm842_vm0, %v813_v25, 0.0  ;;  %v2295_v44 = vsel %vm842_vm0, %v814_v0, 0.0  ;;  %vm14049_vm7 = vcmask 654912  }
 0x3c5   : > { %v5430_v58 = vsel %vm3426_vm1, %v5429_v50, %v5425_v18  ;;  %v2782_v30 = vmul.f32 0.020408163, %v2054_v51  ;;  %v2781_v1 = vmul.f32 0.020408163, %v2051_v23  ;;  %v815_v50 = vld [vmem:[%s9820_s11 + $0xf28] sm:$0xff]  ;;  %v800_v18 = vld [vmem:[%s9820_s11 + $0xeb0] sm:$0xff] }
 0x3c7   : > { %v5439_v41 = vrot.slane %v2782_v30, %v9996_v37  ;;  %v5434_v2 = vrot.slane %v2781_v1, %v9991_v31  ;;  %2338 = vadd.xlane.f32.xlu1 %v2337_v54  ;;  %2290 = vadd.xlane.f32.xlu0 %v2289_v56  ;;  %v2298_v30 = vsel %vm842_vm0, %v815_v50, 0.0  ;;  %v2253_v1 = vsel %vm842_vm0, %v800_v18, 0.0 }
 0x3c8   : > { %v2060_v38 = vpop.xlane.xlu1 %2059  ;;  %v2057_v4 = vpop.xlane.xlu0 %2056 }
 0x3c9   : > { %v5435_v36 = vsel %vm3433_vm2, %v5434_v2, %v5430_v58  ;;  %v2784_v48 = vmul.f32 0.020408163, %v2060_v38  ;;  %v2783_v10 = vmul.f32 0.020408163, %v2057_v4  ;;  %v801_v2 = vld [vmem:[%s9820_s11 + $0xeb8] sm:$0xff]  ;;  %v831_v38 = vld [vmem:[%s9820_s11 + $0xfa8] sm:$0xff] }
 0x3ca   : > { %v5440_v15 = vsel %vm3440_vm3, %v5439_v41, %v5435_v36  ;;  %v2346_v12 = vsel %vm842_vm0, %v831_v38, 0.0 }
 0x3cb   : > { %v5449_v55 = vrot.slane %v2784_v48, %v10001_v42  ;;  %v5444_v11 = vrot.slane %v2783_v10, %v10008_v47  ;;  %2293 = vadd.xlane.f32.xlu1 %v2292_v6  ;;  %2248 = vadd.xlane.f32.xlu0 %v2247_v13  ;;  %v2256_v10 = vsel %vm842_vm0, %v801_v2, 0.0 }
 0x3cc   : > { %v2066_v20 = vpop.xlane.xlu1 %2065  ;;  %v2063_v21 = vpop.xlane.xlu0 %2062 }
 0x3cd   : > { %v5445_v24 = vsel %vm3447_vm4, %v5444_v11, %v5440_v15  ;;  %v2786_v26 = vmul.f32 0.020408163, %v2066_v20  ;;  %v2785_v63 = vmul.f32 0.020408163, %v2063_v21  ;;  %v832_v11 = vld [vmem:[%s9820_s11 + $0xfb0] sm:$0xff] }
 0x3ce   : > { %v5450_v32 = vsel %vm3454_vm5, %v5449_v55, %v5445_v24  ;;  %v816_v20 = vld [vmem:[%s9820_s11 + $0xf30] sm:$0xff] }
 0x3cf   : > { %v5459_v33 = vrot.slane %v2786_v26, %v10019_v60  ;;  %v5454_v35 = vrot.slane %v2785_v63, %v10022_v61  ;;  %2251 = vadd.xlane.f32.xlu1 %v2250_v62  ;;  %2341 = vadd.xlane.f32.xlu0 %v2340_v22  ;;  %v2349_v63 = vsel %vm842_vm0, %v832_v11, 0.0  ;;  %v2301_v3 = vsel %vm842_vm0, %v816_v20, 0.0 }
 0x3d0   : > { %v2072_v40 = vpop.xlane.xlu1 %2071  ;;  %v2069_v45 = vpop.xlane.xlu0 %2068 }
 0x3d1   : > { %v5455_v5 = vsel %vm3461_vm6, %v5454_v35, %v5450_v32  ;;  %v2788_v17 = vmul.f32 0.020408163, %v2072_v40  ;;  %v2787_v46 = vmul.f32 0.020408163, %v2069_v45  ;;  %v817_v35 = vld [vmem:[%s9820_s11 + $0xf38] sm:$0xff]  ;;  %v802_v40 = vld [vmem:[%s9820_s11 + $0xec0] sm:$0xff] }
 0x3d2   : > { %v5460_v51 = vsel %vm14048_vm9, %v5459_v33, %v5455_v5  ;;  %vm14050_vm9 = vcmask 786112   ;;  %v2259_v50 = vsel %vm842_vm0, %v802_v40, 0.0 }
 0x3d3   : > { %v5469_v23 = vrot.slane %v2788_v17, %v10036_v14  ;;  %v5464_v54 = vrot.slane %v2787_v46, %v10042_v19  ;;  %2344 = vadd.xlane.f32.xlu1 %v2343_v43  ;;  %2296 = vadd.xlane.f32.xlu0 %v2295_v44  ;;  %v2304_v46 = vsel %vm842_vm0, %v817_v35, 0.0 }
 0x3d4   : > { %v2078_v56 = vpop.xlane.xlu1 %2077  ;;  %v2075_v58 = vpop.xlane.xlu0 %2074 }
 0x3d5   : > { %v5465_v25 = vsel %vm3475_vm8, %v5464_v54, %v5460_v51  ;;  %v2790_v28 = vmul.f32 0.020408163, %v2078_v56  ;;  %v2789_v41 = vmul.f32 0.020408163, %v2075_v58  ;;  %v803_v54 = vld [vmem:[%s9820_s11 + $0xec8] sm:$0xff]  ;;  %v833_v56 = vld [vmem:[%s9820_s11 + $0xfb8] sm:$0xff] }
 0x3d6   : > { %v5470_v4 = vsel %vm14049_vm7, %v5469_v23, %v5465_v25  ;;  %vm14051_vm7 = vcmask 1044484   ;;  %v2262_v2 = vsel %vm842_vm0, %v803_v54, 0.0  ;;  %v2352_v38 = vsel %vm842_vm0, %v833_v56, 0.0 }
 0x3d7   : > { %v5479_v6 = vrot.slane %v2790_v28, %v10052_v34  ;;  %v5474_v13 = vrot.slane %v2789_v41, %v10058_v39  ;;  %2299 = vadd.xlane.f32.xlu1 %v2298_v30  ;;  %2254 = vadd.xlane.f32.xlu0 %v2253_v1 }
 0x3d8   : > { %v2084_v36 = vpop.xlane.xlu1 %2083  ;;  %v2081_v48 = vpop.xlane.xlu0 %2080 }
 0x3d9   : > { %v5475_v52 = vsel %vm3489_vm10, %v5474_v13, %v5470_v4  ;;  %v2792_v15 = vmul.f32 0.020408163, %v2084_v36  ;;  %v2791_v55 = vmul.f32 0.020408163, %v2081_v48  ;;  %v818_v36 = vld [vmem:[%s9820_s11 + $0xf40] sm:$0xff] }
 0x3da   : > { %v5480_v21 = vsel %vm14050_vm9, %v5479_v6, %v5475_v52  ;;  %vm14052_vm9 = vcmask 523712  }
 0x3db   : > { %v5489_v62 = vrot.slane %v2792_v15, %v10068_v53  ;;  %v5484_v22 = vrot.slane %v2791_v55, %v10074_v57  ;;  %2257 = vadd.xlane.f32.xlu1 %v2256_v10  ;;  %2347 = vadd.xlane.f32.xlu0 %v2346_v12  ;;  %v2307_v55 = vsel %vm842_vm0, %v818_v36, 0.0 }
 0x3dc   : > { %v2090_v24 = vpop.xlane.xlu1 %2089  ;;  %v2087_v26 = vpop.xlane.xlu0 %2086 }
 0x3dd   : > { %v5485_v0 = vsel %vm3503_vm12, %v5484_v22, %v5480_v21  ;;  %v2794_v32 = vmul.f32 0.020408163, %v2090_v24  ;;  %v2793_v33 = vmul.f32 0.020408163, %v2087_v26  ;;  %v804_v22 = vld [vmem:[%s9820_s11 + $0xed0] sm:$0xff] }
 0x3de   : > { %v5490_v45 = vsel %vm3510_vm13, %v5489_v62, %v5485_v0  ;;  %v819_v62 = vld [vmem:[%s9820_s11 + $0xf48] sm:$0xff] }
 0x3df   : > { %v5499_v43 = vrot.slane %v2794_v32, %v10084_v7  ;;  %v5494_v44 = vrot.slane %v2793_v33, %v10089_v9  ;;  %2350 = vadd.xlane.f32.xlu1 %v2349_v63  ;;  %2302 = vadd.xlane.f32.xlu0 %v2301_v3  ;;  %v2310_v32 = vsel %vm842_vm0, %v819_v62, 0.0  ;;  %v2265_v33 = vsel %vm842_vm0, %v804_v22, 0.0 }
 0x3e0   : > { %v2096_v5 = vpop.xlane.xlu1 %2095  ;;  %v2093_v17 = vpop.xlane.xlu0 %2092 }
 0x3e1   : > { %v5495_v18 = vsel %vm3517_vm14, %v5494_v44, %v5490_v45  ;;  %v2796_v51 = vmul.f32 0.020408163, %v2096_v5  ;;  %v2795_v23 = vmul.f32 0.020408163, %v2093_v17  ;;  %v835_v44 = vld [vmem:[%s9820_s11 + $0xfc8] sm:$0xff] }
 0x3e2   : > { %v5500_v58 = vsel %vm3524_vm15, %v5499_v43, %v5495_v18  ;;  %v805_v43 = vld [vmem:[%s9820_s11 + $0xed8] sm:$0xff] }
 0x3e3   : > { %v11792_v30 = vsel %vm14051_vm7, %v5500_v58, %v11658_v8  ;;  %v5508_v1 = vrot.slane %v2796_v51, %v9987_v29  ;;  %v5504_v25 = vrot.slane %v2795_v23, %v9984_v27  ;;  %2305 = vadd.xlane.f32.xlu1 %v2304_v46  ;;  %2260 = vadd.xlane.f32.xlu0 %v2259_v50  ;;  %v834_v8 = vld [vmem:[%s9820_s11 + $0xfc0] sm:$0xff]  ;;  %v2268_v51 = vsel %vm842_vm0, %v805_v43, 0.0 }
 0x3e4   : > { %v2102_v28 = vpop.xlane.xlu1 %2101  ;;  %v2099_v41 = vpop.xlane.xlu0 %2098  ;;  %v2355_v15 = vsel %vm842_vm0, %v834_v8, 0.0  ;;  %v2358_v23 = vsel %vm842_vm0, %v835_v44, 0.0  ;;  %vm14053_vm7 = vcmask 654912  }
 0x3e5   : > { %v5509_v4 = vsel %vm3426_vm1, %v5508_v1, %v5504_v25  ;;  %v2798_v6 = vmul.f32 0.020408163, %v2102_v28  ;;  %v2797_v13 = vmul.f32 0.020408163, %v2099_v41  ;;  %v836_v1 = vld [vmem:[%s9820_s11 + $0xfd0] sm:$0xff] }
 0x3e6   : > { %v820_v25 = vld [vmem:[%s9820_s11 + $0xf50] sm:$0xff] }
 0x3e7   : > { %v5518_v48 = vrot.slane %v2798_v6, %v9996_v37  ;;  %v5513_v10 = vrot.slane %v2797_v13, %v9991_v31  ;;  %2263 = vadd.xlane.f32.xlu1 %v2262_v2  ;;  %2353 = vadd.xlane.f32.xlu0 %v2352_v38  ;;  %v2361_v6 = vsel %vm842_vm0, %v836_v1, 0.0  ;;  %v2313_v13 = vsel %vm842_vm0, %v820_v25, 0.0 }
 0x3e8   : > { %v2108_v12 = vpop.xlane.xlu1 %2107  ;;  %v2105_v52 = vpop.xlane.xlu0 %2104 }
 0x3e9   : > { %v5514_v11 = vsel %vm3433_vm2, %v5513_v10, %v5509_v4  ;;  %v2800_v20 = vmul.f32 0.020408163, %v2108_v12  ;;  %v2799_v21 = vmul.f32 0.020408163, %v2105_v52  ;;  %v821_v10 = vld [vmem:[%s9820_s11 + $0xf58] sm:$0xff]  ;;  %v806_v12 = vld [vmem:[%s9820_s11 + $0xee0] sm:$0xff] }
 0x3ea   : > { %v5519_v24 = vsel %vm3440_vm3, %v5518_v48, %v5514_v11  ;;  %v2271_v62 = vsel %vm842_vm0, %v806_v12, 0.0 }
 0x3eb   : > { %v5528_v26 = vrot.slane %v2800_v20, %v10001_v42  ;;  %v5523_v63 = vrot.slane %v2799_v21, %v10008_v47  ;;  %2356 = vadd.xlane.f32.xlu1 %v2355_v15  ;;  %2308 = vadd.xlane.f32.xlu0 %v2307_v55  ;;  %v2316_v21 = vsel %vm842_vm0, %v821_v10, 0.0 }
 0x3ec   : > { %v2114_v3 = vpop.xlane.xlu1 %2113  ;;  %v2111_v0 = vpop.xlane.xlu0 %2110 }
 0x3ed   : > { %v5524_v35 = vsel %vm3447_vm4, %v5523_v63, %v5519_v24  ;;  %v2802_v40 = vmul.f32 0.020408163, %v2114_v3  ;;  %v2801_v45 = vmul.f32 0.020408163, %v2111_v0  ;;  %v807_v63 = vld [vmem:[%s9820_s11 + $0xee8] sm:$0xff]  ;;  %v837_v3 = vld [vmem:[%s9820_s11 + $0xfd8] sm:$0xff] }
 0x3ee   : > { %v5529_v5 = vsel %vm3454_vm5, %v5528_v26, %v5524_v35  ;;  %v2364_v43 = vsel %vm842_vm0, %v837_v3, 0.0 }
 0x3ef   : > { %v5538_v17 = vrot.slane %v2802_v40, %v10019_v60  ;;  %v5533_v46 = vrot.slane %v2801_v45, %v10022_v61  ;;  %2311 = vadd.xlane.f32.xlu1 %v2310_v32  ;;  %2266 = vadd.xlane.f32.xlu0 %v2265_v33  ;;  %v2274_v45 = vsel %vm842_vm0, %v807_v63, 0.0 }
 0x3f0   : > { %v2120_v50 = vpop.xlane.xlu1 %2119  ;;  %v2117_v18 = vpop.xlane.xlu0 %2116 }
 0x3f1   : > { %v5534_v54 = vsel %vm3461_vm6, %v5533_v46, %v5529_v5  ;;  %v2804_v56 = vmul.f32 0.020408163, %v2120_v50  ;;  %v2803_v58 = vmul.f32 0.020408163, %v2117_v18  ;;  %v838_v46 = vld [vmem:[%s9820_s11 + $0xfe0] sm:$0xff] }
 0x3f2   : > { %v5539_v28 = vsel %vm14052_vm9, %v5538_v17, %v5534_v54  ;;  %vm14054_vm9 = vcmask 786112   ;;  %v822_v50 = vld [vmem:[%s9820_s11 + $0xf60] sm:$0xff] }
 0x3f3   : > { %v5548_v41 = vrot.slane %v2804_v56, %v10036_v14  ;;  %v5543_v2 = vrot.slane %v2803_v58, %v10042_v19  ;;  %2269 = vadd.xlane.f32.xlu1 %v2268_v51  ;;  %2359 = vadd.xlane.f32.xlu0 %v2358_v23  ;;  %v2367_v58 = vsel %vm842_vm0, %v838_v46, 0.0  ;;  %v2319_v1 = vsel %vm842_vm0, %v822_v50, 0.0 }
 0x3f4   : > { %v2126_v38 = vpop.xlane.xlu1 %2125  ;;  %v2123_v4 = vpop.xlane.xlu0 %2122 }
 0x3f5   : > { %v5544_v8 = vsel %vm3475_vm8, %v5543_v2, %v5539_v28  ;;  %v2806_v36 = vmul.f32 0.020408163, %v2126_v38  ;;  %v2805_v48 = vmul.f32 0.020408163, %v2123_v4  ;;  %v823_v2 = vld [vmem:[%s9820_s11 + $0xf68] sm:$0xff]  ;;  %v808_v38 = vld [vmem:[%s9820_s11 + $0xef0] sm:$0xff] }
 0x3f6   : > { %v5549_v52 = vsel %vm14053_vm7, %v5548_v41, %v5544_v8  ;;  %vm14055_vm7 = vcmask 1045509   ;;  %v2322_v10 = vsel %vm842_vm0, %v823_v2, 0.0  ;;  %v2277_v12 = vsel %vm842_vm0, %v808_v38, 0.0 }
 0x3f7   : > { %v5558_v15 = vrot.slane %v2806_v36, %v10052_v34  ;;  %v5553_v55 = vrot.slane %v2805_v48, %v10058_v39  ;;  %2362 = vadd.xlane.f32.xlu1 %v2361_v6  ;;  %2314 = vadd.xlane.f32.xlu0 %v2313_v13 }
 0x3f8   : > { %v2132_v11 = vpop.xlane.xlu1 %2131  ;;  %v2129_v20 = vpop.xlane.xlu0 %2128 }
 0x3f9   : > { %v5554_v22 = vsel %vm3489_vm10, %v5553_v55, %v5549_v52  ;;  %v2808_v24 = vmul.f32 0.020408163, %v2132_v11  ;;  %v2807_v26 = vmul.f32 0.020408163, %v2129_v20  ;;  %v839_v11 = vld [vmem:[%s9820_s11 + $0xfe8] sm:$0xff] }
 0x3fa   : > { %v5559_v0 = vsel %vm14054_vm9, %v5558_v15, %v5554_v22  ;;  %vm14056_vm9 = vcmask 523712  }
 0x3fb   : > { %v5568_v32 = vrot.slane %v2808_v24, %v10068_v53  ;;  %v5563_v33 = vrot.slane %v2807_v26, %v10074_v57  ;;  %2317 = vadd.xlane.f32.xlu1 %v2316_v21  ;;  %2272 = vadd.xlane.f32.xlu0 %v2271_v62  ;;  %v2370_v26 = vsel %vm842_vm0, %v839_v11, 0.0 }
 0x3fc   : > { %v2138_v35 = vpop.xlane.xlu1 %2137  ;;  %v2135_v40 = vpop.xlane.xlu0 %2134 }
 0x3fd   : > { %v5564_v44 = vsel %vm3503_vm12, %v5563_v33, %v5559_v0  ;;  %v2810_v5 = vmul.f32 0.020408163, %v2138_v35  ;;  %v2809_v17 = vmul.f32 0.020408163, %v2135_v40  ;;  %v824_v33 = vld [vmem:[%s9820_s11 + $0xf70] sm:$0xff] }
 0x3fe   : > { %v5569_v18 = vsel %vm3510_vm13, %v5568_v32, %v5564_v44  ;;  %v840_v32 = vld [vmem:[%s9820_s11 + $0xff0] sm:$0xff] }
 0x3ff   : > { %v5578_v51 = vrot.slane %v2810_v5, %v10084_v7  ;;  %v5573_v23 = vrot.slane %v2809_v17, %v10089_v9  ;;  %2275 = vadd.xlane.f32.xlu1 %v2274_v45  ;;  %2365 = vadd.xlane.f32.xlu0 %v2364_v43  ;;  %v2373_v5 = vsel %vm842_vm0, %v840_v32, 0.0  ;;  %v2325_v17 = vsel %vm842_vm0, %v824_v33, 0.0 }
 0x400   : > { %v2144_v54 = vpop.xlane.xlu1 %2143  ;;  %v2141_v56 = vpop.xlane.xlu0 %2140 }
 0x401   : > { %v5574_v25 = vsel %vm3517_vm14, %v5573_v23, %v5569_v18  ;;  %v2812_v28 = vmul.f32 0.020408163, %v2144_v54  ;;  %v2811_v41 = vmul.f32 0.020408163, %v2141_v56  ;;  %v825_v23 = vld [vmem:[%s9820_s11 + $0xf78] sm:$0xff] }
 0x402   : > { %v5579_v4 = vsel %vm3524_vm15, %v5578_v51, %v5574_v25  ;;  %v841_v51 = vld [vmem:[%s9820_s11 + $0xff8] sm:$0xff] }
 0x403   : > { %v11859_v6 = vsel %vm14055_vm7, %v5579_v4, %v11725_v49  ;;  %v5587_v13 = vrot.slane %v2812_v28, %v9987_v29  ;;  %v5583_v8 = vrot.slane %v2811_v41, %v9984_v27  ;;  %2368 = vadd.xlane.f32.xlu1 %v2367_v58  ;;  %2320 = vadd.xlane.f32.xlu0 %v2319_v1  ;;  %v809_v49 = vld [vmem:[%s9820_s11 + $0xef8] sm:$0xff]  ;;  %v2376_v28 = vsel %vm842_vm0, %v841_v51, 0.0 }
 0x404   : > { %v2150_v36 = vpop.xlane.xlu1 %2149  ;;  %v2147_v48 = vpop.xlane.xlu0 %2146  ;;  %v2280_v24 = vsel %vm842_vm0, %v809_v49, 0.0  ;;  %v2328_v41 = vsel %vm842_vm0, %v825_v23, 0.0  ;;  %vm14057_vm7 = vcmask 654912   ;;  %vm14058_vm0 = vcmask 786112  }
 0x405   : > { %v5588_v52 = vsel %vm3426_vm1, %v5587_v13, %v5583_v8  ;;  %v2814_v15 = vmul.f32 0.020408163, %v2150_v36  ;;  %v2813_v55 = vmul.f32 0.020408163, %v2147_v48 }
 0x407   : > { %v5597_v20 = vrot.slane %v2814_v15, %v9996_v37  ;;  %v5592_v21 = vrot.slane %v2813_v55, %v9991_v31  ;;  %2323 = vadd.xlane.f32.xlu1 %v2322_v10  ;;  %2278 = vadd.xlane.f32.xlu0 %v2277_v12 }
 0x408   : > { %v2156_v62 = vpop.xlane.xlu1 %2155  ;;  %v2153_v22 = vpop.xlane.xlu0 %2152 }
 0x409   : > { %v5593_v63 = vsel %vm3433_vm2, %v5592_v21, %v5588_v52  ;;  %v2816_v3 = vmul.f32 0.020408163, %v2156_v62  ;;  %v2815_v0 = vmul.f32 0.020408163, %v2153_v22 }
 0x40a   : > { %v5598_v35 = vsel %vm3440_vm3, %v5597_v20, %v5593_v63 }
 0x40b   : > { %v5607_v40 = vrot.slane %v2816_v3, %v10001_v42  ;;  %v5602_v45 = vrot.slane %v2815_v0, %v10008_v47  ;;  %2281 = vadd.xlane.f32.xlu1 %v2280_v24  ;;  %2371 = vadd.xlane.f32.xlu0 %v2370_v26 }
 0x40c   : > { %v2162_v43 = vpop.xlane.xlu1 %2161  ;;  %v2159_v44 = vpop.xlane.xlu0 %2158 }
 0x40d   : > { %v5603_v46 = vsel %vm3447_vm4, %v5602_v45, %v5598_v35  ;;  %v2818_v50 = vmul.f32 0.020408163, %v2162_v43  ;;  %v2817_v18 = vmul.f32 0.020408163, %v2159_v44 }
 0x40e   : > { %v5608_v54 = vsel %vm3454_vm5, %v5607_v40, %v5603_v46 }
 0x40f   : > { %v5617_v56 = vrot.slane %v2818_v50, %v10019_v60  ;;  %v5612_v58 = vrot.slane %v2817_v18, %v10022_v61  ;;  %2374 = vadd.xlane.f32.xlu1 %v2373_v5  ;;  %2326 = vadd.xlane.f32.xlu0 %v2325_v17 }
 0x410   : > { %v2168_v1 = vpop.xlane.xlu1 %2167  ;;  %v2165_v25 = vpop.xlane.xlu0 %2164 }
 0x411   : > { %v5613_v2 = vsel %vm3461_vm6, %v5612_v58, %v5608_v54  ;;  %v2820_v38 = vmul.f32 0.020408163, %v2168_v1  ;;  %v2819_v4 = vmul.f32 0.020408163, %v2165_v25 }
 0x412   : > { %v5618_v13 = vsel %vm14056_vm9, %v5617_v56, %v5613_v2  ;;  %vm14059_vm9 = vcmask 1045509  }
 0x413   : > { %v5627_v8 = vrot.slane %v2820_v38, %v10036_v14  ;;  %v5622_v36 = vrot.slane %v2819_v4, %v10042_v19  ;;  %2377 = vadd.xlane.f32.xlu1 %v2376_v28  ;;  %2329 = vadd.xlane.f32.xlu0 %v2328_v41 }
 0x414   : > { %v2174_v48 = vpop.xlane.xlu1 %2173  ;;  %v2171_v10 = vpop.xlane.xlu0 %2170 }
 0x415   : > { %v5623_v12 = vsel %vm3475_vm8, %v5622_v36, %v5618_v13  ;;  %v2822_v52 = vmul.f32 0.020408163, %v2174_v48  ;;  %v2821_v15 = vmul.f32 0.020408163, %v2171_v10 }
 0x416   : > { %v5628_v55 = vsel %vm14057_vm7, %v5627_v8, %v5623_v12  ;;  %vm14060_vm7 = vcmask 523712  }
 0x417   : > { %v5637_v49 = vrot.slane %v2822_v52, %v10052_v34  ;;  %v5632_v11 = vrot.slane %v2821_v15, %v10058_v39 }
 0x418   : > { %v2180_v20 = vpop.xlane.xlu1 %2179  ;;  %v2177_v21 = vpop.xlane.xlu0 %2176 }
 0x419   : > { %v5633_v62 = vsel %vm3489_vm10, %v5632_v11, %v5628_v55  ;;  %v2824_v22 = vmul.f32 0.020408163, %v2180_v20  ;;  %v2823_v24 = vmul.f32 0.020408163, %v2177_v21 }
 0x41a   : > { %v5638_v26 = vsel %vm14058_vm0, %v5637_v49, %v5633_v62  ;;  %vm14061_vm0 = vcmask 654912  }
 0x41b   : > { %v5647_v63 = vrot.slane %v2824_v22, %v10068_v53  ;;  %v5642_v3 = vrot.slane %v2823_v24, %v10074_v57 }
 0x41c   : > { %v2186_v0 = vpop.xlane.xlu1 %2185  ;;  %v2183_v32 = vpop.xlane.xlu0 %2182 }
 0x41d   : > { %v5643_v33 = vsel %vm3503_vm12, %v5642_v3, %v5638_v26  ;;  %v2826_v35 = vmul.f32 0.020408163, %v2186_v0  ;;  %v2825_v40 = vmul.f32 0.020408163, %v2183_v32 }
 0x41e   : > { %v5648_v45 = vsel %vm3510_vm13, %v5647_v63, %v5643_v33 }
 0x41f   : > { %v5657_v43 = vrot.slane %v2826_v35, %v10084_v7  ;;  %v5652_v44 = vrot.slane %v2825_v40, %v10089_v9 }
 0x420   : > { %v2192_v5 = vpop.xlane.xlu1 %2191  ;;  %v2189_v17 = vpop.xlane.xlu0 %2188 }
 0x421   : > { %v5653_v46 = vsel %vm3517_vm14, %v5652_v44, %v5648_v45  ;;  %v2828_v50 = vmul.f32 0.020408163, %v2192_v5  ;;  %v2827_v18 = vmul.f32 0.020408163, %v2189_v17 }
 0x422   : > { %v5658_v51 = vsel %vm3524_vm15, %v5657_v43, %v5653_v46 }
 0x423   : > { %v5666_v23 = vrot.slane %v2828_v50, %v9987_v29  ;;  %v5662_v54 = vrot.slane %v2827_v18, %v9984_v27  ;;  %v11910_v56 = vsel %vm14059_vm9, %v5658_v51, %v11792_v30  ;;  %vm14062_vm9 = vcmask 786112  }
 0x424   : > { %v2198_v58 = vpop.xlane.xlu1 %2197  ;;  %v2195_v1 = vpop.xlane.xlu0 %2194 }
 0x425   : > { %v5667_v25 = vsel %vm3426_vm1, %v5666_v23, %v5662_v54  ;;  %v2830_v28 = vmul.f32 0.020408163, %v2198_v58  ;;  %v2829_v41 = vmul.f32 0.020408163, %v2195_v1 }
 0x427   : > { %v5676_v2 = vrot.slane %v2830_v28, %v9996_v37  ;;  %v5671_v38 = vrot.slane %v2829_v41, %v9991_v31 }
 0x428   : > { %v2204_v4 = vpop.xlane.xlu1 %2203  ;;  %v2201_v13 = vpop.xlane.xlu0 %2200 }
 0x429   : > { %v5672_v8 = vsel %vm3433_vm2, %v5671_v38, %v5667_v25  ;;  %v2832_v36 = vmul.f32 0.020408163, %v2204_v4  ;;  %v2831_v48 = vmul.f32 0.020408163, %v2201_v13 }
 0x42a   : > { %v5677_v10 = vsel %vm3440_vm3, %v5676_v2, %v5672_v8 }
 0x42b   : > { %v5686_v30 = vrot.slane %v2832_v36, %v10001_v42  ;;  %v5681_v12 = vrot.slane %v2831_v48, %v10008_v47 }
 0x42c   : > { %v2210_v52 = vpop.xlane.xlu1 %2209  ;;  %v2207_v15 = vpop.xlane.xlu0 %2206 }
 0x42d   : > { %v5682_v55 = vsel %vm3447_vm4, %v5681_v12, %v5677_v10  ;;  %v2834_v49 = vmul.f32 0.020408163, %v2210_v52  ;;  %v2833_v11 = vmul.f32 0.020408163, %v2207_v15 }
 0x42e   : > { %v5687_v20 = vsel %vm3454_vm5, %v5686_v30, %v5682_v55 }
 0x42f   : > { %v5696_v21 = vrot.slane %v2834_v49, %v10019_v60  ;;  %v5691_v62 = vrot.slane %v2833_v11, %v10022_v61 }
 0x430   : > { %v2216_v22 = vpop.xlane.xlu1 %2215  ;;  %v2213_v24 = vpop.xlane.xlu0 %2212 }
 0x431   : > { %v5692_v26 = vsel %vm3461_vm6, %v5691_v62, %v5687_v20  ;;  %v2836_v63 = vmul.f32 0.020408163, %v2216_v22  ;;  %v2835_v3 = vmul.f32 0.020408163, %v2213_v24 }
 0x432   : > { %v5697_v0 = vsel %vm14060_vm7, %v5696_v21, %v5692_v26  ;;  %vm14063_vm7 = vcmask 1046534  }
 0x433   : > { %v5706_v32 = vrot.slane %v2836_v63, %v10036_v14  ;;  %v5701_v33 = vrot.slane %v2835_v3, %v10042_v19 }
 0x434   : > { %v2222_v35 = vpop.xlane.xlu1 %2221  ;;  %v2219_v40 = vpop.xlane.xlu0 %2218 }
 0x435   : > { %v5702_v45 = vsel %vm3475_vm8, %v5701_v33, %v5697_v0  ;;  %v2838_v43 = vmul.f32 0.020408163, %v2222_v35  ;;  %v2837_v44 = vmul.f32 0.020408163, %v2219_v40 }
 0x436   : > { %v5707_v5 = vsel %vm14061_vm0, %v5706_v32, %v5702_v45 }
 0x437   : > { %v5716_v17 = vrot.slane %v2838_v43, %v10052_v34  ;;  %v5711_v46 = vrot.slane %v2837_v44, %v10058_v39 }
 0x438   : > { %v2228_v50 = vpop.xlane.xlu1 %2227  ;;  %v2225_v18 = vpop.xlane.xlu0 %2224 }
 0x439   : > { %v5712_v51 = vsel %vm3489_vm10, %v5711_v46, %v5707_v5  ;;  %v2840_v23 = vmul.f32 0.020408163, %v2228_v50  ;;  %v2839_v54 = vmul.f32 0.020408163, %v2225_v18 }
 0x43a   : > { %v5717_v58 = vsel %vm14062_vm9, %v5716_v17, %v5712_v51 }
 0x43b   : > { %v5726_v1 = vrot.slane %v2840_v23, %v10068_v53  ;;  %v5721_v25 = vrot.slane %v2839_v54, %v10074_v57 }
 0x43c   : > { %v2234_v28 = vpop.xlane.xlu1 %2233  ;;  %v2231_v41 = vpop.xlane.xlu0 %2230 }
 0x43d   : > { %v5722_v2 = vsel %vm3503_vm12, %v5721_v25, %v5717_v58  ;;  %v2842_v38 = vmul.f32 0.020408163, %v2234_v28  ;;  %v2841_v4 = vmul.f32 0.020408163, %v2231_v41 }
 0x43e   : > { %v5727_v13 = vsel %vm3510_vm13, %v5726_v1, %v5722_v2 }
 0x43f   : > { %v5736_v8 = vrot.slane %v2842_v38, %v10084_v7  ;;  %v5731_v36 = vrot.slane %v2841_v4, %v10089_v9 }
 0x440   : > { %v2240_v48 = vpop.xlane.xlu1 %2239  ;;  %v2237_v10 = vpop.xlane.xlu0 %2236 }
 0x441   : > { %v5732_v30 = vsel %vm3517_vm14, %v5731_v36, %v5727_v13  ;;  %v2844_v12 = vmul.f32 0.020408163, %v2240_v48  ;;  %v2843_v52 = vmul.f32 0.020408163, %v2237_v10 }
 0x442   : > { %v5737_v15 = vsel %vm3524_vm15, %v5736_v8, %v5732_v30 }
 0x443   : > { %v5745_v55 = vrot.slane %v2844_v12, %v9987_v29  ;;  %v5741_v49 = vrot.slane %v2843_v52, %v9984_v27  ;;  %v11945_v11 = vsel %vm14063_vm7, %v5737_v15, %v11859_v6 }
 0x444   : > { %v2285_v20 = vpop.xlane.xlu1 %2284  ;;  %v2243_v21 = vpop.xlane.xlu0 %2242 }
 0x445   : > { %v5746_v62 = vsel %vm3426_vm1, %v5745_v55, %v5741_v49  ;;  %v2845_v22 = vmul.f32 0.020408163, %v2243_v21  ;;  %v2859_v24 = vmul.f32 0.020408163, %v2285_v20 }
 0x447   : > { %v5750_v26 = vrot.slane %v2845_v22, %v9991_v31  ;;  %v5820_v33 = vrot.slane %v2859_v24, %v9984_v27 }
 0x448   : > { %v2333_v63 = vpop.xlane.xlu1 %2332  ;;  %v2288_v3 = vpop.xlane.xlu0 %2287 }
 0x449   : > { %v5751_v0 = vsel %vm3433_vm2, %v5750_v26, %v5746_v62  ;;  %v2860_v32 = vmul.f32 0.020408163, %v2288_v3  ;;  %v2875_v35 = vmul.f32 0.020408163, %v2333_v63 }
 0x44b   : > { %v5824_v40 = vrot.slane %v2860_v32, %v9987_v29  ;;  %v5899_v17 = vrot.slane %v2875_v35, %v9984_v27 }
 0x44c   : > { %v2246_v6 = vpop.xlane.xlu1 %2245  ;;  %v2336_v45 = vpop.xlane.xlu0 %2335 }
 0x44d   : > { %v5825_v43 = vsel %vm3426_vm1, %v5824_v40, %v5820_v33  ;;  %v2846_v44 = vmul.f32 0.020408163, %v2246_v6  ;;  %v2876_v5 = vmul.f32 0.020408163, %v2336_v45 }
 0x44f   : > { %v5755_v46 = vrot.slane %v2846_v44, %v9996_v37  ;;  %v5903_v50 = vrot.slane %v2876_v5, %v9987_v29 }
 0x450   : > { %v2339_v18 = vpop.xlane.xlu1 %2338  ;;  %v2291_v51 = vpop.xlane.xlu0 %2290 }
 0x451   : > { %v5756_v23 = vsel %vm3440_vm3, %v5755_v46, %v5751_v0  ;;  %v5904_v54 = vsel %vm3426_vm1, %v5903_v50, %v5899_v17  ;;  %v2877_v21 = vmul.f32 0.020408163, %v2339_v18  ;;  %v2861_v62 = vmul.f32 0.020408163, %v2291_v51 }
 0x452   : > { %vm14064_vm1 = vcmask 523712  }
 0x453   : > { %v5908_v0 = vrot.slane %v2877_v21, %v9991_v31  ;;  %v5829_v32 = vrot.slane %v2861_v62, %v9991_v31 }
 0x454   : > { %v2294_v58 = vpop.xlane.xlu1 %2293  ;;  %v2249_v1 = vpop.xlane.xlu0 %2248 }
 0x455   : > { %v2862_v22 = vmul.f32 0.020408163, %v2294_v58  ;;  %v2847_v24 = vmul.f32 0.020408163, %v2249_v1  ;;  %v5909_v51 = vsel %vm3433_vm2, %v5908_v0, %v5904_v54  ;;  %v5830_v58 = vsel %vm3433_vm2, %v5829_v32, %v5825_v43  ;;  %vm14065_vm2 = vmmov %vm14064_vm1 }
 0x457   : > { %v5834_v35 = vrot.slane %v2862_v22, %v9996_v37  ;;  %v5760_v40 = vrot.slane %v2847_v24, %v10008_v47 }
 0x458   : > { %v2252_v25 = vpop.xlane.xlu1 %2251  ;;  %v2342_v28 = vpop.xlane.xlu0 %2341 }
 0x459   : > { %v2848_v3 = vmul.f32 0.020408163, %v2252_v25  ;;  %v2878_v33 = vmul.f32 0.020408163, %v2342_v28  ;;  %v5835_v25 = vsel %vm3440_vm3, %v5834_v35, %v5830_v58  ;;  %v5761_v28 = vsel %vm3447_vm4, %v5760_v40, %v5756_v23 }
 0x45b   : > { %v5765_v46 = vrot.slane %v2848_v3, %v10001_v42  ;;  %v5913_v31 = vrot.slane %v2878_v33, %v9996_v37 }
 0x45c   : > { %v2345_v41 = vpop.xlane.xlu1 %2344  ;;  %v2297_v2 = vpop.xlane.xlu0 %2296 }
 0x45d   : > { %v2879_v6 = vmul.f32 0.020408163, %v2345_v41  ;;  %v2863_v45 = vmul.f32 0.020408163, %v2297_v2  ;;  %v5766_v43 = vsel %vm3454_vm5, %v5765_v46, %v5761_v28  ;;  %v5914_v23 = vsel %vm3440_vm3, %v5913_v31, %v5909_v51  ;;  %vm14066_vm3 = vmmov %vm14061_vm0 }
 0x45e   : > { %v12007_v28 = vadd.s32 8, %v9972_v16 }
 0x45f   : > { %v5918_v41 = vrot.slane %v2879_v6, %v10008_v47  ;;  %v5839_v2 = vrot.slane %v2863_v45, %v10008_v47 }
 0x460   : > { %v2300_v38 = vpop.xlane.xlu1 %2299  ;;  %v2255_v4 = vpop.xlane.xlu0 %2254 }
 0x461   : > { %v2864_v44 = vmul.f32 0.020408163, %v2300_v38  ;;  %v2849_v50 = vmul.f32 0.020408163, %v2255_v4  ;;  %v5919_v0 = vsel %vm3447_vm4, %v5918_v41, %v5914_v23 }
 0x463   : > { %v5844_v38 = vrot.slane %v2864_v44, %v10001_v42  ;;  %v5770_v37 = vrot.slane %v2849_v50, %v10022_v61 }
 0x464   : > { %v2258_v13 = vpop.xlane.xlu1 %2257  ;;  %v2348_v27 = vpop.xlane.xlu0 %2347 }
 0x465   : > { %v2880_v18 = vmul.f32 0.020408163, %v2348_v27  ;;  %v2850_v21 = vmul.f32 0.020408163, %v2258_v13  ;;  %v5840_v13 = vsel %vm3447_vm4, %v5839_v2, %v5835_v25  ;;  %v5771_v6 = vsel %vm3461_vm6, %v5770_v37, %v5766_v43  ;;  %vm14067_vm4 = vmmov %vm14064_vm1 }
 0x466   : > { %v5845_v32 = vsel %vm3454_vm5, %v5844_v38, %v5840_v13 }
 0x467   : > { %v5775_v33 = vrot.slane %v2850_v21, %v10019_v60 }
 0x468   : > { %v2351_v8 = vpop.xlane.xlu1 %2350  ;;  %v2303_v36 = vpop.xlane.xlu0 %2302 }
 0x469   : > { %v2865_v1 = vmul.f32 0.020408163, %v2303_v36  ;;  %v2881_v4 = vmul.f32 0.020408163, %v2351_v8  ;;  %v5923_v36 = vrot.slane %v2880_v18, %v10001_v42  ;;  %v5776_v58 = vsel %vm14064_vm1, %v5775_v33, %v5771_v6 }
 0x46b   : > { %v5849_v24 = vrot.slane %v2865_v1, %v10022_v61  ;;  %v5928_v35 = vrot.slane %v2881_v4, %v10022_v61 }
 0x46c   : > { %v2306_v48 = vpop.xlane.xlu1 %2305  ;;  %v2261_v29 = vpop.xlane.xlu0 %2260 }
 0x46d   : > { %v2866_v27 = vmul.f32 0.020408163, %v2306_v48  ;;  %v2851_v22 = vmul.f32 0.020408163, %v2261_v29 }
 0x46f   : > { %v5854_v42 = vrot.slane %v2866_v27, %v10019_v60 }
 0x470   : > { %v2264_v10 = vpop.xlane.xlu1 %2263  ;;  %v2354_v30 = vpop.xlane.xlu0 %2353 }
 0x471   : > { %v2852_v3 = vmul.f32 0.020408163, %v2264_v10  ;;  %v2882_v47 = vmul.f32 0.020408163, %v2354_v30  ;;  %v5924_v10 = vsel %vm3454_vm5, %v5923_v36, %v5919_v0  ;;  %v5780_v30 = vrot.slane %v2851_v22, %v10042_v19  ;;  %vm14068_vm5 = vmmov %vm14062_vm9 }
 0x472   : > { %v5929_v31 = vsel %vm3461_vm6, %v5928_v35, %v5924_v10  ;;  %vm14070_vm9 = vmmov %vm14061_vm0 }
 0x473   : > { %v5933_v44 = vrot.slane %v2882_v47, %v10019_v60  ;;  %v5781_v60 = vsel %vm3475_vm8, %v5780_v30, %v5776_v58 }
 0x474   : > { %v2357_v12 = vpop.xlane.xlu1 %2356  ;;  %v11958_v52 = vpop.xlane.xlu0 %2308 }
 0x475   : > { %v2883_v8 = vmul.f32 0.020408163, %v2357_v12  ;;  %v5850_v12 = vsel %vm3461_vm6, %v5849_v24, %v5845_v32  ;;  %v2867_v50 = vmul.f32 0.020408163, %v11958_v52  ;;  %v5934_v38 = vsel %vm14067_vm4, %v5933_v44, %v5929_v31  ;;  %vm14069_vm6 = vmmov %vm14063_vm7 }
 0x476   : > { %vm14072_vm7 = vmmov %vm14068_vm5 }
 0x477   : > { %v5938_v61 = vrot.slane %v2883_v8, %v10042_v19  ;;  %v5859_v16 = vrot.slane %v2867_v50, %v10042_v19 }
 0x478   : > { %v11960_v15 = vpop.xlane.xlu1 %2311  ;;  %v2267_v55 = vpop.xlane.xlu0 %2266 }
 0x479   : > { %v2853_v48 = vmul.f32 0.020408163, %v2267_v55  ;;  %v5785_v55 = vrot.slane %v2852_v3, %v10036_v14  ;;  %v5939_v27 = vsel %vm3475_vm8, %v5938_v61, %v5934_v38 }
 0x47b   : > { %v5790_v18 = vrot.slane %v2853_v48, %v10058_v39  ;;  %v5786_v2 = vsel %vm14066_vm3, %v5785_v55, %v5781_v60 }
 0x47c   : > { %v2270_v49 = vpop.xlane.xlu1 %2269  ;;  %v11962_v20 = vpop.xlane.xlu0 %2359 }
 0x47d   : > { %v2854_v45 = vmul.f32 0.020408163, %v2270_v49  ;;  %v5855_v49 = vsel %vm14065_vm2, %v5854_v42, %v5850_v12  ;;  %v2884_v21 = vmul.f32 0.020408163, %v11962_v20 }
 0x47f   : > { %v5795_v52 = vrot.slane %v2854_v45, %v10052_v34  ;;  %v5943_v0 = vrot.slane %v2884_v21, %v10036_v14  ;;  %v5860_v45 = vsel %vm3475_vm8, %v5859_v16, %v5855_v49  ;;  %vm14071_vm8 = vmmov %vm14068_vm5 }
 0x480   : > { %v11964_v26 = vpop.xlane.xlu1 %2362  ;;  %v11966_v63 = vpop.xlane.xlu0 %2314 }
 0x481   : > { %v2869_v37 = vmul.f32 0.020408163, %v11966_v63 }
 0x483   : > { %v5869_v35 = vrot.slane %v2869_v37, %v10058_v39 }
 0x484   : > { %v11972_v5 = vpop.xlane.xlu1 %2317  ;;  %v2273_v17 = vpop.xlane.xlu0 %2272 }
 0x485   : > { %v2855_v46 = vmul.f32 0.020408163, %v2273_v17  ;;  %v2868_v17 = vmul.f32 0.020408163, %v11960_v15  ;;  %v2885_v15 = vmul.f32 0.020408163, %v11964_v26 }
 0x486   : > { %v2870_v36 = vmul.f32 0.020408163, %v11972_v5 }
 0x487   : > { %v5800_v4 = vrot.slane %v2855_v46, %v10074_v57  ;;  %v5864_v24 = vrot.slane %v2868_v17, %v10036_v14  ;;  %v5948_v33 = vrot.slane %v2885_v15, %v10058_v39  ;;  %v5944_v46 = vsel %vm14070_vm9, %v5943_v0, %v5939_v27 }
 0x488   : > { %v2276_v62 = vpop.xlane.xlu1 %2275  ;;  %v2366_v54 = vpop.xlane.xlu0 %2365  ;;  %v5874_v42 = vrot.slane %v2870_v36, %v10052_v34 }
 0x489   : > { %v2856_v51 = vmul.f32 0.020408163, %v2276_v62  ;;  %v5791_v62 = vsel %vm3489_vm10, %v5790_v18, %v5786_v2  ;;  %v2886_v47 = vmul.f32 0.020408163, %v2366_v54  ;;  %v5865_v44 = vsel %vm14061_vm0, %v5864_v24, %v5860_v45 }
 0x48a   : > { %v5796_v3 = vsel %vm14068_vm5, %v5795_v52, %v5791_v62  ;;  %v5949_v50 = vsel %vm3489_vm10, %v5948_v33, %v5944_v46  ;;  %v5870_v18 = vsel %vm3489_vm10, %v5869_v35, %v5865_v44  ;;  %vm2898_vm10 = vcmp.lt.s32.totalorder %v12007_v28, %v2896_v59 }
 0x48b   : > { %v5805_v43 = vrot.slane %v2856_v51, %v10068_v53  ;;  %v5801_v13 = vsel %vm3503_vm12, %v5800_v4, %v5796_v3  ;;  %v5953_v10 = vrot.slane %v2886_v47, %v10052_v34 }
 0x48c   : > { %v2369_v29 = vpop.xlane.xlu1 %2368  ;;  %v2321_v40 = vpop.xlane.xlu0 %2320 }
 0x48d   : > { %v2887_v8 = vmul.f32 0.020408163, %v2369_v29  ;;  %v2871_v26 = vmul.f32 0.020408163, %v2321_v40  ;;  %v5806_v63 = vsel %vm3510_vm13, %v5805_v43, %v5801_v13  ;;  %v5954_v49 = vsel %vm14072_vm7, %v5953_v10, %v5949_v50 }
 0x48f   : > { %v5958_v12 = vrot.slane %v2887_v8, %v10074_v57  ;;  %v5879_v55 = vrot.slane %v2871_v26, %v10074_v57 }
 0x490   : > { %v2324_v1 = vpop.xlane.xlu1 %2323  ;;  %v2279_v25 = vpop.xlane.xlu0 %2278 }
 0x491   : > { %v2857_v41 = vmul.f32 0.020408163, %v2279_v25  ;;  %v2872_v48 = vmul.f32 0.020408163, %v2324_v1 }
 0x493   : > { %v5810_v22 = vrot.slane %v2857_v41, %v10089_v9  ;;  %v5884_v61 = vrot.slane %v2872_v48, %v10068_v53 }
 0x494   : > { %v2282_v23 = vpop.xlane.xlu1 %2281  ;;  %v2372_v20 = vpop.xlane.xlu0 %2371 }
 0x495   : > { %v2858_v19 = vmul.f32 0.020408163, %v2282_v23  ;;  %v2888_v32 = vmul.f32 0.020408163, %v2372_v20  ;;  %v5811_v54 = vsel %vm3517_vm14, %v5810_v22, %v5806_v63 }
 0x497   : > { %v5815_v5 = vrot.slane %v2858_v19, %v10084_v7  ;;  %v5963_v34 = vrot.slane %v2888_v32, %v10068_v53  ;;  %v5959_v53 = vsel %vm3503_vm12, %v5958_v12, %v5954_v49 }
 0x498   : > { %v2375_v6 = vpop.xlane.xlu1 %2374  ;;  %v2327_v14 = vpop.xlane.xlu0 %2326 }
 0x499   : > { %v5816_v29 = vsel %vm3524_vm15, %v5815_v5, %v5811_v54  ;;  %v2889_v40 = vmul.f32 0.020408163, %v2375_v6  ;;  %v2873_v30 = vmul.f32 0.020408163, %v2327_v14  ;;  %v5964_v52 = vsel %vm3510_vm13, %v5963_v34, %v5959_v53 }
 0x49a   : > { %v6008_v39 = vsel %vm14069_vm6, %v5816_v29, %v11910_v56  ;;  %v5875_v56 = vsel %vm14071_vm8, %v5874_v42, %v5870_v18 }
 0x49b   : > { %v5968_v51 = vrot.slane %v2889_v40, %v10089_v9  ;;  %v5889_v57 = vrot.slane %v2873_v30, %v10089_v9  ;;  %v5880_v60 = vsel %vm3503_vm12, %v5879_v55, %v5875_v56 }
 0x49c   : > { %v2378_v58 = vpop.xlane.xlu1 %2377  ;;  %v2330_v31 = vpop.xlane.xlu0 %2329  ;;  %v5885_v17 = vsel %vm3510_vm13, %v5884_v61, %v5880_v60 }
 0x49d   : > { %v2890_v1 = vmul.f32 0.020408163, %v2378_v58  ;;  %v2874_v25 = vmul.f32 0.020408163, %v2330_v31  ;;  %v5969_v2 = vsel %vm3517_vm14, %v5968_v51, %v5964_v52  ;;  %v5890_v38 = vsel %vm3517_vm14, %v5889_v57, %v5885_v17 }
 0x49f   : > { %v5973_v9 = vrot.slane %v2890_v1, %v10084_v7  ;;  %v5894_v41 = vrot.slane %v2874_v25, %v10084_v7 }
 0x4a1   : > { %v5974_v21 = vsel %vm3524_vm15, %v5973_v9, %v5969_v2  ;;  %v5895_v4 = vsel %vm3524_vm15, %v5894_v41, %v5890_v38 }
 0x4a2   : > { %v6009_v27 = vsel %vm5987_vm11, %v5974_v21, %v6008_v39  ;;  %v6002_v16 = vsel %vm5987_vm11, %v5895_v4, %v11945_v11 }
 0x4a3   : > { %v6017_v62 = vsel %vm2898_vm10, %v6009_v27, 0.0  ;;  %v6016_v43 = vsel %vm2898_vm10, %v6002_v16, 0.0 }
 0x4a4   : > { %6026 = vst [vmem:[%s11063_s20 + $0x18] sm:$0xff] %v6017_v62  ;;  %6025 = vst [vmem:[%s11063_s20 + $0x10] sm:$0xff] %v6016_v43 }
 0x4a5 PF: > { %p9535_p8 = scmp.lt.s32.totalorder %s9806_s25, 1 }
 0x4a6   : > { %s9537_s21 = sshll.u32 (!%p9535_p8), %s9812_s26, 3 }
 0x4a7   : > { %6030 = sbr.rel (%p9535_p8) target bundleno = 1852 (0x73c), region = 48  ;;  %s13156_s22 = ssub.s32 (!%p9535_p8), 8, %s9537_s21 }
 0x4a8   : > { %s8898_s23 = sshra.s32 (!%p9535_p8), %s9537_s21, 3 }
 0x4a9   : > { %s9552_s26 = sshll.u32 (!%p9535_p8), %s8898_s23, 4 }
 0x4aa   : > { %s8902_s27 = scalar_lea.vmem (!%p9535_p8), [#allocation3], %s9552_s26 }
 0x4ac   : > { %v6034_v7 = vld [vmem:[%s9825_s15 + $0x10] sm:$0xff]  ;;  %vm6288_vm12 = vcmask 400384   ;;  %v6032_v59 = vld [vmem:[%s9825_s15] sm:$0xff]  ;;  %v6035_v11 = vld [vmem:[%s9825_s15 + $0x18] sm:$0xff]  ;;  %vm7588_vm13 = vcmask 130112   ;;  %vm7595_vm14 = vcmask 195712  }
 0x4ad   : > { %v6295_v28 = vsel %vm6288_vm12, %v6034_v7, 0.0  ;;  %v6289_v15 = vsel %vm6288_vm12, %v6032_v59, 0.0  ;;  %v6033_v37 = vld [vmem:[%s9825_s15 + $0x8] sm:$0xff]  ;;  %v6298_v36 = vsel %vm6288_vm12, %v6035_v11, 0.0  ;;  %v6036_v20 = vld [vmem:[%s9825_s15 + $0x20] sm:$0xff]  ;;  %v6039_v47 = vld [vmem:[%s9825_s15 + $0x38] sm:$0xff] }
 0x4ae   : > { %6296 = vadd.xlane.f32.xlu1 %v6295_v28  ;;  %6290 = vadd.xlane.f32.xlu0 %v6289_v15  ;;  %v6292_v22 = vsel %vm6288_vm12, %v6033_v37, 0.0  ;;  %v6037_v23 = vld [vmem:[%s9825_s15 + $0x28] sm:$0xff]  ;;  %v6301_v3 = vsel %vm6288_vm12, %v6036_v20, 0.0  ;;  %v6038_v19 = vld [vmem:[%s9825_s15 + $0x30] sm:$0xff]  ;;  %v6310_v0 = vsel %vm6288_vm12, %v6039_v47, 0.0  ;;  %v6040_v26 = vld [vmem:[%s9825_s15 + $0x40] sm:$0xff] }
 0x4af   : > { %v6304_v24 = vsel %vm6288_vm12, %v6037_v23, 0.0  ;;  %v6307_v13 = vsel %vm6288_vm12, %v6038_v19, 0.0  ;;  %v6041_v8 = vld [vmem:[%s9825_s15 + $0x48] sm:$0xff]  ;;  %v6313_v48 = vsel %vm6288_vm12, %v6040_v26, 0.0  ;;  %v6043_v5 = vld [vmem:[%s9825_s15 + $0x58] sm:$0xff]  ;;  %v6042_v32 = vld [vmem:[%s9825_s15 + $0x50] sm:$0xff] }
 0x4b0   : > { %v6316_v63 = vsel %vm6288_vm12, %v6041_v8, 0.0  ;;  %v6322_v33 = vsel %vm6288_vm12, %v6043_v5, 0.0  ;;  %v6319_v35 = vsel %vm6288_vm12, %v6042_v32, 0.0  ;;  %v6045_v42 = vld [vmem:[%s9825_s15 + $0x68] sm:$0xff]  ;;  %v6044_v54 = vld [vmem:[%s9825_s15 + $0x60] sm:$0xff]  ;;  %v6047_v10 = vld [vmem:[%s9825_s15 + $0x78] sm:$0xff] }
 0x4b1   : > { %v6328_v6 = vsel %vm6288_vm12, %v6045_v42, 0.0  ;;  %v6325_v14 = vsel %vm6288_vm12, %v6044_v54, 0.0  ;;  %v6046_v29 = vld [vmem:[%s9825_s15 + $0x70] sm:$0xff]  ;;  %v6334_v40 = vsel %vm6288_vm12, %v6047_v10, 0.0  ;;  %v6049_v45 = vld [vmem:[%s9825_s15 + $0x88] sm:$0xff]  ;;  %v6048_v12 = vld [vmem:[%s9825_s15 + $0x80] sm:$0xff] }
 0x4b2   : > { %6299 = vadd.xlane.f32.xlu1 %v6298_v36  ;;  %6293 = vadd.xlane.f32.xlu0 %v6292_v22  ;;  %v6331_v30 = vsel %vm6288_vm12, %v6046_v29, 0.0  ;;  %v6340_v55 = vsel %vm6288_vm12, %v6049_v45, 0.0  ;;  %v6337_v39 = vsel %vm6288_vm12, %v6048_v12, 0.0  ;;  %v6051_v44 = vld [vmem:[%s9825_s15 + $0x98] sm:$0xff]  ;;  %v6050_v46 = vld [vmem:[%s9825_s15 + $0x90] sm:$0xff]  ;;  %v6053_v50 = vld [vmem:[%s9825_s15 + $0xa8] sm:$0xff] }
 0x4b3   : > { %v6346_v61 = vsel %vm6288_vm12, %v6051_v44, 0.0  ;;  %v6343_v34 = vsel %vm6288_vm12, %v6050_v46, 0.0  ;;  %v6052_v18 = vld [vmem:[%s9825_s15 + $0xa0] sm:$0xff]  ;;  %v6352_v51 = vsel %vm6288_vm12, %v6053_v50, 0.0  ;;  %v6055_v58 = vld [vmem:[%s9825_s15 + $0xb8] sm:$0xff]  ;;  %v6054_v31 = vld [vmem:[%s9825_s15 + $0xb0] sm:$0xff] }
 0x4b4   : > { %v6349_v57 = vsel %vm6288_vm12, %v6052_v18, 0.0  ;;  %v6358_v56 = vsel %vm6288_vm12, %v6055_v58, 0.0  ;;  %v6355_v49 = vsel %vm6288_vm12, %v6054_v31, 0.0  ;;  %v6057_v1 = vld [vmem:[%s9825_s15 + $0xc8] sm:$0xff]  ;;  %v6056_v25 = vld [vmem:[%s9825_s15 + $0xc0] sm:$0xff]  ;;  %v6059_v17 = vld [vmem:[%s9825_s15 + $0xd8] sm:$0xff] }
 0x4b5   : > { %v6364_v53 = vsel %vm6288_vm12, %v6057_v1, 0.0  ;;  %v6361_v60 = vsel %vm6288_vm12, %v6056_v25, 0.0  ;;  %v6058_v52 = vld [vmem:[%s9825_s15 + $0xd0] sm:$0xff]  ;;  %v6370_v9 = vsel %vm6288_vm12, %v6059_v17, 0.0  ;;  %v6061_v2 = vld [vmem:[%s9825_s15 + $0xe8] sm:$0xff]  ;;  %v6060_v38 = vld [vmem:[%s9825_s15 + $0xe0] sm:$0xff] }
 0x4b6   : > { %6305 = vadd.xlane.f32.xlu1 %v6304_v24  ;;  %6302 = vadd.xlane.f32.xlu0 %v6301_v3  ;;  %v6367_v41 = vsel %vm6288_vm12, %v6058_v52, 0.0  ;;  %v6376_v21 = vsel %vm6288_vm12, %v6061_v2, 0.0  ;;  %v6373_v4 = vsel %vm6288_vm12, %v6060_v38, 0.0  ;;  %v6063_v27 = vld [vmem:[%s9825_s15 + $0xf8] sm:$0xff]  ;;  %v6062_v16 = vld [vmem:[%s9825_s15 + $0xf0] sm:$0xff]  ;;  %v6065_v7 = vld [vmem:[%s9825_s15 + $0x108] sm:$0xff] }
 0x4b7   : > { %v6382_v62 = vsel %vm6288_vm12, %v6063_v27, 0.0  ;;  %v6379_v43 = vsel %vm6288_vm12, %v6062_v16, 0.0  ;;  %v6064_v59 = vld [vmem:[%s9825_s15 + $0x100] sm:$0xff]  ;;  %v6388_v11 = vsel %vm6288_vm12, %v6065_v7, 0.0  ;;  %v6067_v15 = vld [vmem:[%s9825_s15 + $0x118] sm:$0xff]  ;;  %v6066_v37 = vld [vmem:[%s9825_s15 + $0x110] sm:$0xff] }
 0x4b8   : > { %v6385_v28 = vsel %vm6288_vm12, %v6064_v59, 0.0  ;;  %v6394_v36 = vsel %vm6288_vm12, %v6067_v15, 0.0  ;;  %v6391_v22 = vsel %vm6288_vm12, %v6066_v37, 0.0  ;;  %v6069_v23 = vld [vmem:[%s9825_s15 + $0x128] sm:$0xff]  ;;  %v6068_v20 = vld [vmem:[%s9825_s15 + $0x120] sm:$0xff]  ;;  %v6071_v47 = vld [vmem:[%s9825_s15 + $0x138] sm:$0xff] }
 0x4b9   : > { %v6400_v24 = vsel %vm6288_vm12, %v6069_v23, 0.0  ;;  %v6397_v3 = vsel %vm6288_vm12, %v6068_v20, 0.0  ;;  %v6070_v19 = vld [vmem:[%s9825_s15 + $0x130] sm:$0xff]  ;;  %v6073_v8 = vld [vmem:[%s9825_s15 + $0x148] sm:$0xff]  ;;  %v6072_v26 = vld [vmem:[%s9825_s15 + $0x140] sm:$0xff]  ;;  %v7313_v23 = vlaneseq  ;;  %vm7602_vm15 = vcmask 261312  }
 0x4ba   : > { %6311 = vadd.xlane.f32.xlu1 %v6310_v0  ;;  %6308 = vadd.xlane.f32.xlu0 %v6307_v13  ;;  %v6406_v0 = vsel %vm6288_vm12, %v6071_v47, 0.0  ;;  %v6403_v13 = vsel %vm6288_vm12, %v6070_v19, 0.0  ;;  %v6075_v5 = vld [vmem:[%s9825_s15 + $0x158] sm:$0xff]  ;;  %v6074_v32 = vld [vmem:[%s9825_s15 + $0x150] sm:$0xff]  ;;  %v6077_v42 = vld [vmem:[%s9825_s15 + $0x168] sm:$0xff]  ;;  %vm7609_vm11 = vcmask 326912  }
 0x4bb   : > { %v6076_v54 = vld [vmem:[%s9825_s15 + $0x160] sm:$0xff]  ;;  %v6079_v10 = vld [vmem:[%s9825_s15 + $0x178] sm:$0xff]  ;;  %v6078_v29 = vld [vmem:[%s9825_s15 + $0x170] sm:$0xff]  ;;  %v12210_v19 = vand.u32 127, %v7313_v23  ;;  %vm7616_vm1 = vcmask 392512   ;;  %vm7623_vm2 = vcmask 458112  }
 0x4bc   : > { %v6081_v45 = vld [vmem:[%s9825_s15 + $0x188] sm:$0xff]  ;;  %v6080_v12 = vld [vmem:[%s9825_s15 + $0x180] sm:$0xff]  ;;  %v6083_v44 = vld [vmem:[%s9825_s15 + $0x198] sm:$0xff]  ;;  %vm7630_vm3 = vcmask 523712   ;;  %vm7637_vm4 = vcmask 589312   ;;  %vm13977_vm5 = vcmask 654912  }
 0x4bd   : > { %v6082_v46 = vld [vmem:[%s9825_s15 + $0x190] sm:$0xff]  ;;  %v6085_v50 = vld [vmem:[%s9825_s15 + $0x1a8] sm:$0xff]  ;;  %v6084_v18 = vld [vmem:[%s9825_s15 + $0x1a0] sm:$0xff]  ;;  %vm7651_vm6 = vcmask 720512   ;;  %vm13976_vm0 = vcmask 786112   ;;  %vm7665_vm9 = vcmask 851712  }
 0x4be   : > { %6317 = vadd.xlane.f32.xlu1 %v6316_v63  ;;  %6314 = vadd.xlane.f32.xlu0 %v6313_v48  ;;  %v6412_v63 = vsel %vm6288_vm12, %v6073_v8, 0.0  ;;  %v6409_v48 = vsel %vm6288_vm12, %v6072_v26, 0.0  ;;  %v6087_v58 = vld [vmem:[%s9825_s15 + $0x1b8] sm:$0xff]  ;;  %v6086_v31 = vld [vmem:[%s9825_s15 + $0x1b0] sm:$0xff]  ;;  %v6089_v1 = vld [vmem:[%s9825_s15 + $0x1c8] sm:$0xff]  ;;  %v12214_v8 = vshrl.u32 %v7313_v23, 7 }
 0x4bf   : > { %v6088_v25 = vld [vmem:[%s9825_s15 + $0x1c0] sm:$0xff]  ;;  %v6091_v17 = vld [vmem:[%s9825_s15 + $0x1d8] sm:$0xff]  ;;  %v6090_v52 = vld [vmem:[%s9825_s15 + $0x1d0] sm:$0xff]  ;;  %v7583_v26 = vadd.s32 4294967288, %v12210_v19  ;;  %vm7672_vm8 = vcmask 917312   ;;  %vm7679_vm7 = vcmask 982912  }
 0x4c0   : > { %v6093_v2 = vld [vmem:[%s9825_s15 + $0x1e8] sm:$0xff]  ;;  %v6092_v38 = vld [vmem:[%s9825_s15 + $0x1e0] sm:$0xff]  ;;  %v6095_v27 = vld [vmem:[%s9825_s15 + $0x1f8] sm:$0xff]  ;;  %vm7686_vm10 = vcmask 1048512  }
 0x4c1   : > { %v6094_v16 = vld [vmem:[%s9825_s15 + $0x1f0] sm:$0xff]  ;;  %v6097_v7 = vld [vmem:[%s9825_s15 + $0x208] sm:$0xff]  ;;  %v6096_v59 = vld [vmem:[%s9825_s15 + $0x200] sm:$0xff] }
 0x4c2   : > { %6323 = vadd.xlane.f32.xlu1 %v6322_v33  ;;  %6320 = vadd.xlane.f32.xlu0 %v6319_v35  ;;  %v6418_v33 = vsel %vm6288_vm12, %v6075_v5, 0.0  ;;  %v6415_v35 = vsel %vm6288_vm12, %v6074_v32, 0.0  ;;  %v6099_v15 = vld [vmem:[%s9825_s15 + $0x218] sm:$0xff]  ;;  %v6098_v37 = vld [vmem:[%s9825_s15 + $0x210] sm:$0xff]  ;;  %v6101_v20 = vld [vmem:[%s9825_s15 + $0x228] sm:$0xff] }
 0x4c6   : > { %6329 = vadd.xlane.f32.xlu1 %v6328_v6  ;;  %6326 = vadd.xlane.f32.xlu0 %v6325_v14  ;;  %v6424_v6 = vsel %vm6288_vm12, %v6077_v42, 0.0  ;;  %v6421_v14 = vsel %vm6288_vm12, %v6076_v54, 0.0  ;;  %v6105_v42 = vld [vmem:[%s9825_s15 + $0x248] sm:$0xff]  ;;  %v6104_v54 = vld [vmem:[%s9825_s15 + $0x240] sm:$0xff] }
 0x4ca   : > { %6335 = vadd.xlane.f32.xlu1 %v6334_v40  ;;  %6332 = vadd.xlane.f32.xlu0 %v6331_v30  ;;  %v6430_v40 = vsel %vm6288_vm12, %v6079_v10, 0.0  ;;  %v6427_v30 = vsel %vm6288_vm12, %v6078_v29, 0.0  ;;  %v12229_v29 = vsub.s32 %v7583_v26, %v12214_v8 }
 0x4ce   : > { %6341 = vadd.xlane.f32.xlu1 %v6340_v55  ;;  %6338 = vadd.xlane.f32.xlu0 %v6337_v39  ;;  %v6436_v55 = vsel %vm6288_vm12, %v6081_v45, 0.0  ;;  %v6433_v39 = vsel %vm6288_vm12, %v6080_v12, 0.0 }
 0x4d2   : > { %6347 = vadd.xlane.f32.xlu1 %v6346_v61  ;;  %6344 = vadd.xlane.f32.xlu0 %v6343_v34  ;;  %v6442_v61 = vsel %vm6288_vm12, %v6083_v44, 0.0  ;;  %v6439_v34 = vsel %vm6288_vm12, %v6082_v46, 0.0  ;;  %v6505_v44 = vsel %vm6288_vm12, %v6104_v54, 0.0 }
 0x4d6   : > { %6353 = vadd.xlane.f32.xlu1 %v6352_v51  ;;  %6350 = vadd.xlane.f32.xlu0 %v6349_v57  ;;  %v6448_v51 = vsel %vm6288_vm12, %v6085_v50, 0.0  ;;  %v6445_v57 = vsel %vm6288_vm12, %v6084_v18, 0.0  ;;  %v6107_v50 = vld [vmem:[%s9825_s15 + $0x258] sm:$0xff]  ;;  %v6106_v18 = vld [vmem:[%s9825_s15 + $0x250] sm:$0xff] }
 0x4da   : > { %6359 = vadd.xlane.f32.xlu1 %v6358_v56  ;;  %6356 = vadd.xlane.f32.xlu0 %v6355_v49  ;;  %v6454_v56 = vsel %vm6288_vm12, %v6087_v58, 0.0  ;;  %v6451_v49 = vsel %vm6288_vm12, %v6086_v31, 0.0  ;;  %v7618_v58 = vadd.s32 4294967248, %v12210_v19 }
 0x4de   : > { %6365 = vadd.xlane.f32.xlu1 %v6364_v53  ;;  %6362 = vadd.xlane.f32.xlu0 %v6361_v60  ;;  %v6460_v53 = vsel %vm6288_vm12, %v6089_v1, 0.0  ;;  %v6457_v60 = vsel %vm6288_vm12, %v6088_v25, 0.0 }
 0x4e2   : > { %6371 = vadd.xlane.f32.xlu1 %v6370_v9  ;;  %6368 = vadd.xlane.f32.xlu0 %v6367_v41  ;;  %v6466_v9 = vsel %vm6288_vm12, %v6091_v17, 0.0  ;;  %v6463_v41 = vsel %vm6288_vm12, %v6090_v52, 0.0  ;;  %v6511_v17 = vsel %vm6288_vm12, %v6106_v18, 0.0 }
 0x4e6   : > { %6377 = vadd.xlane.f32.xlu1 %v6376_v21  ;;  %6374 = vadd.xlane.f32.xlu0 %v6373_v4  ;;  %v6472_v21 = vsel %vm6288_vm12, %v6093_v2, 0.0  ;;  %v6469_v4 = vsel %vm6288_vm12, %v6092_v38, 0.0  ;;  %v6109_v38 = vld [vmem:[%s9825_s15 + $0x268] sm:$0xff] }
 0x4ea   : > { %6383 = vadd.xlane.f32.xlu1 %v6382_v62  ;;  %6380 = vadd.xlane.f32.xlu0 %v6379_v43  ;;  %v6478_v62 = vsel %vm6288_vm12, %v6095_v27, 0.0  ;;  %v6475_v43 = vsel %vm6288_vm12, %v6094_v16, 0.0  ;;  %v12264_v16 = vsub.s32 %v7618_v58, %v12214_v8 }
 0x4ee   : > { %6389 = vadd.xlane.f32.xlu1 %v6388_v11  ;;  %6386 = vadd.xlane.f32.xlu0 %v6385_v28  ;;  %v6484_v11 = vsel %vm6288_vm12, %v6097_v7, 0.0  ;;  %v6481_v28 = vsel %vm6288_vm12, %v6096_v59, 0.0 }
 0x4f2   : > { %6395 = vadd.xlane.f32.xlu1 %v6394_v36  ;;  %6392 = vadd.xlane.f32.xlu0 %v6391_v22  ;;  %v6490_v36 = vsel %vm6288_vm12, %v6099_v15, 0.0  ;;  %v6487_v22 = vsel %vm6288_vm12, %v6098_v37, 0.0  ;;  %v6520_v37 = vsel %vm6288_vm12, %v6109_v38, 0.0 }
 0x4f6   : > { %6401 = vadd.xlane.f32.xlu1 %v6400_v24  ;;  %6398 = vadd.xlane.f32.xlu0 %v6397_v3  ;;  %v6100_v24 = vld [vmem:[%s9825_s15 + $0x220] sm:$0xff]  ;;  %v6496_v3 = vsel %vm6288_vm12, %v6101_v20, 0.0 }
 0x4f7   : > { %v6493_v47 = vsel %vm6288_vm12, %v6100_v24, 0.0 }
 0x4fa   : > { %6407 = vadd.xlane.f32.xlu1 %v6406_v0  ;;  %6404 = vadd.xlane.f32.xlu0 %v6403_v13  ;;  %v6103_v0 = vld [vmem:[%s9825_s15 + $0x238] sm:$0xff]  ;;  %v6102_v13 = vld [vmem:[%s9825_s15 + $0x230] sm:$0xff] }
 0x4fb   : > { %v6502_v32 = vsel %vm6288_vm12, %v6103_v0, 0.0 }
 0x4fe   : > { %6413 = vadd.xlane.f32.xlu1 %v6412_v63  ;;  %6410 = vadd.xlane.f32.xlu0 %v6409_v48  ;;  %v7590_v63 = vadd.s32 4294967280, %v12210_v19 }
 0x502   : > { %6419 = vadd.xlane.f32.xlu1 %v6418_v33  ;;  %6416 = vadd.xlane.f32.xlu0 %v6415_v35  ;;  %v6499_v33 = vsel %vm6288_vm12, %v6102_v13, 0.0  ;;  %v7597_v35 = vadd.s32 4294967272, %v12210_v19  ;;  %v7653_v13 = vadd.s32 4294967208, %v12210_v19 }
 0x504   : > { %v12238_v46 = vsub.s32 %v7597_v35, %v12214_v8 }
 0x506   : > { %6425 = vadd.xlane.f32.xlu1 %v6424_v6  ;;  %6422 = vadd.xlane.f32.xlu0 %v6421_v14  ;;  %v7611_v6 = vadd.s32 4294967256, %v12210_v19  ;;  %v12226_v14 = vsub.s32 %v12210_v19, %v12214_v8 }
 0x50a   : > { %6431 = vadd.xlane.f32.xlu1 %v6430_v40  ;;  %6428 = vadd.xlane.f32.xlu0 %v6427_v30  ;;  %v7604_v40 = vadd.s32 4294967264, %v12210_v19  ;;  %v12233_v30 = vsub.s32 %v7590_v63, %v12214_v8 }
 0x50e   : > { %6437 = vadd.xlane.f32.xlu1 %v6436_v55  ;;  %6434 = vadd.xlane.f32.xlu0 %v6433_v39  ;;  %v6508_v39 = vsel %vm6288_vm12, %v6105_v42, 0.0 }
 0x512   : > { %6443 = vadd.xlane.f32.xlu1 %v6442_v61  ;;  %6440 = vadd.xlane.f32.xlu0 %v6439_v34 }
 0x516   : > { %6449 = vadd.xlane.f32.xlu1 %v6448_v51  ;;  %6446 = vadd.xlane.f32.xlu0 %v6445_v57  ;;  %v12243_v51 = vsub.s32 %v7611_v6, %v12214_v8  ;;  %v7625_v57 = vadd.s32 4294967240, %v12210_v19 }
 0x518   : > { %v12261_v27 = vsub.s32 %v7625_v57, %v12214_v8 }
 0x51a   : > { %6455 = vadd.xlane.f32.xlu1 %v6454_v56  ;;  %6452 = vadd.xlane.f32.xlu0 %v6451_v49  ;;  %v12250_v49 = vsub.s32 %v7604_v40, %v12214_v8  ;;  %v6113_v40 = vld [vmem:[%s9825_s15 + $0x288] sm:$0xff] }
 0x51b   : > { %v6532_v58 = vsel %vm6288_vm12, %v6113_v40, 0.0 }
 0x51e   : > { %6461 = vadd.xlane.f32.xlu1 %v6460_v53  ;;  %6458 = vadd.xlane.f32.xlu0 %v6457_v60  ;;  %v6514_v60 = vsel %vm6288_vm12, %v6107_v50, 0.0  ;;  %v7660_v50 = vadd.s32 4294967200, %v12210_v19 }
 0x520   : > { %v12316_v38 = vsub.s32 %v7660_v50, %v12214_v8  ;;  %v6120_v50 = vld [vmem:[%s9825_s15 + $0x2c0] sm:$0xff] }
 0x522   : > { %6467 = vadd.xlane.f32.xlu1 %v6466_v9  ;;  %6464 = vadd.xlane.f32.xlu0 %v6463_v41 }
 0x526   : > { %6473 = vadd.xlane.f32.xlu1 %v6472_v21  ;;  %6470 = vadd.xlane.f32.xlu0 %v6469_v4  ;;  %v6108_v21 = vld [vmem:[%s9825_s15 + $0x260] sm:$0xff] }
 0x52a   : > { %6479 = vadd.xlane.f32.xlu1 %v6478_v62  ;;  %6476 = vadd.xlane.f32.xlu0 %v6475_v43  ;;  %v7639_v62 = vadd.s32 4294967224, %v12210_v19 }
 0x52c   : > { %v12278_v0 = vsub.s32 %v7639_v62, %v12214_v8 }
 0x52e   : > { %6485 = vadd.xlane.f32.xlu1 %v6484_v11  ;;  %6482 = vadd.xlane.f32.xlu0 %v6481_v28  ;;  %v7632_v11 = vadd.s32 4294967232, %v12210_v19 }
 0x532   : > { %6491 = vadd.xlane.f32.xlu1 %v6490_v36  ;;  %6488 = vadd.xlane.f32.xlu0 %v6487_v22  ;;  %v6517_v36 = vsel %vm6288_vm12, %v6108_v21, 0.0  ;;  %v6111_v22 = vld [vmem:[%s9825_s15 + $0x278] sm:$0xff]  ;;  %v7674_v21 = vadd.s32 4294967184, %v12210_v19 }
 0x533   : > { %v6526_v35 = vsel %vm6288_vm12, %v6111_v22, 0.0 }
 0x536   : > { %6497 = vadd.xlane.f32.xlu1 %v6496_v3  ;;  %6494 = vadd.xlane.f32.xlu0 %v6493_v47  ;;  %v6110_v3 = vld [vmem:[%s9825_s15 + $0x270] sm:$0xff] }
 0x537   : > { %v6297_v48 = vpop.xlane.xlu1 %6296  ;;  %v6291_v5 = vpop.xlane.xlu0 %6290  ;;  %v6523_v42 = vsel %vm6288_vm12, %v6110_v3, 0.0 }
 0x538   : > { %v7057_v10 = vmul.f32 0.020408163, %v6291_v5  ;;  %v7059_v45 = vmul.f32 0.020408163, %v6297_v48  ;;  %v12284_v48 = vsub.s32 %v7632_v11, %v12214_v8  ;;  %v7646_v5 = vadd.s32 4294967216, %v12210_v19 }
 0x53a   : > { %6503 = vadd.xlane.f32.xlu1 %v6502_v32  ;;  %6500 = vadd.xlane.f32.xlu0 %v6499_v33  ;;  %v7582_v31 = vrot.slane %v7057_v10, %v12226_v14  ;;  %v7594_v1 = vrot.slane %v7059_v45, %v12233_v30  ;;  %v6112_v45 = vld [vmem:[%s9825_s15 + $0x280] sm:$0xff] }
 0x53b   : > { %v6300_v12 = vpop.xlane.xlu1 %6299  ;;  %v6294_v55 = vpop.xlane.xlu0 %6293 }
 0x53c   : > { %v7060_v61 = vmul.f32 0.020408163, %v6300_v12  ;;  %v7058_v34 = vmul.f32 0.020408163, %v6294_v55  ;;  %v12294_v55 = vsub.s32 %v7653_v13, %v12214_v8 }
 0x53e   : > { %v7587_v56 = vrot.slane %v7058_v34, %v12229_v29  ;;  %6509 = vadd.xlane.f32.xlu1 %v6508_v39  ;;  %6506 = vadd.xlane.f32.xlu0 %v6505_v44  ;;  %v7601_v52 = vrot.slane %v7060_v61, %v12238_v46  ;;  %v7667_v39 = vadd.s32 4294967192, %v12210_v19  ;;  %v12300_v34 = vsub.s32 %v7646_v5, %v12214_v8 }
 0x53f   : > { %v6306_v25 = vpop.xlane.xlu1 %6305  ;;  %v6303_v53 = vpop.xlane.xlu0 %6302 }
 0x540   : > { %v7589_v9 = vsel %vm7588_vm13, %v7587_v56, %v7582_v31  ;;  %v7062_v41 = vmul.f32 0.020408163, %v6306_v25  ;;  %v7061_v2 = vmul.f32 0.020408163, %v6303_v53  ;;  %v6529_v31 = vsel %vm6288_vm12, %v6112_v45, 0.0  ;;  %v6115_v53 = vld [vmem:[%s9825_s15 + $0x298] sm:$0xff] }
 0x541   : > { %v7596_v4 = vsel %vm7595_vm14, %v7594_v1, %v7589_v9  ;;  %v7681_v9 = vadd.s32 4294967176, %v12210_v19 }
 0x542   : > { %v7615_v43 = vrot.slane %v7062_v41, %v12243_v51  ;;  %v7603_v7 = vsel %vm7602_vm15, %v7601_v52, %v7596_v4  ;;  %v7608_v59 = vrot.slane %v7061_v2, %v12250_v49  ;;  %6515 = vadd.xlane.f32.xlu1 %v6514_v60  ;;  %6512 = vadd.xlane.f32.xlu0 %v6511_v17  ;;  %v6114_v60 = vld [vmem:[%s9825_s15 + $0x290] sm:$0xff] }
 0x543   : > { %v6312_v28 = vpop.xlane.xlu1 %6311  ;;  %v6309_v15 = vpop.xlane.xlu0 %6308  ;;  %v12310_v52 = vsub.s32 %v7667_v39, %v12214_v8  ;;  %v12326_v22 = vsub.s32 %v7681_v9, %v12214_v8  ;;  %v6123_v9 = vld [vmem:[%s9825_s15 + $0x2d8] sm:$0xff] }
 0x544   : > { %v7610_v23 = vsel %vm7609_vm11, %v7608_v59, %v7603_v7  ;;  %v7064_v20 = vmul.f32 0.020408163, %v6312_v28  ;;  %v7063_v24 = vmul.f32 0.020408163, %v6309_v15  ;;  %v6535_v7 = vsel %vm6288_vm12, %v6114_v60, 0.0  ;;  %v6117_v15 = vld [vmem:[%s9825_s15 + $0x2a8] sm:$0xff] }
 0x545   : > { %v7617_v47 = vsel %vm7616_vm1, %v7615_v43, %v7610_v23  ;;  %v6538_v43 = vsel %vm6288_vm12, %v6115_v53, 0.0 }
 0x546   : > { %v7629_v26 = vrot.slane %v7064_v20, %v12261_v27  ;;  %v7622_v63 = vrot.slane %v7063_v24, %v12264_v16  ;;  %6521 = vadd.xlane.f32.xlu1 %v6520_v37  ;;  %6518 = vadd.xlane.f32.xlu0 %v6517_v36  ;;  %v6116_v37 = vld [vmem:[%s9825_s15 + $0x2a0] sm:$0xff]  ;;  %v12331_v20 = vsub.s32 %v7674_v21, %v12214_v8 }
 0x547   : > { %v6318_v32 = vpop.xlane.xlu1 %6317  ;;  %v6315_v33 = vpop.xlane.xlu0 %6314  ;;  %v6541_v13 = vsel %vm6288_vm12, %v6116_v37, 0.0  ;;  %v6124_v37 = vld [vmem:[%s9825_s15 + $0x2e0] sm:$0xff] }
 0x548   : > { %v7624_v54 = vsel %vm7623_vm2, %v7622_v63, %v7617_v47  ;;  %v7066_v6 = vmul.f32 0.020408163, %v6318_v32  ;;  %v7065_v10 = vmul.f32 0.020408163, %v6315_v33  ;;  %v6544_v47 = vsel %vm6288_vm12, %v6117_v15, 0.0  ;;  %v6119_v32 = vld [vmem:[%s9825_s15 + $0x2b8] sm:$0xff] }
 0x549   : > { %v7631_v12 = vsel %vm7630_vm3, %v7629_v26, %v7624_v54  ;;  %v6118_v33 = vld [vmem:[%s9825_s15 + $0x2b0] sm:$0xff]  ;;  %v6550_v40 = vsel %vm6288_vm12, %v6119_v32, 0.0  ;;  %v6125_v15 = vld [vmem:[%s9825_s15 + $0x2e8] sm:$0xff]  ;;  %v6127_v32 = vld [vmem:[%s9825_s15 + $0x2f8] sm:$0xff] }
 0x54a   : > { %v7643_v44 = vrot.slane %v7066_v6, %v12278_v0  ;;  %v7636_v61 = vrot.slane %v7065_v10, %v12284_v48  ;;  %6527 = vadd.xlane.f32.xlu1 %v6526_v35  ;;  %6524 = vadd.xlane.f32.xlu0 %v6523_v42  ;;  %v6547_v45 = vsel %vm6288_vm12, %v6118_v33, 0.0  ;;  %v6126_v33 = vld [vmem:[%s9825_s15 + $0x2f0] sm:$0xff] }
 0x54b   : > { %v6324_v18 = vpop.xlane.xlu1 %6323  ;;  %v6321_v57 = vpop.xlane.xlu0 %6320 }
 0x54c   : > { %v7638_v56 = vsel %vm7637_vm4, %v7636_v61, %v7631_v12  ;;  %v7068_v1 = vmul.f32 0.020408163, %v6324_v18  ;;  %v7067_v25 = vmul.f32 0.020408163, %v6321_v57  ;;  %v6121_v61 = vld [vmem:[%s9825_s15 + $0x2c8] sm:$0xff] }
 0x54d   : > { %v7645_v17 = vsel %vm13977_vm5, %v7643_v44, %v7638_v56 }
 0x54e   : > { %v7657_v41 = vrot.slane %v7068_v1, %v12294_v55  ;;  %v7650_v2 = vrot.slane %v7067_v25, %v12300_v34  ;;  %6533 = vadd.xlane.f32.xlu1 %v6532_v58  ;;  %6530 = vadd.xlane.f32.xlu0 %v6529_v31  ;;  %v6556_v1 = vsel %vm6288_vm12, %v6121_v61, 0.0  ;;  %v6553_v25 = vsel %vm6288_vm12, %v6120_v50, 0.0  ;;  %v6129_v61 = vld [vmem:[%s9825_s15 + $0x308] sm:$0xff]  ;;  %v6128_v50 = vld [vmem:[%s9825_s15 + $0x300] sm:$0xff] }
 0x54f   : > { %v6330_v4 = vpop.xlane.xlu1 %6329  ;;  %v6327_v62 = vpop.xlane.xlu0 %6326 }
 0x550   : > { %v7652_v59 = vsel %vm7651_vm6, %v7650_v2, %v7645_v17  ;;  %v7070_v11 = vmul.f32 0.020408163, %v6330_v4  ;;  %v7069_v28 = vmul.f32 0.020408163, %v6327_v62 }
 0x551   : > { %v7659_v36 = vsel %vm13976_vm0, %v7657_v41, %v7652_v59  ;;  %v6122_v41 = vld [vmem:[%s9825_s15 + $0x2d0] sm:$0xff] }
 0x552   : > { %v7671_v19 = vrot.slane %v7070_v11, %v12310_v52  ;;  %v7664_v23 = vrot.slane %v7069_v28, %v12316_v38  ;;  %6539 = vadd.xlane.f32.xlu1 %v6538_v43  ;;  %6536 = vadd.xlane.f32.xlu0 %v6535_v7  ;;  %v6562_v43 = vsel %vm6288_vm12, %v6123_v9, 0.0  ;;  %v6559_v7 = vsel %vm6288_vm12, %v6122_v41, 0.0  ;;  %v6131_v41 = vld [vmem:[%s9825_s15 + $0x318] sm:$0xff] }
 0x553   : > { %v6336_v24 = vpop.xlane.xlu1 %6335  ;;  %v6333_v3 = vpop.xlane.xlu0 %6332 }
 0x554   : > { %v7666_v26 = vsel %vm7665_vm9, %v7664_v23, %v7659_v36  ;;  %v7072_v63 = vmul.f32 0.020408163, %v6336_v24  ;;  %v7071_v5 = vmul.f32 0.020408163, %v6333_v3 }
 0x555   : > { %v7673_v35 = vsel %vm7672_vm8, %v7671_v19, %v7666_v26 }
 0x556   : > { %v7685_v42 = vrot.slane %v7072_v63, %v12326_v22  ;;  %v7678_v54 = vrot.slane %v7071_v5, %v12331_v20  ;;  %6545 = vadd.xlane.f32.xlu1 %v6544_v47  ;;  %6542 = vadd.xlane.f32.xlu0 %v6541_v13  ;;  %v6568_v47 = vsel %vm6288_vm12, %v6125_v15, 0.0  ;;  %v6565_v13 = vsel %vm6288_vm12, %v6124_v37, 0.0 }
 0x557   : > { %v6342_v6 = vpop.xlane.xlu1 %6341  ;;  %v6339_v10 = vpop.xlane.xlu0 %6338 }
 0x558   : > { %v7680_v12 = vsel %vm7679_vm7, %v7678_v54, %v7673_v35  ;;  %v7074_v39 = vmul.f32 0.020408163, %v6342_v6  ;;  %v7073_v44 = vmul.f32 0.020408163, %v6339_v10 }
 0x559   : > { %v12347_v18 = vsel %vm7686_vm10, %v7685_v42, %v7680_v12 }
 0x55a   : > { %v7695_v57 = vrot.slane %v7074_v39, %v12229_v29  ;;  %v7691_v58 = vrot.slane %v7073_v44, %v12226_v14  ;;  %6551 = vadd.xlane.f32.xlu1 %v6550_v40  ;;  %6548 = vadd.xlane.f32.xlu0 %v6547_v45  ;;  %v6574_v40 = vsel %vm6288_vm12, %v6127_v32, 0.0  ;;  %v6571_v45 = vsel %vm6288_vm12, %v6126_v33, 0.0 }
 0x55b   : > { %v6348_v31 = vpop.xlane.xlu1 %6347  ;;  %v6345_v56 = vpop.xlane.xlu0 %6344 }
 0x55c   : > { %v7696_v53 = vsel %vm7588_vm13, %v7695_v57, %v7691_v58  ;;  %v7076_v60 = vmul.f32 0.020408163, %v6348_v31  ;;  %v7075_v17 = vmul.f32 0.020408163, %v6345_v56 }
 0x55e   : > { %v7705_v2 = vrot.slane %v7076_v60, %v12238_v46  ;;  %v7700_v21 = vrot.slane %v7075_v17, %v12233_v30  ;;  %6557 = vadd.xlane.f32.xlu1 %v6556_v1  ;;  %6554 = vadd.xlane.f32.xlu0 %v6553_v25  ;;  %v6580_v25 = vsel %vm6288_vm12, %v6129_v61, 0.0 }
 0x55f   : > { %v6354_v4 = vpop.xlane.xlu1 %6353  ;;  %v6351_v62 = vpop.xlane.xlu0 %6350 }
 0x560   : > { %v7701_v59 = vsel %vm7595_vm14, %v7700_v21, %v7696_v53  ;;  %v7078_v11 = vmul.f32 0.020408163, %v6354_v4  ;;  %v7077_v28 = vmul.f32 0.020408163, %v6351_v62  ;;  %v6577_v53 = vsel %vm6288_vm12, %v6128_v50, 0.0 }
 0x561   : > { %v7706_v36 = vsel %vm7602_vm15, %v7705_v2, %v7701_v59  ;;  %v6130_v2 = vld [vmem:[%s9825_s15 + $0x310] sm:$0xff]  ;;  %v6586_v59 = vsel %vm6288_vm12, %v6131_v41, 0.0 }
 0x562   : > { %v7715_v19 = vrot.slane %v7078_v11, %v12243_v51  ;;  %v7710_v23 = vrot.slane %v7077_v28, %v12250_v49  ;;  %6563 = vadd.xlane.f32.xlu1 %v6562_v43  ;;  %6560 = vadd.xlane.f32.xlu0 %v6559_v7  ;;  %v6583_v11 = vsel %vm6288_vm12, %v6130_v2, 0.0 }
 0x563   : > { %v6360_v24 = vpop.xlane.xlu1 %6359  ;;  %v6357_v3 = vpop.xlane.xlu0 %6356 }
 0x564   : > { %v7711_v26 = vsel %vm7609_vm11, %v7710_v23, %v7706_v36  ;;  %v7080_v63 = vmul.f32 0.020408163, %v6360_v24  ;;  %v7079_v5 = vmul.f32 0.020408163, %v6357_v3  ;;  %v6133_v36 = vld [vmem:[%s9825_s15 + $0x328] sm:$0xff] }
 0x565   : > { %v7716_v35 = vsel %vm7616_vm1, %v7715_v19, %v7711_v26  ;;  %v6132_v19 = vld [vmem:[%s9825_s15 + $0x320] sm:$0xff]  ;;  %v6592_v26 = vsel %vm6288_vm12, %v6133_v36, 0.0 }
 0x566   : > { %v7725_v42 = vrot.slane %v7080_v63, %v12261_v27  ;;  %v7720_v54 = vrot.slane %v7079_v5, %v12264_v16  ;;  %6569 = vadd.xlane.f32.xlu1 %v6568_v47  ;;  %6566 = vadd.xlane.f32.xlu0 %v6565_v13  ;;  %v6589_v63 = vsel %vm6288_vm12, %v6132_v19, 0.0  ;;  %v6141_v19 = vld [vmem:[%s9825_s15 + $0x368] sm:$0xff] }
 0x567   : > { %v6366_v6 = vpop.xlane.xlu1 %6365  ;;  %v6363_v10 = vpop.xlane.xlu0 %6362 }
 0x568   : > { %v7721_v12 = vsel %vm7623_vm2, %v7720_v54, %v7716_v35  ;;  %v7082_v39 = vmul.f32 0.020408163, %v6366_v6  ;;  %v7081_v44 = vmul.f32 0.020408163, %v6363_v10  ;;  %v6135_v35 = vld [vmem:[%s9825_s15 + $0x338] sm:$0xff] }
 0x569   : > { %v7726_v57 = vsel %vm7630_vm3, %v7725_v42, %v7721_v12  ;;  %v6134_v42 = vld [vmem:[%s9825_s15 + $0x330] sm:$0xff]  ;;  %v6598_v12 = vsel %vm6288_vm12, %v6135_v35, 0.0 }
 0x56a   : > { %v7735_v58 = vrot.slane %v7082_v39, %v12278_v0  ;;  %v7730_v31 = vrot.slane %v7081_v44, %v12284_v48  ;;  %6575 = vadd.xlane.f32.xlu1 %v6574_v40  ;;  %6572 = vadd.xlane.f32.xlu0 %v6571_v45  ;;  %v6595_v39 = vsel %vm6288_vm12, %v6134_v42, 0.0  ;;  %v6143_v42 = vld [vmem:[%s9825_s15 + $0x378] sm:$0xff] }
 0x56b   : > { %v6372_v56 = vpop.xlane.xlu1 %6371  ;;  %v6369_v1 = vpop.xlane.xlu0 %6368 }
 0x56c   : > { %v7731_v60 = vsel %vm7637_vm4, %v7730_v31, %v7726_v57  ;;  %v7084_v17 = vmul.f32 0.020408163, %v6372_v56  ;;  %v7083_v9 = vmul.f32 0.020408163, %v6369_v1  ;;  %v6137_v57 = vld [vmem:[%s9825_s15 + $0x348] sm:$0xff] }
 0x56d   : > { %v7736_v21 = vsel %vm13977_vm5, %v7735_v58, %v7731_v60  ;;  %v6136_v58 = vld [vmem:[%s9825_s15 + $0x340] sm:$0xff]  ;;  %v6604_v60 = vsel %vm6288_vm12, %v6137_v57, 0.0 }
 0x56e   : > { %v7745_v4 = vrot.slane %v7084_v17, %v12294_v55  ;;  %v7740_v62 = vrot.slane %v7083_v9, %v12300_v34  ;;  %6581 = vadd.xlane.f32.xlu1 %v6580_v25  ;;  %6578 = vadd.xlane.f32.xlu0 %v6577_v53  ;;  %v6601_v17 = vsel %vm6288_vm12, %v6136_v58, 0.0  ;;  %v6145_v58 = vld [vmem:[%s9825_s15 + $0x388] sm:$0xff] }
 0x56f   : > { %v6378_v43 = vpop.xlane.xlu1 %6377  ;;  %v6375_v7 = vpop.xlane.xlu0 %6374 }
 0x570   : > { %v7741_v28 = vsel %vm7651_vm6, %v7740_v62, %v7736_v21  ;;  %v7086_v15 = vmul.f32 0.020408163, %v6378_v43  ;;  %v7085_v37 = vmul.f32 0.020408163, %v6375_v7  ;;  %v6139_v21 = vld [vmem:[%s9825_s15 + $0x358] sm:$0xff] }
 0x571   : > { %v7746_v23 = vsel %vm13976_vm0, %v7745_v4, %v7741_v28  ;;  %v6138_v4 = vld [vmem:[%s9825_s15 + $0x350] sm:$0xff] }
 0x572   : > { %v7755_v24 = vrot.slane %v7086_v15, %v12310_v52  ;;  %v7750_v3 = vrot.slane %v7085_v37, %v12316_v38  ;;  %6587 = vadd.xlane.f32.xlu1 %v6586_v59  ;;  %6584 = vadd.xlane.f32.xlu0 %v6583_v11  ;;  %v6610_v11 = vsel %vm6288_vm12, %v6139_v21, 0.0  ;;  %v6607_v28 = vsel %vm6288_vm12, %v6138_v4, 0.0 }
 0x573   : > { %v6384_v47 = vpop.xlane.xlu1 %6383  ;;  %v6381_v13 = vpop.xlane.xlu0 %6380 }
 0x574   : > { %v7751_v5 = vsel %vm7665_vm9, %v7750_v3, %v7746_v23  ;;  %v7088_v32 = vmul.f32 0.020408163, %v6384_v47  ;;  %v7087_v33 = vmul.f32 0.020408163, %v6381_v13  ;;  %v6140_v23 = vld [vmem:[%s9825_s15 + $0x360] sm:$0xff] }
 0x575   : > { %v7756_v54 = vsel %vm7672_vm8, %v7755_v24, %v7751_v5  ;;  %v6613_v5 = vsel %vm6288_vm12, %v6140_v23, 0.0 }
 0x576   : > { %v7765_v6 = vrot.slane %v7088_v32, %v12326_v22  ;;  %v7760_v10 = vrot.slane %v7087_v33, %v12331_v20  ;;  %6593 = vadd.xlane.f32.xlu1 %v6592_v26  ;;  %6590 = vadd.xlane.f32.xlu0 %v6589_v63  ;;  %v6616_v63 = vsel %vm6288_vm12, %v6141_v19, 0.0 }
 0x577   : > { %v6390_v40 = vpop.xlane.xlu1 %6389  ;;  %v6387_v45 = vpop.xlane.xlu0 %6386 }
 0x578   : > { %v7761_v44 = vsel %vm7679_vm7, %v7760_v10, %v7756_v54  ;;  %v7090_v61 = vmul.f32 0.020408163, %v6390_v40  ;;  %v7089_v50 = vmul.f32 0.020408163, %v6387_v45  ;;  %v6142_v54 = vld [vmem:[%s9825_s15 + $0x370] sm:$0xff] }
 0x579   : > { %v12412_v31 = vsel %vm7686_vm10, %v7765_v6, %v7761_v44  ;;  %v6619_v44 = vsel %vm6288_vm12, %v6142_v54, 0.0 }
 0x57a   : > { %v7774_v56 = vrot.slane %v7090_v61, %v12229_v29  ;;  %v7770_v1 = vrot.slane %v7089_v50, %v12226_v14  ;;  %6599 = vadd.xlane.f32.xlu1 %v6598_v12  ;;  %6596 = vadd.xlane.f32.xlu0 %v6595_v39  ;;  %v6622_v39 = vsel %vm6288_vm12, %v6143_v42, 0.0 }
 0x57b   : > { %v6396_v25 = vpop.xlane.xlu1 %6395  ;;  %v6393_v53 = vpop.xlane.xlu0 %6392 }
 0x57c   : > { %v7775_v9 = vsel %vm7588_vm13, %v7774_v56, %v7770_v1  ;;  %v7092_v41 = vmul.f32 0.020408163, %v6396_v25  ;;  %v7091_v2 = vmul.f32 0.020408163, %v6393_v53  ;;  %v6144_v56 = vld [vmem:[%s9825_s15 + $0x380] sm:$0xff] }
 0x57e   : > { %v7784_v62 = vrot.slane %v7092_v41, %v12238_v46  ;;  %v7779_v43 = vrot.slane %v7091_v2, %v12233_v30  ;;  %6605 = vadd.xlane.f32.xlu1 %v6604_v60  ;;  %6602 = vadd.xlane.f32.xlu0 %v6601_v17  ;;  %v6625_v41 = vsel %vm6288_vm12, %v6144_v56, 0.0 }
 0x57f   : > { %v6402_v7 = vpop.xlane.xlu1 %6401  ;;  %v6399_v59 = vpop.xlane.xlu0 %6398 }
 0x580   : > { %v7780_v15 = vsel %vm7595_vm14, %v7779_v43, %v7775_v9  ;;  %v7094_v37 = vmul.f32 0.020408163, %v6402_v7  ;;  %v7093_v36 = vmul.f32 0.020408163, %v6399_v59  ;;  %v6628_v9 = vsel %vm6288_vm12, %v6145_v58, 0.0  ;;  %v6146_v43 = vld [vmem:[%s9825_s15 + $0x390] sm:$0xff] }
 0x581   : > { %v7785_v24 = vsel %vm7602_vm15, %v7784_v62, %v7780_v15  ;;  %v6147_v62 = vld [vmem:[%s9825_s15 + $0x398] sm:$0xff] }
 0x582   : > { %v7794_v3 = vrot.slane %v7094_v37, %v12243_v51  ;;  %v7789_v47 = vrot.slane %v7093_v36, %v12250_v49  ;;  %6611 = vadd.xlane.f32.xlu1 %v6610_v11  ;;  %6608 = vadd.xlane.f32.xlu0 %v6607_v28  ;;  %v6634_v37 = vsel %vm6288_vm12, %v6147_v62, 0.0  ;;  %v6631_v36 = vsel %vm6288_vm12, %v6146_v43, 0.0 }
 0x583   : > { %v6408_v13 = vpop.xlane.xlu1 %6407  ;;  %v6405_v26 = vpop.xlane.xlu0 %6404 }
 0x584   : > { %v7790_v32 = vsel %vm7609_vm11, %v7789_v47, %v7785_v24  ;;  %v7096_v33 = vmul.f32 0.020408163, %v6408_v13  ;;  %v7095_v35 = vmul.f32 0.020408163, %v6405_v26  ;;  %v6148_v47 = vld [vmem:[%s9825_s15 + $0x3a0] sm:$0xff] }
 0x585   : > { %v7795_v6 = vsel %vm7616_vm1, %v7794_v3, %v7790_v32  ;;  %v6149_v3 = vld [vmem:[%s9825_s15 + $0x3a8] sm:$0xff] }
 0x586   : > { %v7804_v10 = vrot.slane %v7096_v33, %v12261_v27  ;;  %v7799_v40 = vrot.slane %v7095_v35, %v12264_v16  ;;  %6617 = vadd.xlane.f32.xlu1 %v6616_v63  ;;  %6614 = vadd.xlane.f32.xlu0 %v6613_v5  ;;  %v6640_v33 = vsel %vm6288_vm12, %v6149_v3, 0.0  ;;  %v6637_v35 = vsel %vm6288_vm12, %v6148_v47, 0.0 }
 0x587   : > { %v6414_v45 = vpop.xlane.xlu1 %6413  ;;  %v6411_v12 = vpop.xlane.xlu0 %6410 }
 0x588   : > { %v7800_v61 = vsel %vm7623_vm2, %v7799_v40, %v7795_v6  ;;  %v7098_v50 = vmul.f32 0.020408163, %v6414_v45  ;;  %v7097_v57 = vmul.f32 0.020408163, %v6411_v12  ;;  %v6150_v40 = vld [vmem:[%s9825_s15 + $0x3b0] sm:$0xff] }
 0x589   : > { %v7805_v1 = vsel %vm7630_vm3, %v7804_v10, %v7800_v61  ;;  %v6151_v10 = vld [vmem:[%s9825_s15 + $0x3b8] sm:$0xff] }
 0x58a   : > { %v7814_v25 = vrot.slane %v7098_v50, %v12278_v0  ;;  %v7809_v53 = vrot.slane %v7097_v57, %v12284_v48  ;;  %6623 = vadd.xlane.f32.xlu1 %v6622_v39  ;;  %6620 = vadd.xlane.f32.xlu0 %v6619_v44  ;;  %v6646_v50 = vsel %vm6288_vm12, %v6151_v10, 0.0  ;;  %v6643_v57 = vsel %vm6288_vm12, %v6150_v40, 0.0 }
 0x58b   : > { %v6420_v60 = vpop.xlane.xlu1 %6419  ;;  %v6417_v17 = vpop.xlane.xlu0 %6416 }
 0x58c   : > { %v7810_v2 = vsel %vm7637_vm4, %v7809_v53, %v7805_v1  ;;  %v7100_v21 = vmul.f32 0.020408163, %v6420_v60  ;;  %v7099_v4 = vmul.f32 0.020408163, %v6417_v17  ;;  %v6152_v53 = vld [vmem:[%s9825_s15 + $0x3c0] sm:$0xff] }
 0x58d   : > { %v7815_v7 = vsel %vm13977_vm5, %v7814_v25, %v7810_v2  ;;  %v6153_v25 = vld [vmem:[%s9825_s15 + $0x3c8] sm:$0xff]  ;;  %v6649_v62 = vsel %vm6288_vm12, %v6152_v53, 0.0 }
 0x58e   : > { %v7824_v59 = vrot.slane %v7100_v21, %v12294_v55  ;;  %v7819_v11 = vrot.slane %v7099_v4, %v12300_v34  ;;  %6629 = vadd.xlane.f32.xlu1 %v6628_v9  ;;  %6626 = vadd.xlane.f32.xlu0 %v6625_v41  ;;  %v6652_v4 = vsel %vm6288_vm12, %v6153_v25, 0.0 }
 0x58f   : > { %v6426_v28 = vpop.xlane.xlu1 %6425  ;;  %v6423_v15 = vpop.xlane.xlu0 %6422 }
 0x590   : > { %v7820_v19 = vsel %vm7651_vm6, %v7819_v11, %v7815_v7  ;;  %v7102_v23 = vmul.f32 0.020408163, %v6426_v28  ;;  %v7101_v24 = vmul.f32 0.020408163, %v6423_v15  ;;  %v6154_v11 = vld [vmem:[%s9825_s15 + $0x3d0] sm:$0xff] }
 0x591   : > { %v7825_v13 = vsel %vm13976_vm0, %v7824_v59, %v7820_v19  ;;  %vm8873_vm0 = vcmask 1041409  }
 0x592   : > { %v7834_v26 = vrot.slane %v7102_v23, %v12310_v52  ;;  %v7829_v63 = vrot.slane %v7101_v24, %v12316_v38  ;;  %6635 = vadd.xlane.f32.xlu1 %v6634_v37  ;;  %6632 = vadd.xlane.f32.xlu0 %v6631_v36  ;;  %v6655_v23 = vsel %vm6288_vm12, %v6154_v11, 0.0 }
 0x593   : > { %v6432_v5 = vpop.xlane.xlu1 %6431  ;;  %v6429_v32 = vpop.xlane.xlu0 %6428 }
 0x594   : > { %v7830_v42 = vsel %vm7665_vm9, %v7829_v63, %v7825_v13  ;;  %v7104_v54 = vmul.f32 0.020408163, %v6432_v5  ;;  %v7103_v6 = vmul.f32 0.020408163, %v6429_v32  ;;  %v6157_v13 = vld [vmem:[%s9825_s15 + $0x3e8] sm:$0xff] }
 0x595   : > { %v7835_v45 = vsel %vm7672_vm8, %v7834_v26, %v7830_v42  ;;  %v6156_v26 = vld [vmem:[%s9825_s15 + $0x3e0] sm:$0xff]  ;;  %v6664_v42 = vsel %vm6288_vm12, %v6157_v13, 0.0 }
 0x596   : > { %v7844_v12 = vrot.slane %v7104_v54, %v12326_v22  ;;  %v7839_v39 = vrot.slane %v7103_v6, %v12331_v20  ;;  %6641 = vadd.xlane.f32.xlu1 %v6640_v33  ;;  %6638 = vadd.xlane.f32.xlu0 %v6637_v35  ;;  %v6661_v54 = vsel %vm6288_vm12, %v6156_v26, 0.0 }
 0x597   : > { %v6438_v44 = vpop.xlane.xlu1 %6437  ;;  %v6435_v61 = vpop.xlane.xlu0 %6434 }
 0x598   : > { %v7840_v58 = vsel %vm7679_vm7, %v7839_v39, %v7835_v45  ;;  %v7106_v56 = vmul.f32 0.020408163, %v6438_v44  ;;  %v7105_v1 = vmul.f32 0.020408163, %v6435_v61  ;;  %v6159_v45 = vld [vmem:[%s9825_s15 + $0x3f8] sm:$0xff] }
 0x599   : > { %v7845_v60 = vsel %vm7686_vm10, %v7844_v12, %v7840_v58  ;;  %v6158_v12 = vld [vmem:[%s9825_s15 + $0x3f0] sm:$0xff]  ;;  %v6670_v58 = vsel %vm6288_vm12, %v6159_v45, 0.0 }
 0x59a   : > { %v12479_v17 = vsel %vm8873_vm0, %v7845_v60, %v12347_v18  ;;  %v7853_v9 = vrot.slane %v7106_v56, %v12229_v29  ;;  %v7849_v41 = vrot.slane %v7105_v1, %v12226_v14  ;;  %6647 = vadd.xlane.f32.xlu1 %v6646_v50  ;;  %6644 = vadd.xlane.f32.xlu0 %v6643_v57  ;;  %v6155_v18 = vld [vmem:[%s9825_s15 + $0x3d8] sm:$0xff]  ;;  %v6667_v56 = vsel %vm6288_vm12, %v6158_v12, 0.0  ;;  %v6161_v60 = vld [vmem:[%s9825_s15 + $0x408] sm:$0xff] }
 0x59b   : > { %v6444_v2 = vpop.xlane.xlu1 %6443  ;;  %v6441_v21 = vpop.xlane.xlu0 %6440  ;;  %v6658_v19 = vsel %vm6288_vm12, %v6155_v18, 0.0 }
 0x59c   : > { %v7854_v43 = vsel %vm7588_vm13, %v7853_v9, %v7849_v41  ;;  %v7108_v7 = vmul.f32 0.020408163, %v6444_v2  ;;  %v7107_v59 = vmul.f32 0.020408163, %v6441_v21  ;;  %v6160_v9 = vld [vmem:[%s9825_s15 + $0x400] sm:$0xff] }
 0x59e   : > { %v7863_v28 = vrot.slane %v7108_v7, %v12238_v46  ;;  %v7858_v15 = vrot.slane %v7107_v59, %v12233_v30  ;;  %6653 = vadd.xlane.f32.xlu1 %v6652_v4  ;;  %6650 = vadd.xlane.f32.xlu0 %v6649_v62  ;;  %v6673_v7 = vsel %vm6288_vm12, %v6160_v9, 0.0 }
 0x59f   : > { %v6450_v37 = vpop.xlane.xlu1 %6449  ;;  %v6447_v36 = vpop.xlane.xlu0 %6446 }
 0x5a0   : > { %v7859_v24 = vsel %vm7595_vm14, %v7858_v15, %v7854_v43  ;;  %v7110_v3 = vmul.f32 0.020408163, %v6450_v37  ;;  %v7109_v47 = vmul.f32 0.020408163, %v6447_v36  ;;  %v6676_v43 = vsel %vm6288_vm12, %v6161_v60, 0.0  ;;  %v6162_v15 = vld [vmem:[%s9825_s15 + $0x410] sm:$0xff] }
 0x5a1   : > { %v7864_v63 = vsel %vm7602_vm15, %v7863_v28, %v7859_v24  ;;  %v6163_v28 = vld [vmem:[%s9825_s15 + $0x418] sm:$0xff] }
 0x5a2   : > { %v7873_v5 = vrot.slane %v7110_v3, %v12243_v51  ;;  %v7868_v32 = vrot.slane %v7109_v47, %v12250_v49  ;;  %6659 = vadd.xlane.f32.xlu1 %v6658_v19  ;;  %6656 = vadd.xlane.f32.xlu0 %v6655_v23  ;;  %v6682_v3 = vsel %vm6288_vm12, %v6163_v28, 0.0  ;;  %v6679_v47 = vsel %vm6288_vm12, %v6162_v15, 0.0 }
 0x5a3   : > { %v6456_v33 = vpop.xlane.xlu1 %6455  ;;  %v6453_v35 = vpop.xlane.xlu0 %6452 }
 0x5a4   : > { %v7869_v6 = vsel %vm7609_vm11, %v7868_v32, %v7864_v63  ;;  %v7112_v10 = vmul.f32 0.020408163, %v6456_v33  ;;  %v7111_v40 = vmul.f32 0.020408163, %v6453_v35  ;;  %v6164_v32 = vld [vmem:[%s9825_s15 + $0x420] sm:$0xff] }
 0x5a5   : > { %v7874_v39 = vsel %vm7616_vm1, %v7873_v5, %v7869_v6  ;;  %v6165_v5 = vld [vmem:[%s9825_s15 + $0x428] sm:$0xff] }
 0x5a6   : > { %v7883_v44 = vrot.slane %v7112_v10, %v12261_v27  ;;  %v7878_v61 = vrot.slane %v7111_v40, %v12264_v16  ;;  %6665 = vadd.xlane.f32.xlu1 %v6664_v42  ;;  %6662 = vadd.xlane.f32.xlu0 %v6661_v54  ;;  %v6688_v10 = vsel %vm6288_vm12, %v6165_v5, 0.0  ;;  %v6685_v40 = vsel %vm6288_vm12, %v6164_v32, 0.0 }
 0x5a7   : > { %v6462_v50 = vpop.xlane.xlu1 %6461  ;;  %v6459_v57 = vpop.xlane.xlu0 %6458 }
 0x5a8   : > { %v7879_v1 = vsel %vm7623_vm2, %v7878_v61, %v7874_v39  ;;  %v7114_v25 = vmul.f32 0.020408163, %v6462_v50  ;;  %v7113_v53 = vmul.f32 0.020408163, %v6459_v57  ;;  %v6166_v61 = vld [vmem:[%s9825_s15 + $0x430] sm:$0xff] }
 0x5a9   : > { %v7884_v41 = vsel %vm7630_vm3, %v7883_v44, %v7879_v1  ;;  %v6167_v44 = vld [vmem:[%s9825_s15 + $0x438] sm:$0xff] }
 0x5aa   : > { %v7893_v2 = vrot.slane %v7114_v25, %v12278_v0  ;;  %v7888_v21 = vrot.slane %v7113_v53, %v12284_v48  ;;  %6671 = vadd.xlane.f32.xlu1 %v6670_v58  ;;  %6668 = vadd.xlane.f32.xlu0 %v6667_v56  ;;  %v6694_v25 = vsel %vm6288_vm12, %v6167_v44, 0.0  ;;  %v6691_v53 = vsel %vm6288_vm12, %v6166_v61, 0.0 }
 0x5ab   : > { %v6468_v4 = vpop.xlane.xlu1 %6467  ;;  %v6465_v62 = vpop.xlane.xlu0 %6464 }
 0x5ac   : > { %v7889_v59 = vsel %vm7637_vm4, %v7888_v21, %v7884_v41  ;;  %v7116_v18 = vmul.f32 0.020408163, %v6468_v4  ;;  %v7115_v11 = vmul.f32 0.020408163, %v6465_v62  ;;  %v6168_v21 = vld [vmem:[%s9825_s15 + $0x440] sm:$0xff] }
 0x5ad   : > { %v7894_v37 = vsel %vm13977_vm5, %v7893_v2, %v7889_v59  ;;  %vm14073_vm5 = vcmask 786112   ;;  %v6169_v2 = vld [vmem:[%s9825_s15 + $0x448] sm:$0xff]  ;;  %v6697_v28 = vsel %vm6288_vm12, %v6168_v21, 0.0 }
 0x5ae   : > { %v7903_v36 = vrot.slane %v7116_v18, %v12294_v55  ;;  %v7898_v19 = vrot.slane %v7115_v11, %v12300_v34  ;;  %6677 = vadd.xlane.f32.xlu1 %v6676_v43  ;;  %6674 = vadd.xlane.f32.xlu0 %v6673_v7  ;;  %v6700_v11 = vsel %vm6288_vm12, %v6169_v2, 0.0 }
 0x5af   : > { %v6474_v23 = vpop.xlane.xlu1 %6473  ;;  %v6471_v24 = vpop.xlane.xlu0 %6470 }
 0x5b0   : > { %v7899_v13 = vsel %vm7651_vm6, %v7898_v19, %v7894_v37  ;;  %v7118_v26 = vmul.f32 0.020408163, %v6474_v23  ;;  %v7117_v63 = vmul.f32 0.020408163, %v6471_v24  ;;  %v6170_v19 = vld [vmem:[%s9825_s15 + $0x450] sm:$0xff] }
 0x5b1   : > { %v7904_v33 = vsel %vm14073_vm5, %v7903_v36, %v7899_v13  ;;  %vm14074_vm5 = vcmask 654912  }
 0x5b2   : > { %v7913_v35 = vrot.slane %v7118_v26, %v12310_v52  ;;  %v7908_v42 = vrot.slane %v7117_v63, %v12316_v38  ;;  %6683 = vadd.xlane.f32.xlu1 %v6682_v3  ;;  %6680 = vadd.xlane.f32.xlu0 %v6679_v47  ;;  %v6703_v26 = vsel %vm6288_vm12, %v6170_v19, 0.0 }
 0x5b3   : > { %v6480_v54 = vpop.xlane.xlu1 %6479  ;;  %v6477_v6 = vpop.xlane.xlu0 %6476 }
 0x5b4   : > { %v7909_v45 = vsel %vm7665_vm9, %v7908_v42, %v7904_v33  ;;  %v7120_v12 = vmul.f32 0.020408163, %v6480_v54  ;;  %v7119_v39 = vmul.f32 0.020408163, %v6477_v6  ;;  %v6173_v33 = vld [vmem:[%s9825_s15 + $0x468] sm:$0xff] }
 0x5b5   : > { %v7914_v50 = vsel %vm7672_vm8, %v7913_v35, %v7909_v45  ;;  %v6172_v35 = vld [vmem:[%s9825_s15 + $0x460] sm:$0xff]  ;;  %v6712_v45 = vsel %vm6288_vm12, %v6173_v33, 0.0 }
 0x5b6   : > { %v7923_v57 = vrot.slane %v7120_v12, %v12326_v22  ;;  %v7918_v58 = vrot.slane %v7119_v39, %v12331_v20  ;;  %6689 = vadd.xlane.f32.xlu1 %v6688_v10  ;;  %6686 = vadd.xlane.f32.xlu0 %v6685_v40  ;;  %v6709_v12 = vsel %vm6288_vm12, %v6172_v35, 0.0 }
 0x5b7   : > { %v6486_v56 = vpop.xlane.xlu1 %6485  ;;  %v6483_v1 = vpop.xlane.xlu0 %6482 }
 0x5b8   : > { %v7919_v60 = vsel %vm7679_vm7, %v7918_v58, %v7914_v50  ;;  %v7122_v9 = vmul.f32 0.020408163, %v6486_v56  ;;  %v7121_v41 = vmul.f32 0.020408163, %v6483_v1  ;;  %v6175_v50 = vld [vmem:[%s9825_s15 + $0x478] sm:$0xff] }
 0x5b9   : > { %v7924_v4 = vsel %vm7686_vm10, %v7923_v57, %v7919_v60  ;;  %v6174_v57 = vld [vmem:[%s9825_s15 + $0x470] sm:$0xff]  ;;  %v6718_v60 = vsel %vm6288_vm12, %v6175_v50, 0.0 }
 0x5ba   : > { %v12546_v62 = vsel %vm8873_vm0, %v7924_v4, %v12412_v31  ;;  %v7932_v43 = vrot.slane %v7122_v9, %v12229_v29  ;;  %v7928_v7 = vrot.slane %v7121_v41, %v12226_v14  ;;  %6695 = vadd.xlane.f32.xlu1 %v6694_v25  ;;  %6692 = vadd.xlane.f32.xlu0 %v6691_v53  ;;  %v6171_v31 = vld [vmem:[%s9825_s15 + $0x458] sm:$0xff]  ;;  %v6715_v9 = vsel %vm6288_vm12, %v6174_v57, 0.0  ;;  %v6177_v4 = vld [vmem:[%s9825_s15 + $0x488] sm:$0xff] }
 0x5bb   : > { %v6492_v59 = vpop.xlane.xlu1 %6491  ;;  %v6489_v18 = vpop.xlane.xlu0 %6488  ;;  %v6706_v13 = vsel %vm6288_vm12, %v6171_v31, 0.0  ;;  %vm14075_vm0 = vcmask 786112  }
 0x5bc   : > { %v7933_v15 = vsel %vm7588_vm13, %v7932_v43, %v7928_v7  ;;  %v7124_v37 = vmul.f32 0.020408163, %v6492_v59  ;;  %v7123_v36 = vmul.f32 0.020408163, %v6489_v18  ;;  %v6176_v43 = vld [vmem:[%s9825_s15 + $0x480] sm:$0xff] }
 0x5be   : > { %v7942_v23 = vrot.slane %v7124_v37, %v12238_v46  ;;  %v7937_v24 = vrot.slane %v7123_v36, %v12233_v30  ;;  %6701 = vadd.xlane.f32.xlu1 %v6700_v11  ;;  %6698 = vadd.xlane.f32.xlu0 %v6697_v28  ;;  %v6721_v37 = vsel %vm6288_vm12, %v6176_v43, 0.0 }
 0x5bf   : > { %v6498_v3 = vpop.xlane.xlu1 %6497  ;;  %v6495_v47 = vpop.xlane.xlu0 %6494 }
 0x5c0   : > { %v7938_v63 = vsel %vm7595_vm14, %v7937_v24, %v7933_v15  ;;  %v7126_v5 = vmul.f32 0.020408163, %v6498_v3  ;;  %v7125_v32 = vmul.f32 0.020408163, %v6495_v47  ;;  %v6724_v15 = vsel %vm6288_vm12, %v6177_v4, 0.0  ;;  %v6178_v24 = vld [vmem:[%s9825_s15 + $0x490] sm:$0xff] }
 0x5c1   : > { %v7943_v42 = vsel %vm7602_vm15, %v7942_v23, %v7938_v63  ;;  %v6179_v23 = vld [vmem:[%s9825_s15 + $0x498] sm:$0xff] }
 0x5c2   : > { %v7952_v54 = vrot.slane %v7126_v5, %v12243_v51  ;;  %v7947_v6 = vrot.slane %v7125_v32, %v12250_v49  ;;  %6707 = vadd.xlane.f32.xlu1 %v6706_v13  ;;  %6704 = vadd.xlane.f32.xlu0 %v6703_v26  ;;  %v6730_v5 = vsel %vm6288_vm12, %v6179_v23, 0.0  ;;  %v6727_v32 = vsel %vm6288_vm12, %v6178_v24, 0.0 }
 0x5c3   : > { %v6504_v10 = vpop.xlane.xlu1 %6503  ;;  %v6501_v40 = vpop.xlane.xlu0 %6500 }
 0x5c4   : > { %v7948_v39 = vsel %vm7609_vm11, %v7947_v6, %v7943_v42  ;;  %v7128_v44 = vmul.f32 0.020408163, %v6504_v10  ;;  %v7127_v61 = vmul.f32 0.020408163, %v6501_v40  ;;  %v6180_v6 = vld [vmem:[%s9825_s15 + $0x4a0] sm:$0xff] }
 0x5c5   : > { %v7953_v58 = vsel %vm7616_vm1, %v7952_v54, %v7948_v39  ;;  %v6181_v54 = vld [vmem:[%s9825_s15 + $0x4a8] sm:$0xff] }
 0x5c6   : > { %v7962_v56 = vrot.slane %v7128_v44, %v12261_v27  ;;  %v7957_v1 = vrot.slane %v7127_v61, %v12264_v16  ;;  %6713 = vadd.xlane.f32.xlu1 %v6712_v45  ;;  %6710 = vadd.xlane.f32.xlu0 %v6709_v12  ;;  %v6736_v44 = vsel %vm6288_vm12, %v6181_v54, 0.0  ;;  %v6733_v61 = vsel %vm6288_vm12, %v6180_v6, 0.0 }
 0x5c7   : > { %v6510_v25 = vpop.xlane.xlu1 %6509  ;;  %v6507_v53 = vpop.xlane.xlu0 %6506 }
 0x5c8   : > { %v7958_v41 = vsel %vm7623_vm2, %v7957_v1, %v7953_v58  ;;  %v7130_v2 = vmul.f32 0.020408163, %v6510_v25  ;;  %v7129_v21 = vmul.f32 0.020408163, %v6507_v53  ;;  %v6182_v1 = vld [vmem:[%s9825_s15 + $0x4b0] sm:$0xff] }
 0x5c9   : > { %v7963_v7 = vsel %vm7630_vm3, %v7962_v56, %v7958_v41  ;;  %v6183_v56 = vld [vmem:[%s9825_s15 + $0x4b8] sm:$0xff] }
 0x5ca   : > { %v7972_v59 = vrot.slane %v7130_v2, %v12278_v0  ;;  %v7967_v18 = vrot.slane %v7129_v21, %v12284_v48  ;;  %6719 = vadd.xlane.f32.xlu1 %v6718_v60  ;;  %6716 = vadd.xlane.f32.xlu0 %v6715_v9  ;;  %v6742_v2 = vsel %vm6288_vm12, %v6183_v56, 0.0  ;;  %v6739_v21 = vsel %vm6288_vm12, %v6182_v1, 0.0 }
 0x5cb   : > { %v6516_v11 = vpop.xlane.xlu1 %6515  ;;  %v6513_v28 = vpop.xlane.xlu0 %6512 }
 0x5cc   : > { %v7968_v36 = vsel %vm7637_vm4, %v7967_v18, %v7963_v7  ;;  %v7132_v31 = vmul.f32 0.020408163, %v6516_v11  ;;  %v7131_v19 = vmul.f32 0.020408163, %v6513_v28  ;;  %v6184_v18 = vld [vmem:[%s9825_s15 + $0x4c0] sm:$0xff] }
 0x5cd   : > { %v7973_v3 = vsel %vm14074_vm5, %v7972_v59, %v7968_v36  ;;  %vm8875_vm5 = vcmask 1042434   ;;  %v6185_v59 = vld [vmem:[%s9825_s15 + $0x4c8] sm:$0xff]  ;;  %v6745_v23 = vsel %vm6288_vm12, %v6184_v18, 0.0 }
 0x5ce   : > { %v7982_v47 = vrot.slane %v7132_v31, %v12294_v55  ;;  %v7977_v13 = vrot.slane %v7131_v19, %v12300_v34  ;;  %6725 = vadd.xlane.f32.xlu1 %v6724_v15  ;;  %6722 = vadd.xlane.f32.xlu0 %v6721_v37  ;;  %v6748_v19 = vsel %vm6288_vm12, %v6185_v59, 0.0 }
 0x5cf   : > { %v6522_v26 = vpop.xlane.xlu1 %6521  ;;  %v6519_v63 = vpop.xlane.xlu0 %6518 }
 0x5d0   : > { %v7978_v33 = vsel %vm7651_vm6, %v7977_v13, %v7973_v3  ;;  %v7134_v35 = vmul.f32 0.020408163, %v6522_v26  ;;  %v7133_v42 = vmul.f32 0.020408163, %v6519_v63  ;;  %v6186_v13 = vld [vmem:[%s9825_s15 + $0x4d0] sm:$0xff] }
 0x5d1   : > { %v7983_v10 = vsel %vm14075_vm0, %v7982_v47, %v7978_v33  ;;  %vm14076_vm0 = vcmask 654912  }
 0x5d2   : > { %v7992_v40 = vrot.slane %v7134_v35, %v12310_v52  ;;  %v7987_v45 = vrot.slane %v7133_v42, %v12316_v38  ;;  %6731 = vadd.xlane.f32.xlu1 %v6730_v5  ;;  %6728 = vadd.xlane.f32.xlu0 %v6727_v32  ;;  %v6751_v35 = vsel %vm6288_vm12, %v6186_v13, 0.0 }
 0x5d3   : > { %v6528_v12 = vpop.xlane.xlu1 %6527  ;;  %v6525_v39 = vpop.xlane.xlu0 %6524 }
 0x5d4   : > { %v7988_v50 = vsel %vm7665_vm9, %v7987_v45, %v7983_v10  ;;  %v7136_v57 = vmul.f32 0.020408163, %v6528_v12  ;;  %v7135_v58 = vmul.f32 0.020408163, %v6525_v39  ;;  %v6189_v10 = vld [vmem:[%s9825_s15 + $0x4e8] sm:$0xff] }
 0x5d5   : > { %v7993_v25 = vsel %vm7672_vm8, %v7992_v40, %v7988_v50  ;;  %v6188_v40 = vld [vmem:[%s9825_s15 + $0x4e0] sm:$0xff]  ;;  %v6760_v50 = vsel %vm6288_vm12, %v6189_v10, 0.0 }
 0x5d6   : > { %v8002_v53 = vrot.slane %v7136_v57, %v12326_v22  ;;  %v7997_v60 = vrot.slane %v7135_v58, %v12331_v20  ;;  %6737 = vadd.xlane.f32.xlu1 %v6736_v44  ;;  %6734 = vadd.xlane.f32.xlu0 %v6733_v61  ;;  %v6757_v57 = vsel %vm6288_vm12, %v6188_v40, 0.0 }
 0x5d7   : > { %v6534_v9 = vpop.xlane.xlu1 %6533  ;;  %v6531_v41 = vpop.xlane.xlu0 %6530 }
 0x5d8   : > { %v7998_v4 = vsel %vm7679_vm7, %v7997_v60, %v7993_v25  ;;  %v7138_v43 = vmul.f32 0.020408163, %v6534_v9  ;;  %v7137_v7 = vmul.f32 0.020408163, %v6531_v41  ;;  %v6191_v25 = vld [vmem:[%s9825_s15 + $0x4f8] sm:$0xff] }
 0x5d9   : > { %v8003_v11 = vsel %vm7686_vm10, %v8002_v53, %v7998_v4  ;;  %v6190_v53 = vld [vmem:[%s9825_s15 + $0x4f0] sm:$0xff]  ;;  %v6766_v4 = vsel %vm6288_vm12, %v6191_v25, 0.0 }
 0x5da   : > { %v12613_v28 = vsel %vm8875_vm5, %v8003_v11, %v12479_v17  ;;  %v8011_v15 = vrot.slane %v7138_v43, %v12229_v29  ;;  %v8007_v37 = vrot.slane %v7137_v7, %v12226_v14  ;;  %6743 = vadd.xlane.f32.xlu1 %v6742_v2  ;;  %6740 = vadd.xlane.f32.xlu0 %v6739_v21  ;;  %v6187_v17 = vld [vmem:[%s9825_s15 + $0x4d8] sm:$0xff]  ;;  %v6763_v43 = vsel %vm6288_vm12, %v6190_v53, 0.0  ;;  %v6193_v11 = vld [vmem:[%s9825_s15 + $0x508] sm:$0xff] }
 0x5db   : > { %v6540_v36 = vpop.xlane.xlu1 %6539  ;;  %v6537_v31 = vpop.xlane.xlu0 %6536  ;;  %v6754_v33 = vsel %vm6288_vm12, %v6187_v17, 0.0 }
 0x5dc   : > { %v8012_v24 = vsel %vm7588_vm13, %v8011_v15, %v8007_v37  ;;  %v7140_v3 = vmul.f32 0.020408163, %v6540_v36  ;;  %v7139_v47 = vmul.f32 0.020408163, %v6537_v31  ;;  %v6192_v15 = vld [vmem:[%s9825_s15 + $0x500] sm:$0xff] }
 0x5de   : > { %v8021_v26 = vrot.slane %v7140_v3, %v12238_v46  ;;  %v8016_v63 = vrot.slane %v7139_v47, %v12233_v30  ;;  %6749 = vadd.xlane.f32.xlu1 %v6748_v19  ;;  %6746 = vadd.xlane.f32.xlu0 %v6745_v23  ;;  %v6769_v3 = vsel %vm6288_vm12, %v6192_v15, 0.0 }
 0x5df   : > { %v6546_v5 = vpop.xlane.xlu1 %6545  ;;  %v6543_v32 = vpop.xlane.xlu0 %6542 }
 0x5e0   : > { %v8017_v42 = vsel %vm7595_vm14, %v8016_v63, %v8012_v24  ;;  %v7142_v54 = vmul.f32 0.020408163, %v6546_v5  ;;  %v7141_v6 = vmul.f32 0.020408163, %v6543_v32  ;;  %v6772_v24 = vsel %vm6288_vm12, %v6193_v11, 0.0  ;;  %v6194_v63 = vld [vmem:[%s9825_s15 + $0x510] sm:$0xff] }
 0x5e1   : > { %v8022_v45 = vsel %vm7602_vm15, %v8021_v26, %v8017_v42  ;;  %v6195_v26 = vld [vmem:[%s9825_s15 + $0x518] sm:$0xff] }
 0x5e2   : > { %v8031_v12 = vrot.slane %v7142_v54, %v12243_v51  ;;  %v8026_v39 = vrot.slane %v7141_v6, %v12250_v49  ;;  %6755 = vadd.xlane.f32.xlu1 %v6754_v33  ;;  %6752 = vadd.xlane.f32.xlu0 %v6751_v35  ;;  %v6778_v54 = vsel %vm6288_vm12, %v6195_v26, 0.0  ;;  %v6775_v6 = vsel %vm6288_vm12, %v6194_v63, 0.0 }
 0x5e3   : > { %v6552_v44 = vpop.xlane.xlu1 %6551  ;;  %v6549_v61 = vpop.xlane.xlu0 %6548 }
 0x5e4   : > { %v8027_v58 = vsel %vm7609_vm11, %v8026_v39, %v8022_v45  ;;  %v7144_v56 = vmul.f32 0.020408163, %v6552_v44  ;;  %v7143_v1 = vmul.f32 0.020408163, %v6549_v61  ;;  %v6196_v39 = vld [vmem:[%s9825_s15 + $0x520] sm:$0xff] }
 0x5e5   : > { %v8032_v60 = vsel %vm7616_vm1, %v8031_v12, %v8027_v58  ;;  %v6197_v12 = vld [vmem:[%s9825_s15 + $0x528] sm:$0xff] }
 0x5e6   : > { %v8041_v9 = vrot.slane %v7144_v56, %v12261_v27  ;;  %v8036_v41 = vrot.slane %v7143_v1, %v12264_v16  ;;  %6761 = vadd.xlane.f32.xlu1 %v6760_v50  ;;  %6758 = vadd.xlane.f32.xlu0 %v6757_v57  ;;  %v6784_v56 = vsel %vm6288_vm12, %v6197_v12, 0.0  ;;  %v6781_v1 = vsel %vm6288_vm12, %v6196_v39, 0.0 }
 0x5e7   : > { %v6558_v2 = vpop.xlane.xlu1 %6557  ;;  %v6555_v21 = vpop.xlane.xlu0 %6554 }
 0x5e8   : > { %v8037_v7 = vsel %vm7623_vm2, %v8036_v41, %v8032_v60  ;;  %v7146_v59 = vmul.f32 0.020408163, %v6558_v2  ;;  %v7145_v18 = vmul.f32 0.020408163, %v6555_v21  ;;  %v6198_v41 = vld [vmem:[%s9825_s15 + $0x530] sm:$0xff] }
 0x5e9   : > { %v8042_v37 = vsel %vm7630_vm3, %v8041_v9, %v8037_v7  ;;  %v6199_v9 = vld [vmem:[%s9825_s15 + $0x538] sm:$0xff] }
 0x5ea   : > { %v8051_v36 = vrot.slane %v7146_v59, %v12278_v0  ;;  %v8046_v31 = vrot.slane %v7145_v18, %v12284_v48  ;;  %6767 = vadd.xlane.f32.xlu1 %v6766_v4  ;;  %6764 = vadd.xlane.f32.xlu0 %v6763_v43  ;;  %v6790_v59 = vsel %vm6288_vm12, %v6199_v9, 0.0  ;;  %v6787_v18 = vsel %vm6288_vm12, %v6198_v41, 0.0 }
 0x5eb   : > { %v6564_v19 = vpop.xlane.xlu1 %6563  ;;  %v6561_v23 = vpop.xlane.xlu0 %6560 }
 0x5ec   : > { %v8047_v47 = vsel %vm7637_vm4, %v8046_v31, %v8042_v37  ;;  %v7148_v17 = vmul.f32 0.020408163, %v6564_v19  ;;  %v7147_v13 = vmul.f32 0.020408163, %v6561_v23  ;;  %v6200_v31 = vld [vmem:[%s9825_s15 + $0x540] sm:$0xff] }
 0x5ed   : > { %v8052_v5 = vsel %vm14076_vm0, %v8051_v36, %v8047_v47  ;;  %vm14077_vm0 = vcmask 786112   ;;  %v6201_v36 = vld [vmem:[%s9825_s15 + $0x548] sm:$0xff]  ;;  %v6793_v26 = vsel %vm6288_vm12, %v6200_v31, 0.0 }
 0x5ee   : > { %v8061_v32 = vrot.slane %v7148_v17, %v12294_v55  ;;  %v8056_v33 = vrot.slane %v7147_v13, %v12300_v34  ;;  %6773 = vadd.xlane.f32.xlu1 %v6772_v24  ;;  %6770 = vadd.xlane.f32.xlu0 %v6769_v3  ;;  %v6796_v13 = vsel %vm6288_vm12, %v6201_v36, 0.0 }
 0x5ef   : > { %v6570_v35 = vpop.xlane.xlu1 %6569  ;;  %v6567_v42 = vpop.xlane.xlu0 %6566 }
 0x5f0   : > { %v8057_v10 = vsel %vm7651_vm6, %v8056_v33, %v8052_v5  ;;  %v7150_v40 = vmul.f32 0.020408163, %v6570_v35  ;;  %v7149_v45 = vmul.f32 0.020408163, %v6567_v42  ;;  %v6202_v33 = vld [vmem:[%s9825_s15 + $0x550] sm:$0xff] }
 0x5f1   : > { %v8062_v44 = vsel %vm14077_vm0, %v8061_v32, %v8057_v10 }
 0x5f2   : > { %v8071_v61 = vrot.slane %v7150_v40, %v12310_v52  ;;  %v8066_v50 = vrot.slane %v7149_v45, %v12316_v38  ;;  %6779 = vadd.xlane.f32.xlu1 %v6778_v54  ;;  %6776 = vadd.xlane.f32.xlu0 %v6775_v6  ;;  %v6799_v40 = vsel %vm6288_vm12, %v6202_v33, 0.0 }
 0x5f3   : > { %v6576_v57 = vpop.xlane.xlu1 %6575  ;;  %v6573_v58 = vpop.xlane.xlu0 %6572 }
 0x5f4   : > { %v8067_v25 = vsel %vm7665_vm9, %v8066_v50, %v8062_v44  ;;  %v7152_v53 = vmul.f32 0.020408163, %v6576_v57  ;;  %v7151_v60 = vmul.f32 0.020408163, %v6573_v58  ;;  %v6205_v44 = vld [vmem:[%s9825_s15 + $0x568] sm:$0xff] }
 0x5f5   : > { %v8072_v2 = vsel %vm7672_vm8, %v8071_v61, %v8067_v25  ;;  %v6204_v61 = vld [vmem:[%s9825_s15 + $0x560] sm:$0xff]  ;;  %v6808_v25 = vsel %vm6288_vm12, %v6205_v44, 0.0 }
 0x5f6   : > { %v8081_v21 = vrot.slane %v7152_v53, %v12326_v22  ;;  %v8076_v4 = vrot.slane %v7151_v60, %v12331_v20  ;;  %6785 = vadd.xlane.f32.xlu1 %v6784_v56  ;;  %6782 = vadd.xlane.f32.xlu0 %v6781_v1  ;;  %v6805_v53 = vsel %vm6288_vm12, %v6204_v61, 0.0 }
 0x5f7   : > { %v6582_v43 = vpop.xlane.xlu1 %6581  ;;  %v6579_v7 = vpop.xlane.xlu0 %6578 }
 0x5f8   : > { %v8077_v11 = vsel %vm7679_vm7, %v8076_v4, %v8072_v2  ;;  %v7154_v15 = vmul.f32 0.020408163, %v6582_v43  ;;  %v7153_v37 = vmul.f32 0.020408163, %v6579_v7  ;;  %v6207_v2 = vld [vmem:[%s9825_s15 + $0x578] sm:$0xff] }
 0x5f9   : > { %v8082_v19 = vsel %vm7686_vm10, %v8081_v21, %v8077_v11  ;;  %v6206_v21 = vld [vmem:[%s9825_s15 + $0x570] sm:$0xff]  ;;  %v6814_v11 = vsel %vm6288_vm12, %v6207_v2, 0.0 }
 0x5fa   : > { %v12680_v23 = vsel %vm8875_vm5, %v8082_v19, %v12546_v62  ;;  %v8090_v24 = vrot.slane %v7154_v15, %v12229_v29  ;;  %v8086_v3 = vrot.slane %v7153_v37, %v12226_v14  ;;  %6791 = vadd.xlane.f32.xlu1 %v6790_v59  ;;  %6788 = vadd.xlane.f32.xlu0 %v6787_v18  ;;  %v6203_v62 = vld [vmem:[%s9825_s15 + $0x558] sm:$0xff]  ;;  %v6811_v15 = vsel %vm6288_vm12, %v6206_v21, 0.0  ;;  %v6209_v19 = vld [vmem:[%s9825_s15 + $0x588] sm:$0xff] }
 0x5fb   : > { %v6588_v47 = vpop.xlane.xlu1 %6587  ;;  %v6585_v17 = vpop.xlane.xlu0 %6584  ;;  %v6802_v10 = vsel %vm6288_vm12, %v6203_v62, 0.0  ;;  %vm14078_vm5 = vcmask 654912  }
 0x5fc   : > { %v8091_v63 = vsel %vm7588_vm13, %v8090_v24, %v8086_v3  ;;  %v7156_v5 = vmul.f32 0.020408163, %v6588_v47  ;;  %v7155_v32 = vmul.f32 0.020408163, %v6585_v17  ;;  %v6208_v24 = vld [vmem:[%s9825_s15 + $0x580] sm:$0xff] }
 0x5fe   : > { %v8100_v35 = vrot.slane %v7156_v5, %v12238_v46  ;;  %v8095_v42 = vrot.slane %v7155_v32, %v12233_v30  ;;  %6797 = vadd.xlane.f32.xlu1 %v6796_v13  ;;  %6794 = vadd.xlane.f32.xlu0 %v6793_v26  ;;  %v6817_v5 = vsel %vm6288_vm12, %v6208_v24, 0.0 }
 0x5ff   : > { %v6594_v54 = vpop.xlane.xlu1 %6593  ;;  %v6591_v6 = vpop.xlane.xlu0 %6590 }
 0x600   : > { %v8096_v45 = vsel %vm7595_vm14, %v8095_v42, %v8091_v63  ;;  %v7158_v12 = vmul.f32 0.020408163, %v6594_v54  ;;  %v7157_v39 = vmul.f32 0.020408163, %v6591_v6  ;;  %v6820_v63 = vsel %vm6288_vm12, %v6209_v19, 0.0  ;;  %v6210_v42 = vld [vmem:[%s9825_s15 + $0x590] sm:$0xff] }
 0x601   : > { %v8101_v50 = vsel %vm7602_vm15, %v8100_v35, %v8096_v45  ;;  %v6211_v35 = vld [vmem:[%s9825_s15 + $0x598] sm:$0xff] }
 0x602   : > { %v8110_v57 = vrot.slane %v7158_v12, %v12243_v51  ;;  %v8105_v58 = vrot.slane %v7157_v39, %v12250_v49  ;;  %6803 = vadd.xlane.f32.xlu1 %v6802_v10  ;;  %6800 = vadd.xlane.f32.xlu0 %v6799_v40  ;;  %v6826_v12 = vsel %vm6288_vm12, %v6211_v35, 0.0  ;;  %v6823_v39 = vsel %vm6288_vm12, %v6210_v42, 0.0 }
 0x603   : > { %v6600_v56 = vpop.xlane.xlu1 %6599  ;;  %v6597_v1 = vpop.xlane.xlu0 %6596 }
 0x604   : > { %v8106_v60 = vsel %vm7609_vm11, %v8105_v58, %v8101_v50  ;;  %v7160_v9 = vmul.f32 0.020408163, %v6600_v56  ;;  %v7159_v41 = vmul.f32 0.020408163, %v6597_v1  ;;  %v6212_v58 = vld [vmem:[%s9825_s15 + $0x5a0] sm:$0xff] }
 0x605   : > { %v8111_v4 = vsel %vm7616_vm1, %v8110_v57, %v8106_v60  ;;  %v6213_v57 = vld [vmem:[%s9825_s15 + $0x5a8] sm:$0xff] }
 0x606   : > { %v8120_v43 = vrot.slane %v7160_v9, %v12261_v27  ;;  %v8115_v7 = vrot.slane %v7159_v41, %v12264_v16  ;;  %6809 = vadd.xlane.f32.xlu1 %v6808_v25  ;;  %6806 = vadd.xlane.f32.xlu0 %v6805_v53  ;;  %v6832_v9 = vsel %vm6288_vm12, %v6213_v57, 0.0  ;;  %v6829_v41 = vsel %vm6288_vm12, %v6212_v58, 0.0 }
 0x607   : > { %v6606_v59 = vpop.xlane.xlu1 %6605  ;;  %v6603_v18 = vpop.xlane.xlu0 %6602 }
 0x608   : > { %v8116_v37 = vsel %vm7623_vm2, %v8115_v7, %v8111_v4  ;;  %v7162_v36 = vmul.f32 0.020408163, %v6606_v59  ;;  %v7161_v31 = vmul.f32 0.020408163, %v6603_v18  ;;  %v6214_v7 = vld [vmem:[%s9825_s15 + $0x5b0] sm:$0xff] }
 0x609   : > { %v8121_v3 = vsel %vm7630_vm3, %v8120_v43, %v8116_v37  ;;  %v6215_v43 = vld [vmem:[%s9825_s15 + $0x5b8] sm:$0xff] }
 0x60a   : > { %v8130_v47 = vrot.slane %v7162_v36, %v12278_v0  ;;  %v8125_v17 = vrot.slane %v7161_v31, %v12284_v48  ;;  %6815 = vadd.xlane.f32.xlu1 %v6814_v11  ;;  %6812 = vadd.xlane.f32.xlu0 %v6811_v15  ;;  %v6838_v36 = vsel %vm6288_vm12, %v6215_v43, 0.0  ;;  %v6835_v31 = vsel %vm6288_vm12, %v6214_v7, 0.0 }
 0x60b   : > { %v6612_v13 = vpop.xlane.xlu1 %6611  ;;  %v6609_v26 = vpop.xlane.xlu0 %6608 }
 0x60c   : > { %v8126_v32 = vsel %vm7637_vm4, %v8125_v17, %v8121_v3  ;;  %v7164_v62 = vmul.f32 0.020408163, %v6612_v13  ;;  %v7163_v33 = vmul.f32 0.020408163, %v6609_v26  ;;  %v6216_v17 = vld [vmem:[%s9825_s15 + $0x5c0] sm:$0xff] }
 0x60d   : > { %v8131_v54 = vsel %vm14078_vm5, %v8130_v47, %v8126_v32  ;;  %vm8877_vm5 = vcmask 1043459   ;;  %v6217_v47 = vld [vmem:[%s9825_s15 + $0x5c8] sm:$0xff]  ;;  %v6841_v35 = vsel %vm6288_vm12, %v6216_v17, 0.0 }
 0x60e   : > { %v8140_v6 = vrot.slane %v7164_v62, %v12294_v55  ;;  %v8135_v10 = vrot.slane %v7163_v33, %v12300_v34  ;;  %6821 = vadd.xlane.f32.xlu1 %v6820_v63  ;;  %6818 = vadd.xlane.f32.xlu0 %v6817_v5  ;;  %v6844_v33 = vsel %vm6288_vm12, %v6217_v47, 0.0 }
 0x60f   : > { %v6618_v40 = vpop.xlane.xlu1 %6617  ;;  %v6615_v45 = vpop.xlane.xlu0 %6614 }
 0x610   : > { %v8136_v44 = vsel %vm7651_vm6, %v8135_v10, %v8131_v54  ;;  %v7166_v61 = vmul.f32 0.020408163, %v6618_v40  ;;  %v7165_v50 = vmul.f32 0.020408163, %v6615_v45  ;;  %v6218_v10 = vld [vmem:[%s9825_s15 + $0x5d0] sm:$0xff] }
 0x611   : > { %v8141_v56 = vsel %vm14077_vm0, %v8140_v6, %v8136_v44  ;;  %vm14079_vm0 = vcmask 654912  }
 0x612   : > { %v8150_v1 = vrot.slane %v7166_v61, %v12310_v52  ;;  %v8145_v25 = vrot.slane %v7165_v50, %v12316_v38  ;;  %6827 = vadd.xlane.f32.xlu1 %v6826_v12  ;;  %6824 = vadd.xlane.f32.xlu0 %v6823_v39  ;;  %v6847_v61 = vsel %vm6288_vm12, %v6218_v10, 0.0 }
 0x613   : > { %v6624_v53 = vpop.xlane.xlu1 %6623  ;;  %v6621_v60 = vpop.xlane.xlu0 %6620 }
 0x614   : > { %v8146_v2 = vsel %vm7665_vm9, %v8145_v25, %v8141_v56  ;;  %v7168_v21 = vmul.f32 0.020408163, %v6624_v53  ;;  %v7167_v4 = vmul.f32 0.020408163, %v6621_v60  ;;  %v6221_v56 = vld [vmem:[%s9825_s15 + $0x5e8] sm:$0xff] }
 0x615   : > { %v8151_v59 = vsel %vm7672_vm8, %v8150_v1, %v8146_v2  ;;  %v6220_v1 = vld [vmem:[%s9825_s15 + $0x5e0] sm:$0xff]  ;;  %v6856_v2 = vsel %vm6288_vm12, %v6221_v56, 0.0 }
 0x616   : > { %v8160_v18 = vrot.slane %v7168_v21, %v12326_v22  ;;  %v8155_v11 = vrot.slane %v7167_v4, %v12331_v20  ;;  %6833 = vadd.xlane.f32.xlu1 %v6832_v9  ;;  %6830 = vadd.xlane.f32.xlu0 %v6829_v41  ;;  %v6853_v21 = vsel %vm6288_vm12, %v6220_v1, 0.0 }
 0x617   : > { %v6630_v15 = vpop.xlane.xlu1 %6629  ;;  %v6627_v37 = vpop.xlane.xlu0 %6626 }
 0x618   : > { %v8156_v19 = vsel %vm7679_vm7, %v8155_v11, %v8151_v59  ;;  %v7170_v24 = vmul.f32 0.020408163, %v6630_v15  ;;  %v7169_v3 = vmul.f32 0.020408163, %v6627_v37  ;;  %v6223_v59 = vld [vmem:[%s9825_s15 + $0x5f8] sm:$0xff] }
 0x619   : > { %v8161_v13 = vsel %vm7686_vm10, %v8160_v18, %v8156_v19  ;;  %v6222_v18 = vld [vmem:[%s9825_s15 + $0x5f0] sm:$0xff]  ;;  %v6862_v19 = vsel %vm6288_vm12, %v6223_v59, 0.0 }
 0x61a   : > { %v12747_v26 = vsel %vm8877_vm5, %v8161_v13, %v12613_v28  ;;  %v8169_v63 = vrot.slane %v7170_v24, %v12229_v29  ;;  %v8165_v5 = vrot.slane %v7169_v3, %v12226_v14  ;;  %6839 = vadd.xlane.f32.xlu1 %v6838_v36  ;;  %6836 = vadd.xlane.f32.xlu0 %v6835_v31  ;;  %v6219_v28 = vld [vmem:[%s9825_s15 + $0x5d8] sm:$0xff]  ;;  %v6859_v24 = vsel %vm6288_vm12, %v6222_v18, 0.0  ;;  %v6225_v13 = vld [vmem:[%s9825_s15 + $0x608] sm:$0xff] }
 0x61b   : > { %v6636_v32 = vpop.xlane.xlu1 %6635  ;;  %v6633_v62 = vpop.xlane.xlu0 %6632  ;;  %v6850_v44 = vsel %vm6288_vm12, %v6219_v28, 0.0 }
 0x61c   : > { %v8170_v42 = vsel %vm7588_vm13, %v8169_v63, %v8165_v5  ;;  %v7172_v54 = vmul.f32 0.020408163, %v6636_v32  ;;  %v7171_v6 = vmul.f32 0.020408163, %v6633_v62  ;;  %v6224_v63 = vld [vmem:[%s9825_s15 + $0x600] sm:$0xff] }
 0x61e   : > { %v8179_v40 = vrot.slane %v7172_v54, %v12238_v46  ;;  %v8174_v45 = vrot.slane %v7171_v6, %v12233_v30  ;;  %6845 = vadd.xlane.f32.xlu1 %v6844_v33  ;;  %6842 = vadd.xlane.f32.xlu0 %v6841_v35  ;;  %v6865_v54 = vsel %vm6288_vm12, %v6224_v63, 0.0 }
 0x61f   : > { %v6642_v12 = vpop.xlane.xlu1 %6641  ;;  %v6639_v39 = vpop.xlane.xlu0 %6638 }
 0x620   : > { %v8175_v50 = vsel %vm7595_vm14, %v8174_v45, %v8170_v42  ;;  %v7174_v57 = vmul.f32 0.020408163, %v6642_v12  ;;  %v7173_v58 = vmul.f32 0.020408163, %v6639_v39  ;;  %v6868_v42 = vsel %vm6288_vm12, %v6225_v13, 0.0  ;;  %v6226_v45 = vld [vmem:[%s9825_s15 + $0x610] sm:$0xff] }
 0x621   : > { %v8180_v25 = vsel %vm7602_vm15, %v8179_v40, %v8175_v50  ;;  %v6227_v40 = vld [vmem:[%s9825_s15 + $0x618] sm:$0xff] }
 0x622   : > { %v8189_v53 = vrot.slane %v7174_v57, %v12243_v51  ;;  %v8184_v60 = vrot.slane %v7173_v58, %v12250_v49  ;;  %6851 = vadd.xlane.f32.xlu1 %v6850_v44  ;;  %6848 = vadd.xlane.f32.xlu0 %v6847_v61  ;;  %v6874_v57 = vsel %vm6288_vm12, %v6227_v40, 0.0  ;;  %v6871_v58 = vsel %vm6288_vm12, %v6226_v45, 0.0 }
 0x623   : > { %v6648_v9 = vpop.xlane.xlu1 %6647  ;;  %v6645_v41 = vpop.xlane.xlu0 %6644 }
 0x624   : > { %v8185_v4 = vsel %vm7609_vm11, %v8184_v60, %v8180_v25  ;;  %v7176_v43 = vmul.f32 0.020408163, %v6648_v9  ;;  %v7175_v7 = vmul.f32 0.020408163, %v6645_v41  ;;  %v6228_v60 = vld [vmem:[%s9825_s15 + $0x620] sm:$0xff] }
 0x625   : > { %v8190_v11 = vsel %vm7616_vm1, %v8189_v53, %v8185_v4  ;;  %v6229_v53 = vld [vmem:[%s9825_s15 + $0x628] sm:$0xff] }
 0x626   : > { %v8199_v15 = vrot.slane %v7176_v43, %v12261_v27  ;;  %v8194_v37 = vrot.slane %v7175_v7, %v12264_v16  ;;  %6857 = vadd.xlane.f32.xlu1 %v6856_v2  ;;  %6854 = vadd.xlane.f32.xlu0 %v6853_v21  ;;  %v6880_v43 = vsel %vm6288_vm12, %v6229_v53, 0.0  ;;  %v6877_v7 = vsel %vm6288_vm12, %v6228_v60, 0.0 }
 0x627   : > { %v6654_v36 = vpop.xlane.xlu1 %6653  ;;  %v6651_v31 = vpop.xlane.xlu0 %6650 }
 0x628   : > { %v8195_v3 = vsel %vm7623_vm2, %v8194_v37, %v8190_v11  ;;  %v7178_v47 = vmul.f32 0.020408163, %v6654_v36  ;;  %v7177_v17 = vmul.f32 0.020408163, %v6651_v31  ;;  %v6230_v37 = vld [vmem:[%s9825_s15 + $0x630] sm:$0xff] }
 0x629   : > { %v8200_v5 = vsel %vm7630_vm3, %v8199_v15, %v8195_v3  ;;  %v6231_v15 = vld [vmem:[%s9825_s15 + $0x638] sm:$0xff] }
 0x62a   : > { %v8209_v32 = vrot.slane %v7178_v47, %v12278_v0  ;;  %v8204_v62 = vrot.slane %v7177_v17, %v12284_v48  ;;  %6863 = vadd.xlane.f32.xlu1 %v6862_v19  ;;  %6860 = vadd.xlane.f32.xlu0 %v6859_v24  ;;  %v6886_v47 = vsel %vm6288_vm12, %v6231_v15, 0.0  ;;  %v6883_v17 = vsel %vm6288_vm12, %v6230_v37, 0.0 }
 0x62b   : > { %v6660_v33 = vpop.xlane.xlu1 %6659  ;;  %v6657_v35 = vpop.xlane.xlu0 %6656 }
 0x62c   : > { %v8205_v6 = vsel %vm7637_vm4, %v8204_v62, %v8200_v5  ;;  %v7180_v28 = vmul.f32 0.020408163, %v6660_v33  ;;  %v7179_v10 = vmul.f32 0.020408163, %v6657_v35  ;;  %v6232_v62 = vld [vmem:[%s9825_s15 + $0x640] sm:$0xff] }
 0x62d   : > { %v8210_v12 = vsel %vm14079_vm0, %v8209_v32, %v8205_v6  ;;  %vm14080_vm0 = vcmask 786112   ;;  %v6233_v32 = vld [vmem:[%s9825_s15 + $0x648] sm:$0xff]  ;;  %v6889_v40 = vsel %vm6288_vm12, %v6232_v62, 0.0 }
 0x62e   : > { %v8219_v39 = vrot.slane %v7180_v28, %v12294_v55  ;;  %v8214_v44 = vrot.slane %v7179_v10, %v12300_v34  ;;  %6869 = vadd.xlane.f32.xlu1 %v6868_v42  ;;  %6866 = vadd.xlane.f32.xlu0 %v6865_v54  ;;  %v6892_v10 = vsel %vm6288_vm12, %v6233_v32, 0.0 }
 0x62f   : > { %v6666_v61 = vpop.xlane.xlu1 %6665  ;;  %v6663_v50 = vpop.xlane.xlu0 %6662 }
 0x630   : > { %v8215_v56 = vsel %vm7651_vm6, %v8214_v44, %v8210_v12  ;;  %v7182_v1 = vmul.f32 0.020408163, %v6666_v61  ;;  %v7181_v25 = vmul.f32 0.020408163, %v6663_v50  ;;  %v6234_v44 = vld [vmem:[%s9825_s15 + $0x650] sm:$0xff] }
 0x631   : > { %v8220_v9 = vsel %vm14080_vm0, %v8219_v39, %v8215_v56 }
 0x632   : > { %v8229_v41 = vrot.slane %v7182_v1, %v12310_v52  ;;  %v8224_v2 = vrot.slane %v7181_v25, %v12316_v38  ;;  %6875 = vadd.xlane.f32.xlu1 %v6874_v57  ;;  %6872 = vadd.xlane.f32.xlu0 %v6871_v58  ;;  %v6895_v1 = vsel %vm6288_vm12, %v6234_v44, 0.0 }
 0x633   : > { %v6672_v21 = vpop.xlane.xlu1 %6671  ;;  %v6669_v4 = vpop.xlane.xlu0 %6668 }
 0x634   : > { %v8225_v59 = vsel %vm7665_vm9, %v8224_v2, %v8220_v9  ;;  %v7184_v18 = vmul.f32 0.020408163, %v6672_v21  ;;  %v7183_v11 = vmul.f32 0.020408163, %v6669_v4  ;;  %v6237_v9 = vld [vmem:[%s9825_s15 + $0x668] sm:$0xff] }
 0x635   : > { %v8230_v36 = vsel %vm7672_vm8, %v8229_v41, %v8225_v59  ;;  %v6236_v41 = vld [vmem:[%s9825_s15 + $0x660] sm:$0xff]  ;;  %v6904_v59 = vsel %vm6288_vm12, %v6237_v9, 0.0 }
 0x636   : > { %v8239_v31 = vrot.slane %v7184_v18, %v12326_v22  ;;  %v8234_v19 = vrot.slane %v7183_v11, %v12331_v20  ;;  %6881 = vadd.xlane.f32.xlu1 %v6880_v43  ;;  %6878 = vadd.xlane.f32.xlu0 %v6877_v7  ;;  %v6901_v18 = vsel %vm6288_vm12, %v6236_v41, 0.0 }
 0x637   : > { %v6678_v24 = vpop.xlane.xlu1 %6677  ;;  %v6675_v3 = vpop.xlane.xlu0 %6674 }
 0x638   : > { %v8235_v13 = vsel %vm7679_vm7, %v8234_v19, %v8230_v36  ;;  %v7186_v63 = vmul.f32 0.020408163, %v6678_v24  ;;  %v7185_v5 = vmul.f32 0.020408163, %v6675_v3  ;;  %v6239_v36 = vld [vmem:[%s9825_s15 + $0x678] sm:$0xff] }
 0x639   : > { %v8240_v33 = vsel %vm7686_vm10, %v8239_v31, %v8235_v13  ;;  %v6238_v31 = vld [vmem:[%s9825_s15 + $0x670] sm:$0xff]  ;;  %v6910_v13 = vsel %vm6288_vm12, %v6239_v36, 0.0 }
 0x63a   : > { %v12814_v35 = vsel %vm8877_vm5, %v8240_v33, %v12680_v23  ;;  %v8248_v42 = vrot.slane %v7186_v63, %v12229_v29  ;;  %v8244_v54 = vrot.slane %v7185_v5, %v12226_v14  ;;  %6887 = vadd.xlane.f32.xlu1 %v6886_v47  ;;  %6884 = vadd.xlane.f32.xlu0 %v6883_v17  ;;  %v6235_v23 = vld [vmem:[%s9825_s15 + $0x658] sm:$0xff]  ;;  %v6907_v63 = vsel %vm6288_vm12, %v6238_v31, 0.0  ;;  %v6241_v33 = vld [vmem:[%s9825_s15 + $0x688] sm:$0xff] }
 0x63b   : > { %v6684_v6 = vpop.xlane.xlu1 %6683  ;;  %v6681_v28 = vpop.xlane.xlu0 %6680  ;;  %v6898_v56 = vsel %vm6288_vm12, %v6235_v23, 0.0  ;;  %vm14081_vm5 = vcmask 654912  }
 0x63c   : > { %v8249_v45 = vsel %vm7588_vm13, %v8248_v42, %v8244_v54  ;;  %v7188_v12 = vmul.f32 0.020408163, %v6684_v6  ;;  %v7187_v39 = vmul.f32 0.020408163, %v6681_v28  ;;  %v6240_v42 = vld [vmem:[%s9825_s15 + $0x680] sm:$0xff] }
 0x63e   : > { %v8258_v61 = vrot.slane %v7188_v12, %v12238_v46  ;;  %v8253_v50 = vrot.slane %v7187_v39, %v12233_v30  ;;  %6893 = vadd.xlane.f32.xlu1 %v6892_v10  ;;  %6890 = vadd.xlane.f32.xlu0 %v6889_v40  ;;  %v6913_v12 = vsel %vm6288_vm12, %v6240_v42, 0.0 }
 0x63f   : > { %v6690_v57 = vpop.xlane.xlu1 %6689  ;;  %v6687_v58 = vpop.xlane.xlu0 %6686 }
 0x640   : > { %v8254_v25 = vsel %vm7595_vm14, %v8253_v50, %v8249_v45  ;;  %v7190_v53 = vmul.f32 0.020408163, %v6690_v57  ;;  %v7189_v60 = vmul.f32 0.020408163, %v6687_v58  ;;  %v6916_v45 = vsel %vm6288_vm12, %v6241_v33, 0.0  ;;  %v6242_v50 = vld [vmem:[%s9825_s15 + $0x690] sm:$0xff] }
 0x641   : > { %v8259_v2 = vsel %vm7602_vm15, %v8258_v61, %v8254_v25  ;;  %v6256_v61 = vld [vmem:[%s9825_s15 + $0x700] sm:$0xff] }
 0x642   : > { %v8268_v21 = vrot.slane %v7190_v53, %v12243_v51  ;;  %v8263_v4 = vrot.slane %v7189_v60, %v12250_v49  ;;  %6899 = vadd.xlane.f32.xlu1 %v6898_v56  ;;  %6896 = vadd.xlane.f32.xlu0 %v6895_v1  ;;  %v6961_v53 = vsel %vm6288_vm12, %v6256_v61, 0.0  ;;  %v6919_v60 = vsel %vm6288_vm12, %v6242_v50, 0.0 }
 0x643   : > { %v6696_v43 = vpop.xlane.xlu1 %6695  ;;  %v6693_v7 = vpop.xlane.xlu0 %6692 }
 0x644   : > { %v8264_v11 = vsel %vm7609_vm11, %v8263_v4, %v8259_v2  ;;  %v7192_v15 = vmul.f32 0.020408163, %v6696_v43  ;;  %v7191_v37 = vmul.f32 0.020408163, %v6693_v7  ;;  %v6257_v4 = vld [vmem:[%s9825_s15 + $0x708] sm:$0xff] }
 0x645   : > { %v8269_v19 = vsel %vm7616_vm1, %v8268_v21, %v8264_v11  ;;  %v6272_v21 = vld [vmem:[%s9825_s15 + $0x780] sm:$0xff] }
 0x646   : > { %v8278_v24 = vrot.slane %v7192_v15, %v12261_v27  ;;  %v8273_v3 = vrot.slane %v7191_v37, %v12264_v16  ;;  %6905 = vadd.xlane.f32.xlu1 %v6904_v59  ;;  %6902 = vadd.xlane.f32.xlu0 %v6901_v18  ;;  %v7009_v15 = vsel %vm6288_vm12, %v6272_v21, 0.0  ;;  %v6964_v37 = vsel %vm6288_vm12, %v6257_v4, 0.0 }
 0x647   : > { %v6702_v47 = vpop.xlane.xlu1 %6701  ;;  %v6699_v17 = vpop.xlane.xlu0 %6698 }
 0x648   : > { %v8274_v5 = vsel %vm7623_vm2, %v8273_v3, %v8269_v19  ;;  %v7194_v32 = vmul.f32 0.020408163, %v6702_v47  ;;  %v7193_v62 = vmul.f32 0.020408163, %v6699_v17  ;;  %v6273_v3 = vld [vmem:[%s9825_s15 + $0x788] sm:$0xff] }
 0x649   : > { %v8279_v54 = vsel %vm7630_vm3, %v8278_v24, %v8274_v5  ;;  %v6243_v24 = vld [vmem:[%s9825_s15 + $0x698] sm:$0xff] }
 0x64a   : > { %v8288_v6 = vrot.slane %v7194_v32, %v12278_v0  ;;  %v8283_v28 = vrot.slane %v7193_v62, %v12284_v48  ;;  %6911 = vadd.xlane.f32.xlu1 %v6910_v13  ;;  %6908 = vadd.xlane.f32.xlu0 %v6907_v63  ;;  %v6922_v32 = vsel %vm6288_vm12, %v6243_v24, 0.0  ;;  %v7012_v62 = vsel %vm6288_vm12, %v6273_v3, 0.0 }
 0x64b   : > { %v6708_v10 = vpop.xlane.xlu1 %6707  ;;  %v6705_v40 = vpop.xlane.xlu0 %6704 }
 0x64c   : > { %v8284_v39 = vsel %vm7637_vm4, %v8283_v28, %v8279_v54  ;;  %v7196_v23 = vmul.f32 0.020408163, %v6708_v10  ;;  %v7195_v44 = vmul.f32 0.020408163, %v6705_v40  ;;  %v6258_v28 = vld [vmem:[%s9825_s15 + $0x710] sm:$0xff] }
 0x64d   : > { %v8289_v57 = vsel %vm14081_vm5, %v8288_v6, %v8284_v39  ;;  %vm8879_vm5 = vcmask 1044484   ;;  %v6274_v6 = vld [vmem:[%s9825_s15 + $0x790] sm:$0xff]  ;;  %v6967_v61 = vsel %vm6288_vm12, %v6258_v28, 0.0 }
 0x64e   : > { %v8298_v58 = vrot.slane %v7196_v23, %v12294_v55  ;;  %v8293_v56 = vrot.slane %v7195_v44, %v12300_v34  ;;  %6917 = vadd.xlane.f32.xlu1 %v6916_v45  ;;  %6914 = vadd.xlane.f32.xlu0 %v6913_v12  ;;  %v7015_v44 = vsel %vm6288_vm12, %v6274_v6, 0.0 }
 0x64f   : > { %v6714_v1 = vpop.xlane.xlu1 %6713  ;;  %v6711_v25 = vpop.xlane.xlu0 %6710 }
 0x650   : > { %v8294_v9 = vsel %vm7651_vm6, %v8293_v56, %v8289_v57  ;;  %v7198_v41 = vmul.f32 0.020408163, %v6714_v1  ;;  %v7197_v2 = vmul.f32 0.020408163, %v6711_v25  ;;  %v6244_v56 = vld [vmem:[%s9825_s15 + $0x6a0] sm:$0xff] }
 0x651   : > { %v8299_v43 = vsel %vm14080_vm0, %v8298_v58, %v8294_v9  ;;  %vm14082_vm0 = vcmask 654912  }
 0x652   : > { %v8308_v7 = vrot.slane %v7198_v41, %v12310_v52  ;;  %v8303_v59 = vrot.slane %v7197_v2, %v12316_v38  ;;  %6962 = vadd.xlane.f32.xlu1 %v6961_v53  ;;  %6920 = vadd.xlane.f32.xlu0 %v6919_v60  ;;  %v6925_v41 = vsel %vm6288_vm12, %v6244_v56, 0.0 }
 0x653   : > { %v6720_v18 = vpop.xlane.xlu1 %6719  ;;  %v6717_v11 = vpop.xlane.xlu0 %6716 }
 0x654   : > { %v8304_v36 = vsel %vm7665_vm9, %v8303_v59, %v8299_v43  ;;  %v7200_v31 = vmul.f32 0.020408163, %v6720_v18  ;;  %v7199_v19 = vmul.f32 0.020408163, %v6717_v11  ;;  %v6245_v43 = vld [vmem:[%s9825_s15 + $0x6a8] sm:$0xff] }
 0x655   : > { %v8309_v47 = vsel %vm7672_vm8, %v8308_v7, %v8304_v36  ;;  %v6275_v7 = vld [vmem:[%s9825_s15 + $0x798] sm:$0xff]  ;;  %v6928_v36 = vsel %vm6288_vm12, %v6245_v43, 0.0 }
 0x656   : > { %v8318_v17 = vrot.slane %v7200_v31, %v12326_v22  ;;  %v8313_v13 = vrot.slane %v7199_v19, %v12331_v20  ;;  %7010 = vadd.xlane.f32.xlu1 %v7009_v15  ;;  %6965 = vadd.xlane.f32.xlu0 %v6964_v37  ;;  %v7018_v31 = vsel %vm6288_vm12, %v6275_v7, 0.0 }
 0x657   : > { %v6726_v63 = vpop.xlane.xlu1 %6725  ;;  %v6723_v5 = vpop.xlane.xlu0 %6722 }
 0x658   : > { %v8314_v33 = vsel %vm7679_vm7, %v8313_v13, %v8309_v47  ;;  %v7202_v42 = vmul.f32 0.020408163, %v6726_v63  ;;  %v7201_v54 = vmul.f32 0.020408163, %v6723_v5  ;;  %v6276_v47 = vld [vmem:[%s9825_s15 + $0x7a0] sm:$0xff] }
 0x659   : > { %v8319_v10 = vsel %vm7686_vm10, %v8318_v17, %v8314_v33  ;;  %v6260_v17 = vld [vmem:[%s9825_s15 + $0x720] sm:$0xff]  ;;  %v7021_v33 = vsel %vm6288_vm12, %v6276_v47, 0.0 }
 0x65a   : > { %v12881_v40 = vsel %vm8879_vm5, %v8319_v10, %v12747_v26  ;;  %v8327_v45 = vrot.slane %v7202_v42, %v12229_v29  ;;  %v8323_v12 = vrot.slane %v7201_v54, %v12226_v14  ;;  %6923 = vadd.xlane.f32.xlu1 %v6922_v32  ;;  %7013 = vadd.xlane.f32.xlu0 %v7012_v62  ;;  %v6259_v26 = vld [vmem:[%s9825_s15 + $0x718] sm:$0xff]  ;;  %v6973_v42 = vsel %vm6288_vm12, %v6260_v17, 0.0  ;;  %v6261_v10 = vld [vmem:[%s9825_s15 + $0x728] sm:$0xff] }
 0x65b   : > { %v6732_v39 = vpop.xlane.xlu1 %6731  ;;  %v6729_v23 = vpop.xlane.xlu0 %6728  ;;  %v6970_v9 = vsel %vm6288_vm12, %v6259_v26, 0.0 }
 0x65c   : > { %v8328_v50 = vsel %vm7588_vm13, %v8327_v45, %v8323_v12  ;;  %v7204_v57 = vmul.f32 0.020408163, %v6732_v39  ;;  %v7203_v58 = vmul.f32 0.020408163, %v6729_v23  ;;  %v6246_v45 = vld [vmem:[%s9825_s15 + $0x6b0] sm:$0xff] }
 0x65e   : > { %v8337_v1 = vrot.slane %v7204_v57, %v12238_v46  ;;  %v8332_v25 = vrot.slane %v7203_v58, %v12233_v30  ;;  %7016 = vadd.xlane.f32.xlu1 %v7015_v44  ;;  %6968 = vadd.xlane.f32.xlu0 %v6967_v61  ;;  %v6931_v57 = vsel %vm6288_vm12, %v6246_v45, 0.0 }
 0x65f   : > { %v6738_v53 = vpop.xlane.xlu1 %6737  ;;  %v6735_v60 = vpop.xlane.xlu0 %6734 }
 0x660   : > { %v8333_v2 = vsel %vm7595_vm14, %v8332_v25, %v8328_v50  ;;  %v7206_v21 = vmul.f32 0.020408163, %v6738_v53  ;;  %v7205_v4 = vmul.f32 0.020408163, %v6735_v60  ;;  %v6976_v50 = vsel %vm6288_vm12, %v6261_v10, 0.0  ;;  %v6277_v25 = vld [vmem:[%s9825_s15 + $0x7a8] sm:$0xff] }
 0x661   : > { %v8338_v59 = vsel %vm7602_vm15, %v8337_v1, %v8333_v2  ;;  %v6247_v1 = vld [vmem:[%s9825_s15 + $0x6b8] sm:$0xff] }
 0x662   : > { %v8347_v18 = vrot.slane %v7206_v21, %v12243_v51  ;;  %v8342_v11 = vrot.slane %v7205_v4, %v12250_v49  ;;  %6971 = vadd.xlane.f32.xlu1 %v6970_v9  ;;  %6926 = vadd.xlane.f32.xlu0 %v6925_v41  ;;  %v6934_v21 = vsel %vm6288_vm12, %v6247_v1, 0.0  ;;  %v7024_v4 = vsel %vm6288_vm12, %v6277_v25, 0.0 }
 0x663   : > { %v6744_v15 = vpop.xlane.xlu1 %6743  ;;  %v6741_v37 = vpop.xlane.xlu0 %6740 }
 0x664   : > { %v8343_v19 = vsel %vm7609_vm11, %v8342_v11, %v8338_v59  ;;  %v7208_v24 = vmul.f32 0.020408163, %v6744_v15  ;;  %v7207_v3 = vmul.f32 0.020408163, %v6741_v37  ;;  %v6262_v11 = vld [vmem:[%s9825_s15 + $0x730] sm:$0xff] }
 0x665   : > { %v8348_v13 = vsel %vm7616_vm1, %v8347_v18, %v8343_v19  ;;  %v6278_v18 = vld [vmem:[%s9825_s15 + $0x7b0] sm:$0xff] }
 0x666   : > { %v8357_v63 = vrot.slane %v7208_v24, %v12261_v27  ;;  %v8352_v5 = vrot.slane %v7207_v3, %v12264_v16  ;;  %6929 = vadd.xlane.f32.xlu1 %v6928_v36  ;;  %7019 = vadd.xlane.f32.xlu0 %v7018_v31  ;;  %v7027_v24 = vsel %vm6288_vm12, %v6278_v18, 0.0  ;;  %v6979_v3 = vsel %vm6288_vm12, %v6262_v11, 0.0 }
 0x667   : > { %v6750_v32 = vpop.xlane.xlu1 %6749  ;;  %v6747_v62 = vpop.xlane.xlu0 %6746 }
 0x668   : > { %v8353_v54 = vsel %vm7623_vm2, %v8352_v5, %v8348_v13  ;;  %v7210_v6 = vmul.f32 0.020408163, %v6750_v32  ;;  %v7209_v28 = vmul.f32 0.020408163, %v6747_v62  ;;  %v6248_v5 = vld [vmem:[%s9825_s15 + $0x6c0] sm:$0xff] }
 0x669   : > { %v8358_v12 = vsel %vm7630_vm3, %v8357_v63, %v8353_v54  ;;  %v6263_v63 = vld [vmem:[%s9825_s15 + $0x738] sm:$0xff] }
 0x66a   : > { %v8367_v39 = vrot.slane %v7210_v6, %v12278_v0  ;;  %v8362_v23 = vrot.slane %v7209_v28, %v12284_v48  ;;  %7022 = vadd.xlane.f32.xlu1 %v7021_v33  ;;  %6974 = vadd.xlane.f32.xlu0 %v6973_v42  ;;  %v6982_v6 = vsel %vm6288_vm12, %v6263_v63, 0.0  ;;  %v6937_v28 = vsel %vm6288_vm12, %v6248_v5, 0.0 }
 0x66b   : > { %v6756_v44 = vpop.xlane.xlu1 %6755  ;;  %v6753_v61 = vpop.xlane.xlu0 %6752 }
 0x66c   : > { %v8363_v58 = vsel %vm7637_vm4, %v8362_v23, %v8358_v12  ;;  %v7212_v26 = vmul.f32 0.020408163, %v6756_v44  ;;  %v7211_v56 = vmul.f32 0.020408163, %v6753_v61  ;;  %v6279_v23 = vld [vmem:[%s9825_s15 + $0x7b8] sm:$0xff] }
 0x66d   : > { %v8368_v53 = vsel %vm14082_vm0, %v8367_v39, %v8363_v58  ;;  %vm14083_vm0 = vcmask 786112   ;;  %v6249_v39 = vld [vmem:[%s9825_s15 + $0x6c8] sm:$0xff]  ;;  %v7030_v1 = vsel %vm6288_vm12, %v6279_v23, 0.0 }
 0x66e   : > { %v8377_v60 = vrot.slane %v7212_v26, %v12294_v55  ;;  %v8372_v9 = vrot.slane %v7211_v56, %v12300_v34  ;;  %6977 = vadd.xlane.f32.xlu1 %v6976_v50  ;;  %6932 = vadd.xlane.f32.xlu0 %v6931_v57  ;;  %v6940_v56 = vsel %vm6288_vm12, %v6249_v39, 0.0 }
 0x66f   : > { %v6762_v41 = vpop.xlane.xlu1 %6761  ;;  %v6759_v2 = vpop.xlane.xlu0 %6758 }
 0x670   : > { %v8373_v43 = vsel %vm7651_vm6, %v8372_v9, %v8368_v53  ;;  %v7214_v7 = vmul.f32 0.020408163, %v6762_v41  ;;  %v7213_v59 = vmul.f32 0.020408163, %v6759_v2  ;;  %v6264_v9 = vld [vmem:[%s9825_s15 + $0x740] sm:$0xff] }
 0x671   : > { %v8378_v15 = vsel %vm14083_vm0, %v8377_v60, %v8373_v43 }
 0x672   : > { %v8387_v37 = vrot.slane %v7214_v7, %v12310_v52  ;;  %v8382_v36 = vrot.slane %v7213_v59, %v12316_v38  ;;  %6935 = vadd.xlane.f32.xlu1 %v6934_v21  ;;  %7025 = vadd.xlane.f32.xlu0 %v7024_v4  ;;  %v6985_v7 = vsel %vm6288_vm12, %v6264_v9, 0.0 }
 0x673   : > { %v6768_v31 = vpop.xlane.xlu1 %6767  ;;  %v6765_v19 = vpop.xlane.xlu0 %6764 }
 0x674   : > { %v8383_v47 = vsel %vm7665_vm9, %v8382_v36, %v8378_v15  ;;  %v7216_v17 = vmul.f32 0.020408163, %v6768_v31  ;;  %v7215_v13 = vmul.f32 0.020408163, %v6765_v19  ;;  %v6265_v15 = vld [vmem:[%s9825_s15 + $0x748] sm:$0xff] }
 0x675   : > { %v8388_v32 = vsel %vm7672_vm8, %v8387_v37, %v8383_v47  ;;  %v6250_v37 = vld [vmem:[%s9825_s15 + $0x6d0] sm:$0xff]  ;;  %v6988_v47 = vsel %vm6288_vm12, %v6265_v15, 0.0 }
 0x676   : > { %v8397_v62 = vrot.slane %v7216_v17, %v12326_v22  ;;  %v8392_v33 = vrot.slane %v7215_v13, %v12331_v20  ;;  %7028 = vadd.xlane.f32.xlu1 %v7027_v24  ;;  %6980 = vadd.xlane.f32.xlu0 %v6979_v3  ;;  %v6943_v17 = vsel %vm6288_vm12, %v6250_v37, 0.0 }
 0x677   : > { %v6774_v42 = vpop.xlane.xlu1 %6773  ;;  %v6771_v54 = vpop.xlane.xlu0 %6770 }
 0x678   : > { %v8393_v10 = vsel %vm7679_vm7, %v8392_v33, %v8388_v32  ;;  %v7218_v45 = vmul.f32 0.020408163, %v6774_v42  ;;  %v7217_v12 = vmul.f32 0.020408163, %v6771_v54  ;;  %v6251_v32 = vld [vmem:[%s9825_s15 + $0x6d8] sm:$0xff] }
 0x679   : > { %v8398_v44 = vsel %vm7686_vm10, %v8397_v62, %v8393_v10  ;;  %v6281_v62 = vld [vmem:[%s9825_s15 + $0x7c8] sm:$0xff]  ;;  %v6946_v10 = vsel %vm6288_vm12, %v6251_v32, 0.0 }
 0x67a   : > { %v12948_v61 = vsel %vm8879_vm5, %v8398_v44, %v12814_v35  ;;  %v8406_v50 = vrot.slane %v7218_v45, %v12229_v29  ;;  %v8402_v57 = vrot.slane %v7217_v12, %v12226_v14  ;;  %6983 = vadd.xlane.f32.xlu1 %v6982_v6  ;;  %6938 = vadd.xlane.f32.xlu0 %v6937_v28  ;;  %v6280_v35 = vld [vmem:[%s9825_s15 + $0x7c0] sm:$0xff]  ;;  %v7036_v45 = vsel %vm6288_vm12, %v6281_v62, 0.0  ;;  %v6282_v44 = vld [vmem:[%s9825_s15 + $0x7d0] sm:$0xff] }
 0x67b   : > { %v6780_v58 = vpop.xlane.xlu1 %6779  ;;  %v6777_v26 = vpop.xlane.xlu0 %6776  ;;  %v7033_v43 = vsel %vm6288_vm12, %v6280_v35, 0.0  ;;  %vm14084_vm5 = vcmask 654912  }
 0x67c   : > { %v8407_v25 = vsel %vm7588_vm13, %v8406_v50, %v8402_v57  ;;  %v7220_v53 = vmul.f32 0.020408163, %v6780_v58  ;;  %v7219_v60 = vmul.f32 0.020408163, %v6777_v26  ;;  %v6266_v50 = vld [vmem:[%s9825_s15 + $0x750] sm:$0xff] }
 0x67e   : > { %v8416_v41 = vrot.slane %v7220_v53, %v12238_v46  ;;  %v8411_v2 = vrot.slane %v7219_v60, %v12233_v30  ;;  %6941 = vadd.xlane.f32.xlu1 %v6940_v56  ;;  %7031 = vadd.xlane.f32.xlu0 %v7030_v1  ;;  %v6991_v53 = vsel %vm6288_vm12, %v6266_v50, 0.0 }
 0x67f   : > { %v6786_v21 = vpop.xlane.xlu1 %6785  ;;  %v6783_v4 = vpop.xlane.xlu0 %6782 }
 0x680   : > { %v8412_v59 = vsel %vm7595_vm14, %v8411_v2, %v8407_v25  ;;  %v7222_v18 = vmul.f32 0.020408163, %v6786_v21  ;;  %v7221_v11 = vmul.f32 0.020408163, %v6783_v4  ;;  %v7039_v25 = vsel %vm6288_vm12, %v6282_v44, 0.0  ;;  %v6252_v2 = vld [vmem:[%s9825_s15 + $0x6e0] sm:$0xff] }
 0x681   : > { %v8417_v36 = vsel %vm7602_vm15, %v8416_v41, %v8412_v59  ;;  %v6267_v41 = vld [vmem:[%s9825_s15 + $0x758] sm:$0xff] }
 0x682   : > { %v8426_v31 = vrot.slane %v7222_v18, %v12243_v51  ;;  %v8421_v19 = vrot.slane %v7221_v11, %v12250_v49  ;;  %7034 = vadd.xlane.f32.xlu1 %v7033_v43  ;;  %6986 = vadd.xlane.f32.xlu0 %v6985_v7  ;;  %v6994_v18 = vsel %vm6288_vm12, %v6267_v41, 0.0  ;;  %v6949_v11 = vsel %vm6288_vm12, %v6252_v2, 0.0 }
 0x683   : > { %v6792_v24 = vpop.xlane.xlu1 %6791  ;;  %v6789_v3 = vpop.xlane.xlu0 %6788 }
 0x684   : > { %v8422_v13 = vsel %vm7609_vm11, %v8421_v19, %v8417_v36  ;;  %v7224_v63 = vmul.f32 0.020408163, %v6792_v24  ;;  %v7223_v5 = vmul.f32 0.020408163, %v6789_v3  ;;  %v6283_v19 = vld [vmem:[%s9825_s15 + $0x7d8] sm:$0xff] }
 0x685   : > { %v8427_v33 = vsel %vm7616_vm1, %v8426_v31, %v8422_v13  ;;  %v6253_v31 = vld [vmem:[%s9825_s15 + $0x6e8] sm:$0xff] }
 0x686   : > { %v8436_v42 = vrot.slane %v7224_v63, %v12261_v27  ;;  %v8431_v54 = vrot.slane %v7223_v5, %v12264_v16  ;;  %6989 = vadd.xlane.f32.xlu1 %v6988_v47  ;;  %6944 = vadd.xlane.f32.xlu0 %v6943_v17  ;;  %v6952_v63 = vsel %vm6288_vm12, %v6253_v31, 0.0  ;;  %v7042_v5 = vsel %vm6288_vm12, %v6283_v19, 0.0 }
 0x687   : > { %v6798_v6 = vpop.xlane.xlu1 %6797  ;;  %v6795_v28 = vpop.xlane.xlu0 %6794 }
 0x688   : > { %v8432_v12 = vsel %vm7623_vm2, %v8431_v54, %v8427_v33  ;;  %v7226_v39 = vmul.f32 0.020408163, %v6798_v6  ;;  %v7225_v23 = vmul.f32 0.020408163, %v6795_v28  ;;  %v6268_v54 = vld [vmem:[%s9825_s15 + $0x760] sm:$0xff] }
 0x689   : > { %v8437_v57 = vsel %vm7630_vm3, %v8436_v42, %v8432_v12  ;;  %v6284_v42 = vld [vmem:[%s9825_s15 + $0x7e0] sm:$0xff] }
 0x68a   : > { %v8446_v58 = vrot.slane %v7226_v39, %v12278_v0  ;;  %v8441_v26 = vrot.slane %v7225_v23, %v12284_v48  ;;  %6947 = vadd.xlane.f32.xlu1 %v6946_v10  ;;  %7037 = vadd.xlane.f32.xlu0 %v7036_v45  ;;  %v7045_v39 = vsel %vm6288_vm12, %v6284_v42, 0.0  ;;  %v6997_v23 = vsel %vm6288_vm12, %v6268_v54, 0.0 }
 0x68b   : > { %v6804_v56 = vpop.xlane.xlu1 %6803  ;;  %v6801_v1 = vpop.xlane.xlu0 %6800 }
 0x68c   : > { %v8442_v60 = vsel %vm7637_vm4, %v8441_v26, %v8437_v57  ;;  %v7228_v35 = vmul.f32 0.020408163, %v6804_v56  ;;  %v7227_v9 = vmul.f32 0.020408163, %v6801_v1  ;;  %v6254_v26 = vld [vmem:[%s9825_s15 + $0x6f0] sm:$0xff] }
 0x68d   : > { %v8447_v21 = vsel %vm14084_vm5, %v8446_v58, %v8442_v60  ;;  %vm8881_vm5 = vcmask 1045509   ;;  %v6269_v58 = vld [vmem:[%s9825_s15 + $0x768] sm:$0xff]  ;;  %v6955_v41 = vsel %vm6288_vm12, %v6254_v26, 0.0 }
 0x68e   : > { %v8456_v4 = vrot.slane %v7228_v35, %v12294_v55  ;;  %v8451_v43 = vrot.slane %v7227_v9, %v12300_v34  ;;  %7040 = vadd.xlane.f32.xlu1 %v7039_v25  ;;  %6992 = vadd.xlane.f32.xlu0 %v6991_v53  ;;  %v7000_v9 = vsel %vm6288_vm12, %v6269_v58, 0.0 }
 0x68f   : > { %v6810_v7 = vpop.xlane.xlu1 %6809  ;;  %v6807_v59 = vpop.xlane.xlu0 %6806 }
 0x690   : > { %v8452_v15 = vsel %vm7651_vm6, %v8451_v43, %v8447_v21  ;;  %v7230_v37 = vmul.f32 0.020408163, %v6810_v7  ;;  %v7229_v36 = vmul.f32 0.020408163, %v6807_v59  ;;  %v6285_v43 = vld [vmem:[%s9825_s15 + $0x7e8] sm:$0xff] }
 0x691   : > { %v8457_v24 = vsel %vm14083_vm0, %v8456_v4, %v8452_v15  ;;  %vm14085_vm0 = vcmask 654912  }
 0x692   : > { %v8466_v3 = vrot.slane %v7230_v37, %v12310_v52  ;;  %v8461_v47 = vrot.slane %v7229_v36, %v12316_v38  ;;  %6995 = vadd.xlane.f32.xlu1 %v6994_v18  ;;  %6950 = vadd.xlane.f32.xlu0 %v6949_v11  ;;  %v7048_v37 = vsel %vm6288_vm12, %v6285_v43, 0.0 }
 0x693   : > { %v6816_v17 = vpop.xlane.xlu1 %6815  ;;  %v6813_v13 = vpop.xlane.xlu0 %6812 }
 0x694   : > { %v8462_v32 = vsel %vm7665_vm9, %v8461_v47, %v8457_v24  ;;  %v7232_v62 = vmul.f32 0.020408163, %v6816_v17  ;;  %v7231_v33 = vmul.f32 0.020408163, %v6813_v13  ;;  %v6286_v24 = vld [vmem:[%s9825_s15 + $0x7f0] sm:$0xff] }
 0x695   : > { %v8467_v6 = vsel %vm7672_vm8, %v8466_v3, %v8462_v32  ;;  %v6270_v3 = vld [vmem:[%s9825_s15 + $0x770] sm:$0xff]  ;;  %v7051_v32 = vsel %vm6288_vm12, %v6286_v24, 0.0 }
 0x696   : > { %v8476_v28 = vrot.slane %v7232_v62, %v12326_v22  ;;  %v8471_v10 = vrot.slane %v7231_v33, %v12331_v20  ;;  %6953 = vadd.xlane.f32.xlu1 %v6952_v63  ;;  %7043 = vadd.xlane.f32.xlu0 %v7042_v5  ;;  %v7003_v62 = vsel %vm6288_vm12, %v6270_v3, 0.0 }
 0x697   : > { %v6822_v45 = vpop.xlane.xlu1 %6821  ;;  %v6819_v12 = vpop.xlane.xlu0 %6818 }
 0x698   : > { %v8472_v44 = vsel %vm7679_vm7, %v8471_v10, %v8467_v6  ;;  %v7234_v50 = vmul.f32 0.020408163, %v6822_v45  ;;  %v7233_v57 = vmul.f32 0.020408163, %v6819_v12  ;;  %v6287_v6 = vld [vmem:[%s9825_s15 + $0x7f8] sm:$0xff] }
 0x699   : > { %v8477_v56 = vsel %vm7686_vm10, %v8476_v28, %v8472_v44  ;;  %v6271_v28 = vld [vmem:[%s9825_s15 + $0x778] sm:$0xff]  ;;  %v7054_v44 = vsel %vm6288_vm12, %v6287_v6, 0.0 }
 0x69a   : > { %v13015_v1 = vsel %vm8881_vm5, %v8477_v56, %v12881_v40  ;;  %v8485_v25 = vrot.slane %v7234_v50, %v12229_v29  ;;  %v8481_v53 = vrot.slane %v7233_v57, %v12226_v14  ;;  %7046 = vadd.xlane.f32.xlu1 %v7045_v39  ;;  %6998 = vadd.xlane.f32.xlu0 %v6997_v23  ;;  %v6255_v40 = vld [vmem:[%s9825_s15 + $0x6f8] sm:$0xff]  ;;  %v7006_v50 = vsel %vm6288_vm12, %v6271_v28, 0.0 }
 0x69b   : > { %v6828_v60 = vpop.xlane.xlu1 %6827  ;;  %v6825_v35 = vpop.xlane.xlu0 %6824  ;;  %v6958_v15 = vsel %vm6288_vm12, %v6255_v40, 0.0  ;;  %vm14086_vm12 = vcmask 786112  }
 0x69c   : > { %v8486_v2 = vsel %vm7588_vm13, %v8485_v25, %v8481_v53  ;;  %v7236_v21 = vmul.f32 0.020408163, %v6828_v60  ;;  %v7235_v4 = vmul.f32 0.020408163, %v6825_v35 }
 0x69e   : > { %v8495_v7 = vrot.slane %v7236_v21, %v12238_v46  ;;  %v8490_v59 = vrot.slane %v7235_v4, %v12233_v30  ;;  %7001 = vadd.xlane.f32.xlu1 %v7000_v9  ;;  %6956 = vadd.xlane.f32.xlu0 %v6955_v41 }
 0x69f   : > { %v6834_v18 = vpop.xlane.xlu1 %6833  ;;  %v6831_v11 = vpop.xlane.xlu0 %6830 }
 0x6a0   : > { %v8491_v36 = vsel %vm7595_vm14, %v8490_v59, %v8486_v2  ;;  %v7238_v31 = vmul.f32 0.020408163, %v6834_v18  ;;  %v7237_v19 = vmul.f32 0.020408163, %v6831_v11 }
 0x6a1   : > { %v8496_v47 = vsel %vm7602_vm15, %v8495_v7, %v8491_v36 }
 0x6a2   : > { %v8505_v17 = vrot.slane %v7238_v31, %v12243_v51  ;;  %v8500_v13 = vrot.slane %v7237_v19, %v12250_v49  ;;  %6959 = vadd.xlane.f32.xlu1 %v6958_v15  ;;  %7049 = vadd.xlane.f32.xlu0 %v7048_v37 }
 0x6a3   : > { %v6840_v63 = vpop.xlane.xlu1 %6839  ;;  %v6837_v5 = vpop.xlane.xlu0 %6836 }
 0x6a4   : > { %v8501_v33 = vsel %vm7609_vm11, %v8500_v13, %v8496_v47  ;;  %v7240_v42 = vmul.f32 0.020408163, %v6840_v63  ;;  %v7239_v54 = vmul.f32 0.020408163, %v6837_v5 }
 0x6a5   : > { %v8506_v10 = vsel %vm7616_vm1, %v8505_v17, %v8501_v33 }
 0x6a6   : > { %v8515_v45 = vrot.slane %v7240_v42, %v12261_v27  ;;  %v8510_v12 = vrot.slane %v7239_v54, %v12264_v16  ;;  %7052 = vadd.xlane.f32.xlu1 %v7051_v32  ;;  %7004 = vadd.xlane.f32.xlu0 %v7003_v62 }
 0x6a7   : > { %v6846_v39 = vpop.xlane.xlu1 %6845  ;;  %v6843_v23 = vpop.xlane.xlu0 %6842 }
 0x6a8   : > { %v8511_v57 = vsel %vm7623_vm2, %v8510_v12, %v8506_v10  ;;  %v7242_v58 = vmul.f32 0.020408163, %v6846_v39  ;;  %v7241_v26 = vmul.f32 0.020408163, %v6843_v23 }
 0x6a9   : > { %v8516_v56 = vsel %vm7630_vm3, %v8515_v45, %v8511_v57 }
 0x6aa   : > { %v8525_v25 = vrot.slane %v7242_v58, %v12278_v0  ;;  %v8520_v53 = vrot.slane %v7241_v26, %v12284_v48  ;;  %7055 = vadd.xlane.f32.xlu1 %v7054_v44  ;;  %7007 = vadd.xlane.f32.xlu0 %v7006_v50 }
 0x6ab   : > { %v6852_v60 = vpop.xlane.xlu1 %6851  ;;  %v6849_v35 = vpop.xlane.xlu0 %6848 }
 0x6ac   : > { %v8521_v9 = vsel %vm7637_vm4, %v8520_v53, %v8516_v56  ;;  %v7244_v41 = vmul.f32 0.020408163, %v6852_v60  ;;  %v7243_v2 = vmul.f32 0.020408163, %v6849_v35 }
 0x6ad   : > { %v8526_v21 = vsel %vm14085_vm0, %v8525_v25, %v8521_v9 }
 0x6ae   : > { %v8535_v4 = vrot.slane %v7244_v41, %v12294_v55  ;;  %v8530_v40 = vrot.slane %v7243_v2, %v12300_v34 }
 0x6af   : > { %v6858_v43 = vpop.xlane.xlu1 %6857  ;;  %v6855_v7 = vpop.xlane.xlu0 %6854 }
 0x6b0   : > { %v8531_v59 = vsel %vm7651_vm6, %v8530_v40, %v8526_v21  ;;  %v7246_v18 = vmul.f32 0.020408163, %v6858_v43  ;;  %v7245_v11 = vmul.f32 0.020408163, %v6855_v7 }
 0x6b1   : > { %v8536_v15 = vsel %vm14086_vm12, %v8535_v4, %v8531_v59 }
 0x6b2   : > { %v8545_v37 = vrot.slane %v7246_v18, %v12310_v52  ;;  %v8540_v36 = vrot.slane %v7245_v11, %v12316_v38 }
 0x6b3   : > { %v6864_v31 = vpop.xlane.xlu1 %6863  ;;  %v6861_v19 = vpop.xlane.xlu0 %6860 }
 0x6b4   : > { %v8541_v24 = vsel %vm7665_vm9, %v8540_v36, %v8536_v15  ;;  %v7248_v3 = vmul.f32 0.020408163, %v6864_v31  ;;  %v7247_v47 = vmul.f32 0.020408163, %v6861_v19 }
 0x6b5   : > { %v8546_v17 = vsel %vm7672_vm8, %v8545_v37, %v8541_v24 }
 0x6b6   : > { %v8555_v13 = vrot.slane %v7248_v3, %v12326_v22  ;;  %v8550_v63 = vrot.slane %v7247_v47, %v12331_v20 }
 0x6b7   : > { %v6870_v5 = vpop.xlane.xlu1 %6869  ;;  %v6867_v32 = vpop.xlane.xlu0 %6866 }
 0x6b8   : > { %v8551_v62 = vsel %vm7679_vm7, %v8550_v63, %v8546_v17  ;;  %v7250_v33 = vmul.f32 0.020408163, %v6870_v5  ;;  %v7249_v42 = vmul.f32 0.020408163, %v6867_v32 }
 0x6b9   : > { %v8556_v54 = vsel %vm7686_vm10, %v8555_v13, %v8551_v62 }
 0x6ba   : > { %v8564_v6 = vrot.slane %v7250_v33, %v12229_v29  ;;  %v8560_v28 = vrot.slane %v7249_v42, %v12226_v14  ;;  %v13066_v10 = vsel %vm8881_vm5, %v8556_v54, %v12948_v61  ;;  %vm14087_vm5 = vmmov %vm14085_vm0 }
 0x6bb   : > { %v6876_v45 = vpop.xlane.xlu1 %6875  ;;  %v6873_v12 = vpop.xlane.xlu0 %6872  ;;  %vm14088_vm0 = vmmov %vm14086_vm12  ;;  %vm8883_vm12 = vcmask 1046534  }
 0x6bc   : > { %v8565_v39 = vsel %vm7588_vm13, %v8564_v6, %v8560_v28  ;;  %v7252_v23 = vmul.f32 0.020408163, %v6876_v45  ;;  %v7251_v44 = vmul.f32 0.020408163, %v6873_v12 }
 0x6be   : > { %v8574_v50 = vrot.slane %v7252_v23, %v12238_v46  ;;  %v8569_v57 = vrot.slane %v7251_v44, %v12233_v30 }
 0x6bf   : > { %v6882_v58 = vpop.xlane.xlu1 %6881  ;;  %v6879_v26 = vpop.xlane.xlu0 %6878 }
 0x6c0   : > { %v8570_v56 = vsel %vm7595_vm14, %v8569_v57, %v8565_v39  ;;  %v7254_v25 = vmul.f32 0.020408163, %v6882_v58  ;;  %v7253_v53 = vmul.f32 0.020408163, %v6879_v26 }
 0x6c1   : > { %v8575_v60 = vsel %vm7602_vm15, %v8574_v50, %v8570_v56 }
 0x6c2   : > { %v8584_v61 = vrot.slane %v7254_v25, %v12243_v51  ;;  %v8579_v35 = vrot.slane %v7253_v53, %v12250_v49 }
 0x6c3   : > { %v6888_v9 = vpop.xlane.xlu1 %6887  ;;  %v6885_v41 = vpop.xlane.xlu0 %6884 }
 0x6c4   : > { %v8580_v2 = vsel %vm7609_vm11, %v8579_v35, %v8575_v60  ;;  %v7256_v21 = vmul.f32 0.020408163, %v6888_v9  ;;  %v7255_v4 = vmul.f32 0.020408163, %v6885_v41 }
 0x6c5   : > { %v8585_v40 = vsel %vm7616_vm1, %v8584_v61, %v8580_v2 }
 0x6c6   : > { %v8594_v43 = vrot.slane %v7256_v21, %v12261_v27  ;;  %v8589_v7 = vrot.slane %v7255_v4, %v12264_v16 }
 0x6c7   : > { %v6894_v59 = vpop.xlane.xlu1 %6893  ;;  %v6891_v18 = vpop.xlane.xlu0 %6890 }
 0x6c8   : > { %v8590_v11 = vsel %vm7623_vm2, %v8589_v7, %v8585_v40  ;;  %v7258_v15 = vmul.f32 0.020408163, %v6894_v59  ;;  %v7257_v37 = vmul.f32 0.020408163, %v6891_v18 }
 0x6c9   : > { %v8595_v36 = vsel %vm7630_vm3, %v8594_v43, %v8590_v11 }
 0x6ca   : > { %v8604_v31 = vrot.slane %v7258_v15, %v12278_v0  ;;  %v8599_v19 = vrot.slane %v7257_v37, %v12284_v48 }
 0x6cb   : > { %v6900_v24 = vpop.xlane.xlu1 %6899  ;;  %v6897_v3 = vpop.xlane.xlu0 %6896 }
 0x6cc   : > { %v8600_v47 = vsel %vm7637_vm4, %v8599_v19, %v8595_v36  ;;  %v7260_v17 = vmul.f32 0.020408163, %v6900_v24  ;;  %v7259_v13 = vmul.f32 0.020408163, %v6897_v3 }
 0x6cd   : > { %v8605_v63 = vsel %vm14087_vm5, %v8604_v31, %v8600_v47 }
 0x6ce   : > { %v8614_v5 = vrot.slane %v7260_v17, %v12294_v55  ;;  %v8609_v32 = vrot.slane %v7259_v13, %v12300_v34 }
 0x6cf   : > { %v6906_v62 = vpop.xlane.xlu1 %6905  ;;  %v6903_v33 = vpop.xlane.xlu0 %6902 }
 0x6d0   : > { %v8610_v42 = vsel %vm7651_vm6, %v8609_v32, %v8605_v63  ;;  %v7262_v54 = vmul.f32 0.020408163, %v6906_v62  ;;  %v7261_v6 = vmul.f32 0.020408163, %v6903_v33 }
 0x6d1   : > { %v8615_v28 = vsel %vm14088_vm0, %v8614_v5, %v8610_v42 }
 0x6d2   : > { %v8624_v45 = vrot.slane %v7262_v54, %v12310_v52  ;;  %v8619_v12 = vrot.slane %v7261_v6, %v12316_v38 }
 0x6d3   : > { %v6912_v39 = vpop.xlane.xlu1 %6911  ;;  %v6909_v23 = vpop.xlane.xlu0 %6908 }
 0x6d4   : > { %v8620_v44 = vsel %vm7665_vm9, %v8619_v12, %v8615_v28  ;;  %v7264_v50 = vmul.f32 0.020408163, %v6912_v39  ;;  %v7263_v57 = vmul.f32 0.020408163, %v6909_v23 }
 0x6d5   : > { %v8625_v58 = vsel %vm7672_vm8, %v8624_v45, %v8620_v44 }
 0x6d6   : > { %v8634_v26 = vrot.slane %v7264_v50, %v12326_v22  ;;  %v8629_v56 = vrot.slane %v7263_v57, %v12331_v20 }
 0x6d7   : > { %v6918_v25 = vpop.xlane.xlu1 %6917  ;;  %v6915_v53 = vpop.xlane.xlu0 %6914 }
 0x6d8   : > { %v8630_v60 = vsel %vm7679_vm7, %v8629_v56, %v8625_v58  ;;  %v7266_v61 = vmul.f32 0.020408163, %v6918_v25  ;;  %v7265_v35 = vmul.f32 0.020408163, %v6915_v53 }
 0x6d9   : > { %v8635_v9 = vsel %vm7686_vm10, %v8634_v26, %v8630_v60 }
 0x6da   : > { %v8643_v41 = vrot.slane %v7266_v61, %v12229_v29  ;;  %v8639_v2 = vrot.slane %v7265_v35, %v12226_v14  ;;  %v13101_v21 = vsel %vm8883_vm12, %v8635_v9, %v13015_v1 }
 0x6db   : > { %v6963_v4 = vpop.xlane.xlu1 %6962  ;;  %v6921_v40 = vpop.xlane.xlu0 %6920 }
 0x6dc   : > { %v8644_v43 = vsel %vm7588_vm13, %v8643_v41, %v8639_v2  ;;  %v7267_v7 = vmul.f32 0.020408163, %v6921_v40  ;;  %v7281_v59 = vmul.f32 0.020408163, %v6963_v4 }
 0x6de   : > { %v8648_v18 = vrot.slane %v7267_v7, %v12233_v30  ;;  %v8718_v31 = vrot.slane %v7281_v59, %v12226_v14 }
 0x6df   : > { %v7011_v11 = vpop.xlane.xlu1 %7010  ;;  %v6966_v15 = vpop.xlane.xlu0 %6965 }
 0x6e0   : > { %v8649_v37 = vsel %vm7595_vm14, %v8648_v18, %v8644_v43  ;;  %v7282_v36 = vmul.f32 0.020408163, %v6966_v15  ;;  %v7297_v19 = vmul.f32 0.020408163, %v7011_v11 }
 0x6e2   : > { %v8722_v24 = vrot.slane %v7282_v36, %v12229_v29  ;;  %v8797_v63 = vrot.slane %v7297_v19, %v12226_v14 }
 0x6e3   : > { %v6924_v1 = vpop.xlane.xlu1 %6923  ;;  %v7014_v3 = vpop.xlane.xlu0 %7013 }
 0x6e4   : > { %v8723_v47 = vsel %vm7588_vm13, %v8722_v24, %v8718_v31  ;;  %v7268_v17 = vmul.f32 0.020408163, %v6924_v1  ;;  %v7298_v13 = vmul.f32 0.020408163, %v7014_v3 }
 0x6e6   : > { %v8653_v5 = vrot.slane %v7268_v17, %v12238_v46  ;;  %v8801_v32 = vrot.slane %v7298_v13, %v12229_v29 }
 0x6e7   : > { %v7017_v62 = vpop.xlane.xlu1 %7016  ;;  %v6969_v33 = vpop.xlane.xlu0 %6968 }
 0x6e8   : > { %v8654_v42 = vsel %vm7602_vm15, %v8653_v5, %v8649_v37  ;;  %v8802_v54 = vsel %vm7588_vm13, %v8801_v32, %v8797_v63  ;;  %v7299_v4 = vmul.f32 0.020408163, %v7017_v62  ;;  %v7283_v40 = vmul.f32 0.020408163, %v6969_v33  ;;  %vm14089_vm13 = vmmov %vm14087_vm5 }
 0x6ea   : > { %v8806_v15 = vrot.slane %v7299_v4, %v12233_v30  ;;  %v8727_v37 = vrot.slane %v7283_v40, %v12233_v30 }
 0x6eb   : > { %v6972_v6 = vpop.xlane.xlu1 %6971  ;;  %v6927_v28 = vpop.xlane.xlu0 %6926 }
 0x6ec   : > { %v7284_v43 = vmul.f32 0.020408163, %v6972_v6  ;;  %v7269_v7 = vmul.f32 0.020408163, %v6927_v28  ;;  %v8807_v62 = vsel %vm7595_vm14, %v8806_v15, %v8802_v54  ;;  %v8728_v33 = vsel %vm7595_vm14, %v8727_v37, %v8723_v47  ;;  %vm14090_vm14 = vmmov %vm14088_vm0 }
 0x6ee   : > { %v8732_v31 = vrot.slane %v7284_v43, %v12238_v46  ;;  %v8658_v19 = vrot.slane %v7269_v7, %v12250_v49 }
 0x6ef   : > { %v6930_v45 = vpop.xlane.xlu1 %6929  ;;  %v7020_v12 = vpop.xlane.xlu0 %7019 }
 0x6f0   : > { %v7270_v11 = vmul.f32 0.020408163, %v6930_v45  ;;  %v7300_v36 = vmul.f32 0.020408163, %v7020_v12  ;;  %v8733_v28 = vsel %vm7602_vm15, %v8732_v31, %v8728_v33  ;;  %v8659_v45 = vsel %vm7609_vm11, %v8658_v19, %v8654_v42 }
 0x6f2   : > { %v8663_v63 = vrot.slane %v7270_v11, %v12243_v51  ;;  %v8811_v30 = vrot.slane %v7300_v36, %v12238_v46 }
 0x6f3   : > { %v7023_v39 = vpop.xlane.xlu1 %7022  ;;  %v6975_v23 = vpop.xlane.xlu0 %6974 }
 0x6f4   : > { %v7301_v24 = vmul.f32 0.020408163, %v7023_v39  ;;  %v7285_v1 = vmul.f32 0.020408163, %v6975_v23  ;;  %v8664_v47 = vsel %vm7616_vm1, %v8663_v63, %v8659_v45  ;;  %v8812_v42 = vsel %vm7602_vm15, %v8811_v30, %v8807_v62  ;;  %vm14091_vm15 = vmmov %vm14087_vm5 }
 0x6f6   : > { %v8816_v12 = vrot.slane %v7301_v24, %v12250_v49  ;;  %v8737_v39 = vrot.slane %v7285_v1, %v12250_v49 }
 0x6f7   : > { %v6978_v44 = vpop.xlane.xlu1 %6977  ;;  %v6933_v50 = vpop.xlane.xlu0 %6932 }
 0x6f8   : > { %v7286_v3 = vmul.f32 0.020408163, %v6978_v44  ;;  %v7271_v5 = vmul.f32 0.020408163, %v6933_v50 }
 0x6fa   : > { %v8742_v23 = vrot.slane %v7286_v3, %v12243_v51  ;;  %v8668_v46 = vrot.slane %v7271_v5, %v12264_v16 }
 0x6fb   : > { %v6936_v57 = vpop.xlane.xlu1 %6935  ;;  %v7026_v14 = vpop.xlane.xlu0 %7025 }
 0x6fc   : > { %v7302_v32 = vmul.f32 0.020408163, %v7026_v14  ;;  %v7272_v44 = vmul.f32 0.020408163, %v6936_v57  ;;  %v8817_v57 = vsel %vm7609_vm11, %v8816_v12, %v8812_v42 }
 0x6fe   : > { %v8673_v37 = vrot.slane %v7272_v44, %v12261_v27 }
 0x6ff   : > { %v7029_v58 = vpop.xlane.xlu1 %7028  ;;  %v6981_v26 = vpop.xlane.xlu0 %6980 }
 0x700   : > { %v7287_v6 = vmul.f32 0.020408163, %v6981_v26  ;;  %v7303_v50 = vmul.f32 0.020408163, %v7029_v58  ;;  %v8821_v26 = vrot.slane %v7302_v32, %v12243_v51  ;;  %v8738_v58 = vsel %vm7609_vm11, %v8737_v39, %v8733_v28  ;;  %vm14092_vm11 = vmmov %vm14087_vm5 }
 0x701   : > { %v8743_v15 = vsel %vm7616_vm1, %v8742_v23, %v8738_v58  ;;  %v7317_v28 = vstv %s13156_s22 }
 0x702   : > { %v8747_v43 = vrot.slane %v7287_v6, %v12264_v16  ;;  %v8826_v51 = vrot.slane %v7303_v50, %v12264_v16 }
 0x703   : > { %v6984_v56 = vpop.xlane.xlu1 %6983  ;;  %v6939_v29 = vpop.xlane.xlu0 %6938 }
 0x704   : > { %v7288_v14 = vmul.f32 0.020408163, %v6984_v56  ;;  %v7273_v40 = vmul.f32 0.020408163, %v6939_v29 }
 0x706   : > { %v8752_v29 = vrot.slane %v7288_v14, %v12261_v27  ;;  %v8678_v19 = vrot.slane %v7273_v40, %v12284_v48 }
 0x707   : > { %v6942_v25 = vpop.xlane.xlu1 %6941  ;;  %v7032_v53 = vpop.xlane.xlu0 %7031 }
 0x708   : > { %v7274_v7 = vmul.f32 0.020408163, %v6942_v25  ;;  %v7304_v49 = vmul.f32 0.020408163, %v7032_v53  ;;  %v8669_v25 = vsel %vm7623_vm2, %v8668_v46, %v8664_v47  ;;  %v8822_v53 = vsel %vm7616_vm1, %v8821_v26, %v8817_v57  ;;  %vm14093_vm1 = vmmov %vm14088_vm0 }
 0x709   : > { %v8827_v62 = vsel %vm7623_vm2, %v8826_v51, %v8822_v53 }
 0x70a   : > { %v8831_v16 = vrot.slane %v7304_v49, %v12261_v27 }
 0x70b   : > { %v7035_v60 = vpop.xlane.xlu1 %7034  ;;  %v13114_v61 = vpop.xlane.xlu0 %6986 }
 0x70c   : > { %v7305_v56 = vmul.f32 0.020408163, %v7035_v60  ;;  %v8748_v60 = vsel %vm7623_vm2, %v8747_v43, %v8743_v15  ;;  %v7289_v63 = vmul.f32 0.020408163, %v13114_v61  ;;  %v8832_v39 = vsel %vm7630_vm3, %v8831_v16, %v8827_v62  ;;  %vm14094_vm2 = vmmov %vm14088_vm0 }
 0x70d   : > { %v8753_v33 = vsel %vm7630_vm3, %v8752_v29, %v8748_v60 }
 0x70e   : > { %v8836_v3 = vrot.slane %v7305_v56, %v12284_v48  ;;  %v8757_v14 = vrot.slane %v7289_v63, %v12284_v48 }
 0x70f   : > { %v13116_v35 = vpop.xlane.xlu1 %6989  ;;  %v6945_v9 = vpop.xlane.xlu0 %6944 }
 0x710   : > { %v7275_v11 = vmul.f32 0.020408163, %v6945_v9  ;;  %v8683_v9 = vrot.slane %v7274_v7, %v12278_v0  ;;  %v7290_v27 = vmul.f32 0.020408163, %v13116_v35  ;;  %v8837_v50 = vsel %vm7637_vm4, %v8836_v3, %v8832_v39 }
 0x712   : > { %v8688_v5 = vrot.slane %v7275_v11, %v12300_v34  ;;  %v8762_v43 = vrot.slane %v7290_v27, %v12278_v0 }
 0x713   : > { %v6948_v41 = vpop.xlane.xlu1 %6947  ;;  %v13118_v2 = vpop.xlane.xlu0 %7037 }
 0x714   : > { %v7276_v24 = vmul.f32 0.020408163, %v6948_v41  ;;  %v8674_v41 = vsel %vm7630_vm3, %v8673_v37, %v8669_v25  ;;  %v7306_v23 = vmul.f32 0.020408163, %v13118_v2  ;;  %vm8885_vm3 = vcmask 1047559  }
 0x715   : > { %v8679_v45 = vsel %vm7637_vm4, %v8678_v19, %v8674_v41 }
 0x716   : > { %v8684_v61 = vsel %vm14089_vm13, %v8683_v9, %v8679_v45  ;;  %v8841_v57 = vrot.slane %v7306_v23, %v12278_v0 }
 0x717   : > { %v13120_v59 = vpop.xlane.xlu1 %7040  ;;  %v13122_v18 = vpop.xlane.xlu0 %6992 }
 0x718   : > { %v7307_v35 = vmul.f32 0.020408163, %v13120_v59  ;;  %v7291_v46 = vmul.f32 0.020408163, %v13122_v18 }
 0x71a   : > { %v8846_v37 = vrot.slane %v7307_v35, %v12300_v34  ;;  %v8767_v51 = vrot.slane %v7291_v46, %v12300_v34 }
 0x71b   : > { %v13128_v17 = vpop.xlane.xlu1 %6995  ;;  %v6951_v13 = vpop.xlane.xlu0 %6950 }
 0x71c   : > { %v7277_v1 = vmul.f32 0.020408163, %v6951_v13  ;;  %v8693_v13 = vrot.slane %v7276_v24, %v12294_v55  ;;  %v7292_v26 = vmul.f32 0.020408163, %v13128_v17  ;;  %v8758_v24 = vsel %vm7637_vm4, %v8757_v14, %v8753_v33 }
 0x71d   : > { %v8763_v16 = vsel %vm14091_vm15, %v8762_v43, %v8758_v24  ;;  %vm7318_vm4 = vcmp.lt.s32.totalorder %v12214_v8, %v7317_v28 }
 0x71e   : > { %v8698_v44 = vrot.slane %v7277_v1, %v12316_v38  ;;  %v8772_v29 = vrot.slane %v7292_v26, %v12294_v55  ;;  %v8842_v1 = vsel %vm14092_vm11, %v8841_v57, %v8837_v50 }
 0x71f   : > { %v6954_v54 = vpop.xlane.xlu1 %6953  ;;  %v7044_v4 = vpop.xlane.xlu0 %7043  ;;  %v8847_v63 = vsel %vm7651_vm6, %v8846_v37, %v8842_v1 }
 0x720   : > { %v7278_v32 = vmul.f32 0.020408163, %v6954_v54  ;;  %v8689_v54 = vsel %vm7651_vm6, %v8688_v5, %v8684_v61  ;;  %v7308_v49 = vmul.f32 0.020408163, %v7044_v4  ;;  %v8768_v5 = vsel %vm7651_vm6, %v8767_v51, %v8763_v16 }
 0x721   : > { %v8694_v7 = vsel %vm14090_vm14, %v8693_v13, %v8689_v54  ;;  %v8773_v62 = vsel %vm14093_vm1, %v8772_v29, %v8768_v5 }
 0x722   : > { %v8703_v47 = vrot.slane %v7278_v32, %v12310_v52  ;;  %v8699_v58 = vsel %vm7665_vm9, %v8698_v44, %v8694_v7 }
 0x723   : > { %v7047_v36 = vpop.xlane.xlu1 %7046  ;;  %v6999_v31 = vpop.xlane.xlu0 %6998 }
 0x724   : > { %v7309_v56 = vmul.f32 0.020408163, %v7047_v36  ;;  %v7293_v59 = vmul.f32 0.020408163, %v6999_v31  ;;  %v8704_v18 = vsel %vm7672_vm8, %v8703_v47, %v8699_v58  ;;  %v8851_v36 = vrot.slane %v7308_v49, %v12294_v55 }
 0x726   : > { %v8856_v60 = vrot.slane %v7309_v56, %v12316_v38  ;;  %v8777_v9 = vrot.slane %v7293_v59, %v12316_v38  ;;  %v8852_v33 = vsel %vm14094_vm2, %v8851_v36, %v8847_v63 }
 0x727   : > { %v7002_v30 = vpop.xlane.xlu1 %7001  ;;  %v6957_v6 = vpop.xlane.xlu0 %6956 }
 0x728   : > { %v7279_v12 = vmul.f32 0.020408163, %v6957_v6  ;;  %v7294_v11 = vmul.f32 0.020408163, %v7002_v30  ;;  %v8778_v45 = vsel %vm7665_vm9, %v8777_v9, %v8773_v62 }
 0x72a   : > { %v8708_v40 = vrot.slane %v7279_v12, %v12331_v20  ;;  %v8782_v3 = vrot.slane %v7294_v11, %v12310_v52 }
 0x72b   : > { %v6960_v42 = vpop.xlane.xlu1 %6959  ;;  %v7050_v2 = vpop.xlane.xlu0 %7049 }
 0x72c   : > { %v7280_v48 = vmul.f32 0.020408163, %v6960_v42  ;;  %v7310_v15 = vmul.f32 0.020408163, %v7050_v2  ;;  %v8709_v4 = vsel %vm7679_vm7, %v8708_v40, %v8704_v18  ;;  %v8783_v27 = vsel %vm7672_vm8, %v8782_v3, %v8778_v45 }
 0x72e   : > { %v8713_v17 = vrot.slane %v7280_v48, %v12326_v22  ;;  %v8861_v55 = vrot.slane %v7310_v15, %v12310_v52  ;;  %v8857_v52 = vsel %vm7665_vm9, %v8856_v60, %v8852_v33 }
 0x72f   : > { %v7053_v0 = vpop.xlane.xlu1 %7052  ;;  %v7005_v25 = vpop.xlane.xlu0 %7004 }
 0x730   : > { %v8714_v31 = vsel %vm7686_vm10, %v8713_v17, %v8709_v4  ;;  %v7311_v53 = vmul.f32 0.020408163, %v7053_v0  ;;  %v7295_v19 = vmul.f32 0.020408163, %v7005_v25  ;;  %v8862_v13 = vsel %vm7672_vm8, %v8861_v55, %v8857_v52 }
 0x731   : > { %v8892_v34 = vsel %vm8883_vm12, %v8714_v31, %v13066_v10 }
 0x732   : > { %v8866_v32 = vrot.slane %v7311_v53, %v12331_v20  ;;  %v8787_v38 = vrot.slane %v7295_v19, %v12331_v20 }
 0x733   : > { %v7056_v41 = vpop.xlane.xlu1 %7055  ;;  %v7008_v10 = vpop.xlane.xlu0 %7007 }
 0x734   : > { %v7312_v30 = vmul.f32 0.020408163, %v7056_v41  ;;  %v7296_v6 = vmul.f32 0.020408163, %v7008_v10  ;;  %v8867_v61 = vsel %vm7679_vm7, %v8866_v32, %v8862_v13  ;;  %v8788_v39 = vsel %vm7679_vm7, %v8787_v38, %v8783_v27 }
 0x736   : > { %v8871_v20 = vrot.slane %v7312_v30, %v12326_v22  ;;  %v8792_v12 = vrot.slane %v7296_v6, %v12326_v22 }
 0x738   : > { %v8872_v23 = vsel %vm7686_vm10, %v8871_v20, %v8867_v61  ;;  %v8793_v44 = vsel %vm7686_vm10, %v8792_v12, %v8788_v39 }
 0x739   : > { %v8893_v50 = vsel %vm8885_vm3, %v8872_v23, %v8892_v34  ;;  %v8886_v14 = vsel %vm8885_vm3, %v8793_v44, %v13101_v21 }
 0x73a   : > { %v8897_v54 = vsel %vm7318_vm4, %v8893_v50, 0.0  ;;  %v8896_v47 = vsel %vm7318_vm4, %v8886_v14, 0.0 }
 0x73b   : > { %8904 = vst [vmem:[%s8902_s27 + $0x8] sm:$0xff] %v8897_v54  ;;  %8903 = vst [vmem:[%s8902_s27] sm:$0xff] %v8896_v47 }
 0x73c PF: > { %p9540_p9 = scmp.ne.s32.totalorder %s9806_s25, 1 }
 0x73e   : > { %8908 = sbr.rel (%p9540_p9) target bundleno = 2345 (0x929), region = 52 }
 0x743   : > { %v13230_v8 = vld [vmem:[%s13961_s2 + $0x170] sm:$0xff]  ;;  %v13235_v22 = vld [vmem:[%s13961_s2 + $0x2f8] sm:$0xff]  ;;  %v13240_v21 = vld [vmem:[%s13961_s2 + $0x168] sm:$0xff] }
 0x744   : > { %9026 = vmatprep.subr.mxu0 %v13230_v8  ;;  %9553 = vmatprep.subr.mxu1 %v13235_v22  ;;  %v13247_v28 = vld [vmem:[%s13961_s2 + $0x178] sm:$0xff]  ;;  %v13257_v46 = vld [vmem:[%s13961_s2 + $0x2e0] sm:$0xff]  ;;  %v13264_v26 = vld [vmem:[%s13961_s2 + $0x150] sm:$0xff] }
 0x745   : > { %v13252_v35 = vld [vmem:[%s13961_s2 + $0x158] sm:$0xff]  ;;  %9027 = vmatpush1.msra.mxu0 %v13240_v21  ;;  %9554 = vmatpush3.msra.mxu1 %v13247_v28  ;;  %v13269_v40 = vld [vmem:[%s13961_s2 + $0x160] sm:$0xff]  ;;  %v13281_v2 = vld [vmem:[%s13961_s2 + $0x2c8] sm:$0xff] }
 0x746   : > { %v13274_v42 = vld [vmem:[%s13961_s2 + $0x140] sm:$0xff]  ;;  %9028 = vmatprep.subr.mxu0 %v13252_v35  ;;  %9555 = vmatprep.subr.mxu1 %v13257_v46  ;;  %v13286_v43 = vld [vmem:[%s13961_s2 + $0x138] sm:$0xff]  ;;  %v13291_v7 = vld [vmem:[%s13961_s2 + $0x148] sm:$0xff] }
 0x747   : > { %9029 = vmatpush1.msra.mxu0 %v13264_v26  ;;  %9556 = vmatpush3.msra.mxu1 %v13269_v40  ;;  %v13298_v49 = vld [vmem:[%s13961_s2 + $0x128] sm:$0xff]  ;;  %v13303_v48 = vld [vmem:[%s13961_s2 + $0x2b0] sm:$0xff]  ;;  %v13310_v57 = vld [vmem:[%s13961_s2 + $0x120] sm:$0xff] }
 0x748   : > { %9030 = vmatprep.subr.mxu0 %v13274_v42  ;;  %9557 = vmatprep.subr.mxu1 %v13281_v2  ;;  %v13315_v58 = vld [vmem:[%s13961_s2 + $0x130] sm:$0xff]  ;;  %v13327_v59 = vld [vmem:[%s13961_s2 + $0x298] sm:$0xff]  ;;  %v13334_v18 = vld [vmem:[%s13961_s2 + $0x108] sm:$0xff] }
 0x749   : > { %9031 = vmatpush1.msra.mxu0 %v13286_v43  ;;  %9558 = vmatpush3.msra.mxu1 %v13291_v7  ;;  %v13322_v56 = vld [vmem:[%s13961_s2 + $0x110] sm:$0xff]  ;;  %v13339_v11 = vld [vmem:[%s13961_s2 + $0x118] sm:$0xff]  ;;  %v13351_v15 = vld [vmem:[%s13961_s2 + $0x280] sm:$0xff] }
 0x74a   : > { %9032 = vmatprep.subr.mxu0 %v13298_v49  ;;  %9559 = vmatprep.subr.mxu1 %v13303_v48  ;;  %v13346_v17 = vld [vmem:[%s13961_s2 + $0xf8] sm:$0xff]  ;;  %v13358_v37 = vld [vmem:[%s13961_s2 + $0xf0] sm:$0xff]  ;;  %v13363_v51 = vld [vmem:[%s13961_s2 + $0x100] sm:$0xff] }
 0x74b   : > { %9033 = vmatpush1.msra.mxu0 %v13310_v57  ;;  %9560 = vmatpush3.msra.mxu1 %v13315_v58  ;;  %v13370_v29 = vld [vmem:[%s13961_s2 + $0xe0] sm:$0xff]  ;;  %v13375_v4 = vld [vmem:[%s13961_s2 + $0x268] sm:$0xff]  ;;  %v13382_v0 = vld [vmem:[%s13961_s2 + $0xd8] sm:$0xff] }
 0x74c   : > { %9034 = vmatprep.subr.mxu0 %v13322_v56  ;;  %9561 = vmatprep.subr.mxu1 %v13327_v59  ;;  %v13387_v25 = vld [vmem:[%s13961_s2 + $0xe8] sm:$0xff]  ;;  %v13399_v31 = vld [vmem:[%s13961_s2 + $0x250] sm:$0xff]  ;;  %v13406_v53 = vld [vmem:[%s13961_s2 + $0xc0] sm:$0xff] }
 0x74d   : > { %9035 = vmatpush1.msra.mxu0 %v13334_v18  ;;  %9562 = vmatpush3.msra.mxu1 %v13339_v11  ;;  %v13394_v36 = vld [vmem:[%s13961_s2 + $0xc8] sm:$0xff]  ;;  %v13411_v19 = vld [vmem:[%s13961_s2 + $0xd0] sm:$0xff]  ;;  %v13423_v60 = vld [vmem:[%s13961_s2 + $0x238] sm:$0xff] }
 0x74e   : > { %9036 = vmatprep.subr.mxu0 %v13346_v17  ;;  %9563 = vmatprep.subr.mxu1 %v13351_v15  ;;  %v13418_v24 = vld [vmem:[%s13961_s2 + $0xb0] sm:$0xff]  ;;  %v13430_v9 = vld [vmem:[%s13961_s2 + $0xa8] sm:$0xff]  ;;  %v13435_v34 = vld [vmem:[%s13961_s2 + $0xb8] sm:$0xff] }
 0x74f   : > { %9037 = vmatpush1.msra.mxu0 %v13358_v37  ;;  %9564 = vmatpush3.msra.mxu1 %v13363_v51  ;;  %v13442_v16 = vld [vmem:[%s13961_s2 + $0x98] sm:$0xff]  ;;  %v13447_v1 = vld [vmem:[%s13961_s2 + $0x220] sm:$0xff]  ;;  %v13454_v3 = vld [vmem:[%s13961_s2 + $0x90] sm:$0xff] }
 0x750   : > { %9038 = vmatprep.subr.mxu0 %v13370_v29  ;;  %9565 = vmatprep.subr.mxu1 %v13375_v4  ;;  %v13459_v55 = vld [vmem:[%s13961_s2 + $0xa0] sm:$0xff]  ;;  %v13471_v5 = vld [vmem:[%s13961_s2 + $0x208] sm:$0xff]  ;;  %v13478_v32 = vld [vmem:[%s13961_s2 + $0x78] sm:$0xff] }
 0x751   : > { %9039 = vmatpush1.msra.mxu0 %v13382_v0  ;;  %9566 = vmatpush3.msra.mxu1 %v13387_v25  ;;  %v13466_v63 = vld [vmem:[%s13961_s2 + $0x80] sm:$0xff]  ;;  %v13483_v38 = vld [vmem:[%s13961_s2 + $0x88] sm:$0xff]  ;;  %v13495_v10 = vld [vmem:[%s13961_s2 + $0x1f0] sm:$0xff] }
 0x752   : > { %9040 = vmatprep.subr.mxu0 %v13394_v36  ;;  %9567 = vmatprep.subr.mxu1 %v13399_v31  ;;  %v13490_v41 = vld [vmem:[%s13961_s2 + $0x68] sm:$0xff]  ;;  %v13502_v62 = vld [vmem:[%s13961_s2 + $0x60] sm:$0xff]  ;;  %v13507_v33 = vld [vmem:[%s13961_s2 + $0x70] sm:$0xff] }
 0x753   : > { %9041 = vmatpush1.msra.mxu0 %v13406_v53  ;;  %9568 = vmatpush3.msra.mxu1 %v13411_v19  ;;  %14095 = vst [vmem:[#allocation11_spill] sm:$0xff] %v13507_v33  ;;  %v13514_v30 = vld [vmem:[%s13961_s2 + $0x50] sm:$0xff]  ;;  %v13519_v6 = vld [vmem:[%s13961_s2 + $0x1d8] sm:$0xff]  ;;  %v13526_v52 = vld [vmem:[%s13961_s2 + $0x48] sm:$0xff] }
 0x754   : > { %9042 = vmatprep.subr.mxu0 %v13418_v24  ;;  %9569 = vmatprep.subr.mxu1 %v13423_v60  ;;  %14096 = vst [vmem:[#allocation12_spill] sm:$0xff] %v13519_v6  ;;  %v13531_v45 = vld [vmem:[%s13961_s2 + $0x58] sm:$0xff]  ;;  %v13543_v13 = vld [vmem:[%s13961_s2 + $0x1c0] sm:$0xff]  ;;  %v13550_v20 = vld [vmem:[%s13961_s2 + $0x30] sm:$0xff] }
 0x755   : > { %9043 = vmatpush1.msra.mxu0 %v13430_v9  ;;  %9570 = vmatpush3.msra.mxu1 %v13435_v34  ;;  %14097 = vst [vmem:[#allocation13_spill] sm:$0xff] %v13531_v45  ;;  %v13538_v27 = vld [vmem:[%s13961_s2 + $0x38] sm:$0xff]  ;;  %14098 = vst [vmem:[#allocation14_spill] sm:$0xff] %v13543_v13  ;;  %v13555_v12 = vld [vmem:[%s13961_s2 + $0x40] sm:$0xff] }
 0x756   : > { %9044 = vmatprep.subr.mxu0 %v13442_v16  ;;  %9571 = vmatprep.subr.mxu1 %v13447_v1  ;;  %14099 = vst [vmem:[#allocation15_spill] sm:$0xff] %v13555_v12  ;;  %v13562_v61 = vld [vmem:[%s13961_s2 + $0x20] sm:$0xff]  ;;  %v13567_v39 = vld [vmem:[%s13961_s2 + $0x1a8] sm:$0xff]  ;;  %v13574_v23 = vld [vmem:[%s13961_s2 + $0x18] sm:$0xff] }
 0x757   : > { %9045 = vmatpush1.msra.mxu0 %v13454_v3  ;;  %9572 = vmatpush3.msra.mxu1 %v13459_v55  ;;  %14100 = vst [vmem:[#allocation16_spill] sm:$0xff] %v13567_v39  ;;  %v13579_v44 = vld [vmem:[%s13961_s2 + $0x28] sm:$0xff]  ;;  %v13591_v14 = vld [vmem:[%s13961_s2 + $0x190] sm:$0xff]  ;;  %v13598_v54 = vld [vmem:[%s13961_s2] sm:$0xff] }
 0x758   : > { %9046 = vmatprep.subr.mxu0 %v13466_v63  ;;  %9573 = vmatprep.subr.mxu1 %v13471_v5  ;;  %14101 = vst [vmem:[#allocation17_spill] sm:$0xff] %v13579_v44  ;;  %v13586_v50 = vld [vmem:[%s13961_s2 + $0x8] sm:$0xff]  ;;  %14102 = vst [vmem:[#allocation18_spill] sm:$0xff] %v13591_v14  ;;  %v13603_v47 = vld [vmem:[%s13961_s2 + $0x10] sm:$0xff] }
 0x759   : > { %9047 = vmatpush1.msra.mxu0 %v13478_v32  ;;  %9574 = vmatpush3.msra.mxu1 %v13483_v38  ;;  %14103 = vst [vmem:[#allocation19_spill] sm:$0xff] %v13603_v47 }
 0x75a   : > { %9048 = vmatprep.subr.mxu0 %v13490_v41  ;;  %9575 = vmatprep.subr.mxu1 %v13495_v10 }
 0x75b   : > { %9049 = vmatpush1.msra.mxu0 %v13502_v62  ;;  %9576 = vmatpush3.msra.mxu1 %v13507_v33  ;;  %v13657_v33 = vld [vmem:[%s13961_s2 + $0x2b8] sm:$0xff] }
 0x75c   : > { %9050 = vmatprep.subr.mxu0 %v13514_v30  ;;  %9577 = vmatprep.subr.mxu1 %v13519_v6  ;;  %v13646_v6 = vld [vmem:[%s13961_s2 + $0x2c0] sm:$0xff] }
 0x75d   : > { %9051 = vmatpush1.msra.mxu0 %v13526_v52  ;;  %9578 = vmatpush3.msra.mxu1 %v13531_v45  ;;  %v13630_v45 = vld [vmem:[%s13961_s2 + $0x2d8] sm:$0xff] }
 0x75e   : > { %9052 = vmatprep.subr.mxu0 %v13538_v27  ;;  %9579 = vmatprep.subr.mxu1 %v13543_v13  ;;  %v13616_v13 = vld [vmem:[#allocation2] sm:$0xff] }
 0x75f   : > { %9053 = vmatpush1.msra.mxu0 %v13550_v20  ;;  %9580 = vmatpush3.msra.mxu1 %v13555_v12  ;;  %v13607_v12 = vld [vmem:[#allocation2 + $0x8] sm:$0xff] }
 0x760   : > { %9054 = vmatprep.subr.mxu0 %v13562_v61  ;;  %9581 = vmatprep.subr.mxu1 %v13567_v39  ;;  %v13612_v39 = vld [vmem:[%s13961_s2 + $0x2f0] sm:$0xff] }
 0x761   : > { %9055 = vmatpush1.msra.mxu0 %v13574_v23  ;;  %9582 = vmatpush3.msra.mxu1 %v13579_v44  ;;  %v13623_v44 = vld [vmem:[%s13961_s2 + $0x2e8] sm:$0xff] }
 0x762   : > { %9056 = vmatprep.subr.mxu0 %v13586_v50  ;;  %9583 = vmatprep.subr.mxu1 %v13591_v14  ;;  %v13639_v14 = vld [vmem:[#allocation2 + $0x18] sm:$0xff] }
 0x763   : > { %9057 = vmatpush1.msra.mxu0 %v13598_v54  ;;  %9584 = vmatpush3.msra.mxu1 %v13603_v47  ;;  %v13637_v47 = vld [vmem:[%s13961_s2 + $0x2d0] sm:$0xff] }
 0x764   : > { %9167 = vmatprep.mubr.f32.mxu1 %v13607_v12  ;;  %9058 = vmatprep.subr.mxu0 %v13612_v39 }
 0x765   : > { %9168 = vmatmul.mubr.f32.vlgmr.msra.gmra.mxu1 %v13616_v13  ;;  %9180 = vmatprep.subr.mxu1 %v13230_v8  ;;  %v13650_v8 = vld [vmem:[#allocation2 + $0x10] sm:$0xff] }
 0x766   : > { %9059 = vmatpush2.msra.mxu0 %v13623_v44  ;;  %9181 = vmatpush1.msra.mxu1 %v13240_v21  ;;  %v13664_v21 = vld [vmem:[%s13961_s2 + $0x2a8] sm:$0xff] }
 0x767   : > { %9060 = vmatprep.subr.mxu0 %v13630_v45  ;;  %9182 = vmatprep.subr.mxu1 %v13252_v35  ;;  %v13671_v35 = vld [vmem:[%s13961_s2 + $0x2a0] sm:$0xff] }
 0x768   : > { %9061 = vmatpush2.msra.mxu0 %v13637_v47  ;;  %9172 = vmatprep.mubr.f32.mxu1 %v13639_v14 }
 0x769   : > { %9183 = vmatpush1.msra.mxu1 %v13264_v26  ;;  %9062 = vmatprep.subr.mxu0 %v13646_v6  ;;  %v13678_v26 = vld [vmem:[%s13961_s2 + $0x290] sm:$0xff] }
 0x76a   : > { %9173 = vmatmul.mubr.f32.gmra.mxu1 %v13650_v8  ;;  %9184 = vmatprep.subr.mxu1 %v13274_v42  ;;  %v13685_v42 = vld [vmem:[%s13961_s2 + $0x288] sm:$0xff] }
 0x76b   : > { %9063 = vmatpush2.msra.mxu0 %v13657_v33  ;;  %9185 = vmatpush1.msra.mxu1 %v13286_v43  ;;  %v13692_v43 = vld [vmem:[%s13961_s2 + $0x278] sm:$0xff] }
 0x76c   : > { %9064 = vmatprep.subr.mxu0 %v13664_v21  ;;  %9186 = vmatprep.subr.mxu1 %v13298_v49  ;;  %v13699_v49 = vld [vmem:[%s13961_s2 + $0x270] sm:$0xff] }
 0x76d   : > { %9065 = vmatpush2.msra.mxu0 %v13671_v35  ;;  %9187 = vmatpush1.msra.mxu1 %v13310_v57  ;;  %v13706_v57 = vld [vmem:[%s13961_s2 + $0x260] sm:$0xff] }
 0x76e   : > { %9066 = vmatprep.subr.mxu0 %v13678_v26  ;;  %9188 = vmatprep.subr.mxu1 %v13322_v56  ;;  %v13713_v56 = vld [vmem:[%s13961_s2 + $0x258] sm:$0xff] }
 0x76f   : > { %9067 = vmatpush2.msra.mxu0 %v13685_v42  ;;  %9189 = vmatpush1.msra.mxu1 %v13334_v18  ;;  %v13720_v18 = vld [vmem:[%s13961_s2 + $0x248] sm:$0xff] }
 0x770   : > { %9068 = vmatprep.subr.mxu0 %v13692_v43  ;;  %9190 = vmatprep.subr.mxu1 %v13346_v17  ;;  %v13727_v17 = vld [vmem:[%s13961_s2 + $0x240] sm:$0xff] }
 0x771   : > { %9069 = vmatpush2.msra.mxu0 %v13699_v49  ;;  %9191 = vmatpush1.msra.mxu1 %v13358_v37  ;;  %v13734_v37 = vld [vmem:[%s13961_s2 + $0x230] sm:$0xff] }
 0x772   : > { %9070 = vmatprep.subr.mxu0 %v13706_v57  ;;  %9192 = vmatprep.subr.mxu1 %v13370_v29  ;;  %v13741_v29 = vld [vmem:[%s13961_s2 + $0x228] sm:$0xff] }
 0x773   : > { %9071 = vmatpush2.msra.mxu0 %v13713_v56  ;;  %9193 = vmatpush1.msra.mxu1 %v13382_v0  ;;  %v13748_v0 = vld [vmem:[%s13961_s2 + $0x218] sm:$0xff] }
 0x774   : > { %9072 = vmatprep.subr.mxu0 %v13720_v18  ;;  %9194 = vmatprep.subr.mxu1 %v13394_v36  ;;  %v13755_v36 = vld [vmem:[%s13961_s2 + $0x210] sm:$0xff] }
 0x775   : > { %9073 = vmatpush2.msra.mxu0 %v13727_v17  ;;  %9195 = vmatpush1.msra.mxu1 %v13406_v53  ;;  %v13762_v53 = vld [vmem:[%s13961_s2 + $0x200] sm:$0xff] }
 0x776   : > { %9074 = vmatprep.subr.mxu0 %v13734_v37  ;;  %9196 = vmatprep.subr.mxu1 %v13418_v24  ;;  %v13769_v24 = vld [vmem:[%s13961_s2 + $0x1f8] sm:$0xff] }
 0x777   : > { %9075 = vmatpush2.msra.mxu0 %v13741_v29  ;;  %9197 = vmatpush1.msra.mxu1 %v13430_v9  ;;  %v13776_v9 = vld [vmem:[%s13961_s2 + $0x1e8] sm:$0xff] }
 0x778   : > { %9076 = vmatprep.subr.mxu0 %v13748_v0  ;;  %9198 = vmatprep.subr.mxu1 %v13442_v16  ;;  %v13783_v16 = vld [vmem:[%s13961_s2 + $0x1e0] sm:$0xff] }
 0x779   : > { %9077 = vmatpush2.msra.mxu0 %v13755_v36  ;;  %9199 = vmatpush1.msra.mxu1 %v13454_v3  ;;  %v13790_v3 = vld [vmem:[%s13961_s2 + $0x1d0] sm:$0xff] }
 0x77a   : > { %9078 = vmatprep.subr.mxu0 %v13762_v53  ;;  %9200 = vmatprep.subr.mxu1 %v13466_v63  ;;  %v13797_v63 = vld [vmem:[%s13961_s2 + $0x1c8] sm:$0xff] }
 0x77b   : > { %9079 = vmatpush2.msra.mxu0 %v13769_v24  ;;  %9201 = vmatpush1.msra.mxu1 %v13478_v32  ;;  %v13804_v32 = vld [vmem:[%s13961_s2 + $0x1b8] sm:$0xff] }
 0x77c   : > { %9080 = vmatprep.subr.mxu0 %v13776_v9  ;;  %9202 = vmatprep.subr.mxu1 %v13490_v41  ;;  %v13811_v41 = vld [vmem:[%s13961_s2 + $0x1b0] sm:$0xff] }
 0x77d   : > { %9081 = vmatpush2.msra.mxu0 %v13783_v16  ;;  %9203 = vmatpush1.msra.mxu1 %v13502_v62  ;;  %v13818_v62 = vld [vmem:[%s13961_s2 + $0x1a0] sm:$0xff] }
 0x77e   : > { %9082 = vmatprep.subr.mxu0 %v13790_v3  ;;  %9204 = vmatprep.subr.mxu1 %v13514_v30  ;;  %v13825_v30 = vld [vmem:[%s13961_s2 + $0x198] sm:$0xff] }
 0x77f   : > { %9083 = vmatpush2.msra.mxu0 %v13797_v63  ;;  %9205 = vmatpush1.msra.mxu1 %v13526_v52  ;;  %v13832_v52 = vld [vmem:[%s13961_s2 + $0x188] sm:$0xff] }
 0x780   : > { %9084 = vmatprep.subr.mxu0 %v13804_v32  ;;  %9206 = vmatprep.subr.mxu1 %v13538_v27  ;;  %v13839_v27 = vld [vmem:[%s13961_s2 + $0x180] sm:$0xff] }
 0x781   : > { %9085 = vmatpush2.msra.mxu0 %v13811_v41  ;;  %9207 = vmatpush1.msra.mxu1 %v13550_v20 }
 0x782   : > { %9086 = vmatprep.subr.mxu0 %v13818_v62  ;;  %9208 = vmatprep.subr.mxu1 %v13562_v61 }
 0x783   : > { %9087 = vmatpush2.msra.mxu0 %v13825_v30  ;;  %9209 = vmatpush1.msra.mxu1 %v13574_v23 }
 0x784   : > { %9088 = vmatprep.subr.mxu0 %v13832_v52  ;;  %9210 = vmatprep.subr.mxu1 %v13586_v50 }
 0x785   : > { %9089 = vmatpush2.msra.mxu0 %v13839_v27  ;;  %9090 = vmatprep.mubr.f32.mxu0 %v13607_v12 }
 0x786   : > { %9211 = vmatpush1.msra.mxu1 %v13598_v54  ;;  %9091 = vmatmul.mubr.f32.vlgmr.msra.gmra.mxu0 %v13616_v13 }
 0x787   : > { %9212 = vmatprep.subr.mxu1 %v13612_v39  ;;  %9591 = vmatprep.subr.mxu0 %v13235_v22  ;;  %v14104_v22 = vld [vmem:[#allocation11_spill] sm:$0xff] }
 0x788   : > { %9213 = vmatpush2.msra.mxu1 %v13623_v44  ;;  %9592 = vmatpush3.msra.mxu0 %v13247_v28  ;;  %v14105_v28 = vld [vmem:[#allocation12_spill] sm:$0xff] }
 0x789   : > { %9214 = vmatprep.subr.mxu1 %v13630_v45  ;;  %9593 = vmatprep.subr.mxu0 %v13257_v46  ;;  %v14106_v46 = vld [vmem:[#allocation13_spill] sm:$0xff] }
 0x78a   : > { %9096 = vmatprep.mubr.f32.mxu0 %v13639_v14  ;;  %9215 = vmatpush2.msra.mxu1 %v13637_v47 }
 0x78b   : > { %9594 = vmatpush3.msra.mxu0 %v13269_v40  ;;  %9216 = vmatprep.subr.mxu1 %v13646_v6  ;;  %v14107_v40 = vld [vmem:[#allocation14_spill] sm:$0xff] }
 0x78c   : > { %9097 = vmatmul.mubr.f32.gmra.mxu0 %v13650_v8  ;;  %9595 = vmatprep.subr.mxu0 %v13281_v2  ;;  %v14108_v2 = vld [vmem:[#allocation15_spill] sm:$0xff] }
 0x78d   : > { %9217 = vmatpush2.msra.mxu1 %v13657_v33  ;;  %9596 = vmatpush3.msra.mxu0 %v13291_v7  ;;  %v14109_v7 = vld [vmem:[#allocation16_spill] sm:$0xff] }
 0x78e   : > { %9218 = vmatprep.subr.mxu1 %v13664_v21  ;;  %9597 = vmatprep.subr.mxu0 %v13303_v48  ;;  %v9179_v48 = vld [vmem:[#allocation3 + $0x8] sm:$0xff] }
 0x78f   : > { %9219 = vmatpush2.msra.mxu1 %v13671_v35  ;;  %9598 = vmatpush3.msra.mxu0 %v13315_v58  ;;  %v14110_v58 = vld [vmem:[#allocation17_spill] sm:$0xff] }
 0x790   : > { %9220 = vmatprep.subr.mxu1 %v13678_v26  ;;  %9599 = vmatprep.subr.mxu0 %v13327_v59  ;;  %v14111_v59 = vld [vmem:[#allocation18_spill] sm:$0xff] }
 0x791   : > { %9221 = vmatpush2.msra.mxu1 %v13685_v42  ;;  %9600 = vmatpush3.msra.mxu0 %v13339_v11  ;;  %v9178_v11 = vld [vmem:[#allocation3] sm:$0xff] }
 0x792   : > { %9222 = vmatprep.subr.mxu1 %v13692_v43  ;;  %9601 = vmatprep.subr.mxu0 %v13351_v15  ;;  %v14112_v15 = vld [vmem:[#allocation19_spill] sm:$0xff] }
 0x793   : > { %9223 = vmatpush2.msra.mxu1 %v13699_v49  ;;  %9602 = vmatpush3.msra.mxu0 %v13363_v51  ;;  %v9011_v51 = vlaneseq }
 0x794   : > { %9224 = vmatprep.subr.mxu1 %v13706_v57  ;;  %9603 = vmatprep.subr.mxu0 %v13375_v4 }
 0x795   : > { %9225 = vmatpush2.msra.mxu1 %v13713_v56  ;;  %9604 = vmatpush3.msra.mxu0 %v13387_v25  ;;  %v13915_v4 = vshrl.u32 %v9011_v51, 7 }
 0x796   : > { %9226 = vmatprep.subr.mxu1 %v13720_v18  ;;  %9605 = vmatprep.subr.mxu0 %v13399_v31  ;;  %v9005_v31 = vld [vmem:[%s13962_s3] sm:$0x7] }
 0x797   : > { %9227 = vmatpush2.msra.mxu1 %v13727_v17  ;;  %9606 = vmatpush3.msra.mxu0 %v13411_v19  ;;  %v9013_v25 = vsub.s32 0, %v13915_v4  ;;  %v9017_v6 = vsub.s32 1, %v13915_v4  ;;  %v9021_v13 = vsub.s32 2, %v13915_v4 }
 0x798   : > { %9228 = vmatprep.subr.mxu1 %v13734_v37  ;;  %9607 = vmatprep.subr.mxu0 %v13423_v60 }
 0x799   : > { %9229 = vmatpush2.msra.mxu1 %v13741_v29  ;;  %9608 = vmatpush3.msra.mxu0 %v13435_v34  ;;  %v9014_v19 = vrot.slane %v9005_v31, %v9013_v25  ;;  %v9018_v61 = vrot.slane %v9005_v31, %v9017_v6  ;;  %v9022_v39 = vrot.slane %v9005_v31, %v9021_v13 }
 0x79a   : > { %9230 = vmatprep.subr.mxu1 %v13748_v0  ;;  %9609 = vmatprep.subr.mxu0 %v13447_v1 }
 0x79b   : > { %9231 = vmatpush2.msra.mxu1 %v13755_v36  ;;  %9610 = vmatpush3.msra.mxu0 %v13459_v55 }
 0x79c   : > { %9232 = vmatprep.subr.mxu1 %v13762_v53  ;;  %9611 = vmatprep.subr.mxu0 %v13471_v5 }
 0x79d   : > { %9233 = vmatpush2.msra.mxu1 %v13769_v24  ;;  %9612 = vmatpush3.msra.mxu0 %v13483_v38 }
 0x79e   : > { %9234 = vmatprep.subr.mxu1 %v13776_v9  ;;  %9613 = vmatprep.subr.mxu0 %v13495_v10 }
 0x79f   : > { %9235 = vmatpush2.msra.mxu1 %v13783_v16  ;;  %9614 = vmatpush3.msra.mxu0 %v14104_v22 }
 0x7a0   : > { %9236 = vmatprep.subr.mxu1 %v13790_v3  ;;  %9615 = vmatprep.subr.mxu0 %v14105_v28 }
 0x7a1   : > { %9237 = vmatpush2.msra.mxu1 %v13797_v63  ;;  %9616 = vmatpush3.msra.mxu0 %v14106_v46 }
 0x7a2   : > { %9238 = vmatprep.subr.mxu1 %v13804_v32  ;;  %9617 = vmatprep.subr.mxu0 %v14107_v40  ;;  %v9352_v40 = vld [vmem:[%s13963_s4] sm:$0x3] }
 0x7a3   : > { %9239 = vmatpush2.msra.mxu1 %v13811_v41  ;;  %9618 = vmatpush3.msra.mxu0 %v14108_v2  ;;  %v9365_v4 = vrot.slane %v9352_v40, %v9017_v6 }
 0x7a4   : > { %9240 = vmatprep.subr.mxu1 %v13818_v62  ;;  %9619 = vmatprep.subr.mxu0 %v14109_v7 }
 0x7a5   : > { %9241 = vmatpush2.msra.mxu1 %v13825_v30  ;;  %9620 = vmatpush3.msra.mxu0 %v14110_v58  ;;  %v9361_v58 = vrot.slane %v9352_v40, %v9013_v25 }
 0x7a6   : > { %9242 = vmatprep.subr.mxu1 %v13832_v52  ;;  %9621 = vmatprep.subr.mxu0 %v14111_v59 }
 0x7a7   : > { %9243 = vmatpush2.msra.mxu1 %v13839_v27  ;;  %9244 = vmatprep.mubr.f32.mxu1 %v9179_v48 }
 0x7a8   : > { %9622 = vmatpush3.msra.mxu0 %v14112_v15  ;;  %9314 = vmatprep.mubr.f32.mxu0 %v9179_v48 }
 0x7a9   : > { %9245 = vmatmul.mubr.f32.vlgmr.msra.gmra.mxu1 %v9178_v11  ;;  %9315 = vmatmul.mubr.f32.vlgmr.msra.gmra.mxu0 %v9178_v11 }
 0x825   : > { %v9585_v55 = vpop.f32.mrf.mxu1 }
 0x827   : > { %v9586_v10 = vpop.f32.mrf.mxu1 }
 0x828   : > { %v9587_v23 = vadd.f32 %v9586_v10, %v9585_v55 }
 0x82a   : > { %v9588_v33 = vpop.f32.mrf.mxu1  ;;  %v9170_v54 = vadd.f32 %v9587_v23, %v9022_v39 }
 0x82c   : > { %v9589_v45 = vpop.f32.mrf.mxu1 }
 0x82d   : > { %v9590_v12 = vadd.f32 %v9589_v45, %v9588_v33 }
 0x82f   : > { %v9175_v50 = vadd.f32 %v9590_v12, %v9022_v39 }
 0x831   : > { %v9329_v8 = vadd.f32 %v9175_v50, %v9170_v54 }
 0x833   : > { %v9330_v35 = vrot.slane %v9329_v8, 4 }
 0x835   : > { %v9331_v49 = vadd.f32 %v9330_v35, %v9329_v8 }
 0x837   : > { %v9332_v29 = vrot.slane %v9331_v49, 2 }
 0x839   : > { %v9333_v16 = vadd.f32 %v9332_v29, %v9331_v49 }
 0x83b   : > { %v9334_v30 = vrot.slane %v9333_v16, 1 }
 0x83d   : > { %v9335_v2 = vadd.f32 %v9334_v30, %v9333_v16 }
 0x846   : > { %v9092_v60 = vpop.f32.mrf.mxu0 }
 0x847   : > { %v9093_v34 = vadd.f32 %v9092_v60, %v9014_v19 }
 0x848   : > { %v9094_v1 = vpop.f32.mrf.mxu0 }
 0x849   : > { %9320 = vst [vmem:[#allocation4] sm:$0xff] %v9093_v34  ;;  %v9095_v14 = vadd.f32 %v9094_v1, %v9018_v61 }
 0x84c   : > { %v9098_v5 = vpop.f32.mrf.mxu0 }
 0x84d   : > { %v9099_v38 = vadd.f32 %v9098_v5, %v9014_v19 }
 0x84e   : > { %v9100_v20 = vpop.f32.mrf.mxu0 }
 0x84f   : > { %9321 = vst [vmem:[#allocation4 + $0x8] sm:$0xff] %v9099_v38  ;;  %v9101_v44 = vadd.f32 %v9100_v20, %v9018_v61 }
 0x851   : > { %v9322_v47 = vadd.f32 %v9101_v44, %v9095_v14 }
 0x853   : > { %v9323_v21 = vrot.slane %v9322_v47, 4 }
 0x855   : > { %v9324_v26 = vadd.f32 %v9323_v21, %v9322_v47 }
 0x857   : > { %v9325_v18 = vrot.slane %v9324_v26, 2 }
 0x859   : > { %v9326_v53 = vadd.f32 %v9325_v18, %v9324_v26 }
 0x85b   : > { %v9327_v32 = vrot.slane %v9326_v53, 1 }
 0x85d   : > { %v9328_v22 = vadd.f32 %v9327_v32, %v9326_v53 }
 0x869   : > { %v9246_v42 = vpop.f32.mrf.mxu1  ;;  %v9623_v43 = vpop.f32.mrf.mxu0 }
 0x86b   : > { %v9247_v57 = vpop.f32.mrf.mxu1  ;;  %v9624_v56 = vpop.f32.mrf.mxu0 }
 0x86c   : > { %v9248_v17 = vadd.f32 %v9247_v57, %v9018_v61  ;;  %v9625_v37 = vadd.f32 %v9624_v56, %v9623_v43 }
 0x86e   : > { %v9336_v0 = vrot.slane %v9248_v17, 4  ;;  %v9317_v36 = vadd.f32 %v9625_v37, %v9022_v39 }
 0x870   : > { %v9337_v24 = vadd.f32 %v9336_v0, %v9248_v17  ;;  %v9342_v9 = vrot.slane %v9317_v36, 4 }
 0x872   : > { %v9338_v3 = vrot.slane %v9337_v24, 2  ;;  %v9343_v63 = vadd.f32 %v9342_v9, %v9317_v36 }
 0x874   : > { %v9339_v41 = vadd.f32 %v9338_v3, %v9337_v24  ;;  %v9344_v62 = vrot.slane %v9343_v63, 2 }
 0x876   : > { %v9340_v52 = vrot.slane %v9339_v41, 1  ;;  %v9345_v27 = vadd.f32 %v9344_v62, %v9343_v63 }
 0x878   : > { %v9341_v28 = vadd.f32 %v9340_v52, %v9339_v41  ;;  %v9346_v46 = vrot.slane %v9345_v27, 1 }
 0x87a   : > { %v9348_v7 = vadd.f32 %v9341_v28, %v9328_v22  ;;  %v9347_v48 = vadd.f32 %v9346_v46, %v9345_v27 }
 0x87c   : > { %v9350_v59 = vmul.f32 0.041666668, %v9348_v7  ;;  %v9349_v11 = vadd.f32 %v9347_v48, %v9335_v2 }
 0x87e   : > { %v9372_v15 = vsub.f32 %v9248_v17, %v9350_v59  ;;  %v9351_v51 = vmul.f32 0.041666668, %v9349_v11  ;;  %v9353_v31 = vsub.f32 %v9095_v14, %v9350_v59  ;;  %v9355_v19 = vsub.f32 %v9101_v44, %v9350_v59 }
 0x880   : > { %v9373_v60 = vsub.f32 %v9317_v36, %v9351_v51  ;;  %v9374_v34 = vadd.f32 %v9372_v15, %v9361_v58  ;;  %v9354_v1 = vsub.f32 %v9170_v54, %v9351_v51  ;;  %v9368_v55 = vadd.f32 %v9361_v58, %v9353_v31 }
 0x881   : > { %v9356_v5 = vsub.f32 %v9175_v50, %v9351_v51  ;;  %v9370_v33 = vadd.f32 %v9361_v58, %v9355_v19 }
 0x882   : > { %v9375_v38 = vadd.f32 %v9373_v60, %v9365_v4  ;;  %v9369_v10 = vadd.f32 %v9365_v4, %v9354_v1  ;;  %v9394_v13 = vmul.f32 %v9374_v34, %v9374_v34  ;;  %v9376_v12 = vmul.f32 %v9368_v55, %v9368_v55 }
 0x883   : > { %v9371_v45 = vadd.f32 %v9365_v4, %v9356_v5  ;;  %v9378_v6 = vmul.f32 %v9370_v33, %v9370_v33 }
 0x884   : > { %v9395_v20 = vmul.f32 %v9375_v38, %v9375_v38  ;;  %v9377_v25 = vmul.f32 %v9369_v10, %v9369_v10 }
 0x885   : > { %v9379_v23 = vmul.f32 %v9371_v45, %v9371_v45 }
 0x886   : > { %v9396_v61 = vadd.f32 %v9395_v20, %v9394_v13  ;;  %v9380_v39 = vadd.f32 %v9377_v25, %v9376_v12 }
 0x887   : > { %v9383_v44 = vadd.f32 %v9379_v23, %v9378_v6 }
 0x888   : > { %9397 = vadd.xlane.f32.xlu1 %v9396_v61  ;;  %9381 = vadd.xlane.f32.xlu0 %v9380_v39 }
 0x88c   : > { %9384 = vadd.xlane.f32.xlu0 %v9383_v44 }
 0x911   : > { %v9398_v14 = vpop.xlane.xlu1 %9397  ;;  %v9382_v54 = vpop.xlane.xlu0 %9381 }
 0x912   : > { %v9399_v47 = vmax.f32 %v9398_v14, 1e-24  ;;  %v9386_v50 = vmax.f32 %v9382_v54, 1e-24 }
 0x914   : > { %9659 = vrsqrt.f32 %v9399_v47 }
 0x915   : > { %9661 = vrsqrt.f32 %v9386_v50  ;;  %v9385_v8 = vpop.xlane.xlu0 %9384 }
 0x916   : > { %v9387_v21 = vmax.f32 %v9385_v8, 1e-24 }
 0x918   : > { %9663 = vrsqrt.f32 %v9387_v21 }
 0x921   : > { %v9660_v35 = vpop.eup %9659 }
 0x922   : > { %v9662_v26 = vpop.eup %9661  ;;  %v9401_v42 = vmul.f32 %v9660_v35, %v9374_v34  ;;  %v9402_v43 = vmul.f32 %v9660_v35, %v9375_v38 }
 0x923   : > { %v9390_v49 = vmul.f32 %v9662_v26, %v9368_v55  ;;  %v9391_v57 = vmul.f32 %v9662_v26, %v9369_v10 }
 0x924   : > { %9407 = vst [vmem:[#allocation8] sm:$0xff] %v9401_v42  ;;  %9408 = vst [vmem:[#allocation8 + $0x8] sm:$0xff] %v9402_v43 }
 0x925   : > { %v9664_v56 = vpop.eup %9663  ;;  %9403 = vst [vmem:[#allocation6] sm:$0xff] %v9390_v49  ;;  %9404 = vst [vmem:[#allocation6 + $0x8] sm:$0xff] %v9391_v57 }
 0x926   : > { %v9392_v18 = vmul.f32 %v9664_v56, %v9370_v33  ;;  %v9393_v17 = vmul.f32 %v9664_v56, %v9371_v45 }
 0x928   : > { %9405 = vst [vmem:[#allocation6 + $0x10] sm:$0xff] %v9392_v18  ;;  %9406 = vst [vmem:[#allocation6 + $0x18] sm:$0xff] %v9393_v17 }
 0x929 PF: > { %p9638_p10 = scmp.eq.s32.totalorder %s9806_s25, 1  ;;  %s9753_s12 = smov [#allocation6]  }
 0x92a   : > { %s9428_s13 = sshll.u32 %s9753_s12, 4  ;;  %s9429_s13 = int_to_ptr.vmem [resolvable:$true] %s9428_s13 }
 0x92b   : > { %s9665_s14 = scalar_lea.vmem %s9429_s13, 512  ;;  %p9672_p0 = scmp.lt.s32.totalorder %s9429_s13, %s9429_s13 }
 0x92c   : > { %p9666_p11 = scmp.ne.s32.totalorder %s9429_s13, %s9665_s14  ;;  %p9673_p1 = scmp.lt.s32.totalorder %s9665_s14, %s9665_s14 }
 0x92e   : > { %p9667_p12 = pnand %p9666_p11, %p9638_p10  ;;  %p9674_p2 = por %p9673_p1, %p9672_p0 }
 0x930   : > { %p9668_p13 = pneg %p9667_p12 }
 0x932   : > { %p9675_p3 = pnand %p9674_p2, %p9668_p13 }
 0x934   : > { %9678 = shalt.err (!%p9675_p3)
}
 0x935   : > { %s9754_s15 = smov 256   ;;  %s9755_s16 = smov 16  }
 0x936   : > { %9629 = dma.vmem_to_hbm [thread:$0]  (%p9638_p10), %s9429_s13, 512, %s13965_s6, [#allocation7], %s9754_s15, %s9754_s15, %s9755_s16  }
 0x937   : > { %s9756_s19 = smov [#allocation4]  }
 0x938   : > { %s9415_s20 = sshll.u32 %s9756_s19, 4  ;;  %s9416_s20 = int_to_ptr.vmem [resolvable:$true] %s9415_s20 }
 0x939   : > { %s9689_s21 = scalar_lea.vmem %s9416_s20, 256  ;;  %p9696_p7 = scmp.lt.s32.totalorder %s9416_s20, %s9416_s20 }
 0x93a   : > { %p9690_p4 = scmp.ne.s32.totalorder %s9416_s20, %s9689_s21  ;;  %p9697_p8 = scmp.lt.s32.totalorder %s9689_s21, %s9689_s21 }
 0x93c   : > { %p9691_p5 = pnand %p9690_p4, %p9638_p10  ;;  %p9698_p9 = por %p9697_p8, %p9696_p7 }
 0x93e   : > { %p9692_p6 = pneg %p9691_p5 }
 0x940   : > { %p9699_p11 = pnand %p9698_p9, %p9692_p6 }
 0x942   : > { %9702 = shalt.err (!%p9699_p11)
}
 0x943   : > { %s9757_s22 = smov 128   ;;  %s9758_s23 = smov 8  }
 0x944   : > { %9627 = dma.vmem_to_hbm [thread:$0]  (%p9638_p10), %s9416_s20, 256, %s13964_s5, [#allocation5], %s9757_s22, %s9757_s22, %s9758_s23  }
 0x945   : > { %s9759_s28 = smov [#allocation8]  }
 0x946   : > { %s9442_s29 = sshll.u32 %s9759_s28, 4  ;;  %s9443_s29 = int_to_ptr.vmem [resolvable:$true] %s9442_s29 }
 0x947   : > { %s9713_s30 = scalar_lea.vmem %s9443_s29, 256  ;;  %p9720_p1 = scmp.lt.s32.totalorder %s9443_s29, %s9443_s29 }
 0x948   : > { %p9714_p12 = scmp.ne.s32.totalorder %s9443_s29, %s9713_s30  ;;  %p9721_p2 = scmp.lt.s32.totalorder %s9713_s30, %s9713_s30 }
 0x94a   : > { %p9715_p13 = pnand %p9714_p12, %p9638_p10  ;;  %p9722_p3 = por %p9721_p2, %p9720_p1 }
 0x94c   : > { %p9716_p0 = pneg %p9715_p13 }
 0x94e   : > { %p9723_p4 = pnand %p9722_p3, %p9716_p0 }
 0x950   : > { %9726 = shalt.err (!%p9723_p4)
}
 0x951   : > { %9631 = dma.vmem_to_hbm [thread:$0]  (%p9638_p10), %s9443_s29, 256, %s13966_s7, [#allocation7]  }
 0x952   : > { %9742 = dma.done.wait (%p9638_p10), [#allocation5], 256  }
 0x953   : > { %9744 = vsyncadd (%p9638_p10), [#allocation5], 4294967040 }
 0x954   : > { %9746 = dma.done.wait (%p9638_p10), [#allocation7], 768  }
 0x955   : > { %9748 = vsyncadd (%p9638_p10), [#allocation7], 4294966528 }
 0x956 PF: > { %s20_s24 = sadd.s32 1, %s9751_s24  }
 0x957   : > { %p17_p5 = scmp.ge.s32.totalorder %s20_s24, 4  }
 0x959   :  { %19 = sbr.rel (!%p17_p5) target bundleno = 2 (0x2), region = 100 }
 0x95e   :  { %9463 = vsyncpa [#allocation5], 1 }
 0x95f   :  { %9465 = vsyncpa [#allocation5 + $0x1], 1 }
 0x960   :  { %9466 = vsyncpa [#allocation7], 1 }

</bundles_post_ra>
